<compile_context>
chip_gen: v5e
topology: v5e:2x2
jax: 0.10.0
libtpu: 0.0.40
codegen_flags: <defaults>
</compile_context>

<pallas_src>
import jax
import jax.numpy as jnp
from jax import lax
from jax.experimental import pallas as pl
from jax.experimental.pallas import tpu as pltpu

EPS = 1e-5
FC1_K = 64 * 7 * 7          # 3136
FC1_K_PAD = 3584            # 28 * 128, zero-padded contraction dim
FC1_TK = 896                # 7 * 128, 4 grid steps
FC2_OUT = 10
FC2_OUT_PAD = 128           # lane-dense output, sliced to 10 outside


# ----------------------------- Pallas kernels -----------------------------

def _conv_bn_relu_pool_kernel(p_ref, w_ref, b_ref, g_ref, beta_ref, o_ref, y_ref):
    """p_ref: (4, M, K) im2col patches (4 pool-window members x M windows).
    w_ref: (K, C); b/g/beta: (1, C); o_ref: (M, C) pooled output.
    y_ref: (4, M, C) VMEM scratch staging the pre-BN conv outputs."""
    w = w_ref[...]
    bias = b_ref[...]
    m = p_ref.shape[1]
    inv_n = 1.0 / (4.0 * m)

    # Pass 1: conv matmuls + one-pass BN statistics (sum, sum of squares).
    s = jnp.zeros_like(bias)
    ss = jnp.zeros_like(bias)
    for a in range(4):
        y = jnp.dot(p_ref[a], w, preferred_element_type=jnp.float32) + bias
        y_ref[a] = y
        s = s + jnp.sum(y, axis=0, keepdims=True)
        ss = ss + jnp.sum(y * y, axis=0, keepdims=True)
    mu = s * inv_n
    var = ss * inv_n - mu * mu
    scale = lax.rsqrt(var + EPS) * g_ref[...]
    shift = beta_ref[...] - mu * scale

    # Pass 2: normalize, then max over the 4 pool-window members, then ReLU
    # (relu(max(.)) == max(relu(.))).
    z = y_ref[0] * scale + shift
    for a in range(1, 4):
        z = jnp.maximum(z, y_ref[a] * scale + shift)
    o_ref[...] = jnp.maximum(z, 0.0)


def _mlp_kernel(x_ref, w1_ref, b1_ref, w2_ref, b2_ref, o_ref, acc_ref):
    """fc1 pipelined over the contraction dim (grid axis 0), fc2 fused at the
    last step.  Weights are bf16; accumulation is f32."""
    k = pl.program_id(0)

    @pl.when(k == 0)
    def _():
        acc_ref[...] = jnp.zeros_like(acc_ref)

    acc_ref[...] += jnp.dot(x_ref[...].astype(jnp.bfloat16), w1_ref[...],
                            preferred_element_type=jnp.float32)

    @pl.when(k == pl.num_programs(0) - 1)
    def _():
        h = acc_ref[...] + b1_ref[...]                 # fc1 output (no activation)
        o_ref[...] = jnp.dot(h.astype(jnp.bfloat16), w2_ref[...],
                             preferred_element_type=jnp.float32) + b2_ref[...]


# ----------------------------- kernel wrappers -----------------------------

def conv_bn_relu_pool(patches, wmat, bias, gamma, beta):
    _, M, K = patches.shape
    C = wmat.shape[1]
    return pl.pallas_call(
        _conv_bn_relu_pool_kernel,
        out_shape=jax.ShapeDtypeStruct((M, C), jnp.float32),
        grid=(1,),
        in_specs=[pl.BlockSpec((4, M, K), lambda i: (0, 0, 0)),
                  pl.BlockSpec((K, C), lambda i: (0, 0)),
                  pl.BlockSpec((1, C), lambda i: (0, 0)),
                  pl.BlockSpec((1, C), lambda i: (0, 0)),
                  pl.BlockSpec((1, C), lambda i: (0, 0))],
        out_specs=pl.BlockSpec((M, C), lambda i: (0, 0)),
        scratch_shapes=[pltpu.VMEM((4, M, C), jnp.float32)],
        compiler_params=pltpu.CompilerParams(dimension_semantics=("arbitrary",)),
    )(patches, wmat, bias, gamma, beta)


def mlp(x_pad, w1t, b1, w2t, b2):
    B, K = x_pad.shape
    H1 = w1t.shape[1]
    OP = w2t.shape[1]
    nk = K // FC1_TK
    return pl.pallas_call(
        _mlp_kernel,
        out_shape=jax.ShapeDtypeStruct((B, OP), jnp.float32),
        grid=(nk,),
        in_specs=[pl.BlockSpec((B, FC1_TK), lambda k: (0, k)),
                  pl.BlockSpec((FC1_TK, H1), lambda k: (k, 0)),
                  pl.BlockSpec((1, H1), lambda k: (0, 0)),
                  pl.BlockSpec((H1, OP), lambda k: (0, 0)),
                  pl.BlockSpec((1, OP), lambda k: (0, 0))],
        out_specs=pl.BlockSpec((B, OP), lambda k: (0, 0)),
        scratch_shapes=[pltpu.VMEM((B, H1), jnp.float32)],
        compiler_params=pltpu.CompilerParams(dimension_semantics=("arbitrary",)),
    )(x_pad, w1t, b1, w2t, b2)


# ----------------------------- JAX glue -----------------------------

def im2col_pool_blocks(x):
    """x: (B, H, W, C) NHWC, H/W even.  Returns (4, B*(H/2)*(W/2), 9*C) 3x3
    patches (stride 1, padding 1).  Leading index a*2+b picks member (a, b)
    of each 2x2 pool window; rows are in (batch, oh, ow) raster order."""
    B, H, W, C = x.shape
    xp = jnp.pad(x, ((0, 0), (1, 1), (1, 1), (0, 0)))
    taps = [xp[:, dy:dy + H, dx:dx + W, :] for dy in range(3) for dx in range(3)]
    pats = jnp.concatenate(taps, axis=-1)                   # (B, H, W, 9*C)
    pats = pats.reshape(B, H // 2, 2, W // 2, 2, 9 * C)
    pats = pats.transpose(2, 4, 0, 1, 3, 5)                 # (2, 2, B, h2, w2, 9C)
    return pats.reshape(4, B * (H // 2) * (W // 2), 9 * C)


def conv_weight_to_mat(w_oihw):
    # (Cout, Cin, 3, 3) -> (9*Cin, Cout), row index (dy*3+dx)*Cin + ci
    co, ci, kh, kw = w_oihw.shape
    return jnp.transpose(w_oihw, (2, 3, 1, 0)).reshape(kh * kw * ci, co)


def prepare_params(params):
    """One-time weight layout prep (row permutation for channel-last flatten,
    zero padding to aligned tiles, bf16 cast of the FC weights)."""
    row = lambda v: jnp.asarray(v, jnp.float32).reshape(1, -1)
    # fc1 consumes the NCHW flatten (index c*49+h*7+w); permute its rows so it
    # consumes our channel-last flatten (index h*7*64 + w*64 + c) instead.
    fc1 = params['fc1_w'].reshape(512, 64, 7, 7).transpose(0, 2, 3, 1)
    w1t = fc1.reshape(512, FC1_K).T                              # (3136, 512)
    w1t = jnp.pad(w1t, ((0, FC1_K_PAD - FC1_K), (0, 0))).astype(jnp.bfloat16)
    w2t = jnp.pad(params['fc2_w'].T, ((0, 0), (0, FC2_OUT_PAD - FC2_OUT)))
    b2 = jnp.pad(params['fc2_b'], (0, FC2_OUT_PAD - FC2_OUT))
    return {
        'conv1_wm': conv_weight_to_mat(params['conv1_w']),
        'conv1_b': row(params['conv1_b']),
        'bn1_g': row(params['bn1_g']), 'bn1_b': row(params['bn1_b']),
        'conv2_wm': conv_weight_to_mat(params['conv2_w']),
        'conv2_b': row(params['conv2_b']),
        'bn2_g': row(params['bn2_g']), 'bn2_b': row(params['bn2_b']),
        'fc1_wt': w1t.astype(jnp.bfloat16), 'fc1_b': row(params['fc1_b']),
        'fc2_wt': w2t.astype(jnp.bfloat16), 'fc2_b': row(b2),
    }


@jax.jit
def handwritten_forward(x_nchw, prep):
    B = x_nchw.shape[0]
    x = jnp.transpose(x_nchw, (0, 2, 3, 1))                      # NHWC
    # block1 + maxpool1 (fused)
    p1 = im2col_pool_blocks(x)                                   # (4, B*196, 9)
    z1 = conv_bn_relu_pool(p1, prep['conv1_wm'], prep['conv1_b'],
                           prep['bn1_g'], prep['bn1_b'])         # (B*196, 16)
    # block2 + maxpool2 (fused)
    p2 = im2col_pool_blocks(z1.reshape(B, 14, 14, 16))           # (4, B*49, 144)
    z2 = conv_bn_relu_pool(p2, prep['conv2_wm'], prep['conv2_b'],
                           prep['bn2_g'], prep['bn2_b'])         # (B*49, 64)
    # channel-last flatten (fc1 weight was permuted to match), pad K to 3584
    flat = z2.reshape(B, FC1_K)
    flat = jnp.pad(flat, ((0, 0), (0, FC1_K_PAD - FC1_K)))
    out = mlp(flat, prep['fc1_wt'], prep['fc1_b'],
              prep['fc2_wt'], prep['fc2_b'])                     # (B, 128)
    return out[:, :FC2_OUT]


# ----------------------------- pure-JAX reference -----------------------------

def reference_forward(x_nchw, params):
    def conv_block(x, w, b, g, be):
        y = lax.conv_general_dilated(x, w, (1, 1), ((1, 1), (1, 1)),
                                     dimension_numbers=('NCHW', 'OIHW', 'NCHW'),
                                     precision=lax.Precision.HIGHEST)
        y = y + b[None, :, None, None]
        mu = jnp.mean(y, axis=(0, 2, 3), keepdims=True)
        var = jnp.mean((y - mu) ** 2, axis=(0, 2, 3), keepdims=True)
        z = (y - mu) / jnp.sqrt(var + EPS) * g[None, :, None, None] + be[None, :, None, None]
        return jnp.maximum(z, 0.0)

    def maxpool2(x):
        return lax.reduce_window(x, -jnp.inf, lax.max,
                                 (1, 1, 2, 2), (1, 1, 2, 2), 'VALID')

    x = maxpool2(conv_block(x_nchw, params['conv1_w'], params['conv1_b'],
                            params['bn1_g'], params['bn1_b']))
    x = maxpool2(conv_block(x, params['conv2_w'], params['conv2_b'],
                            params['bn2_g'], params['bn2_b']))
    x = x.reshape(x.shape[0], -1)
    x = jnp.dot(x, params['fc1_w'].T, precision=lax.Precision.HIGHEST) + params['fc1_b']
    x = jnp.dot(x, params['fc2_w'].T, precision=lax.Precision.HIGHEST) + params['fc2_b']
    return x


# ----------------------------- params / main -----------------------------

def init_params(key):
    ks = jax.random.split(key, 12)
    nrm = lambda k, s, sc: (jax.random.normal(k, s, jnp.float32) * sc)
    return {
        'conv1_w': nrm(ks[0], (16, 1, 3, 3), 1.0 / 3.0),
        'conv1_b': nrm(ks[1], (16,), 0.1),
        'bn1_g': 1.0 + nrm(ks[2], (16,), 0.1),
        'bn1_b': nrm(ks[3], (16,), 0.1),
        'conv2_w': nrm(ks[4], (64, 16, 3, 3), 1.0 / 12.0),
        'conv2_b': nrm(ks[5], (64,), 0.1),
        'bn2_g': 1.0 + nrm(ks[6], (64,), 0.1),
        'bn2_b': nrm(ks[7], (64,), 0.1),
        'fc1_w': nrm(ks[8], (512, 64 * 7 * 7), 1.0 / 56.0),
        'fc1_b': nrm(ks[9], (512,), 0.05),
        'fc2_w': nrm(ks[10], (10, 512), 1.0 / 22.6),
        'fc2_b': nrm(ks[11], (10,), 0.05),
    }


if __name__ == "__main__":
    key = jax.random.PRNGKey(0)
    pkey, xkey = jax.random.split(key)
    params = init_params(pkey)
    # Module's fc1 (64*7*7) implies 28x28 single-channel input; batch = 2.
    x = jax.random.normal(xkey, (2, 1, 28, 28), jnp.float32)

    prep = prepare_params(params)          # one-time weight layout prep
    out = handwritten_forward(x, prep)
    out = jax.block_until_ready(out)
    assert out.shape == (2, 10)

    ref = reference_forward(x, params)
    assert jnp.allclose(out, ref, rtol=2e-2, atol=2e-2), \
        float(jnp.max(jnp.abs(out - ref)))

    print("KERNEL_OK")
</pallas_src>

<mosaic_0001>
module attributes {stable_mosaic.version = 11 : i64} {
  func.func @_conv_bn_relu_pool_kernel(%arg0: i32, %arg1: memref<4x392x9xf32, #tpu.memory_space<vmem>>, %arg2: memref<9x16xf32, #tpu.memory_space<vmem>>, %arg3: memref<1x16xf32, #tpu.memory_space<vmem>>, %arg4: memref<1x16xf32, #tpu.memory_space<vmem>>, %arg5: memref<1x16xf32, #tpu.memory_space<vmem>>, %arg6: memref<392x16xf32, #tpu.memory_space<vmem>>, %arg7: memref<4x392x16xf32, #tpu.memory_space<vmem>>) attributes {dimension_semantics = [#tpu.dimension_semantics<arbitrary>], iteration_bounds = array<i64: 1>, scalar_prefetch = 0 : i64, scratch_operands = 1 : i64, tpu.core_type = #tpu.core_type<tc>, window_params = [{pipeline_mode = #tpu.pipeline_mode<synchronous>, transform_indices = @transform_0, window_bounds = array<i64: 4, 392, 9>}, {pipeline_mode = #tpu.pipeline_mode<synchronous>, transform_indices = @transform_1, window_bounds = array<i64: 9, 16>}, {pipeline_mode = #tpu.pipeline_mode<synchronous>, transform_indices = @transform_2, window_bounds = array<i64: 1, 16>}, {pipeline_mode = #tpu.pipeline_mode<synchronous>, transform_indices = @transform_3, window_bounds = array<i64: 1, 16>}, {pipeline_mode = #tpu.pipeline_mode<synchronous>, transform_indices = @transform_4, window_bounds = array<i64: 1, 16>}, {pipeline_mode = #tpu.pipeline_mode<synchronous>, transform_indices = @transform_5, window_bounds = array<i64: 392, 16>}]} {
    %c0 = arith.constant 0 : index
    %c0_0 = arith.constant 0 : index
    %0 = vector.load %arg2[%c0, %c0_0] : memref<9x16xf32, #tpu.memory_space<vmem>>, vector<9x16xf32>
    %c0_1 = arith.constant 0 : index
    %c0_2 = arith.constant 0 : index
    %1 = vector.load %arg3[%c0_1, %c0_2] : memref<1x16xf32, #tpu.memory_space<vmem>>, vector<1x16xf32>
    %cst = arith.constant 0.000000e+00 : f32
    %2 = vector.broadcast %cst : f32 to vector<1x16xf32>
    %cst_3 = arith.constant 0.000000e+00 : f32
    %3 = vector.broadcast %cst_3 : f32 to vector<1x16xf32>
    %c0_4 = arith.constant 0 : index
    %c0_5 = arith.constant 0 : index
    %c0_6 = arith.constant 0 : index
    %4 = vector.load %arg1[%c0_4, %c0_5, %c0_6] : memref<4x392x9xf32, #tpu.memory_space<vmem>>, vector<1x392x9xf32>
    %5 = vector.shape_cast %4 : vector<1x392x9xf32> to vector<392x9xf32>
    %cst_7 = arith.constant dense<0.000000e+00> : vector<392x16xf32>
    %6 = tpu.matmul %5, %0, %cst_7 {dimension_numbers = #tpu.dot_dimension_numbers<[1], [0], [0], [1], [0, 0, 1, 1], [], []>} : vector<392x9xf32>, vector<9x16xf32>, vector<392x16xf32> -> vector<392x16xf32>
    %7 = vector.broadcast %1 : vector<1x16xf32> to vector<392x16xf32>
    %8 = arith.addf %6, %7 : vector<392x16xf32>
    %c0_8 = arith.constant 0 : index
    %c0_9 = arith.constant 0 : index
    %c0_10 = arith.constant 0 : index
    %9 = vector.load %arg7[%c0_8, %c0_9, %c0_10] : memref<4x392x16xf32, #tpu.memory_space<vmem>>, vector<1x392x16xf32>
    %10 = vector.shape_cast %9 : vector<1x392x16xf32> to vector<392x16xf32>
    %11 = vector.shape_cast %8 : vector<392x16xf32> to vector<1x392x16xf32>
    tpu.vector_store %arg7[%c0_8, %c0_9, %c0_10], %11 {strides = array<i32>} : memref<4x392x16xf32, #tpu.memory_space<vmem>>, vector<1x392x16xf32>,
    %cst_11 = arith.constant dense<0.000000e+00> : vector<16xf32>
    %12 = vector.multi_reduction <add>, %8, %cst_11 [0] : vector<392x16xf32> to vector<16xf32>
    %13 = vector.shape_cast %12 : vector<16xf32> to vector<1x16xf32>
    %14 = arith.addf %2, %13 : vector<1x16xf32>
    %15 = arith.mulf %8, %8 : vector<392x16xf32>
    %cst_12 = arith.constant dense<0.000000e+00> : vector<16xf32>
    %16 = vector.multi_reduction <add>, %15, %cst_12 [0] : vector<392x16xf32> to vector<16xf32>
    %17 = vector.shape_cast %16 : vector<16xf32> to vector<1x16xf32>
    %18 = arith.addf %3, %17 : vector<1x16xf32>
    %c1 = arith.constant 1 : index
    %c0_13 = arith.constant 0 : index
    %c0_14 = arith.constant 0 : index
    %19 = vector.load %arg1[%c1, %c0_13, %c0_14] : memref<4x392x9xf32, #tpu.memory_space<vmem>>, vector<1x392x9xf32>
    %20 = vector.shape_cast %19 : vector<1x392x9xf32> to vector<392x9xf32>
    %cst_15 = arith.constant dense<0.000000e+00> : vector<392x16xf32>
    %21 = tpu.matmul %20, %0, %cst_15 {dimension_numbers = #tpu.dot_dimension_numbers<[1], [0], [0], [1], [0, 0, 1, 1], [], []>} : vector<392x9xf32>, vector<9x16xf32>, vector<392x16xf32> -> vector<392x16xf32>
    %22 = vector.broadcast %1 : vector<1x16xf32> to vector<392x16xf32>
    %23 = arith.addf %21, %22 : vector<392x16xf32>
    %c1_16 = arith.constant 1 : index
    %c0_17 = arith.constant 0 : index
    %c0_18 = arith.constant 0 : index
    %24 = vector.load %arg7[%c1_16, %c0_17, %c0_18] : memref<4x392x16xf32, #tpu.memory_space<vmem>>, vector<1x392x16xf32>
    %25 = vector.shape_cast %24 : vector<1x392x16xf32> to vector<392x16xf32>
    %26 = vector.shape_cast %23 : vector<392x16xf32> to vector<1x392x16xf32>
    tpu.vector_store %arg7[%c1_16, %c0_17, %c0_18], %26 {strides = array<i32>} : memref<4x392x16xf32, #tpu.memory_space<vmem>>, vector<1x392x16xf32>,
    %cst_19 = arith.constant dense<0.000000e+00> : vector<16xf32>
    %27 = vector.multi_reduction <add>, %23, %cst_19 [0] : vector<392x16xf32> to vector<16xf32>
    %28 = vector.shape_cast %27 : vector<16xf32> to vector<1x16xf32>
    %29 = arith.addf %14, %28 : vector<1x16xf32>
    %30 = arith.mulf %23, %23 : vector<392x16xf32>
    %cst_20 = arith.constant dense<0.000000e+00> : vector<16xf32>
    %31 = vector.multi_reduction <add>, %30, %cst_20 [0] : vector<392x16xf32> to vector<16xf32>
    %32 = vector.shape_cast %31 : vector<16xf32> to vector<1x16xf32>
    %33 = arith.addf %18, %32 : vector<1x16xf32>
    %c2 = arith.constant 2 : index
    %c0_21 = arith.constant 0 : index
    %c0_22 = arith.constant 0 : index
    %34 = vector.load %arg1[%c2, %c0_21, %c0_22] : memref<4x392x9xf32, #tpu.memory_space<vmem>>, vector<1x392x9xf32>
    %35 = vector.shape_cast %34 : vector<1x392x9xf32> to vector<392x9xf32>
    %cst_23 = arith.constant dense<0.000000e+00> : vector<392x16xf32>
    %36 = tpu.matmul %35, %0, %cst_23 {dimension_numbers = #tpu.dot_dimension_numbers<[1], [0], [0], [1], [0, 0, 1, 1], [], []>} : vector<392x9xf32>, vector<9x16xf32>, vector<392x16xf32> -> vector<392x16xf32>
    %37 = vector.broadcast %1 : vector<1x16xf32> to vector<392x16xf32>
    %38 = arith.addf %36, %37 : vector<392x16xf32>
    %c2_24 = arith.constant 2 : index
    %c0_25 = arith.constant 0 : index
    %c0_26 = arith.constant 0 : index
    %39 = vector.load %arg7[%c2_24, %c0_25, %c0_26] : memref<4x392x16xf32, #tpu.memory_space<vmem>>, vector<1x392x16xf32>
    %40 = vector.shape_cast %39 : vector<1x392x16xf32> to vector<392x16xf32>
    %41 = vector.shape_cast %38 : vector<392x16xf32> to vector<1x392x16xf32>
    tpu.vector_store %arg7[%c2_24, %c0_25, %c0_26], %41 {strides = array<i32>} : memref<4x392x16xf32, #tpu.memory_space<vmem>>, vector<1x392x16xf32>,
    %cst_27 = arith.constant dense<0.000000e+00> : vector<16xf32>
    %42 = vector.multi_reduction <add>, %38, %cst_27 [0] : vector<392x16xf32> to vector<16xf32>
    %43 = vector.shape_cast %42 : vector<16xf32> to vector<1x16xf32>
    %44 = arith.addf %29, %43 : vector<1x16xf32>
    %45 = arith.mulf %38, %38 : vector<392x16xf32>
    %cst_28 = arith.constant dense<0.000000e+00> : vector<16xf32>
    %46 = vector.multi_reduction <add>, %45, %cst_28 [0] : vector<392x16xf32> to vector<16xf32>
    %47 = vector.shape_cast %46 : vector<16xf32> to vector<1x16xf32>
    %48 = arith.addf %33, %47 : vector<1x16xf32>
    %c3 = arith.constant 3 : index
    %c0_29 = arith.constant 0 : index
    %c0_30 = arith.constant 0 : index
    %49 = vector.load %arg1[%c3, %c0_29, %c0_30] : memref<4x392x9xf32, #tpu.memory_space<vmem>>, vector<1x392x9xf32>
    %50 = vector.shape_cast %49 : vector<1x392x9xf32> to vector<392x9xf32>
    %cst_31 = arith.constant dense<0.000000e+00> : vector<392x16xf32>
    %51 = tpu.matmul %50, %0, %cst_31 {dimension_numbers = #tpu.dot_dimension_numbers<[1], [0], [0], [1], [0, 0, 1, 1], [], []>} : vector<392x9xf32>, vector<9x16xf32>, vector<392x16xf32> -> vector<392x16xf32>
    %52 = vector.broadcast %1 : vector<1x16xf32> to vector<392x16xf32>
    %53 = arith.addf %51, %52 : vector<392x16xf32>
    %c3_32 = arith.constant 3 : index
    %c0_33 = arith.constant 0 : index
    %c0_34 = arith.constant 0 : index
    %54 = vector.load %arg7[%c3_32, %c0_33, %c0_34] : memref<4x392x16xf32, #tpu.memory_space<vmem>>, vector<1x392x16xf32>
    %55 = vector.shape_cast %54 : vector<1x392x16xf32> to vector<392x16xf32>
    %56 = vector.shape_cast %53 : vector<392x16xf32> to vector<1x392x16xf32>
    tpu.vector_store %arg7[%c3_32, %c0_33, %c0_34], %56 {strides = array<i32>} : memref<4x392x16xf32, #tpu.memory_space<vmem>>, vector<1x392x16xf32>,
    %cst_35 = arith.constant dense<0.000000e+00> : vector<16xf32>
    %57 = vector.multi_reduction <add>, %53, %cst_35 [0] : vector<392x16xf32> to vector<16xf32>
    %58 = vector.shape_cast %57 : vector<16xf32> to vector<1x16xf32>
    %59 = arith.addf %44, %58 : vector<1x16xf32>
    %60 = arith.mulf %53, %53 : vector<392x16xf32>
    %cst_36 = arith.constant dense<0.000000e+00> : vector<16xf32>
    %61 = vector.multi_reduction <add>, %60, %cst_36 [0] : vector<392x16xf32> to vector<16xf32>
    %62 = vector.shape_cast %61 : vector<16xf32> to vector<1x16xf32>
    %63 = arith.addf %48, %62 : vector<1x16xf32>
    %cst_37 = arith.constant 6.37755089E-4 : f32
    %64 = vector.broadcast %cst_37 : f32 to vector<1x16xf32>
    %65 = arith.mulf %59, %64 : vector<1x16xf32>
    %cst_38 = arith.constant 6.37755089E-4 : f32
    %66 = vector.broadcast %cst_38 : f32 to vector<1x16xf32>
    %67 = arith.mulf %63, %66 : vector<1x16xf32>
    %68 = arith.mulf %65, %65 : vector<1x16xf32>
    %69 = arith.subf %67, %68 : vector<1x16xf32>
    %cst_39 = arith.constant 9.99999974E-6 : f32
    %70 = vector.broadcast %cst_39 : f32 to vector<1x16xf32>
    %71 = arith.addf %69, %70 : vector<1x16xf32>
    %72 = math.rsqrt %71 : vector<1x16xf32>
    %c0_40 = arith.constant 0 : index
    %c0_41 = arith.constant 0 : index
    %73 = vector.load %arg4[%c0_40, %c0_41] : memref<1x16xf32, #tpu.memory_space<vmem>>, vector<1x16xf32>
    %74 = arith.mulf %72, %73 : vector<1x16xf32>
    %c0_42 = arith.constant 0 : index
    %c0_43 = arith.constant 0 : index
    %75 = vector.load %arg5[%c0_42, %c0_43] : memref<1x16xf32, #tpu.memory_space<vmem>>, vector<1x16xf32>
    %76 = arith.mulf %65, %74 : vector<1x16xf32>
    %77 = arith.subf %75, %76 : vector<1x16xf32>
    %c0_44 = arith.constant 0 : index
    %c0_45 = arith.constant 0 : index
    %c0_46 = arith.constant 0 : index
    %78 = vector.load %arg7[%c0_44, %c0_45, %c0_46] : memref<4x392x16xf32, #tpu.memory_space<vmem>>, vector<1x392x16xf32>
    %79 = vector.shape_cast %78 : vector<1x392x16xf32> to vector<392x16xf32>
    %80 = vector.broadcast %74 : vector<1x16xf32> to vector<392x16xf32>
    %81 = arith.mulf %79, %80 : vector<392x16xf32>
    %82 = vector.broadcast %77 : vector<1x16xf32> to vector<392x16xf32>
    %83 = arith.addf %81, %82 : vector<392x16xf32>
    %c1_47 = arith.constant 1 : index
    %c0_48 = arith.constant 0 : index
    %c0_49 = arith.constant 0 : index
    %84 = vector.load %arg7[%c1_47, %c0_48, %c0_49] : memref<4x392x16xf32, #tpu.memory_space<vmem>>, vector<1x392x16xf32>
    %85 = vector.shape_cast %84 : vector<1x392x16xf32> to vector<392x16xf32>
    %86 = vector.broadcast %74 : vector<1x16xf32> to vector<392x16xf32>
    %87 = arith.mulf %85, %86 : vector<392x16xf32>
    %88 = vector.broadcast %77 : vector<1x16xf32> to vector<392x16xf32>
    %89 = arith.addf %87, %88 : vector<392x16xf32>
    %90 = arith.maximumf %83, %89 : vector<392x16xf32>
    %c2_50 = arith.constant 2 : index
    %c0_51 = arith.constant 0 : index
    %c0_52 = arith.constant 0 : index
    %91 = vector.load %arg7[%c2_50, %c0_51, %c0_52] : memref<4x392x16xf32, #tpu.memory_space<vmem>>, vector<1x392x16xf32>
    %92 = vector.shape_cast %91 : vector<1x392x16xf32> to vector<392x16xf32>
    %93 = vector.broadcast %74 : vector<1x16xf32> to vector<392x16xf32>
    %94 = arith.mulf %92, %93 : vector<392x16xf32>
    %95 = vector.broadcast %77 : vector<1x16xf32> to vector<392x16xf32>
    %96 = arith.addf %94, %95 : vector<392x16xf32>
    %97 = arith.maximumf %90, %96 : vector<392x16xf32>
    %c3_53 = arith.constant 3 : index
    %c0_54 = arith.constant 0 : index
    %c0_55 = arith.constant 0 : index
    %98 = vector.load %arg7[%c3_53, %c0_54, %c0_55] : memref<4x392x16xf32, #tpu.memory_space<vmem>>, vector<1x392x16xf32>
    %99 = vector.shape_cast %98 : vector<1x392x16xf32> to vector<392x16xf32>
    %100 = vector.broadcast %74 : vector<1x16xf32> to vector<392x16xf32>
    %101 = arith.mulf %99, %100 : vector<392x16xf32>
    %102 = vector.broadcast %77 : vector<1x16xf32> to vector<392x16xf32>
    %103 = arith.addf %101, %102 : vector<392x16xf32>
    %104 = arith.maximumf %97, %103 : vector<392x16xf32>
    %cst_56 = arith.constant 0.000000e+00 : f32
    %105 = vector.broadcast %cst_56 : f32 to vector<392x16xf32>
    %106 = arith.maximumf %104, %105 : vector<392x16xf32>
    %c0_57 = arith.constant 0 : index
    %c0_58 = arith.constant 0 : index
    %107 = vector.load %arg6[%c0_57, %c0_58] : memref<392x16xf32, #tpu.memory_space<vmem>>, vector<392x16xf32>
    tpu.vector_store %arg6[%c0_57, %c0_58], %106 {strides = array<i32>} : memref<392x16xf32, #tpu.memory_space<vmem>>, vector<392x16xf32>,
    return
  }
  func.func @transform_0(%arg0: i32) -> (i32, i32, i32) {
    %c0_i32 = arith.constant 0 : i32
    %c0_i32_0 = arith.constant 0 : i32
    %c0_i32_1 = arith.constant 0 : i32
    %c0_i32_2 = arith.constant 0 : i32
    return %c0_i32, %c0_i32_0, %c0_i32_1 : i32, i32, i32
  }
  func.func @transform_1(%arg0: i32) -> (i32, i32) {
    %c0_i32 = arith.constant 0 : i32
    %c0_i32_0 = arith.constant 0 : i32
    %c0_i32_1 = arith.constant 0 : i32
    return %c0_i32, %c0_i32_0 : i32, i32
  }
  func.func @transform_2(%arg0: i32) -> (i32, i32) {
    %c0_i32 = arith.constant 0 : i32
    %c0_i32_0 = arith.constant 0 : i32
    %c0_i32_1 = arith.constant 0 : i32
    return %c0_i32, %c0_i32_0 : i32, i32
  }
  func.func @transform_3(%arg0: i32) -> (i32, i32) {
    %c0_i32 = arith.constant 0 : i32
    %c0_i32_0 = arith.constant 0 : i32
    %c0_i32_1 = arith.constant 0 : i32
    return %c0_i32, %c0_i32_0 : i32, i32
  }
  func.func @transform_4(%arg0: i32) -> (i32, i32) {
    %c0_i32 = arith.constant 0 : i32
    %c0_i32_0 = arith.constant 0 : i32
    %c0_i32_1 = arith.constant 0 : i32
    return %c0_i32, %c0_i32_0 : i32, i32
  }
  func.func @transform_5(%arg0: i32) -> (i32, i32) {
    %c0_i32 = arith.constant 0 : i32
    %c0_i32_0 = arith.constant 0 : i32
    %c0_i32_1 = arith.constant 0 : i32
    return %c0_i32, %c0_i32_0 : i32, i32
  }
}

module attributes {stable_mosaic.version = 11 : i64} {
  func.func @_conv_bn_relu_pool_kernel(%arg0: i32, %arg1: memref<4x98x144xf32, #tpu.memory_space<vmem>>, %arg2: memref<144x64xf32, #tpu.memory_space<vmem>>, %arg3: memref<1x64xf32, #tpu.memory_space<vmem>>, %arg4: memref<1x64xf32, #tpu.memory_space<vmem>>, %arg5: memref<1x64xf32, #tpu.memory_space<vmem>>, %arg6: memref<98x64xf32, #tpu.memory_space<vmem>>, %arg7: memref<4x98x64xf32, #tpu.memory_space<vmem>>) attributes {dimension_semantics = [#tpu.dimension_semantics<arbitrary>], iteration_bounds = array<i64: 1>, scalar_prefetch = 0 : i64, scratch_operands = 1 : i64, tpu.core_type = #tpu.core_type<tc>, window_params = [{pipeline_mode = #tpu.pipeline_mode<synchronous>, transform_indices = @transform_0, window_bounds = array<i64: 4, 98, 144>}, {pipeline_mode = #tpu.pipeline_mode<synchronous>, transform_indices = @transform_1, window_bounds = array<i64: 144, 64>}, {pipeline_mode = #tpu.pipeline_mode<synchronous>, transform_indices = @transform_2, window_bounds = array<i64: 1, 64>}, {pipeline_mode = #tpu.pipeline_mode<synchronous>, transform_indices = @transform_3, window_bounds = array<i64: 1, 64>}, {pipeline_mode = #tpu.pipeline_mode<synchronous>, transform_indices = @transform_4, window_bounds = array<i64: 1, 64>}, {pipeline_mode = #tpu.pipeline_mode<synchronous>, transform_indices = @transform_5, window_bounds = array<i64: 98, 64>}]} {
    %c0 = arith.constant 0 : index
    %c0_0 = arith.constant 0 : index
    %0 = vector.load %arg2[%c0, %c0_0] : memref<144x64xf32, #tpu.memory_space<vmem>>, vector<144x64xf32>
    %c0_1 = arith.constant 0 : index
    %c0_2 = arith.constant 0 : index
    %1 = vector.load %arg3[%c0_1, %c0_2] : memref<1x64xf32, #tpu.memory_space<vmem>>, vector<1x64xf32>
    %cst = arith.constant 0.000000e+00 : f32
    %2 = vector.broadcast %cst : f32 to vector<1x64xf32>
    %cst_3 = arith.constant 0.000000e+00 : f32
    %3 = vector.broadcast %cst_3 : f32 to vector<1x64xf32>
    %c0_4 = arith.constant 0 : index
    %c0_5 = arith.constant 0 : index
    %c0_6 = arith.constant 0 : index
    %4 = vector.load %arg1[%c0_4, %c0_5, %c0_6] : memref<4x98x144xf32, #tpu.memory_space<vmem>>, vector<1x98x144xf32>
    %5 = vector.shape_cast %4 : vector<1x98x144xf32> to vector<98x144xf32>
    %cst_7 = arith.constant dense<0.000000e+00> : vector<98x64xf32>
    %6 = tpu.matmul %5, %0, %cst_7 {dimension_numbers = #tpu.dot_dimension_numbers<[1], [0], [0], [1], [0, 0, 1, 1], [], []>} : vector<98x144xf32>, vector<144x64xf32>, vector<98x64xf32> -> vector<98x64xf32>
    %7 = vector.broadcast %1 : vector<1x64xf32> to vector<98x64xf32>
    %8 = arith.addf %6, %7 : vector<98x64xf32>
    %c0_8 = arith.constant 0 : index
    %c0_9 = arith.constant 0 : index
    %c0_10 = arith.constant 0 : index
    %9 = vector.load %arg7[%c0_8, %c0_9, %c0_10] : memref<4x98x64xf32, #tpu.memory_space<vmem>>, vector<1x98x64xf32>
    %10 = vector.shape_cast %9 : vector<1x98x64xf32> to vector<98x64xf32>
    %11 = vector.shape_cast %8 : vector<98x64xf32> to vector<1x98x64xf32>
    tpu.vector_store %arg7[%c0_8, %c0_9, %c0_10], %11 {strides = array<i32>} : memref<4x98x64xf32, #tpu.memory_space<vmem>>, vector<1x98x64xf32>,
    %cst_11 = arith.constant dense<0.000000e+00> : vector<64xf32>
    %12 = vector.multi_reduction <add>, %8, %cst_11 [0] : vector<98x64xf32> to vector<64xf32>
    %13 = vector.shape_cast %12 : vector<64xf32> to vector<1x64xf32>
    %14 = arith.addf %2, %13 : vector<1x64xf32>
    %15 = arith.mulf %8, %8 : vector<98x64xf32>
    %cst_12 = arith.constant dense<0.000000e+00> : vector<64xf32>
    %16 = vector.multi_reduction <add>, %15, %cst_12 [0] : vector<98x64xf32> to vector<64xf32>
    %17 = vector.shape_cast %16 : vector<64xf32> to vector<1x64xf32>
    %18 = arith.addf %3, %17 : vector<1x64xf32>
    %c1 = arith.constant 1 : index
    %c0_13 = arith.constant 0 : index
    %c0_14 = arith.constant 0 : index
    %19 = vector.load %arg1[%c1, %c0_13, %c0_14] : memref<4x98x144xf32, #tpu.memory_space<vmem>>, vector<1x98x144xf32>
    %20 = vector.shape_cast %19 : vector<1x98x144xf32> to vector<98x144xf32>
    %cst_15 = arith.constant dense<0.000000e+00> : vector<98x64xf32>
    %21 = tpu.matmul %20, %0, %cst_15 {dimension_numbers = #tpu.dot_dimension_numbers<[1], [0], [0], [1], [0, 0, 1, 1], [], []>} : vector<98x144xf32>, vector<144x64xf32>, vector<98x64xf32> -> vector<98x64xf32>
    %22 = vector.broadcast %1 : vector<1x64xf32> to vector<98x64xf32>
    %23 = arith.addf %21, %22 : vector<98x64xf32>
    %c1_16 = arith.constant 1 : index
    %c0_17 = arith.constant 0 : index
    %c0_18 = arith.constant 0 : index
    %24 = vector.load %arg7[%c1_16, %c0_17, %c0_18] : memref<4x98x64xf32, #tpu.memory_space<vmem>>, vector<1x98x64xf32>
    %25 = vector.shape_cast %24 : vector<1x98x64xf32> to vector<98x64xf32>
    %26 = vector.shape_cast %23 : vector<98x64xf32> to vector<1x98x64xf32>
    tpu.vector_store %arg7[%c1_16, %c0_17, %c0_18], %26 {strides = array<i32>} : memref<4x98x64xf32, #tpu.memory_space<vmem>>, vector<1x98x64xf32>,
    %cst_19 = arith.constant dense<0.000000e+00> : vector<64xf32>
    %27 = vector.multi_reduction <add>, %23, %cst_19 [0] : vector<98x64xf32> to vector<64xf32>
    %28 = vector.shape_cast %27 : vector<64xf32> to vector<1x64xf32>
    %29 = arith.addf %14, %28 : vector<1x64xf32>
    %30 = arith.mulf %23, %23 : vector<98x64xf32>
    %cst_20 = arith.constant dense<0.000000e+00> : vector<64xf32>
    %31 = vector.multi_reduction <add>, %30, %cst_20 [0] : vector<98x64xf32> to vector<64xf32>
    %32 = vector.shape_cast %31 : vector<64xf32> to vector<1x64xf32>
    %33 = arith.addf %18, %32 : vector<1x64xf32>
    %c2 = arith.constant 2 : index
    %c0_21 = arith.constant 0 : index
    %c0_22 = arith.constant 0 : index
    %34 = vector.load %arg1[%c2, %c0_21, %c0_22] : memref<4x98x144xf32, #tpu.memory_space<vmem>>, vector<1x98x144xf32>
    %35 = vector.shape_cast %34 : vector<1x98x144xf32> to vector<98x144xf32>
    %cst_23 = arith.constant dense<0.000000e+00> : vector<98x64xf32>
    %36 = tpu.matmul %35, %0, %cst_23 {dimension_numbers = #tpu.dot_dimension_numbers<[1], [0], [0], [1], [0, 0, 1, 1], [], []>} : vector<98x144xf32>, vector<144x64xf32>, vector<98x64xf32> -> vector<98x64xf32>
    %37 = vector.broadcast %1 : vector<1x64xf32> to vector<98x64xf32>
    %38 = arith.addf %36, %37 : vector<98x64xf32>
    %c2_24 = arith.constant 2 : index
    %c0_25 = arith.constant 0 : index
    %c0_26 = arith.constant 0 : index
    %39 = vector.load %arg7[%c2_24, %c0_25, %c0_26] : memref<4x98x64xf32, #tpu.memory_space<vmem>>, vector<1x98x64xf32>
    %40 = vector.shape_cast %39 : vector<1x98x64xf32> to vector<98x64xf32>
    %41 = vector.shape_cast %38 : vector<98x64xf32> to vector<1x98x64xf32>
    tpu.vector_store %arg7[%c2_24, %c0_25, %c0_26], %41 {strides = array<i32>} : memref<4x98x64xf32, #tpu.memory_space<vmem>>, vector<1x98x64xf32>,
    %cst_27 = arith.constant dense<0.000000e+00> : vector<64xf32>
    %42 = vector.multi_reduction <add>, %38, %cst_27 [0] : vector<98x64xf32> to vector<64xf32>
    %43 = vector.shape_cast %42 : vector<64xf32> to vector<1x64xf32>
    %44 = arith.addf %29, %43 : vector<1x64xf32>
    %45 = arith.mulf %38, %38 : vector<98x64xf32>
    %cst_28 = arith.constant dense<0.000000e+00> : vector<64xf32>
    %46 = vector.multi_reduction <add>, %45, %cst_28 [0] : vector<98x64xf32> to vector<64xf32>
    %47 = vector.shape_cast %46 : vector<64xf32> to vector<1x64xf32>
    %48 = arith.addf %33, %47 : vector<1x64xf32>
    %c3 = arith.constant 3 : index
    %c0_29 = arith.constant 0 : index
    %c0_30 = arith.constant 0 : index
    %49 = vector.load %arg1[%c3, %c0_29, %c0_30] : memref<4x98x144xf32, #tpu.memory_space<vmem>>, vector<1x98x144xf32>
    %50 = vector.shape_cast %49 : vector<1x98x144xf32> to vector<98x144xf32>
    %cst_31 = arith.constant dense<0.000000e+00> : vector<98x64xf32>
    %51 = tpu.matmul %50, %0, %cst_31 {dimension_numbers = #tpu.dot_dimension_numbers<[1], [0], [0], [1], [0, 0, 1, 1], [], []>} : vector<98x144xf32>, vector<144x64xf32>, vector<98x64xf32> -> vector<98x64xf32>
    %52 = vector.broadcast %1 : vector<1x64xf32> to vector<98x64xf32>
    %53 = arith.addf %51, %52 : vector<98x64xf32>
    %c3_32 = arith.constant 3 : index
    %c0_33 = arith.constant 0 : index
    %c0_34 = arith.constant 0 : index
    %54 = vector.load %arg7[%c3_32, %c0_33, %c0_34] : memref<4x98x64xf32, #tpu.memory_space<vmem>>, vector<1x98x64xf32>
    %55 = vector.shape_cast %54 : vector<1x98x64xf32> to vector<98x64xf32>
    %56 = vector.shape_cast %53 : vector<98x64xf32> to vector<1x98x64xf32>
    tpu.vector_store %arg7[%c3_32, %c0_33, %c0_34], %56 {strides = array<i32>} : memref<4x98x64xf32, #tpu.memory_space<vmem>>, vector<1x98x64xf32>,
    %cst_35 = arith.constant dense<0.000000e+00> : vector<64xf32>
    %57 = vector.multi_reduction <add>, %53, %cst_35 [0] : vector<98x64xf32> to vector<64xf32>
    %58 = vector.shape_cast %57 : vector<64xf32> to vector<1x64xf32>
    %59 = arith.addf %44, %58 : vector<1x64xf32>
    %60 = arith.mulf %53, %53 : vector<98x64xf32>
    %cst_36 = arith.constant dense<0.000000e+00> : vector<64xf32>
    %61 = vector.multi_reduction <add>, %60, %cst_36 [0] : vector<98x64xf32> to vector<64xf32>
    %62 = vector.shape_cast %61 : vector<64xf32> to vector<1x64xf32>
    %63 = arith.addf %48, %62 : vector<1x64xf32>
    %cst_37 = arith.constant 0.00255102036 : f32
    %64 = vector.broadcast %cst_37 : f32 to vector<1x64xf32>
    %65 = arith.mulf %59, %64 : vector<1x64xf32>
    %cst_38 = arith.constant 0.00255102036 : f32
    %66 = vector.broadcast %cst_38 : f32 to vector<1x64xf32>
    %67 = arith.mulf %63, %66 : vector<1x64xf32>
    %68 = arith.mulf %65, %65 : vector<1x64xf32>
    %69 = arith.subf %67, %68 : vector<1x64xf32>
    %cst_39 = arith.constant 9.99999974E-6 : f32
    %70 = vector.broadcast %cst_39 : f32 to vector<1x64xf32>
    %71 = arith.addf %69, %70 : vector<1x64xf32>
    %72 = math.rsqrt %71 : vector<1x64xf32>
    %c0_40 = arith.constant 0 : index
    %c0_41 = arith.constant 0 : index
    %73 = vector.load %arg4[%c0_40, %c0_41] : memref<1x64xf32, #tpu.memory_space<vmem>>, vector<1x64xf32>
    %74 = arith.mulf %72, %73 : vector<1x64xf32>
    %c0_42 = arith.constant 0 : index
    %c0_43 = arith.constant 0 : index
    %75 = vector.load %arg5[%c0_42, %c0_43] : memref<1x64xf32, #tpu.memory_space<vmem>>, vector<1x64xf32>
    %76 = arith.mulf %65, %74 : vector<1x64xf32>
    %77 = arith.subf %75, %76 : vector<1x64xf32>
    %c0_44 = arith.constant 0 : index
    %c0_45 = arith.constant 0 : index
    %c0_46 = arith.constant 0 : index
    %78 = vector.load %arg7[%c0_44, %c0_45, %c0_46] : memref<4x98x64xf32, #tpu.memory_space<vmem>>, vector<1x98x64xf32>
    %79 = vector.shape_cast %78 : vector<1x98x64xf32> to vector<98x64xf32>
    %80 = vector.broadcast %74 : vector<1x64xf32> to vector<98x64xf32>
    %81 = arith.mulf %79, %80 : vector<98x64xf32>
    %82 = vector.broadcast %77 : vector<1x64xf32> to vector<98x64xf32>
    %83 = arith.addf %81, %82 : vector<98x64xf32>
    %c1_47 = arith.constant 1 : index
    %c0_48 = arith.constant 0 : index
    %c0_49 = arith.constant 0 : index
    %84 = vector.load %arg7[%c1_47, %c0_48, %c0_49] : memref<4x98x64xf32, #tpu.memory_space<vmem>>, vector<1x98x64xf32>
    %85 = vector.shape_cast %84 : vector<1x98x64xf32> to vector<98x64xf32>
    %86 = vector.broadcast %74 : vector<1x64xf32> to vector<98x64xf32>
    %87 = arith.mulf %85, %86 : vector<98x64xf32>
    %88 = vector.broadcast %77 : vector<1x64xf32> to vector<98x64xf32>
    %89 = arith.addf %87, %88 : vector<98x64xf32>
    %90 = arith.maximumf %83, %89 : vector<98x64xf32>
    %c2_50 = arith.constant 2 : index
    %c0_51 = arith.constant 0 : index
    %c0_52 = arith.constant 0 : index
    %91 = vector.load %arg7[%c2_50, %c0_51, %c0_52] : memref<4x98x64xf32, #tpu.memory_space<vmem>>, vector<1x98x64xf32>
    %92 = vector.shape_cast %91 : vector<1x98x64xf32> to vector<98x64xf32>
    %93 = vector.broadcast %74 : vector<1x64xf32> to vector<98x64xf32>
    %94 = arith.mulf %92, %93 : vector<98x64xf32>
    %95 = vector.broadcast %77 : vector<1x64xf32> to vector<98x64xf32>
    %96 = arith.addf %94, %95 : vector<98x64xf32>
    %97 = arith.maximumf %90, %96 : vector<98x64xf32>
    %c3_53 = arith.constant 3 : index
    %c0_54 = arith.constant 0 : index
    %c0_55 = arith.constant 0 : index
    %98 = vector.load %arg7[%c3_53, %c0_54, %c0_55] : memref<4x98x64xf32, #tpu.memory_space<vmem>>, vector<1x98x64xf32>
    %99 = vector.shape_cast %98 : vector<1x98x64xf32> to vector<98x64xf32>
    %100 = vector.broadcast %74 : vector<1x64xf32> to vector<98x64xf32>
    %101 = arith.mulf %99, %100 : vector<98x64xf32>
    %102 = vector.broadcast %77 : vector<1x64xf32> to vector<98x64xf32>
    %103 = arith.addf %101, %102 : vector<98x64xf32>
    %104 = arith.maximumf %97, %103 : vector<98x64xf32>
    %cst_56 = arith.constant 0.000000e+00 : f32
    %105 = vector.broadcast %cst_56 : f32 to vector<98x64xf32>
    %106 = arith.maximumf %104, %105 : vector<98x64xf32>
    %c0_57 = arith.constant 0 : index
    %c0_58 = arith.constant 0 : index
    %107 = vector.load %arg6[%c0_57, %c0_58] : memref<98x64xf32, #tpu.memory_space<vmem>>, vector<98x64xf32>
    tpu.vector_store %arg6[%c0_57, %c0_58], %106 {strides = array<i32>} : memref<98x64xf32, #tpu.memory_space<vmem>>, vector<98x64xf32>,
    return
  }
  func.func @transform_0(%arg0: i32) -> (i32, i32, i32) {
    %c0_i32 = arith.constant 0 : i32
    %c0_i32_0 = arith.constant 0 : i32
    %c0_i32_1 = arith.constant 0 : i32
    %c0_i32_2 = arith.constant 0 : i32
    return %c0_i32, %c0_i32_0, %c0_i32_1 : i32, i32, i32
  }
  func.func @transform_1(%arg0: i32) -> (i32, i32) {
    %c0_i32 = arith.constant 0 : i32
    %c0_i32_0 = arith.constant 0 : i32
    %c0_i32_1 = arith.constant 0 : i32
    return %c0_i32, %c0_i32_0 : i32, i32
  }
  func.func @transform_2(%arg0: i32) -> (i32, i32) {
    %c0_i32 = arith.constant 0 : i32
    %c0_i32_0 = arith.constant 0 : i32
    %c0_i32_1 = arith.constant 0 : i32
    return %c0_i32, %c0_i32_0 : i32, i32
  }
  func.func @transform_3(%arg0: i32) -> (i32, i32) {
    %c0_i32 = arith.constant 0 : i32
    %c0_i32_0 = arith.constant 0 : i32
    %c0_i32_1 = arith.constant 0 : i32
    return %c0_i32, %c0_i32_0 : i32, i32
  }
  func.func @transform_4(%arg0: i32) -> (i32, i32) {
    %c0_i32 = arith.constant 0 : i32
    %c0_i32_0 = arith.constant 0 : i32
    %c0_i32_1 = arith.constant 0 : i32
    return %c0_i32, %c0_i32_0 : i32, i32
  }
  func.func @transform_5(%arg0: i32) -> (i32, i32) {
    %c0_i32 = arith.constant 0 : i32
    %c0_i32_0 = arith.constant 0 : i32
    %c0_i32_1 = arith.constant 0 : i32
    return %c0_i32, %c0_i32_0 : i32, i32
  }
}

module attributes {stable_mosaic.version = 11 : i64} {
  func.func @_mlp_kernel(%arg0: i32, %arg1: memref<2x896xf32, #tpu.memory_space<vmem>>, %arg2: memref<896x512xbf16, #tpu.memory_space<vmem>>, %arg3: memref<1x512xf32, #tpu.memory_space<vmem>>, %arg4: memref<512x128xbf16, #tpu.memory_space<vmem>>, %arg5: memref<1x128xf32, #tpu.memory_space<vmem>>, %arg6: memref<2x128xf32, #tpu.memory_space<vmem>>, %arg7: memref<2x512xf32, #tpu.memory_space<vmem>>) attributes {dimension_semantics = [#tpu.dimension_semantics<arbitrary>], iteration_bounds = array<i64: 4>, scalar_prefetch = 0 : i64, scratch_operands = 1 : i64, tpu.core_type = #tpu.core_type<tc>, window_params = [{transform_indices = @transform_0, window_bounds = array<i64: 2, 896>}, {transform_indices = @transform_1, window_bounds = array<i64: 896, 512>}, {pipeline_mode = #tpu.pipeline_mode<synchronous>, transform_indices = @transform_2, window_bounds = array<i64: 1, 512>}, {pipeline_mode = #tpu.pipeline_mode<synchronous>, transform_indices = @transform_3, window_bounds = array<i64: 512, 128>}, {pipeline_mode = #tpu.pipeline_mode<synchronous>, transform_indices = @transform_4, window_bounds = array<i64: 1, 128>}, {pipeline_mode = #tpu.pipeline_mode<synchronous>, transform_indices = @transform_5, window_bounds = array<i64: 2, 128>}]} {
    %c0_i32 = arith.constant 0 : i32
    %0 = arith.cmpi eq, %arg0, %c0_i32 : i32
    %1 = arith.extui %0 : i1 to i32
    %c0_i32_0 = arith.constant 0 : i32
    %2 = arith.cmpi ne, %1, %c0_i32_0 : i32
    scf.if %2 {
      %cst_9 = arith.constant 0.000000e+00 : f32
      %13 = vector.broadcast %cst_9 : f32 to vector<2x512xf32>
      %c0_10 = arith.constant 0 : index
      %c0_11 = arith.constant 0 : index
      %14 = vector.load %arg7[%c0_10, %c0_11] : memref<2x512xf32, #tpu.memory_space<vmem>>, vector<2x512xf32>
      tpu.vector_store %arg7[%c0_10, %c0_11], %13 {strides = array<i32>} : memref<2x512xf32, #tpu.memory_space<vmem>>, vector<2x512xf32>,
    } else {
    }
    %c0 = arith.constant 0 : index
    %c0_1 = arith.constant 0 : index
    %3 = vector.load %arg7[%c0, %c0_1] : memref<2x512xf32, #tpu.memory_space<vmem>>, vector<2x512xf32>
    %c0_2 = arith.constant 0 : index
    %c0_3 = arith.constant 0 : index
    %4 = vector.load %arg1[%c0_2, %c0_3] : memref<2x896xf32, #tpu.memory_space<vmem>>, vector<2x896xf32>
    %5 = arith.truncf %4 : vector<2x896xf32> to vector<2x896xbf16>
    %c0_4 = arith.constant 0 : index
    %c0_5 = arith.constant 0 : index
    %6 = vector.load %arg2[%c0_4, %c0_5] : memref<896x512xbf16, #tpu.memory_space<vmem>>, vector<896x512xbf16>
    %cst = arith.constant dense<0.000000e+00> : vector<2x512xf32>
    %7 = tpu.matmul %5, %6, %cst {dimension_numbers = #tpu.dot_dimension_numbers<[1], [0], [0], [1], [0, 0, 1, 1], [], []>} : vector<2x896xbf16>, vector<896x512xbf16>, vector<2x512xf32> -> vector<2x512xf32>
    %8 = arith.addf %3, %7 : vector<2x512xf32>
    %c0_6 = arith.constant 0 : index
    %c0_7 = arith.constant 0 : index
    %9 = vector.load %arg7[%c0_6, %c0_7] : memref<2x512xf32, #tpu.memory_space<vmem>>, vector<2x512xf32>
    tpu.vector_store %arg7[%c0_6, %c0_7], %8 {strides = array<i32>} : memref<2x512xf32, #tpu.memory_space<vmem>>, vector<2x512xf32>,
    %c3_i32 = arith.constant 3 : i32
    %10 = arith.cmpi eq, %arg0, %c3_i32 : i32
    %11 = arith.extui %10 : i1 to i32
    %c0_i32_8 = arith.constant 0 : i32
    %12 = arith.cmpi ne, %11, %c0_i32_8 : i32
    scf.if %12 {
      %c0_9 = arith.constant 0 : index
      %c0_10 = arith.constant 0 : index
      %13 = vector.load %arg7[%c0_9, %c0_10] : memref<2x512xf32, #tpu.memory_space<vmem>>, vector<2x512xf32>
      %c0_11 = arith.constant 0 : index
      %c0_12 = arith.constant 0 : index
      %14 = vector.load %arg3[%c0_11, %c0_12] : memref<1x512xf32, #tpu.memory_space<vmem>>, vector<1x512xf32>
      %15 = vector.broadcast %14 : vector<1x512xf32> to vector<2x512xf32>
      %16 = arith.addf %13, %15 : vector<2x512xf32>
      %17 = arith.truncf %16 : vector<2x512xf32> to vector<2x512xbf16>
      %c0_13 = arith.constant 0 : index
      %c0_14 = arith.constant 0 : index
      %18 = vector.load %arg4[%c0_13, %c0_14] : memref<512x128xbf16, #tpu.memory_space<vmem>>, vector<512x128xbf16>
      %cst_15 = arith.constant dense<0.000000e+00> : vector<2x128xf32>
      %19 = tpu.matmul %17, %18, %cst_15 {dimension_numbers = #tpu.dot_dimension_numbers<[1], [0], [0], [1], [0, 0, 1, 1], [], []>} : vector<2x512xbf16>, vector<512x128xbf16>, vector<2x128xf32> -> vector<2x128xf32>
      %c0_16 = arith.constant 0 : index
      %c0_17 = arith.constant 0 : index
      %20 = vector.load %arg5[%c0_16, %c0_17] : memref<1x128xf32, #tpu.memory_space<vmem>>, vector<1x128xf32>
      %21 = vector.broadcast %20 : vector<1x128xf32> to vector<2x128xf32>
      %22 = arith.addf %19, %21 : vector<2x128xf32>
      %c0_18 = arith.constant 0 : index
      %c0_19 = arith.constant 0 : index
      %23 = vector.load %arg6[%c0_18, %c0_19] : memref<2x128xf32, #tpu.memory_space<vmem>>, vector<2x128xf32>
      tpu.vector_store %arg6[%c0_18, %c0_19], %22 {strides = array<i32>} : memref<2x128xf32, #tpu.memory_space<vmem>>, vector<2x128xf32>,
    } else {
    }
    return
  }
  func.func @transform_0(%arg0: i32) -> (i32, i32) {
    %c0_i32 = arith.constant 0 : i32
    %c0_i32_0 = arith.constant 0 : i32
    return %c0_i32, %arg0 : i32, i32
  }
  func.func @transform_1(%arg0: i32) -> (i32, i32) {
    %c0_i32 = arith.constant 0 : i32
    %c0_i32_0 = arith.constant 0 : i32
    return %arg0, %c0_i32 : i32, i32
  }
  func.func @transform_2(%arg0: i32) -> (i32, i32) {
    %c0_i32 = arith.constant 0 : i32
    %c0_i32_0 = arith.constant 0 : i32
    %c0_i32_1 = arith.constant 0 : i32
    return %c0_i32, %c0_i32_0 : i32, i32
  }
  func.func @transform_3(%arg0: i32) -> (i32, i32) {
    %c0_i32 = arith.constant 0 : i32
    %c0_i32_0 = arith.constant 0 : i32
    %c0_i32_1 = arith.constant 0 : i32
    return %c0_i32, %c0_i32_0 : i32, i32
  }
  func.func @transform_4(%arg0: i32) -> (i32, i32) {
    %c0_i32 = arith.constant 0 : i32
    %c0_i32_0 = arith.constant 0 : i32
    %c0_i32_1 = arith.constant 0 : i32
    return %c0_i32, %c0_i32_0 : i32, i32
  }
  func.func @transform_5(%arg0: i32) -> (i32, i32) {
    %c0_i32 = arith.constant 0 : i32
    %c0_i32_0 = arith.constant 0 : i32
    %c0_i32_1 = arith.constant 0 : i32
    return %c0_i32, %c0_i32_0 : i32, i32
  }
}

</mosaic_0001>

<bundles_post_ra>
// kernel: handwritten_forward.3
= control target key start
LH: loop header
LB: loop body
LE: loop exit
PB: predicated region body
PF: predicated region fallthrough
CT: control target
= control target key end

     0   :  { %vm223_vm0 = vcmask 1040384   ;;  %vm75_vm1 = vcmask 72704   ;;  %vm391_vm2 = vcmask 130048   ;;  %s7356_s1 = inlined_call_operand.vmem [shape: f32[9,16], index: 1, kind: input, shape index: {}]   ;;  %s7357_s0 = inlined_call_operand.vmem [shape: f32[4,392,9], index: 0, kind: input, shape index: {}]   ;;  %s7358_s2 = inlined_call_operand.vmem [shape: f32[1,16], index: 2, kind: input, shape index: {}]   ;;  %s7359_s3 = inlined_call_operand.vmem [shape: f32[1,16], index: 3, kind: input, shape index: {}]   ;;  %s7360_s4 = inlined_call_operand.vmem [shape: f32[1,16], index: 4, kind: input, shape index: {}]   ;;  %s7361_s5 = inlined_call_operand.vmem [shape: f32[392,16], index: 5, kind: output, shape index: {}]  }
   0x1   :  { %v21_v0 = vld [vmem:[%s7356_s1 + $0x8] sm:$0x1]  ;;  %v20_v1 = vld [vmem:[%s7356_s1] sm:$0xff]  ;;  %v3712_v4 = vld [vmem:[%s7357_s0 + $0x310] sm:$0xff] }
   0x2   :  { %3563 = vmatpush.msk.msra.mxu0 %vm223_vm0, %v21_v0  ;;  %3662 = vmatpush.msk.msra.mxu1 %vm223_vm0, %v21_v0  ;;  %v23_v2 = vld [vmem:[%s7357_s0] sm:$0xff]  ;;  %v3613_v3 = vld [vmem:[%s7357_s0 + $0x188] sm:$0xff]  ;;  %v3811_v5 = vld [vmem:[%s7357_s0 + $0x498] sm:$0xff] }
   0x3   :  { %3761 = vmatpush.msk.msra.mxu2 %vm223_vm0, %v21_v0  ;;  %3860 = vmatpush.msk.msra.mxu3 %vm223_vm0, %v21_v0  ;;  %v24_v6 = vld [vmem:[%s7357_s0 + $0x8] sm:$0xff]  ;;  %v3614_v7 = vld [vmem:[%s7357_s0 + $0x190] sm:$0xff]  ;;  %v3713_v8 = vld [vmem:[%s7357_s0 + $0x318] sm:$0xff] }
   0x4   :  { %242 = vmatpush.msra.mxu0 %v20_v1  ;;  %910 = vmatpush.msra.mxu1 %v20_v1  ;;  %v3812_v9 = vld [vmem:[%s7357_s0 + $0x4a0] sm:$0xff]  ;;  %v25_v10 = vld [vmem:[%s7357_s0 + $0x10] sm:$0xff]  ;;  %v3615_v11 = vld [vmem:[%s7357_s0 + $0x198] sm:$0xff] }
   0x5   :  { %1578 = vmatpush.msra.mxu2 %v20_v1  ;;  %2246 = vmatpush.msra.mxu3 %v20_v1  ;;  %v3714_v12 = vld [vmem:[%s7357_s0 + $0x320] sm:$0xff]  ;;  %v3813_v13 = vld [vmem:[%s7357_s0 + $0x4a8] sm:$0xff]  ;;  %v26_v14 = vld [vmem:[%s7357_s0 + $0x18] sm:$0xff] }
   0x6   :  { %3564 = vmatmul.msk.f32.vlgmr.msra.gmra.mxu0 %vm75_vm1, %v23_v2  ;;  %3663 = vmatmul.msk.f32.vlgmr.msra.gmra.mxu1 %vm75_vm1, %v3613_v3  ;;  %v3616_v15 = vld [vmem:[%s7357_s0 + $0x1a0] sm:$0xff]  ;;  %v3715_v16 = vld [vmem:[%s7357_s0 + $0x328] sm:$0xff]  ;;  %v3814_v17 = vld [vmem:[%s7357_s0 + $0x4b0] sm:$0xff] }
   0x7   :  { %3762 = vmatmul.msk.f32.vlgmr.msra.gmra.mxu2 %vm75_vm1, %v3712_v4  ;;  %3861 = vmatmul.msk.f32.vlgmr.msra.gmra.mxu3 %vm75_vm1, %v3811_v5  ;;  %v27_v18 = vld [vmem:[%s7357_s0 + $0x20] sm:$0xff]  ;;  %v3617_v19 = vld [vmem:[%s7357_s0 + $0x1a8] sm:$0xff]  ;;  %v3716_v20 = vld [vmem:[%s7357_s0 + $0x330] sm:$0xff] }
   0x8   :  { %v3815_v21 = vld [vmem:[%s7357_s0 + $0x4b8] sm:$0xff]  ;;  %v28_v22 = vld [vmem:[%s7357_s0 + $0x28] sm:$0xff]  ;;  %v3618_v23 = vld [vmem:[%s7357_s0 + $0x1b0] sm:$0xff] }
   0x9   :  { %v3717_v24 = vld [vmem:[%s7357_s0 + $0x338] sm:$0xff]  ;;  %v3816_v25 = vld [vmem:[%s7357_s0 + $0x4c0] sm:$0xff]  ;;  %v29_v26 = vld [vmem:[%s7357_s0 + $0x30] sm:$0xff] }
   0xa   :  { %v3619_v27 = vld [vmem:[%s7357_s0 + $0x1b8] sm:$0xff]  ;;  %v3718_v28 = vld [vmem:[%s7357_s0 + $0x340] sm:$0xff]  ;;  %v3817_v29 = vld [vmem:[%s7357_s0 + $0x4c8] sm:$0xff] }
   0xb   :  { %v30_v30 = vld [vmem:[%s7357_s0 + $0x38] sm:$0xff]  ;;  %v3620_v31 = vld [vmem:[%s7357_s0 + $0x1c0] sm:$0xff]  ;;  %v3719_v32 = vld [vmem:[%s7357_s0 + $0x348] sm:$0xff] }
   0xc   :  { %v3818_v33 = vld [vmem:[%s7357_s0 + $0x4d0] sm:$0xff]  ;;  %v31_v34 = vld [vmem:[%s7357_s0 + $0x40] sm:$0xff]  ;;  %v3621_v35 = vld [vmem:[%s7357_s0 + $0x1c8] sm:$0xff] }
   0xd   :  { %v3720_v36 = vld [vmem:[%s7357_s0 + $0x350] sm:$0xff]  ;;  %v3819_v37 = vld [vmem:[%s7357_s0 + $0x4d8] sm:$0xff]  ;;  %v32_v38 = vld [vmem:[%s7357_s0 + $0x48] sm:$0xff] }
   0xe   :  { %3565 = vmatmul.msk.f32.gmra.mxu0 %vm75_vm1, %v24_v6  ;;  %3664 = vmatmul.msk.f32.gmra.mxu1 %vm75_vm1, %v3614_v7  ;;  %v3622_v39 = vld [vmem:[%s7357_s0 + $0x1d0] sm:$0xff]  ;;  %v3721_v40 = vld [vmem:[%s7357_s0 + $0x358] sm:$0xff]  ;;  %v3820_v41 = vld [vmem:[%s7357_s0 + $0x4e0] sm:$0xff] }
   0xf   :  { %3763 = vmatmul.msk.f32.gmra.mxu2 %vm75_vm1, %v3713_v8  ;;  %3862 = vmatmul.msk.f32.gmra.mxu3 %vm75_vm1, %v3812_v9  ;;  %v33_v42 = vld [vmem:[%s7357_s0 + $0x50] sm:$0xff]  ;;  %v3623_v43 = vld [vmem:[%s7357_s0 + $0x1d8] sm:$0xff]  ;;  %v3722_v44 = vld [vmem:[%s7357_s0 + $0x360] sm:$0xff] }
  0x10   :  { %v3821_v45 = vld [vmem:[%s7357_s0 + $0x4e8] sm:$0xff]  ;;  %v34_v46 = vld [vmem:[%s7357_s0 + $0x58] sm:$0xff]  ;;  %v3624_v47 = vld [vmem:[%s7357_s0 + $0x1e0] sm:$0xff] }
  0x11   :  { %v3723_v48 = vld [vmem:[%s7357_s0 + $0x368] sm:$0xff]  ;;  %v3822_v49 = vld [vmem:[%s7357_s0 + $0x4f0] sm:$0xff]  ;;  %v35_v50 = vld [vmem:[%s7357_s0 + $0x60] sm:$0xff] }
  0x12   :  { %v3625_v51 = vld [vmem:[%s7357_s0 + $0x1e8] sm:$0xff]  ;;  %v3724_v52 = vld [vmem:[%s7357_s0 + $0x370] sm:$0xff]  ;;  %v3823_v53 = vld [vmem:[%s7357_s0 + $0x4f8] sm:$0xff] }
  0x13   :  { %v36_v54 = vld [vmem:[%s7357_s0 + $0x68] sm:$0xff]  ;;  %v3626_v55 = vld [vmem:[%s7357_s0 + $0x1f0] sm:$0xff]  ;;  %v3725_v56 = vld [vmem:[%s7357_s0 + $0x378] sm:$0xff] }
  0x14   :  { %v3824_v57 = vld [vmem:[%s7357_s0 + $0x500] sm:$0xff]  ;;  %v37_v58 = vld [vmem:[%s7357_s0 + $0x70] sm:$0xff]  ;;  %v3627_v59 = vld [vmem:[%s7357_s0 + $0x1f8] sm:$0xff] }
  0x15   :  { %v3726_v60 = vld [vmem:[%s7357_s0 + $0x380] sm:$0xff]  ;;  %v3825_v61 = vld [vmem:[%s7357_s0 + $0x508] sm:$0xff]  ;;  %v38_v62 = vld [vmem:[%s7357_s0 + $0x78] sm:$0xff] }
  0x16   :  { %3566 = vmatmul.msk.f32.gmra.mxu0 %vm75_vm1, %v25_v10  ;;  %3665 = vmatmul.msk.f32.gmra.mxu1 %vm75_vm1, %v3615_v11  ;;  %v3628_v63 = vld [vmem:[%s7357_s0 + $0x200] sm:$0xff]  ;;  %v3727_v0 = vld [vmem:[%s7357_s0 + $0x388] sm:$0xff]  ;;  %v3826_v1 = vld [vmem:[%s7357_s0 + $0x510] sm:$0xff] }
  0x17   :  { %3764 = vmatmul.msk.f32.gmra.mxu2 %vm75_vm1, %v3714_v12  ;;  %3863 = vmatmul.msk.f32.gmra.mxu3 %vm75_vm1, %v3813_v13  ;;  %v4211_v2 = vld [vmem:[%s7358_s2] ss:$0 sm:$0xff]  ;;  %v3629_v6 = vld [vmem:[%s7357_s0 + $0x208] sm:$0xff]  ;;  %v3728_v9 = vld [vmem:[%s7357_s0 + $0x390] sm:$0xff] }
  0x18   :  { %v39_v5 = vld [vmem:[%s7357_s0 + $0x80] sm:$0xff]  ;;  %v3827_v10 = vld [vmem:[%s7357_s0 + $0x518] sm:$0xff] }
  0x1e   :  { %3567 = vmatmul.msk.f32.gmra.mxu0 %vm75_vm1, %v26_v14  ;;  %3666 = vmatmul.msk.f32.gmra.mxu1 %vm75_vm1, %v3616_v15 }
  0x1f   :  { %3765 = vmatmul.msk.f32.gmra.mxu2 %vm75_vm1, %v3715_v16  ;;  %3864 = vmatmul.msk.f32.gmra.mxu3 %vm75_vm1, %v3814_v17 }
  0x26   :  { %3568 = vmatmul.msk.f32.gmra.mxu0 %vm75_vm1, %v27_v18  ;;  %3667 = vmatmul.msk.f32.gmra.mxu1 %vm75_vm1, %v3617_v19  ;;  %v40_v19 = vld [vmem:[%s7357_s0 + $0x88] sm:$0xff] }
  0x27   :  { %3766 = vmatmul.msk.f32.gmra.mxu2 %vm75_vm1, %v3716_v20  ;;  %3865 = vmatmul.msk.f32.gmra.mxu3 %vm75_vm1, %v3815_v21  ;;  %v3630_v20 = vld [vmem:[%s7357_s0 + $0x210] sm:$0xff] }
  0x2e   :  { %3569 = vmatmul.msk.f32.gmra.mxu0 %vm75_vm1, %v28_v22  ;;  %3668 = vmatmul.msk.f32.gmra.mxu1 %vm75_vm1, %v3618_v23  ;;  %v3729_v23 = vld [vmem:[%s7357_s0 + $0x398] sm:$0xff] }
  0x2f   :  { %3767 = vmatmul.msk.f32.gmra.mxu2 %vm75_vm1, %v3717_v24  ;;  %3866 = vmatmul.msk.f32.gmra.mxu3 %vm75_vm1, %v3816_v25  ;;  %v3828_v24 = vld [vmem:[%s7357_s0 + $0x520] sm:$0xff] }
  0x36   :  { %3570 = vmatmul.msk.f32.gmra.mxu0 %vm75_vm1, %v29_v26  ;;  %3669 = vmatmul.msk.f32.gmra.mxu1 %vm75_vm1, %v3619_v27 }
  0x37   :  { %3768 = vmatmul.msk.f32.gmra.mxu2 %vm75_vm1, %v3718_v28  ;;  %3867 = vmatmul.msk.f32.gmra.mxu3 %vm75_vm1, %v3817_v29 }
  0x3e   :  { %3571 = vmatmul.msk.f32.gmra.mxu0 %vm75_vm1, %v30_v30  ;;  %3670 = vmatmul.msk.f32.gmra.mxu1 %vm75_vm1, %v3620_v31 }
  0x3f   :  { %3769 = vmatmul.msk.f32.gmra.mxu2 %vm75_vm1, %v3719_v32  ;;  %3868 = vmatmul.msk.f32.gmra.mxu3 %vm75_vm1, %v3818_v33 }
  0x46   :  { %3572 = vmatmul.msk.f32.gmra.mxu0 %vm75_vm1, %v31_v34  ;;  %3671 = vmatmul.msk.f32.gmra.mxu1 %vm75_vm1, %v3621_v35 }
  0x47   :  { %3770 = vmatmul.msk.f32.gmra.mxu2 %vm75_vm1, %v3720_v36  ;;  %3869 = vmatmul.msk.f32.gmra.mxu3 %vm75_vm1, %v3819_v37 }
  0x4e   :  { %3573 = vmatmul.msk.f32.gmra.mxu0 %vm75_vm1, %v32_v38  ;;  %3672 = vmatmul.msk.f32.gmra.mxu1 %vm75_vm1, %v3622_v39 }
  0x4f   :  { %3771 = vmatmul.msk.f32.gmra.mxu2 %vm75_vm1, %v3721_v40  ;;  %3870 = vmatmul.msk.f32.gmra.mxu3 %vm75_vm1, %v3820_v41 }
  0x56   :  { %3574 = vmatmul.msk.f32.gmra.mxu0 %vm75_vm1, %v33_v42  ;;  %3673 = vmatmul.msk.f32.gmra.mxu1 %vm75_vm1, %v3623_v43 }
  0x57   :  { %3772 = vmatmul.msk.f32.gmra.mxu2 %vm75_vm1, %v3722_v44  ;;  %3871 = vmatmul.msk.f32.gmra.mxu3 %vm75_vm1, %v3821_v45 }
  0x5e   :  { %3575 = vmatmul.msk.f32.gmra.mxu0 %vm75_vm1, %v34_v46  ;;  %3674 = vmatmul.msk.f32.gmra.mxu1 %vm75_vm1, %v3624_v47 }
  0x5f   :  { %3773 = vmatmul.msk.f32.gmra.mxu2 %vm75_vm1, %v3723_v48  ;;  %3872 = vmatmul.msk.f32.gmra.mxu3 %vm75_vm1, %v3822_v49  ;;  %v41_v49 = vld [vmem:[%s7357_s0 + $0x90] sm:$0xff] }
  0x66   :  { %3576 = vmatmul.msk.f32.gmra.mxu0 %vm75_vm1, %v35_v50  ;;  %3675 = vmatmul.msk.f32.gmra.mxu1 %vm75_vm1, %v3625_v51 }
  0x67   :  { %3774 = vmatmul.msk.f32.gmra.mxu2 %vm75_vm1, %v3724_v52  ;;  %3873 = vmatmul.msk.f32.gmra.mxu3 %vm75_vm1, %v3823_v53 }
  0x6e   :  { %3577 = vmatmul.msk.f32.gmra.mxu0 %vm75_vm1, %v36_v54  ;;  %3676 = vmatmul.msk.f32.gmra.mxu1 %vm75_vm1, %v3626_v55  ;;  %v3631_v54 = vld [vmem:[%s7357_s0 + $0x218] sm:$0xff]  ;;  %v3730_v55 = vld [vmem:[%s7357_s0 + $0x3a0] sm:$0xff] }
  0x6f   :  { %3775 = vmatmul.msk.f32.gmra.mxu2 %vm75_vm1, %v3725_v56  ;;  %3874 = vmatmul.msk.f32.gmra.mxu3 %vm75_vm1, %v3824_v57 }
  0x76   :  { %3578 = vmatmul.msk.f32.gmra.mxu0 %vm75_vm1, %v37_v58  ;;  %3677 = vmatmul.msk.f32.gmra.mxu1 %vm75_vm1, %v3627_v59 }
  0x77   :  { %3776 = vmatmul.msk.f32.gmra.mxu2 %vm75_vm1, %v3726_v60  ;;  %3875 = vmatmul.msk.f32.gmra.mxu3 %vm75_vm1, %v3825_v61  ;;  %v3829_v60 = vld [vmem:[%s7357_s0 + $0x528] sm:$0xff] }
  0x7e   :  { %3579 = vmatmul.msk.f32.gmra.mxu0 %vm75_vm1, %v38_v62  ;;  %3678 = vmatmul.msk.f32.gmra.mxu1 %vm75_vm1, %v3628_v63 }
  0x7f   :  { %3777 = vmatmul.msk.f32.gmra.mxu2 %vm75_vm1, %v3727_v0  ;;  %3876 = vmatmul.msk.f32.gmra.mxu3 %vm75_vm1, %v3826_v1 }
  0x83   :  { %v244_v3 = vpop.f32.mrf.mxu0  ;;  %v912_v4 = vpop.f32.mrf.mxu1 }
  0x84   :  { %v245_v7 = vadd.f32 %v4211_v2, %v244_v3  ;;  %v913_v8 = vadd.f32 %v4211_v2, %v912_v4 }
  0x86   :  { %392 = vst.msk [vmem:[#allocation2] sm:$0xff] %vm391_vm2, %v245_v7  ;;  %3580 = vmatmul.msk.f32.gmra.mxu0 %vm75_vm1, %v39_v5  ;;  %3679 = vmatmul.msk.f32.gmra.mxu1 %vm75_vm1, %v3629_v6  ;;  %v545_v13 = vmul.f32 %v245_v7, %v245_v7  ;;  %v1213_v14 = vmul.f32 %v913_v8, %v913_v8  ;;  %v441_v25 = vsel %vm391_vm2, %v245_v7, 0.0  ;;  %v1109_v26 = vsel %vm391_vm2, %v913_v8, 0.0 }
  0x87   :  { %1060 = vst.msk [vmem:[#allocation2 + $0x188] sm:$0xff] %vm391_vm2, %v913_v8  ;;  %3778 = vmatmul.msk.f32.gmra.mxu2 %vm75_vm1, %v3728_v9  ;;  %3877 = vmatmul.msk.f32.gmra.mxu3 %vm75_vm1, %v3827_v10 }
  0x88   :  { %v594_v31 = vsel %vm391_vm2, %v545_v13, 0.0  ;;  %v1262_v32 = vsel %vm391_vm2, %v1213_v14, 0.0 }
  0x8a   :  { %v1580_v11 = vpop.f32.mrf.mxu2  ;;  %v2248_v12 = vpop.f32.mrf.mxu3 }
  0x8b   :  { %v1581_v15 = vadd.f32 %v4211_v2, %v1580_v11  ;;  %v2249_v16 = vadd.f32 %v4211_v2, %v2248_v12  ;;  %v247_v17 = vpop.f32.mrf.mxu0  ;;  %v915_v18 = vpop.f32.mrf.mxu1 }
  0x8c   :  { %v248_v21 = vadd.f32 %v4211_v2, %v247_v17  ;;  %v916_v22 = vadd.f32 %v4211_v2, %v915_v18 }
  0x8d   :  { %1728 = vst.msk [vmem:[#allocation2 + $0x310] sm:$0xff] %vm391_vm2, %v1581_v15  ;;  %v1881_v35 = vmul.f32 %v1581_v15, %v1581_v15  ;;  %v2549_v36 = vmul.f32 %v2249_v16, %v2249_v16  ;;  %v1777_v43 = vsel %vm391_vm2, %v1581_v15, 0.0  ;;  %v2445_v44 = vsel %vm391_vm2, %v2249_v16, 0.0 }
  0x8e   :  { %2396 = vst.msk [vmem:[#allocation2 + $0x498] sm:$0xff] %vm391_vm2, %v2249_v16  ;;  %v442_v27 = vsel %vm391_vm2, %v248_v21, 0.0  ;;  %v546_v28 = vmul.f32 %v248_v21, %v248_v21  ;;  %v1110_v29 = vsel %vm391_vm2, %v916_v22, 0.0  ;;  %v1214_v30 = vmul.f32 %v916_v22, %v916_v22  ;;  %3581 = vmatmul.msk.f32.gmra.mxu0 %vm75_vm1, %v40_v19  ;;  %3680 = vmatmul.msk.f32.gmra.mxu1 %vm75_vm1, %v3630_v20  ;;  %v42_v19 = vld [vmem:[%s7357_s0 + $0x98] sm:$0xff] }
  0x8f   :  { %393 = vst.msk [vmem:[#allocation2 + $0x8] sm:$0xff] %vm391_vm2, %v248_v21  ;;  %v443_v33 = vadd.f32 %v442_v27, %v441_v25  ;;  %v1111_v34 = vadd.f32 %v1110_v29, %v1109_v26  ;;  %3779 = vmatmul.msk.f32.gmra.mxu2 %vm75_vm1, %v3729_v23  ;;  %3878 = vmatmul.msk.f32.gmra.mxu3 %vm75_vm1, %v3828_v24  ;;  %v1930_v50 = vsel %vm391_vm2, %v1881_v35, 0.0  ;;  %v2598_v51 = vsel %vm391_vm2, %v2549_v36, 0.0  ;;  %v3632_v23 = vld [vmem:[%s7357_s0 + $0x220] sm:$0xff]  ;;  %v3731_v24 = vld [vmem:[%s7357_s0 + $0x3a8] sm:$0xff]  ;;  %v3830_v29 = vld [vmem:[%s7357_s0 + $0x530] sm:$0xff] }
  0x90   :  { %v595_v37 = vsel %vm391_vm2, %v546_v28, 0.0  ;;  %1061 = vst.msk [vmem:[#allocation2 + $0x190] sm:$0xff] %vm391_vm2, %v916_v22  ;;  %v1263_v38 = vsel %vm391_vm2, %v1214_v30, 0.0 }
  0x91   :  { %v596_v39 = vadd.f32 %v595_v37, %v594_v31  ;;  %v1264_v40 = vadd.f32 %v1263_v38, %v1262_v32 }
  0x92   :  { %v1583_v41 = vpop.f32.mrf.mxu2  ;;  %v2251_v42 = vpop.f32.mrf.mxu3 }
  0x93   :  { %v1584_v45 = vadd.f32 %v4211_v2, %v1583_v41  ;;  %v2252_v46 = vadd.f32 %v4211_v2, %v2251_v42  ;;  %v250_v47 = vpop.f32.mrf.mxu0  ;;  %v918_v48 = vpop.f32.mrf.mxu1 }
  0x94   :  { %v251_v52 = vadd.f32 %v4211_v2, %v250_v47  ;;  %v919_v53 = vadd.f32 %v4211_v2, %v918_v48 }
  0x95   :  { %1729 = vst.msk [vmem:[#allocation2 + $0x318] sm:$0xff] %vm391_vm2, %v1584_v45  ;;  %v1778_v56 = vsel %vm391_vm2, %v1584_v45, 0.0  ;;  %v1882_v57 = vmul.f32 %v1584_v45, %v1584_v45  ;;  %v2446_v58 = vsel %vm391_vm2, %v2252_v46, 0.0  ;;  %v2550_v59 = vmul.f32 %v2252_v46, %v2252_v46 }
  0x96   :  { %v1779_v61 = vadd.f32 %v1778_v56, %v1777_v43  ;;  %2397 = vst.msk [vmem:[#allocation2 + $0x4a0] sm:$0xff] %vm391_vm2, %v2252_v46  ;;  %v2447_v62 = vadd.f32 %v2446_v58, %v2445_v44  ;;  %v444_v63 = vsel %vm391_vm2, %v251_v52, 0.0  ;;  %v547_v0 = vmul.f32 %v251_v52, %v251_v52  ;;  %3582 = vmatmul.msk.f32.gmra.mxu0 %vm75_vm1, %v41_v49  ;;  %v3732_v56 = vld [vmem:[%s7357_s0 + $0x3b0] sm:$0xff] }
  0x97   :  { %v1931_v1 = vsel %vm391_vm2, %v1882_v57, 0.0  ;;  %v2599_v3 = vsel %vm391_vm2, %v2550_v59, 0.0  ;;  %394 = vst.msk [vmem:[#allocation2 + $0x10] sm:$0xff] %vm391_vm2, %v251_v52  ;;  %v445_v4 = vadd.f32 %v444_v63, %v443_v33  ;;  %v1112_v5 = vsel %vm391_vm2, %v919_v53, 0.0  ;;  %3681 = vmatmul.msk.f32.gmra.mxu1 %vm75_vm1, %v3631_v54  ;;  %3780 = vmatmul.msk.f32.gmra.mxu2 %vm75_vm1, %v3730_v55  ;;  %v3633_v55 = vld [vmem:[%s7357_s0 + $0x228] sm:$0xff] }
  0x98   :  { %v1932_v6 = vadd.f32 %v1931_v1, %v1930_v50  ;;  %v2600_v7 = vadd.f32 %v2599_v3, %v2598_v51  ;;  %v597_v8 = vsel %vm391_vm2, %v547_v0, 0.0  ;;  %1062 = vst.msk [vmem:[#allocation2 + $0x198] sm:$0xff] %vm391_vm2, %v919_v53  ;;  %v1113_v9 = vadd.f32 %v1112_v5, %v1111_v34  ;;  %3879 = vmatmul.msk.f32.gmra.mxu3 %vm75_vm1, %v3829_v60  ;;  %v43_v51 = vld [vmem:[%s7357_s0 + $0xa0] sm:$0xff] }
  0x99   :  { %v598_v10 = vadd.f32 %v597_v8, %v596_v39  ;;  %v1215_v11 = vmul.f32 %v919_v53, %v919_v53 }
  0x9a   :  { %v1586_v12 = vpop.f32.mrf.mxu2  ;;  %v2254_v13 = vpop.f32.mrf.mxu3 }
  0x9b   :  { %v1265_v14 = vsel %vm391_vm2, %v1215_v11, 0.0  ;;  %v1587_v15 = vadd.f32 %v4211_v2, %v1586_v12  ;;  %v2255_v16 = vadd.f32 %v4211_v2, %v2254_v13  ;;  %v253_v17 = vpop.f32.mrf.mxu0  ;;  %v921_v18 = vpop.f32.mrf.mxu1 }
  0x9c   :  { %v1266_v20 = vadd.f32 %v1265_v14, %v1264_v40  ;;  %v254_v21 = vadd.f32 %v4211_v2, %v253_v17  ;;  %v922_v22 = vadd.f32 %v4211_v2, %v921_v18 }
  0x9d   :  { %1730 = vst.msk [vmem:[#allocation2 + $0x320] sm:$0xff] %vm391_vm2, %v1587_v15  ;;  %v1780_v25 = vsel %vm391_vm2, %v1587_v15, 0.0  ;;  %v1883_v26 = vmul.f32 %v1587_v15, %v1587_v15  ;;  %v2448_v27 = vsel %vm391_vm2, %v2255_v16, 0.0  ;;  %v2551_v28 = vmul.f32 %v2255_v16, %v2255_v16 }
  0x9e   :  { %v1781_v30 = vadd.f32 %v1780_v25, %v1779_v61  ;;  %2398 = vst.msk [vmem:[#allocation2 + $0x4a8] sm:$0xff] %vm391_vm2, %v2255_v16  ;;  %v2449_v31 = vadd.f32 %v2448_v27, %v2447_v62  ;;  %v446_v32 = vsel %vm391_vm2, %v254_v21, 0.0  ;;  %v548_v33 = vmul.f32 %v254_v21, %v254_v21  ;;  %3583 = vmatmul.msk.f32.gmra.mxu0 %vm75_vm1, %v42_v19  ;;  %v3831_v61 = vld [vmem:[%s7357_s0 + $0x538] sm:$0xff] }
  0x9f   :  { %v1933_v34 = vsel %vm391_vm2, %v1883_v26, 0.0  ;;  %v2601_v35 = vsel %vm391_vm2, %v2551_v28, 0.0  ;;  %395 = vst.msk [vmem:[#allocation2 + $0x18] sm:$0xff] %vm391_vm2, %v254_v21  ;;  %v447_v36 = vadd.f32 %v446_v32, %v445_v4  ;;  %v1114_v37 = vsel %vm391_vm2, %v922_v22, 0.0  ;;  %3682 = vmatmul.msk.f32.gmra.mxu1 %vm75_vm1, %v3632_v23  ;;  %3781 = vmatmul.msk.f32.gmra.mxu2 %vm75_vm1, %v3731_v24  ;;  %v3634_v24 = vld [vmem:[%s7357_s0 + $0x230] sm:$0xff]  ;;  %v3733_v25 = vld [vmem:[%s7357_s0 + $0x3b8] sm:$0xff] }
  0xa0   :  { %v1934_v38 = vadd.f32 %v1933_v34, %v1932_v6  ;;  %v2602_v39 = vadd.f32 %v2601_v35, %v2600_v7  ;;  %v599_v40 = vsel %vm391_vm2, %v548_v33, 0.0  ;;  %1063 = vst.msk [vmem:[#allocation2 + $0x1a0] sm:$0xff] %vm391_vm2, %v922_v22  ;;  %v1115_v41 = vadd.f32 %v1114_v37, %v1113_v9  ;;  %3880 = vmatmul.msk.f32.gmra.mxu3 %vm75_vm1, %v3830_v29 }
  0xa1   :  { %v600_v42 = vadd.f32 %v599_v40, %v598_v10  ;;  %v1216_v43 = vmul.f32 %v922_v22, %v922_v22 }
  0xa2   :  { %v1589_v44 = vpop.f32.mrf.mxu2  ;;  %v2257_v45 = vpop.f32.mrf.mxu3 }
  0xa3   :  { %v1267_v46 = vsel %vm391_vm2, %v1216_v43, 0.0  ;;  %v1590_v47 = vadd.f32 %v4211_v2, %v1589_v44  ;;  %v2258_v48 = vadd.f32 %v4211_v2, %v2257_v45  ;;  %v256_v49 = vpop.f32.mrf.mxu0  ;;  %v924_v50 = vpop.f32.mrf.mxu1 }
  0xa4   :  { %v1268_v52 = vadd.f32 %v1267_v46, %v1266_v20  ;;  %v257_v53 = vadd.f32 %v4211_v2, %v256_v49  ;;  %v925_v54 = vadd.f32 %v4211_v2, %v924_v50  ;;  %v44_v20 = vld [vmem:[%s7357_s0 + $0xa8] sm:$0xff] }
  0xa5   :  { %1731 = vst.msk [vmem:[#allocation2 + $0x328] sm:$0xff] %vm391_vm2, %v1590_v47  ;;  %v1782_v57 = vsel %vm391_vm2, %v1590_v47, 0.0  ;;  %v1884_v58 = vmul.f32 %v1590_v47, %v1590_v47  ;;  %v2450_v59 = vsel %vm391_vm2, %v2258_v48, 0.0  ;;  %v2552_v60 = vmul.f32 %v2258_v48, %v2258_v48 }
  0xa6   :  { %v1783_v62 = vadd.f32 %v1782_v57, %v1781_v30  ;;  %2399 = vst.msk [vmem:[#allocation2 + $0x4b0] sm:$0xff] %vm391_vm2, %v2258_v48  ;;  %v2451_v63 = vadd.f32 %v2450_v59, %v2449_v31  ;;  %v448_v0 = vsel %vm391_vm2, %v257_v53, 0.0  ;;  %v549_v1 = vmul.f32 %v257_v53, %v257_v53  ;;  %3584 = vmatmul.msk.f32.gmra.mxu0 %vm75_vm1, %v43_v51  ;;  %v3832_v30 = vld [vmem:[%s7357_s0 + $0x540] sm:$0xff] }
  0xa7   :  { %v1935_v3 = vsel %vm391_vm2, %v1884_v58, 0.0  ;;  %v2603_v4 = vsel %vm391_vm2, %v2552_v60, 0.0  ;;  %396 = vst.msk [vmem:[#allocation2 + $0x20] sm:$0xff] %vm391_vm2, %v257_v53  ;;  %v449_v5 = vadd.f32 %v448_v0, %v447_v36  ;;  %v1116_v6 = vsel %vm391_vm2, %v925_v54, 0.0  ;;  %3683 = vmatmul.msk.f32.gmra.mxu1 %vm75_vm1, %v3633_v55  ;;  %3782 = vmatmul.msk.f32.gmra.mxu2 %vm75_vm1, %v3732_v56  ;;  %v3635_v56 = vld [vmem:[%s7357_s0 + $0x238] sm:$0xff]  ;;  %v3734_v57 = vld [vmem:[%s7357_s0 + $0x3c0] sm:$0xff] }
  0xa8   :  { %v1936_v7 = vadd.f32 %v1935_v3, %v1934_v38  ;;  %v2604_v8 = vadd.f32 %v2603_v4, %v2602_v39  ;;  %v601_v9 = vsel %vm391_vm2, %v549_v1, 0.0  ;;  %1064 = vst.msk [vmem:[#allocation2 + $0x1a8] sm:$0xff] %vm391_vm2, %v925_v54  ;;  %v1117_v10 = vadd.f32 %v1116_v6, %v1115_v41  ;;  %3881 = vmatmul.msk.f32.gmra.mxu3 %vm75_vm1, %v3831_v61 }
  0xa9   :  { %v602_v11 = vadd.f32 %v601_v9, %v600_v42  ;;  %v1217_v12 = vmul.f32 %v925_v54, %v925_v54 }
  0xaa   :  { %v1592_v13 = vpop.f32.mrf.mxu2  ;;  %v2260_v14 = vpop.f32.mrf.mxu3 }
  0xab   :  { %v1269_v15 = vsel %vm391_vm2, %v1217_v12, 0.0  ;;  %v1593_v16 = vadd.f32 %v4211_v2, %v1592_v13  ;;  %v2261_v17 = vadd.f32 %v4211_v2, %v2260_v14  ;;  %v259_v18 = vpop.f32.mrf.mxu0  ;;  %v927_v19 = vpop.f32.mrf.mxu1 }
  0xac   :  { %v1270_v21 = vadd.f32 %v1269_v15, %v1268_v52  ;;  %v260_v22 = vadd.f32 %v4211_v2, %v259_v18  ;;  %v928_v23 = vadd.f32 %v4211_v2, %v927_v19  ;;  %v45_v52 = vld [vmem:[%s7357_s0 + $0xb0] sm:$0xff] }
  0xad   :  { %1732 = vst.msk [vmem:[#allocation2 + $0x330] sm:$0xff] %vm391_vm2, %v1593_v16  ;;  %v1784_v26 = vsel %vm391_vm2, %v1593_v16, 0.0  ;;  %v1885_v27 = vmul.f32 %v1593_v16, %v1593_v16  ;;  %v2452_v28 = vsel %vm391_vm2, %v2261_v17, 0.0  ;;  %v2553_v29 = vmul.f32 %v2261_v17, %v2261_v17 }
  0xae   :  { %v1785_v31 = vadd.f32 %v1784_v26, %v1783_v62  ;;  %2400 = vst.msk [vmem:[#allocation2 + $0x4b8] sm:$0xff] %vm391_vm2, %v2261_v17  ;;  %v2453_v32 = vadd.f32 %v2452_v28, %v2451_v63  ;;  %v450_v33 = vsel %vm391_vm2, %v260_v22, 0.0  ;;  %v550_v34 = vmul.f32 %v260_v22, %v260_v22  ;;  %3585 = vmatmul.msk.f32.gmra.mxu0 %vm75_vm1, %v44_v20  ;;  %v3833_v62 = vld [vmem:[%s7357_s0 + $0x548] sm:$0xff] }
  0xaf   :  { %v1937_v35 = vsel %vm391_vm2, %v1885_v27, 0.0  ;;  %v2605_v36 = vsel %vm391_vm2, %v2553_v29, 0.0  ;;  %397 = vst.msk [vmem:[#allocation2 + $0x28] sm:$0xff] %vm391_vm2, %v260_v22  ;;  %v451_v37 = vadd.f32 %v450_v33, %v449_v5  ;;  %v1118_v38 = vsel %vm391_vm2, %v928_v23, 0.0  ;;  %3684 = vmatmul.msk.f32.gmra.mxu1 %vm75_vm1, %v3634_v24  ;;  %3783 = vmatmul.msk.f32.gmra.mxu2 %vm75_vm1, %v3733_v25  ;;  %v3636_v25 = vld [vmem:[%s7357_s0 + $0x240] sm:$0xff]  ;;  %v3735_v26 = vld [vmem:[%s7357_s0 + $0x3c8] sm:$0xff] }
  0xb0   :  { %v1938_v39 = vadd.f32 %v1937_v35, %v1936_v7  ;;  %v2606_v40 = vadd.f32 %v2605_v36, %v2604_v8  ;;  %v603_v41 = vsel %vm391_vm2, %v550_v34, 0.0  ;;  %1065 = vst.msk [vmem:[#allocation2 + $0x1b0] sm:$0xff] %vm391_vm2, %v928_v23  ;;  %v1119_v42 = vadd.f32 %v1118_v38, %v1117_v10  ;;  %3882 = vmatmul.msk.f32.gmra.mxu3 %vm75_vm1, %v3832_v30 }
  0xb1   :  { %v604_v43 = vadd.f32 %v603_v41, %v602_v11  ;;  %v1218_v44 = vmul.f32 %v928_v23, %v928_v23 }
  0xb2   :  { %v1595_v45 = vpop.f32.mrf.mxu2  ;;  %v2263_v46 = vpop.f32.mrf.mxu3 }
  0xb3   :  { %v1271_v47 = vsel %vm391_vm2, %v1218_v44, 0.0  ;;  %v1596_v48 = vadd.f32 %v4211_v2, %v1595_v45  ;;  %v2264_v49 = vadd.f32 %v4211_v2, %v2263_v46  ;;  %v262_v50 = vpop.f32.mrf.mxu0  ;;  %v930_v51 = vpop.f32.mrf.mxu1 }
  0xb4   :  { %v1272_v53 = vadd.f32 %v1271_v47, %v1270_v21  ;;  %v263_v54 = vadd.f32 %v4211_v2, %v262_v50  ;;  %v931_v55 = vadd.f32 %v4211_v2, %v930_v51  ;;  %v46_v21 = vld [vmem:[%s7357_s0 + $0xb8] sm:$0xff] }
  0xb5   :  { %1733 = vst.msk [vmem:[#allocation2 + $0x338] sm:$0xff] %vm391_vm2, %v1596_v48  ;;  %v1786_v58 = vsel %vm391_vm2, %v1596_v48, 0.0  ;;  %v1886_v59 = vmul.f32 %v1596_v48, %v1596_v48  ;;  %v2454_v60 = vsel %vm391_vm2, %v2264_v49, 0.0  ;;  %v2554_v61 = vmul.f32 %v2264_v49, %v2264_v49 }
  0xb6   :  { %v1787_v63 = vadd.f32 %v1786_v58, %v1785_v31  ;;  %2401 = vst.msk [vmem:[#allocation2 + $0x4c0] sm:$0xff] %vm391_vm2, %v2264_v49  ;;  %v2455_v0 = vadd.f32 %v2454_v60, %v2453_v32  ;;  %v452_v1 = vsel %vm391_vm2, %v263_v54, 0.0  ;;  %v551_v3 = vmul.f32 %v263_v54, %v263_v54  ;;  %3586 = vmatmul.msk.f32.gmra.mxu0 %vm75_vm1, %v45_v52  ;;  %v3834_v31 = vld [vmem:[%s7357_s0 + $0x550] sm:$0xff] }
  0xb7   :  { %v1939_v4 = vsel %vm391_vm2, %v1886_v59, 0.0  ;;  %v2607_v5 = vsel %vm391_vm2, %v2554_v61, 0.0  ;;  %398 = vst.msk [vmem:[#allocation2 + $0x30] sm:$0xff] %vm391_vm2, %v263_v54  ;;  %v453_v6 = vadd.f32 %v452_v1, %v451_v37  ;;  %v1120_v7 = vsel %vm391_vm2, %v931_v55, 0.0  ;;  %3685 = vmatmul.msk.f32.gmra.mxu1 %vm75_vm1, %v3635_v56  ;;  %3784 = vmatmul.msk.f32.gmra.mxu2 %vm75_vm1, %v3734_v57  ;;  %v3637_v57 = vld [vmem:[%s7357_s0 + $0x248] sm:$0xff]  ;;  %v3736_v58 = vld [vmem:[%s7357_s0 + $0x3d0] sm:$0xff] }
  0xb8   :  { %v1940_v8 = vadd.f32 %v1939_v4, %v1938_v39  ;;  %v2608_v9 = vadd.f32 %v2607_v5, %v2606_v40  ;;  %v605_v10 = vsel %vm391_vm2, %v551_v3, 0.0  ;;  %1066 = vst.msk [vmem:[#allocation2 + $0x1b8] sm:$0xff] %vm391_vm2, %v931_v55  ;;  %v1121_v11 = vadd.f32 %v1120_v7, %v1119_v42  ;;  %3883 = vmatmul.msk.f32.gmra.mxu3 %vm75_vm1, %v3833_v62 }
  0xb9   :  { %v606_v12 = vadd.f32 %v605_v10, %v604_v43  ;;  %v1219_v13 = vmul.f32 %v931_v55, %v931_v55 }
  0xba   :  { %v1598_v14 = vpop.f32.mrf.mxu2  ;;  %v2266_v15 = vpop.f32.mrf.mxu3 }
  0xbb   :  { %v1273_v16 = vsel %vm391_vm2, %v1219_v13, 0.0  ;;  %v1599_v17 = vadd.f32 %v4211_v2, %v1598_v14  ;;  %v2267_v18 = vadd.f32 %v4211_v2, %v2266_v15  ;;  %v265_v19 = vpop.f32.mrf.mxu0  ;;  %v933_v20 = vpop.f32.mrf.mxu1 }
  0xbc   :  { %v1274_v22 = vadd.f32 %v1273_v16, %v1272_v53  ;;  %v266_v23 = vadd.f32 %v4211_v2, %v265_v19  ;;  %v934_v24 = vadd.f32 %v4211_v2, %v933_v20  ;;  %v47_v53 = vld [vmem:[%s7357_s0 + $0xc0] sm:$0xff] }
  0xbd   :  { %1734 = vst.msk [vmem:[#allocation2 + $0x340] sm:$0xff] %vm391_vm2, %v1599_v17  ;;  %v1788_v27 = vsel %vm391_vm2, %v1599_v17, 0.0  ;;  %v1887_v28 = vmul.f32 %v1599_v17, %v1599_v17  ;;  %v2456_v29 = vsel %vm391_vm2, %v2267_v18, 0.0  ;;  %v2555_v30 = vmul.f32 %v2267_v18, %v2267_v18 }
  0xbe   :  { %v1789_v32 = vadd.f32 %v1788_v27, %v1787_v63  ;;  %2402 = vst.msk [vmem:[#allocation2 + $0x4c8] sm:$0xff] %vm391_vm2, %v2267_v18  ;;  %v2457_v33 = vadd.f32 %v2456_v29, %v2455_v0  ;;  %v454_v34 = vsel %vm391_vm2, %v266_v23, 0.0  ;;  %v552_v35 = vmul.f32 %v266_v23, %v266_v23  ;;  %3587 = vmatmul.msk.f32.gmra.mxu0 %vm75_vm1, %v46_v21  ;;  %v3835_v63 = vld [vmem:[%s7357_s0 + $0x558] sm:$0xff] }
  0xbf   :  { %v1941_v36 = vsel %vm391_vm2, %v1887_v28, 0.0  ;;  %v2609_v37 = vsel %vm391_vm2, %v2555_v30, 0.0  ;;  %399 = vst.msk [vmem:[#allocation2 + $0x38] sm:$0xff] %vm391_vm2, %v266_v23  ;;  %v455_v38 = vadd.f32 %v454_v34, %v453_v6  ;;  %v1122_v39 = vsel %vm391_vm2, %v934_v24, 0.0  ;;  %3686 = vmatmul.msk.f32.gmra.mxu1 %vm75_vm1, %v3636_v25  ;;  %3785 = vmatmul.msk.f32.gmra.mxu2 %vm75_vm1, %v3735_v26  ;;  %v3638_v26 = vld [vmem:[%s7357_s0 + $0x250] sm:$0xff]  ;;  %v3737_v27 = vld [vmem:[%s7357_s0 + $0x3d8] sm:$0xff] }
  0xc0   :  { %v1942_v40 = vadd.f32 %v1941_v36, %v1940_v8  ;;  %v2610_v41 = vadd.f32 %v2609_v37, %v2608_v9  ;;  %v607_v42 = vsel %vm391_vm2, %v552_v35, 0.0  ;;  %1067 = vst.msk [vmem:[#allocation2 + $0x1c0] sm:$0xff] %vm391_vm2, %v934_v24  ;;  %v1123_v43 = vadd.f32 %v1122_v39, %v1121_v11  ;;  %3884 = vmatmul.msk.f32.gmra.mxu3 %vm75_vm1, %v3834_v31 }
  0xc1   :  { %v608_v44 = vadd.f32 %v607_v42, %v606_v12  ;;  %v1220_v45 = vmul.f32 %v934_v24, %v934_v24 }
  0xc2   :  { %v1601_v46 = vpop.f32.mrf.mxu2  ;;  %v2269_v47 = vpop.f32.mrf.mxu3 }
  0xc3   :  { %v1275_v48 = vsel %vm391_vm2, %v1220_v45, 0.0  ;;  %v1602_v49 = vadd.f32 %v4211_v2, %v1601_v46  ;;  %v2270_v50 = vadd.f32 %v4211_v2, %v2269_v47  ;;  %v268_v51 = vpop.f32.mrf.mxu0  ;;  %v936_v52 = vpop.f32.mrf.mxu1 }
  0xc4   :  { %v1276_v54 = vadd.f32 %v1275_v48, %v1274_v22  ;;  %v269_v55 = vadd.f32 %v4211_v2, %v268_v51  ;;  %v937_v56 = vadd.f32 %v4211_v2, %v936_v52  ;;  %v48_v22 = vld [vmem:[%s7357_s0 + $0xc8] sm:$0xff] }
  0xc5   :  { %1735 = vst.msk [vmem:[#allocation2 + $0x348] sm:$0xff] %vm391_vm2, %v1602_v49  ;;  %v1790_v59 = vsel %vm391_vm2, %v1602_v49, 0.0  ;;  %v1888_v60 = vmul.f32 %v1602_v49, %v1602_v49  ;;  %v2458_v61 = vsel %vm391_vm2, %v2270_v50, 0.0  ;;  %v2556_v62 = vmul.f32 %v2270_v50, %v2270_v50 }
  0xc6   :  { %v1791_v0 = vadd.f32 %v1790_v59, %v1789_v32  ;;  %2403 = vst.msk [vmem:[#allocation2 + $0x4d0] sm:$0xff] %vm391_vm2, %v2270_v50  ;;  %v2459_v1 = vadd.f32 %v2458_v61, %v2457_v33  ;;  %v456_v3 = vsel %vm391_vm2, %v269_v55, 0.0  ;;  %v553_v4 = vmul.f32 %v269_v55, %v269_v55  ;;  %3588 = vmatmul.msk.f32.gmra.mxu0 %vm75_vm1, %v47_v53  ;;  %v3836_v32 = vld [vmem:[%s7357_s0 + $0x560] sm:$0xff] }
  0xc7   :  { %v1943_v5 = vsel %vm391_vm2, %v1888_v60, 0.0  ;;  %v2611_v6 = vsel %vm391_vm2, %v2556_v62, 0.0  ;;  %400 = vst.msk [vmem:[#allocation2 + $0x40] sm:$0xff] %vm391_vm2, %v269_v55  ;;  %v457_v7 = vadd.f32 %v456_v3, %v455_v38  ;;  %v1124_v8 = vsel %vm391_vm2, %v937_v56, 0.0  ;;  %3687 = vmatmul.msk.f32.gmra.mxu1 %vm75_vm1, %v3637_v57  ;;  %3786 = vmatmul.msk.f32.gmra.mxu2 %vm75_vm1, %v3736_v58  ;;  %v3639_v58 = vld [vmem:[%s7357_s0 + $0x258] sm:$0xff]  ;;  %v3738_v59 = vld [vmem:[%s7357_s0 + $0x3e0] sm:$0xff] }
  0xc8   :  { %v1944_v9 = vadd.f32 %v1943_v5, %v1942_v40  ;;  %v2612_v10 = vadd.f32 %v2611_v6, %v2610_v41  ;;  %v609_v11 = vsel %vm391_vm2, %v553_v4, 0.0  ;;  %1068 = vst.msk [vmem:[#allocation2 + $0x1c8] sm:$0xff] %vm391_vm2, %v937_v56  ;;  %v1125_v12 = vadd.f32 %v1124_v8, %v1123_v43  ;;  %3885 = vmatmul.msk.f32.gmra.mxu3 %vm75_vm1, %v3835_v63 }
  0xc9   :  { %v610_v13 = vadd.f32 %v609_v11, %v608_v44  ;;  %v1221_v14 = vmul.f32 %v937_v56, %v937_v56 }
  0xca   :  { %v1604_v15 = vpop.f32.mrf.mxu2  ;;  %v2272_v16 = vpop.f32.mrf.mxu3 }
  0xcb   :  { %v1277_v17 = vsel %vm391_vm2, %v1221_v14, 0.0  ;;  %v1605_v18 = vadd.f32 %v4211_v2, %v1604_v15  ;;  %v2273_v19 = vadd.f32 %v4211_v2, %v2272_v16  ;;  %v271_v20 = vpop.f32.mrf.mxu0  ;;  %v939_v21 = vpop.f32.mrf.mxu1 }
  0xcc   :  { %v1278_v23 = vadd.f32 %v1277_v17, %v1276_v54  ;;  %v272_v24 = vadd.f32 %v4211_v2, %v271_v20  ;;  %v940_v25 = vadd.f32 %v4211_v2, %v939_v21  ;;  %v49_v54 = vld [vmem:[%s7357_s0 + $0xd0] sm:$0xff] }
  0xcd   :  { %1736 = vst.msk [vmem:[#allocation2 + $0x350] sm:$0xff] %vm391_vm2, %v1605_v18  ;;  %v1792_v28 = vsel %vm391_vm2, %v1605_v18, 0.0  ;;  %v1889_v29 = vmul.f32 %v1605_v18, %v1605_v18  ;;  %v2460_v30 = vsel %vm391_vm2, %v2273_v19, 0.0  ;;  %v2557_v31 = vmul.f32 %v2273_v19, %v2273_v19 }
  0xce   :  { %v1793_v33 = vadd.f32 %v1792_v28, %v1791_v0  ;;  %2404 = vst.msk [vmem:[#allocation2 + $0x4d8] sm:$0xff] %vm391_vm2, %v2273_v19  ;;  %v2461_v34 = vadd.f32 %v2460_v30, %v2459_v1  ;;  %v458_v35 = vsel %vm391_vm2, %v272_v24, 0.0  ;;  %v554_v36 = vmul.f32 %v272_v24, %v272_v24  ;;  %3589 = vmatmul.msk.f32.gmra.mxu0 %vm75_vm1, %v48_v22  ;;  %v3837_v0 = vld [vmem:[%s7357_s0 + $0x568] sm:$0xff] }
  0xcf   :  { %v1945_v37 = vsel %vm391_vm2, %v1889_v29, 0.0  ;;  %v2613_v38 = vsel %vm391_vm2, %v2557_v31, 0.0  ;;  %401 = vst.msk [vmem:[#allocation2 + $0x48] sm:$0xff] %vm391_vm2, %v272_v24  ;;  %v459_v39 = vadd.f32 %v458_v35, %v457_v7  ;;  %v1126_v40 = vsel %vm391_vm2, %v940_v25, 0.0  ;;  %3688 = vmatmul.msk.f32.gmra.mxu1 %vm75_vm1, %v3638_v26  ;;  %3787 = vmatmul.msk.f32.gmra.mxu2 %vm75_vm1, %v3737_v27  ;;  %v3640_v27 = vld [vmem:[%s7357_s0 + $0x260] sm:$0xff]  ;;  %v3739_v28 = vld [vmem:[%s7357_s0 + $0x3e8] sm:$0xff] }
  0xd0   :  { %v1946_v41 = vadd.f32 %v1945_v37, %v1944_v9  ;;  %v2614_v42 = vadd.f32 %v2613_v38, %v2612_v10  ;;  %v611_v43 = vsel %vm391_vm2, %v554_v36, 0.0  ;;  %1069 = vst.msk [vmem:[#allocation2 + $0x1d0] sm:$0xff] %vm391_vm2, %v940_v25  ;;  %v1127_v44 = vadd.f32 %v1126_v40, %v1125_v12  ;;  %3886 = vmatmul.msk.f32.gmra.mxu3 %vm75_vm1, %v3836_v32 }
  0xd1   :  { %v612_v45 = vadd.f32 %v611_v43, %v610_v13  ;;  %v1222_v46 = vmul.f32 %v940_v25, %v940_v25 }
  0xd2   :  { %v1607_v47 = vpop.f32.mrf.mxu2  ;;  %v2275_v48 = vpop.f32.mrf.mxu3 }
  0xd3   :  { %v1279_v49 = vsel %vm391_vm2, %v1222_v46, 0.0  ;;  %v1608_v50 = vadd.f32 %v4211_v2, %v1607_v47  ;;  %v2276_v51 = vadd.f32 %v4211_v2, %v2275_v48  ;;  %v274_v52 = vpop.f32.mrf.mxu0  ;;  %v942_v53 = vpop.f32.mrf.mxu1 }
  0xd4   :  { %v1280_v55 = vadd.f32 %v1279_v49, %v1278_v23  ;;  %v275_v56 = vadd.f32 %v4211_v2, %v274_v52  ;;  %v943_v57 = vadd.f32 %v4211_v2, %v942_v53  ;;  %v50_v23 = vld [vmem:[%s7357_s0 + $0xd8] sm:$0xff] }
  0xd5   :  { %1737 = vst.msk [vmem:[#allocation2 + $0x358] sm:$0xff] %vm391_vm2, %v1608_v50  ;;  %v1794_v60 = vsel %vm391_vm2, %v1608_v50, 0.0  ;;  %v1890_v61 = vmul.f32 %v1608_v50, %v1608_v50  ;;  %v2462_v62 = vsel %vm391_vm2, %v2276_v51, 0.0  ;;  %v2558_v63 = vmul.f32 %v2276_v51, %v2276_v51 }
  0xd6   :  { %v1795_v1 = vadd.f32 %v1794_v60, %v1793_v33  ;;  %2405 = vst.msk [vmem:[#allocation2 + $0x4e0] sm:$0xff] %vm391_vm2, %v2276_v51  ;;  %v2463_v3 = vadd.f32 %v2462_v62, %v2461_v34  ;;  %v460_v4 = vsel %vm391_vm2, %v275_v56, 0.0  ;;  %v555_v5 = vmul.f32 %v275_v56, %v275_v56  ;;  %3590 = vmatmul.msk.f32.gmra.mxu0 %vm75_vm1, %v49_v54  ;;  %v3838_v33 = vld [vmem:[%s7357_s0 + $0x570] sm:$0xff] }
  0xd7   :  { %v1947_v6 = vsel %vm391_vm2, %v1890_v61, 0.0  ;;  %v2615_v7 = vsel %vm391_vm2, %v2558_v63, 0.0  ;;  %402 = vst.msk [vmem:[#allocation2 + $0x50] sm:$0xff] %vm391_vm2, %v275_v56  ;;  %v461_v8 = vadd.f32 %v460_v4, %v459_v39  ;;  %v1128_v9 = vsel %vm391_vm2, %v943_v57, 0.0  ;;  %3689 = vmatmul.msk.f32.gmra.mxu1 %vm75_vm1, %v3639_v58  ;;  %3788 = vmatmul.msk.f32.gmra.mxu2 %vm75_vm1, %v3738_v59  ;;  %v3641_v59 = vld [vmem:[%s7357_s0 + $0x268] sm:$0xff]  ;;  %v3740_v60 = vld [vmem:[%s7357_s0 + $0x3f0] sm:$0xff] }
  0xd8   :  { %v1948_v10 = vadd.f32 %v1947_v6, %v1946_v41  ;;  %v2616_v11 = vadd.f32 %v2615_v7, %v2614_v42  ;;  %v613_v12 = vsel %vm391_vm2, %v555_v5, 0.0  ;;  %1070 = vst.msk [vmem:[#allocation2 + $0x1d8] sm:$0xff] %vm391_vm2, %v943_v57  ;;  %v1129_v13 = vadd.f32 %v1128_v9, %v1127_v44  ;;  %3887 = vmatmul.msk.f32.gmra.mxu3 %vm75_vm1, %v3837_v0 }
  0xd9   :  { %v614_v14 = vadd.f32 %v613_v12, %v612_v45  ;;  %v1223_v15 = vmul.f32 %v943_v57, %v943_v57 }
  0xda   :  { %v1610_v16 = vpop.f32.mrf.mxu2  ;;  %v2278_v17 = vpop.f32.mrf.mxu3 }
  0xdb   :  { %v1281_v18 = vsel %vm391_vm2, %v1223_v15, 0.0  ;;  %v1611_v19 = vadd.f32 %v4211_v2, %v1610_v16  ;;  %v2279_v20 = vadd.f32 %v4211_v2, %v2278_v17  ;;  %v277_v21 = vpop.f32.mrf.mxu0  ;;  %v945_v22 = vpop.f32.mrf.mxu1 }
  0xdc   :  { %v1282_v24 = vadd.f32 %v1281_v18, %v1280_v55  ;;  %v278_v25 = vadd.f32 %v4211_v2, %v277_v21  ;;  %v946_v26 = vadd.f32 %v4211_v2, %v945_v22  ;;  %v51_v55 = vld [vmem:[%s7357_s0 + $0xe0] sm:$0xff] }
  0xdd   :  { %1738 = vst.msk [vmem:[#allocation2 + $0x360] sm:$0xff] %vm391_vm2, %v1611_v19  ;;  %v1796_v29 = vsel %vm391_vm2, %v1611_v19, 0.0  ;;  %v1891_v30 = vmul.f32 %v1611_v19, %v1611_v19  ;;  %v2464_v31 = vsel %vm391_vm2, %v2279_v20, 0.0  ;;  %v2559_v32 = vmul.f32 %v2279_v20, %v2279_v20 }
  0xde   :  { %v1797_v34 = vadd.f32 %v1796_v29, %v1795_v1  ;;  %2406 = vst.msk [vmem:[#allocation2 + $0x4e8] sm:$0xff] %vm391_vm2, %v2279_v20  ;;  %v2465_v35 = vadd.f32 %v2464_v31, %v2463_v3  ;;  %v462_v36 = vsel %vm391_vm2, %v278_v25, 0.0  ;;  %v556_v37 = vmul.f32 %v278_v25, %v278_v25  ;;  %3591 = vmatmul.msk.f32.gmra.mxu0 %vm75_vm1, %v50_v23  ;;  %v3839_v1 = vld [vmem:[%s7357_s0 + $0x578] sm:$0xff] }
  0xdf   :  { %v1949_v38 = vsel %vm391_vm2, %v1891_v30, 0.0  ;;  %v2617_v39 = vsel %vm391_vm2, %v2559_v32, 0.0  ;;  %403 = vst.msk [vmem:[#allocation2 + $0x58] sm:$0xff] %vm391_vm2, %v278_v25  ;;  %v463_v40 = vadd.f32 %v462_v36, %v461_v8  ;;  %v1130_v41 = vsel %vm391_vm2, %v946_v26, 0.0  ;;  %3690 = vmatmul.msk.f32.gmra.mxu1 %vm75_vm1, %v3640_v27  ;;  %3789 = vmatmul.msk.f32.gmra.mxu2 %vm75_vm1, %v3739_v28  ;;  %v3642_v28 = vld [vmem:[%s7357_s0 + $0x270] sm:$0xff]  ;;  %v3741_v29 = vld [vmem:[%s7357_s0 + $0x3f8] sm:$0xff] }
  0xe0   :  { %v1950_v42 = vadd.f32 %v1949_v38, %v1948_v10  ;;  %v2618_v43 = vadd.f32 %v2617_v39, %v2616_v11  ;;  %v615_v44 = vsel %vm391_vm2, %v556_v37, 0.0  ;;  %1071 = vst.msk [vmem:[#allocation2 + $0x1e0] sm:$0xff] %vm391_vm2, %v946_v26  ;;  %v1131_v45 = vadd.f32 %v1130_v41, %v1129_v13  ;;  %3888 = vmatmul.msk.f32.gmra.mxu3 %vm75_vm1, %v3838_v33 }
  0xe1   :  { %v616_v46 = vadd.f32 %v615_v44, %v614_v14  ;;  %v1224_v47 = vmul.f32 %v946_v26, %v946_v26 }
  0xe2   :  { %v1613_v48 = vpop.f32.mrf.mxu2  ;;  %v2281_v49 = vpop.f32.mrf.mxu3 }
  0xe3   :  { %v1283_v50 = vsel %vm391_vm2, %v1224_v47, 0.0  ;;  %v1614_v51 = vadd.f32 %v4211_v2, %v1613_v48  ;;  %v2282_v52 = vadd.f32 %v4211_v2, %v2281_v49  ;;  %v280_v53 = vpop.f32.mrf.mxu0  ;;  %v948_v54 = vpop.f32.mrf.mxu1 }
  0xe4   :  { %v1284_v56 = vadd.f32 %v1283_v50, %v1282_v24  ;;  %v281_v57 = vadd.f32 %v4211_v2, %v280_v53  ;;  %v949_v58 = vadd.f32 %v4211_v2, %v948_v54  ;;  %v52_v24 = vld [vmem:[%s7357_s0 + $0xe8] sm:$0xff] }
  0xe5   :  { %1739 = vst.msk [vmem:[#allocation2 + $0x368] sm:$0xff] %vm391_vm2, %v1614_v51  ;;  %v1798_v61 = vsel %vm391_vm2, %v1614_v51, 0.0  ;;  %v1892_v62 = vmul.f32 %v1614_v51, %v1614_v51  ;;  %v2466_v63 = vsel %vm391_vm2, %v2282_v52, 0.0  ;;  %v2560_v0 = vmul.f32 %v2282_v52, %v2282_v52  ;;  %v4656_v51 = vld [vmem:[%s7358_s2] ss:$0 sm:$0xff] }
  0xe6   :  { %v1799_v3 = vadd.f32 %v1798_v61, %v1797_v34  ;;  %2407 = vst.msk [vmem:[#allocation2 + $0x4f0] sm:$0xff] %vm391_vm2, %v2282_v52  ;;  %v2467_v4 = vadd.f32 %v2466_v63, %v2465_v35  ;;  %v464_v5 = vsel %vm391_vm2, %v281_v57, 0.0  ;;  %v557_v6 = vmul.f32 %v281_v57, %v281_v57  ;;  %3592 = vmatmul.msk.f32.gmra.mxu0 %vm75_vm1, %v51_v55  ;;  %v3742_v61 = vld [vmem:[%s7357_s0 + $0x400] sm:$0xff] }
  0xe7   :  { %v1951_v7 = vsel %vm391_vm2, %v1892_v62, 0.0  ;;  %v2619_v8 = vsel %vm391_vm2, %v2560_v0, 0.0  ;;  %404 = vst.msk [vmem:[#allocation2 + $0x60] sm:$0xff] %vm391_vm2, %v281_v57  ;;  %v465_v9 = vadd.f32 %v464_v5, %v463_v40  ;;  %v1132_v10 = vsel %vm391_vm2, %v949_v58, 0.0  ;;  %3691 = vmatmul.msk.f32.gmra.mxu1 %vm75_vm1, %v3641_v59  ;;  %3790 = vmatmul.msk.f32.gmra.mxu2 %vm75_vm1, %v3740_v60  ;;  %v3643_v60 = vld [vmem:[%s7357_s0 + $0x278] sm:$0xff] }
  0xe8   :  { %v1952_v11 = vadd.f32 %v1951_v7, %v1950_v42  ;;  %v2620_v12 = vadd.f32 %v2619_v8, %v2618_v43  ;;  %v617_v13 = vsel %vm391_vm2, %v557_v6, 0.0  ;;  %1072 = vst.msk [vmem:[#allocation2 + $0x1e8] sm:$0xff] %vm391_vm2, %v949_v58  ;;  %v1133_v14 = vadd.f32 %v1132_v10, %v1131_v45  ;;  %3889 = vmatmul.msk.f32.gmra.mxu3 %vm75_vm1, %v3839_v1 }
  0xe9   :  { %v618_v15 = vadd.f32 %v617_v13, %v616_v46  ;;  %v1225_v16 = vmul.f32 %v949_v58, %v949_v58 }
  0xea   :  { %v1616_v17 = vpop.f32.mrf.mxu2  ;;  %v2284_v18 = vpop.f32.mrf.mxu3 }
  0xeb   :  { %v1285_v19 = vsel %vm391_vm2, %v1225_v16, 0.0  ;;  %v1617_v20 = vadd.f32 %v4211_v2, %v1616_v17  ;;  %v2285_v21 = vadd.f32 %v4211_v2, %v2284_v18  ;;  %v283_v22 = vpop.f32.mrf.mxu0  ;;  %v951_v23 = vpop.f32.mrf.mxu1 }
  0xec   :  { %v1286_v25 = vadd.f32 %v1285_v19, %v1284_v56  ;;  %v284_v26 = vadd.f32 %v4211_v2, %v283_v22  ;;  %v952_v27 = vadd.f32 %v4211_v2, %v951_v23  ;;  %v3840_v2 = vld [vmem:[%s7357_s0 + $0x580] sm:$0xff]  ;;  %v53_v56 = vld [vmem:[%s7357_s0 + $0xf0] sm:$0xff] }
  0xed   :  { %1740 = vst.msk [vmem:[#allocation2 + $0x370] sm:$0xff] %vm391_vm2, %v1617_v20  ;;  %v1800_v30 = vsel %vm391_vm2, %v1617_v20, 0.0  ;;  %v1893_v31 = vmul.f32 %v1617_v20, %v1617_v20  ;;  %v2468_v32 = vsel %vm391_vm2, %v2285_v21, 0.0  ;;  %v2561_v33 = vmul.f32 %v2285_v21, %v2285_v21 }
  0xee   :  { %v1801_v34 = vadd.f32 %v1800_v30, %v1799_v3  ;;  %2408 = vst.msk [vmem:[#allocation2 + $0x4f8] sm:$0xff] %vm391_vm2, %v2285_v21  ;;  %v2469_v35 = vadd.f32 %v2468_v32, %v2467_v4  ;;  %v466_v36 = vsel %vm391_vm2, %v284_v26, 0.0  ;;  %v558_v37 = vmul.f32 %v284_v26, %v284_v26  ;;  %3593 = vmatmul.msk.f32.gmra.mxu0 %vm75_vm1, %v52_v24  ;;  %v3841_v3 = vld [vmem:[%s7357_s0 + $0x588] sm:$0xff] }
  0xef   :  { %v1953_v38 = vsel %vm391_vm2, %v1893_v31, 0.0  ;;  %v2621_v39 = vsel %vm391_vm2, %v2561_v33, 0.0  ;;  %405 = vst.msk [vmem:[#allocation2 + $0x68] sm:$0xff] %vm391_vm2, %v284_v26  ;;  %v467_v40 = vadd.f32 %v466_v36, %v465_v9  ;;  %v1134_v41 = vsel %vm391_vm2, %v952_v27, 0.0  ;;  %3692 = vmatmul.msk.f32.gmra.mxu1 %vm75_vm1, %v3642_v28  ;;  %3791 = vmatmul.msk.f32.gmra.mxu2 %vm75_vm1, %v3741_v29  ;;  %v3644_v29 = vld [vmem:[%s7357_s0 + $0x280] sm:$0xff]  ;;  %v3743_v30 = vld [vmem:[%s7357_s0 + $0x408] sm:$0xff] }
  0xf0   :  { %v1954_v42 = vadd.f32 %v1953_v38, %v1952_v11  ;;  %v2622_v43 = vadd.f32 %v2621_v39, %v2620_v12  ;;  %v619_v44 = vsel %vm391_vm2, %v558_v37, 0.0  ;;  %1073 = vst.msk [vmem:[#allocation2 + $0x1f0] sm:$0xff] %vm391_vm2, %v952_v27  ;;  %v1135_v45 = vadd.f32 %v1134_v41, %v1133_v14  ;;  %3890 = vmatmul.msk.f32.gmra.mxu3 %vm75_vm1, %v3840_v2 }
  0xf1   :  { %v620_v46 = vadd.f32 %v619_v44, %v618_v15  ;;  %v1226_v47 = vmul.f32 %v952_v27, %v952_v27 }
  0xf2   :  { %v1619_v48 = vpop.f32.mrf.mxu2  ;;  %v2287_v49 = vpop.f32.mrf.mxu3 }
  0xf3   :  { %v1287_v50 = vsel %vm391_vm2, %v1226_v47, 0.0  ;;  %v1620_v52 = vadd.f32 %v4656_v51, %v1619_v48  ;;  %v2288_v53 = vadd.f32 %v4656_v51, %v2287_v49  ;;  %v286_v54 = vpop.f32.mrf.mxu0  ;;  %v954_v55 = vpop.f32.mrf.mxu1 }
  0xf4   :  { %v1288_v57 = vadd.f32 %v1287_v50, %v1286_v25  ;;  %v287_v58 = vadd.f32 %v4656_v51, %v286_v54  ;;  %v955_v59 = vadd.f32 %v4656_v51, %v954_v55  ;;  %v54_v25 = vld [vmem:[%s7357_s0 + $0xf8] sm:$0xff] }
  0xf5   :  { %1741 = vst.msk [vmem:[#allocation2 + $0x378] sm:$0xff] %vm391_vm2, %v1620_v52  ;;  %v1802_v62 = vsel %vm391_vm2, %v1620_v52, 0.0  ;;  %v1894_v63 = vmul.f32 %v1620_v52, %v1620_v52  ;;  %v2470_v0 = vsel %vm391_vm2, %v2288_v53, 0.0  ;;  %v2562_v1 = vmul.f32 %v2288_v53, %v2288_v53 }
  0xf6   :  { %v1803_v4 = vadd.f32 %v1802_v62, %v1801_v34  ;;  %2409 = vst.msk [vmem:[#allocation2 + $0x500] sm:$0xff] %vm391_vm2, %v2288_v53  ;;  %v2471_v5 = vadd.f32 %v2470_v0, %v2469_v35  ;;  %v468_v6 = vsel %vm391_vm2, %v287_v58, 0.0  ;;  %v559_v7 = vmul.f32 %v287_v58, %v287_v58  ;;  %3594 = vmatmul.msk.f32.gmra.mxu0 %vm75_vm1, %v53_v56  ;;  %v3842_v34 = vld [vmem:[%s7357_s0 + $0x590] sm:$0xff] }
  0xf7   :  { %v1955_v8 = vsel %vm391_vm2, %v1894_v63, 0.0  ;;  %v2623_v9 = vsel %vm391_vm2, %v2562_v1, 0.0  ;;  %406 = vst.msk [vmem:[#allocation2 + $0x70] sm:$0xff] %vm391_vm2, %v287_v58  ;;  %v469_v10 = vadd.f32 %v468_v6, %v467_v40  ;;  %v1136_v11 = vsel %vm391_vm2, %v955_v59, 0.0  ;;  %3693 = vmatmul.msk.f32.gmra.mxu1 %vm75_vm1, %v3643_v60  ;;  %3792 = vmatmul.msk.f32.gmra.mxu2 %vm75_vm1, %v3742_v61  ;;  %v3645_v61 = vld [vmem:[%s7357_s0 + $0x288] sm:$0xff]  ;;  %v3744_v62 = vld [vmem:[%s7357_s0 + $0x410] sm:$0xff] }
  0xf8   :  { %v1956_v12 = vadd.f32 %v1955_v8, %v1954_v42  ;;  %v2624_v13 = vadd.f32 %v2623_v9, %v2622_v43  ;;  %v621_v14 = vsel %vm391_vm2, %v559_v7, 0.0  ;;  %1074 = vst.msk [vmem:[#allocation2 + $0x1f8] sm:$0xff] %vm391_vm2, %v955_v59  ;;  %v1137_v15 = vadd.f32 %v1136_v11, %v1135_v45  ;;  %3891 = vmatmul.msk.f32.gmra.mxu3 %vm75_vm1, %v3841_v3 }
  0xf9   :  { %v622_v16 = vadd.f32 %v621_v14, %v620_v46  ;;  %v1227_v17 = vmul.f32 %v955_v59, %v955_v59 }
  0xfa   :  { %v1622_v18 = vpop.f32.mrf.mxu2  ;;  %v2290_v19 = vpop.f32.mrf.mxu3 }
  0xfb   :  { %v1289_v20 = vsel %vm391_vm2, %v1227_v17, 0.0  ;;  %v1623_v21 = vadd.f32 %v4656_v51, %v1622_v18  ;;  %v2291_v22 = vadd.f32 %v4656_v51, %v2290_v19  ;;  %v289_v23 = vpop.f32.mrf.mxu0  ;;  %v957_v24 = vpop.f32.mrf.mxu1 }
  0xfc   :  { %v1290_v26 = vadd.f32 %v1289_v20, %v1288_v57  ;;  %v290_v27 = vadd.f32 %v4656_v51, %v289_v23  ;;  %v958_v28 = vadd.f32 %v4656_v51, %v957_v24  ;;  %v55_v57 = vld [vmem:[%s7357_s0 + $0x100] sm:$0xff] }
  0xfd   :  { %1742 = vst.msk [vmem:[#allocation2 + $0x380] sm:$0xff] %vm391_vm2, %v1623_v21  ;;  %v1804_v31 = vsel %vm391_vm2, %v1623_v21, 0.0  ;;  %v1895_v32 = vmul.f32 %v1623_v21, %v1623_v21  ;;  %v2472_v33 = vsel %vm391_vm2, %v2291_v22, 0.0  ;;  %v2563_v2 = vmul.f32 %v2291_v22, %v2291_v22 }
  0xfe   :  { %v1805_v35 = vadd.f32 %v1804_v31, %v1803_v4  ;;  %2410 = vst.msk [vmem:[#allocation2 + $0x508] sm:$0xff] %vm391_vm2, %v2291_v22  ;;  %v2473_v36 = vadd.f32 %v2472_v33, %v2471_v5  ;;  %v470_v37 = vsel %vm391_vm2, %v290_v27, 0.0  ;;  %v560_v38 = vmul.f32 %v290_v27, %v290_v27  ;;  %3595 = vmatmul.msk.f32.gmra.mxu0 %vm75_vm1, %v54_v25  ;;  %v3843_v4 = vld [vmem:[%s7357_s0 + $0x598] sm:$0xff] }
  0xff   :  { %v1957_v39 = vsel %vm391_vm2, %v1895_v32, 0.0  ;;  %v2625_v40 = vsel %vm391_vm2, %v2563_v2, 0.0  ;;  %407 = vst.msk [vmem:[#allocation2 + $0x78] sm:$0xff] %vm391_vm2, %v290_v27  ;;  %v471_v41 = vadd.f32 %v470_v37, %v469_v10  ;;  %v1138_v42 = vsel %vm391_vm2, %v958_v28, 0.0  ;;  %3694 = vmatmul.msk.f32.gmra.mxu1 %vm75_vm1, %v3644_v29  ;;  %3793 = vmatmul.msk.f32.gmra.mxu2 %vm75_vm1, %v3743_v30  ;;  %v3646_v30 = vld [vmem:[%s7357_s0 + $0x290] sm:$0xff]  ;;  %v3745_v31 = vld [vmem:[%s7357_s0 + $0x418] sm:$0xff] }
 0x100   :  { %v1958_v43 = vadd.f32 %v1957_v39, %v1956_v12  ;;  %v2626_v44 = vadd.f32 %v2625_v40, %v2624_v13  ;;  %v623_v45 = vsel %vm391_vm2, %v560_v38, 0.0  ;;  %1075 = vst.msk [vmem:[#allocation2 + $0x200] sm:$0xff] %vm391_vm2, %v958_v28  ;;  %v1139_v46 = vadd.f32 %v1138_v42, %v1137_v15  ;;  %3892 = vmatmul.msk.f32.gmra.mxu3 %vm75_vm1, %v3842_v34 }
 0x101   :  { %v624_v47 = vadd.f32 %v623_v45, %v622_v16  ;;  %v1228_v48 = vmul.f32 %v958_v28, %v958_v28 }
 0x102   :  { %v1625_v49 = vpop.f32.mrf.mxu2  ;;  %v2293_v50 = vpop.f32.mrf.mxu3 }
 0x103   :  { %v1291_v52 = vsel %vm391_vm2, %v1228_v48, 0.0  ;;  %v1626_v53 = vadd.f32 %v4656_v51, %v1625_v49  ;;  %v2294_v54 = vadd.f32 %v4656_v51, %v2293_v50  ;;  %v292_v55 = vpop.f32.mrf.mxu0  ;;  %v960_v56 = vpop.f32.mrf.mxu1 }
 0x104   :  { %v1292_v58 = vadd.f32 %v1291_v52, %v1290_v26  ;;  %v293_v59 = vadd.f32 %v4656_v51, %v292_v55  ;;  %v961_v60 = vadd.f32 %v4656_v51, %v960_v56  ;;  %v56_v26 = vld [vmem:[%s7357_s0 + $0x108] sm:$0xff] }
 0x105   :  { %1743 = vst.msk [vmem:[#allocation2 + $0x388] sm:$0xff] %vm391_vm2, %v1626_v53  ;;  %v1806_v63 = vsel %vm391_vm2, %v1626_v53, 0.0  ;;  %v1896_v0 = vmul.f32 %v1626_v53, %v1626_v53  ;;  %v2474_v1 = vsel %vm391_vm2, %v2294_v54, 0.0  ;;  %v2564_v3 = vmul.f32 %v2294_v54, %v2294_v54 }
 0x106   :  { %v1807_v5 = vadd.f32 %v1806_v63, %v1805_v35  ;;  %2411 = vst.msk [vmem:[#allocation2 + $0x510] sm:$0xff] %vm391_vm2, %v2294_v54  ;;  %v2475_v6 = vadd.f32 %v2474_v1, %v2473_v36  ;;  %v472_v7 = vsel %vm391_vm2, %v293_v59, 0.0  ;;  %v561_v8 = vmul.f32 %v293_v59, %v293_v59  ;;  %3596 = vmatmul.msk.f32.gmra.mxu0 %vm75_vm1, %v55_v57  ;;  %v3844_v35 = vld [vmem:[%s7357_s0 + $0x5a0] sm:$0xff]  ;;  %v57_v57 = vld [vmem:[%s7357_s0 + $0x110] sm:$0xff] }
 0x107   :  { %v1959_v9 = vsel %vm391_vm2, %v1896_v0, 0.0  ;;  %v2627_v10 = vsel %vm391_vm2, %v2564_v3, 0.0  ;;  %408 = vst.msk [vmem:[#allocation2 + $0x80] sm:$0xff] %vm391_vm2, %v293_v59  ;;  %v473_v11 = vadd.f32 %v472_v7, %v471_v41  ;;  %v1140_v12 = vsel %vm391_vm2, %v961_v60, 0.0  ;;  %3695 = vmatmul.msk.f32.gmra.mxu1 %vm75_vm1, %v3645_v61  ;;  %3794 = vmatmul.msk.f32.gmra.mxu2 %vm75_vm1, %v3744_v62  ;;  %v3647_v61 = vld [vmem:[%s7357_s0 + $0x298] sm:$0xff]  ;;  %v3746_v62 = vld [vmem:[%s7357_s0 + $0x420] sm:$0xff] }
 0x108   :  { %v1960_v13 = vadd.f32 %v1959_v9, %v1958_v43  ;;  %v2628_v14 = vadd.f32 %v2627_v10, %v2626_v44  ;;  %v625_v15 = vsel %vm391_vm2, %v561_v8, 0.0  ;;  %1076 = vst.msk [vmem:[#allocation2 + $0x208] sm:$0xff] %vm391_vm2, %v961_v60  ;;  %v1141_v16 = vadd.f32 %v1140_v12, %v1139_v46  ;;  %3893 = vmatmul.msk.f32.gmra.mxu3 %vm75_vm1, %v3843_v4  ;;  %v3845_v4 = vld [vmem:[%s7357_s0 + $0x5a8] sm:$0xff] }
 0x109   :  { %v626_v17 = vadd.f32 %v625_v15, %v624_v47  ;;  %v1229_v18 = vmul.f32 %v961_v60, %v961_v60 }
 0x10a   :  { %v1628_v19 = vpop.f32.mrf.mxu2  ;;  %v2296_v20 = vpop.f32.mrf.mxu3 }
 0x10b   :  { %v1293_v21 = vsel %vm391_vm2, %v1229_v18, 0.0  ;;  %v1629_v22 = vadd.f32 %v4656_v51, %v1628_v19  ;;  %v2297_v23 = vadd.f32 %v4656_v51, %v2296_v20  ;;  %v295_v24 = vpop.f32.mrf.mxu0  ;;  %v963_v25 = vpop.f32.mrf.mxu1 }
 0x10c   :  { %v1294_v27 = vadd.f32 %v1293_v21, %v1292_v58  ;;  %v296_v28 = vadd.f32 %v4656_v51, %v295_v24  ;;  %v964_v29 = vadd.f32 %v4656_v51, %v963_v25  ;;  %v58_v25 = vld [vmem:[%s7357_s0 + $0x118] sm:$0xff] }
 0x10d   :  { %1744 = vst.msk [vmem:[#allocation2 + $0x390] sm:$0xff] %vm391_vm2, %v1629_v22  ;;  %v1808_v32 = vsel %vm391_vm2, %v1629_v22, 0.0  ;;  %v1897_v33 = vmul.f32 %v1629_v22, %v1629_v22  ;;  %v2476_v2 = vsel %vm391_vm2, %v2297_v23, 0.0  ;;  %v2565_v34 = vmul.f32 %v2297_v23, %v2297_v23 }
 0x10e   :  { %v1809_v36 = vadd.f32 %v1808_v32, %v1807_v5  ;;  %2412 = vst.msk [vmem:[#allocation2 + $0x518] sm:$0xff] %vm391_vm2, %v2297_v23  ;;  %v2477_v37 = vadd.f32 %v2476_v2, %v2475_v6  ;;  %v474_v38 = vsel %vm391_vm2, %v296_v28, 0.0  ;;  %v562_v39 = vmul.f32 %v296_v28, %v296_v28  ;;  %3597 = vmatmul.msk.f32.gmra.mxu0 %vm75_vm1, %v56_v26  ;;  %v3747_v2 = vld [vmem:[%s7357_s0 + $0x428] sm:$0xff] }
 0x10f   :  { %v1961_v40 = vsel %vm391_vm2, %v1897_v33, 0.0  ;;  %v2629_v41 = vsel %vm391_vm2, %v2565_v34, 0.0  ;;  %409 = vst.msk [vmem:[#allocation2 + $0x88] sm:$0xff] %vm391_vm2, %v296_v28  ;;  %v475_v42 = vadd.f32 %v474_v38, %v473_v11  ;;  %v1142_v43 = vsel %vm391_vm2, %v964_v29, 0.0  ;;  %3696 = vmatmul.msk.f32.gmra.mxu1 %vm75_vm1, %v3646_v30  ;;  %3795 = vmatmul.msk.f32.gmra.mxu2 %vm75_vm1, %v3745_v31  ;;  %v3648_v30 = vld [vmem:[%s7357_s0 + $0x2a0] sm:$0xff]  ;;  %v3846_v34 = vld [vmem:[%s7357_s0 + $0x5b0] sm:$0xff] }
 0x110   :  { %v1962_v44 = vadd.f32 %v1961_v40, %v1960_v13  ;;  %v2630_v45 = vadd.f32 %v2629_v41, %v2628_v14  ;;  %v627_v46 = vsel %vm391_vm2, %v562_v39, 0.0  ;;  %1077 = vst.msk [vmem:[#allocation2 + $0x210] sm:$0xff] %vm391_vm2, %v964_v29  ;;  %v1143_v47 = vadd.f32 %v1142_v43, %v1141_v16  ;;  %3894 = vmatmul.msk.f32.gmra.mxu3 %vm75_vm1, %v3844_v35 }
 0x111   :  { %v628_v48 = vadd.f32 %v627_v46, %v626_v17  ;;  %v1230_v49 = vmul.f32 %v964_v29, %v964_v29 }
 0x112   :  { %v1631_v50 = vpop.f32.mrf.mxu2  ;;  %v2299_v52 = vpop.f32.mrf.mxu3 }
 0x113   :  { %v1295_v53 = vsel %vm391_vm2, %v1230_v49, 0.0  ;;  %v1632_v54 = vadd.f32 %v4656_v51, %v1631_v50  ;;  %v2300_v55 = vadd.f32 %v4656_v51, %v2299_v52  ;;  %v298_v56 = vpop.f32.mrf.mxu0 }
 0x114   :  { %v1296_v58 = vadd.f32 %v1295_v53, %v1294_v27  ;;  %v299_v59 = vadd.f32 %v4656_v51, %v298_v56  ;;  %v966_v60 = vpop.f32.mrf.mxu1 }
 0x115   :  { %1745 = vst.msk [vmem:[#allocation2 + $0x398] sm:$0xff] %vm391_vm2, %v1632_v54  ;;  %v1810_v63 = vsel %vm391_vm2, %v1632_v54, 0.0  ;;  %v1898_v0 = vmul.f32 %v1632_v54, %v1632_v54  ;;  %v2478_v1 = vsel %vm391_vm2, %v2300_v55, 0.0  ;;  %v2566_v3 = vmul.f32 %v2300_v55, %v2300_v55 }
 0x116   :  { %v1811_v5 = vadd.f32 %v1810_v63, %v1809_v36  ;;  %2413 = vst.msk [vmem:[#allocation2 + $0x520] sm:$0xff] %vm391_vm2, %v2300_v55  ;;  %v2479_v6 = vadd.f32 %v2478_v1, %v2477_v37  ;;  %v476_v7 = vsel %vm391_vm2, %v299_v59, 0.0  ;;  %v563_v8 = vmul.f32 %v299_v59, %v299_v59  ;;  %3598 = vmatmul.msk.f32.gmra.mxu0 %vm75_vm1, %v57_v57 }
 0x117   :  { %v1963_v9 = vsel %vm391_vm2, %v1898_v0, 0.0  ;;  %v2631_v10 = vsel %vm391_vm2, %v2566_v3, 0.0  ;;  %410 = vst.msk [vmem:[#allocation2 + $0x90] sm:$0xff] %vm391_vm2, %v299_v59  ;;  %v477_v11 = vadd.f32 %v476_v7, %v475_v42  ;;  %v967_v12 = vadd.f32 %v4656_v51, %v966_v60  ;;  %3697 = vmatmul.msk.f32.gmra.mxu1 %vm75_vm1, %v3647_v61  ;;  %3796 = vmatmul.msk.f32.gmra.mxu2 %vm75_vm1, %v3746_v62  ;;  %v3649_v62 = vld [vmem:[%s7357_s0 + $0x2a8] sm:$0xff]  ;;  %v3748_v3 = vld [vmem:[%s7357_s0 + $0x430] sm:$0xff] }
 0x118   :  { %v1964_v13 = vadd.f32 %v1963_v9, %v1962_v44  ;;  %v2632_v14 = vadd.f32 %v2631_v10, %v2630_v45  ;;  %v629_v15 = vsel %vm391_vm2, %v563_v8, 0.0  ;;  %3895 = vmatmul.msk.f32.gmra.mxu3 %vm75_vm1, %v3845_v4  ;;  %v3847_v4 = vld [vmem:[%s7357_s0 + $0x5b8] sm:$0xff] }
 0x119   :  { %v630_v16 = vadd.f32 %v629_v15, %v628_v48  ;;  %1078 = vst.msk [vmem:[#allocation2 + $0x218] sm:$0xff] %vm391_vm2, %v967_v12  ;;  %v1144_v17 = vsel %vm391_vm2, %v967_v12, 0.0  ;;  %v1231_v18 = vmul.f32 %v967_v12, %v967_v12 }
 0x11a   :  { %v1145_v19 = vadd.f32 %v1144_v17, %v1143_v47  ;;  %v1634_v20 = vpop.f32.mrf.mxu2 }
 0x11b   :  { %v1297_v21 = vsel %vm391_vm2, %v1231_v18, 0.0  ;;  %v1635_v22 = vadd.f32 %v4656_v51, %v1634_v20  ;;  %v2302_v23 = vpop.f32.mrf.mxu3  ;;  %v301_v24 = vpop.f32.mrf.mxu0 }
 0x11c   :  { %v1298_v26 = vadd.f32 %v1297_v21, %v1296_v58  ;;  %v2303_v27 = vadd.f32 %v4656_v51, %v2302_v23  ;;  %v302_v28 = vadd.f32 %v4656_v51, %v301_v24  ;;  %v969_v29 = vpop.f32.mrf.mxu1  ;;  %v59_v58 = vld [vmem:[%s7357_s0 + $0x120] sm:$0xff] }
 0x11d   :  { %1746 = vst.msk [vmem:[#allocation2 + $0x3a0] sm:$0xff] %vm391_vm2, %v1635_v22  ;;  %v1812_v31 = vsel %vm391_vm2, %v1635_v22, 0.0  ;;  %v1899_v32 = vmul.f32 %v1635_v22, %v1635_v22  ;;  %v970_v33 = vadd.f32 %v4656_v51, %v969_v29 }
 0x11e   :  { %v1813_v35 = vadd.f32 %v1812_v31, %v1811_v5  ;;  %2414 = vst.msk [vmem:[#allocation2 + $0x528] sm:$0xff] %vm391_vm2, %v2303_v27  ;;  %v2480_v36 = vsel %vm391_vm2, %v2303_v27, 0.0  ;;  %v2567_v37 = vmul.f32 %v2303_v27, %v2303_v27  ;;  %v478_v38 = vsel %vm391_vm2, %v302_v28, 0.0  ;;  %3599 = vmatmul.msk.f32.gmra.mxu0 %vm75_vm1, %v58_v25  ;;  %v60_v27 = vld [vmem:[%s7357_s0 + $0x128] sm:$0xff]  ;;  %v3650_v31 = vld [vmem:[%s7357_s0 + $0x2b0] sm:$0xff] }
 0x11f   :  { %v1965_v39 = vsel %vm391_vm2, %v1899_v32, 0.0  ;;  %v2481_v40 = vadd.f32 %v2480_v36, %v2479_v6  ;;  %411 = vst.msk [vmem:[#allocation2 + $0x98] sm:$0xff] %vm391_vm2, %v302_v28  ;;  %v479_v41 = vadd.f32 %v478_v38, %v477_v11  ;;  %v564_v42 = vmul.f32 %v302_v28, %v302_v28  ;;  %3698 = vmatmul.msk.f32.gmra.mxu1 %vm75_vm1, %v3648_v30 }
 0x120   :  { %v1966_v43 = vadd.f32 %v1965_v39, %v1964_v13  ;;  %v2633_v44 = vsel %vm391_vm2, %v2567_v37, 0.0  ;;  %1079 = vst.msk [vmem:[#allocation2 + $0x220] sm:$0xff] %vm391_vm2, %v970_v33  ;;  %v1146_v45 = vsel %vm391_vm2, %v970_v33, 0.0  ;;  %v1232_v46 = vmul.f32 %v970_v33, %v970_v33  ;;  %3797 = vmatmul.msk.f32.gmra.mxu2 %vm75_vm1, %v3747_v2  ;;  %3896 = vmatmul.msk.f32.gmra.mxu3 %vm75_vm1, %v3846_v34  ;;  %v3749_v34 = vld [vmem:[%s7357_s0 + $0x438] sm:$0xff] }
 0x121   :  { %v2634_v47 = vadd.f32 %v2633_v44, %v2632_v14  ;;  %v631_v48 = vsel %vm391_vm2, %v564_v42, 0.0  ;;  %v1147_v49 = vadd.f32 %v1146_v45, %v1145_v19 }
 0x122   :  { %v632_v50 = vadd.f32 %v631_v48, %v630_v16  ;;  %v1299_v52 = vsel %vm391_vm2, %v1232_v46, 0.0  ;;  %v1637_v53 = vpop.f32.mrf.mxu2 }
 0x123   :  { %v1300_v54 = vadd.f32 %v1299_v52, %v1298_v26  ;;  %v1638_v55 = vadd.f32 %v4656_v51, %v1637_v53  ;;  %v2305_v56 = vpop.f32.mrf.mxu3  ;;  %v304_v57 = vpop.f32.mrf.mxu0 }
 0x124   :  { %v2306_v59 = vadd.f32 %v4656_v51, %v2305_v56  ;;  %v305_v60 = vadd.f32 %v4656_v51, %v304_v57  ;;  %v972_v61 = vpop.f32.mrf.mxu1 }
 0x125   :  { %1747 = vst.msk [vmem:[#allocation2 + $0x3a8] sm:$0xff] %vm391_vm2, %v1638_v55  ;;  %v1814_v63 = vsel %vm391_vm2, %v1638_v55, 0.0  ;;  %v1900_v0 = vmul.f32 %v1638_v55, %v1638_v55  ;;  %v973_v1 = vadd.f32 %v4656_v51, %v972_v61 }
 0x126   :  { %v1815_v5 = vadd.f32 %v1814_v63, %v1813_v35  ;;  %2415 = vst.msk [vmem:[#allocation2 + $0x530] sm:$0xff] %vm391_vm2, %v2306_v59  ;;  %v2482_v6 = vsel %vm391_vm2, %v2306_v59, 0.0  ;;  %v2568_v7 = vmul.f32 %v2306_v59, %v2306_v59  ;;  %v480_v8 = vsel %vm391_vm2, %v305_v60, 0.0  ;;  %3600 = vmatmul.msk.f32.gmra.mxu0 %vm75_vm1, %v59_v58  ;;  %v3848_v35 = vld [vmem:[%s7357_s0 + $0x5c0] sm:$0xff]  ;;  %v61_v59 = vld [vmem:[%s7357_s0 + $0x130] sm:$0xff]  ;;  %v3651_v63 = vld [vmem:[%s7357_s0 + $0x2b8] sm:$0xff] }
 0x127   :  { %v1967_v9 = vsel %vm391_vm2, %v1900_v0, 0.0  ;;  %v2483_v10 = vadd.f32 %v2482_v6, %v2481_v40  ;;  %412 = vst.msk [vmem:[#allocation2 + $0xa0] sm:$0xff] %vm391_vm2, %v305_v60  ;;  %v481_v11 = vadd.f32 %v480_v8, %v479_v41  ;;  %v565_v12 = vmul.f32 %v305_v60, %v305_v60  ;;  %3699 = vmatmul.msk.f32.gmra.mxu1 %vm75_vm1, %v3649_v62 }
 0x128   :  { %v1968_v13 = vadd.f32 %v1967_v9, %v1966_v43  ;;  %v2635_v14 = vsel %vm391_vm2, %v2568_v7, 0.0  ;;  %1080 = vst.msk [vmem:[#allocation2 + $0x228] sm:$0xff] %vm391_vm2, %v973_v1  ;;  %v1148_v15 = vsel %vm391_vm2, %v973_v1, 0.0  ;;  %v1233_v16 = vmul.f32 %v973_v1, %v973_v1  ;;  %3798 = vmatmul.msk.f32.gmra.mxu2 %vm75_vm1, %v3748_v3  ;;  %3897 = vmatmul.msk.f32.gmra.mxu3 %vm75_vm1, %v3847_v4  ;;  %v3750_v4 = vld [vmem:[%s7357_s0 + $0x440] sm:$0xff] }
 0x129   :  { %v2636_v17 = vadd.f32 %v2635_v14, %v2634_v47  ;;  %v633_v18 = vsel %vm391_vm2, %v565_v12, 0.0  ;;  %v1149_v19 = vadd.f32 %v1148_v15, %v1147_v49 }
 0x12a   :  { %v634_v20 = vadd.f32 %v633_v18, %v632_v50  ;;  %v1301_v21 = vsel %vm391_vm2, %v1233_v16, 0.0  ;;  %v1640_v22 = vpop.f32.mrf.mxu2 }
 0x12b   :  { %v1302_v23 = vadd.f32 %v1301_v21, %v1300_v54  ;;  %v1641_v24 = vadd.f32 %v4656_v51, %v1640_v22  ;;  %v2308_v25 = vpop.f32.mrf.mxu3  ;;  %v307_v26 = vpop.f32.mrf.mxu0 }
 0x12c   :  { %v2309_v28 = vadd.f32 %v4656_v51, %v2308_v25  ;;  %v308_v29 = vadd.f32 %v4656_v51, %v307_v26  ;;  %v975_v30 = vpop.f32.mrf.mxu1 }
 0x12d   :  { %1748 = vst.msk [vmem:[#allocation2 + $0x3b0] sm:$0xff] %vm391_vm2, %v1641_v24  ;;  %v1816_v32 = vsel %vm391_vm2, %v1641_v24, 0.0  ;;  %v1901_v33 = vmul.f32 %v1641_v24, %v1641_v24  ;;  %v976_v2 = vadd.f32 %v4656_v51, %v975_v30 }
 0x12e   :  { %v1817_v36 = vadd.f32 %v1816_v32, %v1815_v5  ;;  %2416 = vst.msk [vmem:[#allocation2 + $0x538] sm:$0xff] %vm391_vm2, %v2309_v28  ;;  %v2484_v37 = vsel %vm391_vm2, %v2309_v28, 0.0  ;;  %v2569_v38 = vmul.f32 %v2309_v28, %v2309_v28  ;;  %v482_v39 = vsel %vm391_vm2, %v308_v29, 0.0  ;;  %3601 = vmatmul.msk.f32.gmra.mxu0 %vm75_vm1, %v60_v27  ;;  %v3849_v5 = vld [vmem:[%s7357_s0 + $0x5c8] sm:$0xff]  ;;  %v62_v28 = vld [vmem:[%s7357_s0 + $0x138] sm:$0xff]  ;;  %v3652_v32 = vld [vmem:[%s7357_s0 + $0x2c0] sm:$0xff] }
 0x12f   :  { %v1969_v40 = vsel %vm391_vm2, %v1901_v33, 0.0  ;;  %v2485_v41 = vadd.f32 %v2484_v37, %v2483_v10  ;;  %413 = vst.msk [vmem:[#allocation2 + $0xa8] sm:$0xff] %vm391_vm2, %v308_v29  ;;  %v483_v42 = vadd.f32 %v482_v39, %v481_v11  ;;  %v566_v43 = vmul.f32 %v308_v29, %v308_v29  ;;  %3700 = vmatmul.msk.f32.gmra.mxu1 %vm75_vm1, %v3650_v31 }
 0x130   :  { %v1970_v44 = vadd.f32 %v1969_v40, %v1968_v13  ;;  %v2637_v45 = vsel %vm391_vm2, %v2569_v38, 0.0  ;;  %1081 = vst.msk [vmem:[#allocation2 + $0x230] sm:$0xff] %vm391_vm2, %v976_v2  ;;  %v1150_v46 = vsel %vm391_vm2, %v976_v2, 0.0  ;;  %v1234_v47 = vmul.f32 %v976_v2, %v976_v2  ;;  %3799 = vmatmul.msk.f32.gmra.mxu2 %vm75_vm1, %v3749_v34  ;;  %3898 = vmatmul.msk.f32.gmra.mxu3 %vm75_vm1, %v3848_v35  ;;  %v3751_v35 = vld [vmem:[%s7357_s0 + $0x448] sm:$0xff] }
 0x131   :  { %v2638_v48 = vadd.f32 %v2637_v45, %v2636_v17  ;;  %v635_v49 = vsel %vm391_vm2, %v566_v43, 0.0  ;;  %v1151_v50 = vadd.f32 %v1150_v46, %v1149_v19 }
 0x132   :  { %v636_v52 = vadd.f32 %v635_v49, %v634_v20  ;;  %v1303_v53 = vsel %vm391_vm2, %v1234_v47, 0.0  ;;  %v1643_v54 = vpop.f32.mrf.mxu2 }
 0x133   :  { %v1304_v55 = vadd.f32 %v1303_v53, %v1302_v23  ;;  %v1644_v56 = vadd.f32 %v4656_v51, %v1643_v54  ;;  %v2311_v57 = vpop.f32.mrf.mxu3  ;;  %v310_v58 = vpop.f32.mrf.mxu0 }
 0x134   :  { %v2312_v60 = vadd.f32 %v4656_v51, %v2311_v57  ;;  %v311_v61 = vadd.f32 %v4656_v51, %v310_v58  ;;  %v978_v62 = vpop.f32.mrf.mxu1 }
 0x135   :  { %1749 = vst.msk [vmem:[#allocation2 + $0x3b8] sm:$0xff] %vm391_vm2, %v1644_v56  ;;  %v1818_v0 = vsel %vm391_vm2, %v1644_v56, 0.0  ;;  %v1902_v1 = vmul.f32 %v1644_v56, %v1644_v56  ;;  %v979_v3 = vadd.f32 %v4656_v51, %v978_v62 }
 0x136   :  { %v1819_v6 = vadd.f32 %v1818_v0, %v1817_v36  ;;  %2417 = vst.msk [vmem:[#allocation2 + $0x540] sm:$0xff] %vm391_vm2, %v2312_v60  ;;  %v2486_v7 = vsel %vm391_vm2, %v2312_v60, 0.0  ;;  %v2570_v8 = vmul.f32 %v2312_v60, %v2312_v60  ;;  %v484_v9 = vsel %vm391_vm2, %v311_v61, 0.0  ;;  %3602 = vmatmul.msk.f32.gmra.mxu0 %vm75_vm1, %v61_v59  ;;  %v3850_v36 = vld [vmem:[%s7357_s0 + $0x5d0] sm:$0xff]  ;;  %v63_v60 = vld [vmem:[%s7357_s0 + $0x140] sm:$0xff]  ;;  %v3653_v0 = vld [vmem:[%s7357_s0 + $0x2c8] sm:$0xff] }
 0x137   :  { %v1971_v10 = vsel %vm391_vm2, %v1902_v1, 0.0  ;;  %v2487_v11 = vadd.f32 %v2486_v7, %v2485_v41  ;;  %414 = vst.msk [vmem:[#allocation2 + $0xb0] sm:$0xff] %vm391_vm2, %v311_v61  ;;  %v485_v12 = vadd.f32 %v484_v9, %v483_v42  ;;  %v567_v13 = vmul.f32 %v311_v61, %v311_v61  ;;  %3701 = vmatmul.msk.f32.gmra.mxu1 %vm75_vm1, %v3651_v63 }
 0x138   :  { %v1972_v14 = vadd.f32 %v1971_v10, %v1970_v44  ;;  %v2639_v15 = vsel %vm391_vm2, %v2570_v8, 0.0  ;;  %1082 = vst.msk [vmem:[#allocation2 + $0x238] sm:$0xff] %vm391_vm2, %v979_v3  ;;  %v1152_v16 = vsel %vm391_vm2, %v979_v3, 0.0  ;;  %v1235_v17 = vmul.f32 %v979_v3, %v979_v3  ;;  %3800 = vmatmul.msk.f32.gmra.mxu2 %vm75_vm1, %v3750_v4  ;;  %3899 = vmatmul.msk.f32.gmra.mxu3 %vm75_vm1, %v3849_v5  ;;  %v3752_v5 = vld [vmem:[%s7357_s0 + $0x450] sm:$0xff] }
 0x139   :  { %v2640_v18 = vadd.f32 %v2639_v15, %v2638_v48  ;;  %v637_v19 = vsel %vm391_vm2, %v567_v13, 0.0  ;;  %v1153_v20 = vadd.f32 %v1152_v16, %v1151_v50 }
 0x13a   :  { %v638_v21 = vadd.f32 %v637_v19, %v636_v52  ;;  %v1305_v22 = vsel %vm391_vm2, %v1235_v17, 0.0  ;;  %v1646_v23 = vpop.f32.mrf.mxu2 }
 0x13b   :  { %v1306_v24 = vadd.f32 %v1305_v22, %v1304_v55  ;;  %v1647_v25 = vadd.f32 %v4656_v51, %v1646_v23  ;;  %v2314_v26 = vpop.f32.mrf.mxu3  ;;  %v313_v27 = vpop.f32.mrf.mxu0 }
 0x13c   :  { %v2315_v29 = vadd.f32 %v4656_v51, %v2314_v26  ;;  %v314_v30 = vadd.f32 %v4656_v51, %v313_v27  ;;  %v981_v31 = vpop.f32.mrf.mxu1 }
 0x13d   :  { %1750 = vst.msk [vmem:[#allocation2 + $0x3c0] sm:$0xff] %vm391_vm2, %v1647_v25  ;;  %v1820_v33 = vsel %vm391_vm2, %v1647_v25, 0.0  ;;  %v1903_v2 = vmul.f32 %v1647_v25, %v1647_v25  ;;  %v982_v34 = vadd.f32 %v4656_v51, %v981_v31 }
 0x13e   :  { %v1821_v37 = vadd.f32 %v1820_v33, %v1819_v6  ;;  %2418 = vst.msk [vmem:[#allocation2 + $0x548] sm:$0xff] %vm391_vm2, %v2315_v29  ;;  %v2488_v38 = vsel %vm391_vm2, %v2315_v29, 0.0  ;;  %v2571_v39 = vmul.f32 %v2315_v29, %v2315_v29  ;;  %v486_v40 = vsel %vm391_vm2, %v314_v30, 0.0  ;;  %3603 = vmatmul.msk.f32.gmra.mxu0 %vm75_vm1, %v62_v28  ;;  %v3851_v6 = vld [vmem:[%s7357_s0 + $0x5d8] sm:$0xff]  ;;  %v64_v29 = vld [vmem:[%s7357_s0 + $0x148] sm:$0xff]  ;;  %v3654_v33 = vld [vmem:[%s7357_s0 + $0x2d0] sm:$0xff] }
 0x13f   :  { %v1973_v41 = vsel %vm391_vm2, %v1903_v2, 0.0  ;;  %v2489_v42 = vadd.f32 %v2488_v38, %v2487_v11  ;;  %415 = vst.msk [vmem:[#allocation2 + $0xb8] sm:$0xff] %vm391_vm2, %v314_v30  ;;  %v487_v43 = vadd.f32 %v486_v40, %v485_v12  ;;  %v568_v44 = vmul.f32 %v314_v30, %v314_v30  ;;  %3702 = vmatmul.msk.f32.gmra.mxu1 %vm75_vm1, %v3652_v32 }
 0x140   :  { %v1974_v45 = vadd.f32 %v1973_v41, %v1972_v14  ;;  %v2641_v46 = vsel %vm391_vm2, %v2571_v39, 0.0  ;;  %1083 = vst.msk [vmem:[#allocation2 + $0x240] sm:$0xff] %vm391_vm2, %v982_v34  ;;  %v1154_v47 = vsel %vm391_vm2, %v982_v34, 0.0  ;;  %v1236_v48 = vmul.f32 %v982_v34, %v982_v34  ;;  %3801 = vmatmul.msk.f32.gmra.mxu2 %vm75_vm1, %v3751_v35  ;;  %3900 = vmatmul.msk.f32.gmra.mxu3 %vm75_vm1, %v3850_v36  ;;  %v3753_v36 = vld [vmem:[%s7357_s0 + $0x458] sm:$0xff] }
 0x141   :  { %v2642_v49 = vadd.f32 %v2641_v46, %v2640_v18  ;;  %v639_v50 = vsel %vm391_vm2, %v568_v44, 0.0  ;;  %v1155_v52 = vadd.f32 %v1154_v47, %v1153_v20 }
 0x142   :  { %v640_v53 = vadd.f32 %v639_v50, %v638_v21  ;;  %v1307_v54 = vsel %vm391_vm2, %v1236_v48, 0.0  ;;  %v1649_v55 = vpop.f32.mrf.mxu2 }
 0x143   :  { %v1308_v56 = vadd.f32 %v1307_v54, %v1306_v24  ;;  %v1650_v57 = vadd.f32 %v4656_v51, %v1649_v55  ;;  %v2317_v58 = vpop.f32.mrf.mxu3  ;;  %v316_v59 = vpop.f32.mrf.mxu0 }
 0x144   :  { %v2318_v61 = vadd.f32 %v4656_v51, %v2317_v58  ;;  %v317_v62 = vadd.f32 %v4656_v51, %v316_v59  ;;  %v984_v63 = vpop.f32.mrf.mxu1 }
 0x145   :  { %1751 = vst.msk [vmem:[#allocation2 + $0x3c8] sm:$0xff] %vm391_vm2, %v1650_v57  ;;  %v1822_v1 = vsel %vm391_vm2, %v1650_v57, 0.0  ;;  %v1904_v3 = vmul.f32 %v1650_v57, %v1650_v57  ;;  %v985_v4 = vadd.f32 %v4656_v51, %v984_v63 }
 0x146   :  { %v1823_v7 = vadd.f32 %v1822_v1, %v1821_v37  ;;  %2419 = vst.msk [vmem:[#allocation2 + $0x550] sm:$0xff] %vm391_vm2, %v2318_v61  ;;  %v2490_v8 = vsel %vm391_vm2, %v2318_v61, 0.0  ;;  %v2572_v9 = vmul.f32 %v2318_v61, %v2318_v61  ;;  %v488_v10 = vsel %vm391_vm2, %v317_v62, 0.0  ;;  %3604 = vmatmul.msk.f32.gmra.mxu0 %vm75_vm1, %v63_v60  ;;  %v3852_v37 = vld [vmem:[%s7357_s0 + $0x5e0] sm:$0xff]  ;;  %v65_v61 = vld [vmem:[%s7357_s0 + $0x150] sm:$0xff]  ;;  %v3655_v1 = vld [vmem:[%s7357_s0 + $0x2d8] sm:$0xff] }
 0x147   :  { %v1975_v11 = vsel %vm391_vm2, %v1904_v3, 0.0  ;;  %v2491_v12 = vadd.f32 %v2490_v8, %v2489_v42  ;;  %416 = vst.msk [vmem:[#allocation2 + $0xc0] sm:$0xff] %vm391_vm2, %v317_v62  ;;  %v489_v13 = vadd.f32 %v488_v10, %v487_v43  ;;  %v569_v14 = vmul.f32 %v317_v62, %v317_v62  ;;  %3703 = vmatmul.msk.f32.gmra.mxu1 %vm75_vm1, %v3653_v0 }
 0x148   :  { %v1976_v15 = vadd.f32 %v1975_v11, %v1974_v45  ;;  %v2643_v16 = vsel %vm391_vm2, %v2572_v9, 0.0  ;;  %1084 = vst.msk [vmem:[#allocation2 + $0x248] sm:$0xff] %vm391_vm2, %v985_v4  ;;  %v1156_v17 = vsel %vm391_vm2, %v985_v4, 0.0  ;;  %v1237_v18 = vmul.f32 %v985_v4, %v985_v4  ;;  %3802 = vmatmul.msk.f32.gmra.mxu2 %vm75_vm1, %v3752_v5  ;;  %3901 = vmatmul.msk.f32.gmra.mxu3 %vm75_vm1, %v3851_v6  ;;  %v3754_v6 = vld [vmem:[%s7357_s0 + $0x460] sm:$0xff] }
 0x149   :  { %v2644_v19 = vadd.f32 %v2643_v16, %v2642_v49  ;;  %v641_v20 = vsel %vm391_vm2, %v569_v14, 0.0  ;;  %v1157_v21 = vadd.f32 %v1156_v17, %v1155_v52 }
 0x14a   :  { %v642_v22 = vadd.f32 %v641_v20, %v640_v53  ;;  %v1309_v23 = vsel %vm391_vm2, %v1237_v18, 0.0  ;;  %v1652_v24 = vpop.f32.mrf.mxu2 }
 0x14b   :  { %v1310_v25 = vadd.f32 %v1309_v23, %v1308_v56  ;;  %v1653_v26 = vadd.f32 %v4656_v51, %v1652_v24  ;;  %v2320_v27 = vpop.f32.mrf.mxu3  ;;  %v319_v28 = vpop.f32.mrf.mxu0 }
 0x14c   :  { %v2321_v30 = vadd.f32 %v4656_v51, %v2320_v27  ;;  %v320_v31 = vadd.f32 %v4656_v51, %v319_v28  ;;  %v987_v32 = vpop.f32.mrf.mxu1 }
 0x14d   :  { %1752 = vst.msk [vmem:[#allocation2 + $0x3d0] sm:$0xff] %vm391_vm2, %v1653_v26  ;;  %v1824_v2 = vsel %vm391_vm2, %v1653_v26, 0.0  ;;  %v1905_v34 = vmul.f32 %v1653_v26, %v1653_v26  ;;  %v988_v35 = vadd.f32 %v4656_v51, %v987_v32  ;;  %v5077_v26 = vld [vmem:[%s7358_s2] ss:$0 sm:$0xff] }
 0x14e   :  { %v1825_v38 = vadd.f32 %v1824_v2, %v1823_v7  ;;  %2420 = vst.msk [vmem:[#allocation2 + $0x558] sm:$0xff] %vm391_vm2, %v2321_v30  ;;  %v2492_v39 = vsel %vm391_vm2, %v2321_v30, 0.0  ;;  %v2573_v40 = vmul.f32 %v2321_v30, %v2321_v30  ;;  %v490_v41 = vsel %vm391_vm2, %v320_v31, 0.0  ;;  %3605 = vmatmul.msk.f32.gmra.mxu0 %vm75_vm1, %v64_v29  ;;  %v3853_v7 = vld [vmem:[%s7357_s0 + $0x5e8] sm:$0xff]  ;;  %v66_v30 = vld [vmem:[%s7357_s0 + $0x158] sm:$0xff]  ;;  %v3656_v2 = vld [vmem:[%s7357_s0 + $0x2e0] sm:$0xff] }
 0x14f   :  { %v1977_v42 = vsel %vm391_vm2, %v1905_v34, 0.0  ;;  %v2493_v43 = vadd.f32 %v2492_v39, %v2491_v12  ;;  %417 = vst.msk [vmem:[#allocation2 + $0xc8] sm:$0xff] %vm391_vm2, %v320_v31  ;;  %v491_v44 = vadd.f32 %v490_v41, %v489_v13  ;;  %v570_v45 = vmul.f32 %v320_v31, %v320_v31  ;;  %3704 = vmatmul.msk.f32.gmra.mxu1 %vm75_vm1, %v3654_v33 }
 0x150   :  { %v1978_v46 = vadd.f32 %v1977_v42, %v1976_v15  ;;  %v2645_v47 = vsel %vm391_vm2, %v2573_v40, 0.0  ;;  %1085 = vst.msk [vmem:[#allocation2 + $0x250] sm:$0xff] %vm391_vm2, %v988_v35  ;;  %v1158_v48 = vsel %vm391_vm2, %v988_v35, 0.0  ;;  %v1238_v49 = vmul.f32 %v988_v35, %v988_v35  ;;  %3803 = vmatmul.msk.f32.gmra.mxu2 %vm75_vm1, %v3753_v36  ;;  %3902 = vmatmul.msk.f32.gmra.mxu3 %vm75_vm1, %v3852_v37  ;;  %v3755_v37 = vld [vmem:[%s7357_s0 + $0x468] sm:$0xff] }
 0x151   :  { %v2646_v50 = vadd.f32 %v2645_v47, %v2644_v19  ;;  %v643_v52 = vsel %vm391_vm2, %v570_v45, 0.0  ;;  %v1159_v53 = vadd.f32 %v1158_v48, %v1157_v21 }
 0x152   :  { %v644_v54 = vadd.f32 %v643_v52, %v642_v22  ;;  %v1311_v55 = vsel %vm391_vm2, %v1238_v49, 0.0  ;;  %v1655_v56 = vpop.f32.mrf.mxu2 }
 0x153   :  { %v1312_v57 = vadd.f32 %v1311_v55, %v1310_v25  ;;  %v1656_v58 = vadd.f32 %v4656_v51, %v1655_v56  ;;  %v2323_v59 = vpop.f32.mrf.mxu3  ;;  %v322_v60 = vpop.f32.mrf.mxu0 }
 0x154   :  { %v2324_v62 = vadd.f32 %v4656_v51, %v2323_v59  ;;  %v323_v63 = vadd.f32 %v4656_v51, %v322_v60  ;;  %v990_v0 = vpop.f32.mrf.mxu1 }
 0x155   :  { %1753 = vst.msk [vmem:[#allocation2 + $0x3d8] sm:$0xff] %vm391_vm2, %v1656_v58  ;;  %v1826_v3 = vsel %vm391_vm2, %v1656_v58, 0.0  ;;  %v1906_v4 = vmul.f32 %v1656_v58, %v1656_v58  ;;  %v991_v5 = vadd.f32 %v4656_v51, %v990_v0 }
 0x156   :  { %v1827_v8 = vadd.f32 %v1826_v3, %v1825_v38  ;;  %2421 = vst.msk [vmem:[#allocation2 + $0x560] sm:$0xff] %vm391_vm2, %v2324_v62  ;;  %v2494_v9 = vsel %vm391_vm2, %v2324_v62, 0.0  ;;  %v2574_v10 = vmul.f32 %v2324_v62, %v2324_v62  ;;  %v492_v11 = vsel %vm391_vm2, %v323_v63, 0.0  ;;  %3606 = vmatmul.msk.f32.gmra.mxu0 %vm75_vm1, %v65_v61  ;;  %v3854_v38 = vld [vmem:[%s7357_s0 + $0x5f0] sm:$0xff]  ;;  %v67_v62 = vld [vmem:[%s7357_s0 + $0x160] sm:$0xff]  ;;  %v3657_v3 = vld [vmem:[%s7357_s0 + $0x2e8] sm:$0xff] }
 0x157   :  { %v1979_v51 = vsel %vm391_vm2, %v1906_v4, 0.0  ;;  %v2495_v12 = vadd.f32 %v2494_v9, %v2493_v43  ;;  %418 = vst.msk [vmem:[#allocation2 + $0xd0] sm:$0xff] %vm391_vm2, %v323_v63  ;;  %v493_v13 = vadd.f32 %v492_v11, %v491_v44  ;;  %v571_v14 = vmul.f32 %v323_v63, %v323_v63  ;;  %3705 = vmatmul.msk.f32.gmra.mxu1 %vm75_vm1, %v3655_v1 }
 0x158   :  { %v1980_v15 = vadd.f32 %v1979_v51, %v1978_v46  ;;  %v2647_v16 = vsel %vm391_vm2, %v2574_v10, 0.0  ;;  %1086 = vst.msk [vmem:[#allocation2 + $0x258] sm:$0xff] %vm391_vm2, %v991_v5  ;;  %v1160_v17 = vsel %vm391_vm2, %v991_v5, 0.0  ;;  %v1239_v18 = vmul.f32 %v991_v5, %v991_v5  ;;  %3804 = vmatmul.msk.f32.gmra.mxu2 %vm75_vm1, %v3754_v6  ;;  %3903 = vmatmul.msk.f32.gmra.mxu3 %vm75_vm1, %v3853_v7  ;;  %v3756_v7 = vld [vmem:[%s7357_s0 + $0x470] sm:$0xff] }
 0x159   :  { %v2648_v19 = vadd.f32 %v2647_v16, %v2646_v50  ;;  %v645_v20 = vsel %vm391_vm2, %v571_v14, 0.0  ;;  %v1161_v21 = vadd.f32 %v1160_v17, %v1159_v53 }
 0x15a   :  { %v646_v22 = vadd.f32 %v645_v20, %v644_v54  ;;  %v1313_v23 = vsel %vm391_vm2, %v1239_v18, 0.0  ;;  %v1658_v24 = vpop.f32.mrf.mxu2 }
 0x15b   :  { %v1314_v25 = vadd.f32 %v1313_v23, %v1312_v57  ;;  %v1659_v27 = vadd.f32 %v5077_v26, %v1658_v24  ;;  %v2326_v28 = vpop.f32.mrf.mxu3  ;;  %v325_v29 = vpop.f32.mrf.mxu0 }
 0x15c   :  { %v2327_v31 = vadd.f32 %v5077_v26, %v2326_v28  ;;  %v326_v32 = vadd.f32 %v5077_v26, %v325_v29  ;;  %v993_v33 = vpop.f32.mrf.mxu1 }
 0x15d   :  { %1754 = vst.msk [vmem:[#allocation2 + $0x3e0] sm:$0xff] %vm391_vm2, %v1659_v27  ;;  %v1828_v34 = vsel %vm391_vm2, %v1659_v27, 0.0  ;;  %v1907_v35 = vmul.f32 %v1659_v27, %v1659_v27  ;;  %v994_v36 = vadd.f32 %v5077_v26, %v993_v33 }
 0x15e   :  { %v1829_v39 = vadd.f32 %v1828_v34, %v1827_v8  ;;  %2422 = vst.msk [vmem:[#allocation2 + $0x568] sm:$0xff] %vm391_vm2, %v2327_v31  ;;  %v2496_v40 = vsel %vm391_vm2, %v2327_v31, 0.0  ;;  %v2575_v41 = vmul.f32 %v2327_v31, %v2327_v31  ;;  %v494_v42 = vsel %vm391_vm2, %v326_v32, 0.0  ;;  %3607 = vmatmul.msk.f32.gmra.mxu0 %vm75_vm1, %v66_v30  ;;  %v3855_v8 = vld [vmem:[%s7357_s0 + $0x5f8] sm:$0xff]  ;;  %v68_v31 = vld [vmem:[%s7357_s0 + $0x168] sm:$0xff]  ;;  %v3658_v34 = vld [vmem:[%s7357_s0 + $0x2f0] sm:$0xff] }
 0x15f   :  { %v1981_v43 = vsel %vm391_vm2, %v1907_v35, 0.0  ;;  %v2497_v44 = vadd.f32 %v2496_v40, %v2495_v12  ;;  %419 = vst.msk [vmem:[#allocation2 + $0xd8] sm:$0xff] %vm391_vm2, %v326_v32  ;;  %v495_v45 = vadd.f32 %v494_v42, %v493_v13  ;;  %v572_v46 = vmul.f32 %v326_v32, %v326_v32  ;;  %3706 = vmatmul.msk.f32.gmra.mxu1 %vm75_vm1, %v3656_v2 }
 0x160   :  { %v1982_v47 = vadd.f32 %v1981_v43, %v1980_v15  ;;  %v2649_v48 = vsel %vm391_vm2, %v2575_v41, 0.0  ;;  %1087 = vst.msk [vmem:[#allocation2 + $0x260] sm:$0xff] %vm391_vm2, %v994_v36  ;;  %v1162_v49 = vsel %vm391_vm2, %v994_v36, 0.0  ;;  %v1240_v50 = vmul.f32 %v994_v36, %v994_v36  ;;  %3805 = vmatmul.msk.f32.gmra.mxu2 %vm75_vm1, %v3755_v37  ;;  %3904 = vmatmul.msk.f32.gmra.mxu3 %vm75_vm1, %v3854_v38  ;;  %v3757_v38 = vld [vmem:[%s7357_s0 + $0x478] sm:$0xff] }
 0x161   :  { %v2650_v52 = vadd.f32 %v2649_v48, %v2648_v19  ;;  %v647_v53 = vsel %vm391_vm2, %v572_v46, 0.0  ;;  %v1163_v54 = vadd.f32 %v1162_v49, %v1161_v21 }
 0x162   :  { %v648_v55 = vadd.f32 %v647_v53, %v646_v22  ;;  %v1315_v56 = vsel %vm391_vm2, %v1240_v50, 0.0  ;;  %v1661_v57 = vpop.f32.mrf.mxu2 }
 0x163   :  { %v1316_v58 = vadd.f32 %v1315_v56, %v1314_v25  ;;  %v1662_v59 = vadd.f32 %v5077_v26, %v1661_v57  ;;  %v2329_v60 = vpop.f32.mrf.mxu3  ;;  %v328_v61 = vpop.f32.mrf.mxu0 }
 0x164   :  { %v2330_v63 = vadd.f32 %v5077_v26, %v2329_v60  ;;  %v329_v0 = vadd.f32 %v5077_v26, %v328_v61  ;;  %v996_v1 = vpop.f32.mrf.mxu1 }
 0x165   :  { %1755 = vst.msk [vmem:[#allocation2 + $0x3e8] sm:$0xff] %vm391_vm2, %v1662_v59  ;;  %v1830_v4 = vsel %vm391_vm2, %v1662_v59, 0.0  ;;  %v1908_v5 = vmul.f32 %v1662_v59, %v1662_v59  ;;  %v997_v6 = vadd.f32 %v5077_v26, %v996_v1 }
 0x166   :  { %v1831_v9 = vadd.f32 %v1830_v4, %v1829_v39  ;;  %2423 = vst.msk [vmem:[#allocation2 + $0x570] sm:$0xff] %vm391_vm2, %v2330_v63  ;;  %v2498_v10 = vsel %vm391_vm2, %v2330_v63, 0.0  ;;  %v2576_v11 = vmul.f32 %v2330_v63, %v2330_v63  ;;  %v496_v51 = vsel %vm391_vm2, %v329_v0, 0.0  ;;  %3608 = vmatmul.msk.f32.gmra.mxu0 %vm75_vm1, %v67_v62  ;;  %v3856_v39 = vld [vmem:[%s7357_s0 + $0x600] sm:$0xff]  ;;  %v69_v63 = vld [vmem:[%s7357_s0 + $0x170] sm:$0xff]  ;;  %v3659_v4 = vld [vmem:[%s7357_s0 + $0x2f8] sm:$0xff] }
 0x167   :  { %v1983_v12 = vsel %vm391_vm2, %v1908_v5, 0.0  ;;  %v2499_v13 = vadd.f32 %v2498_v10, %v2497_v44  ;;  %420 = vst.msk [vmem:[#allocation2 + $0xe0] sm:$0xff] %vm391_vm2, %v329_v0  ;;  %v497_v14 = vadd.f32 %v496_v51, %v495_v45  ;;  %v573_v15 = vmul.f32 %v329_v0, %v329_v0  ;;  %3707 = vmatmul.msk.f32.gmra.mxu1 %vm75_vm1, %v3657_v3 }
 0x168   :  { %v1984_v16 = vadd.f32 %v1983_v12, %v1982_v47  ;;  %v2651_v17 = vsel %vm391_vm2, %v2576_v11, 0.0  ;;  %1088 = vst.msk [vmem:[#allocation2 + $0x268] sm:$0xff] %vm391_vm2, %v997_v6  ;;  %v1164_v18 = vsel %vm391_vm2, %v997_v6, 0.0  ;;  %v1241_v19 = vmul.f32 %v997_v6, %v997_v6  ;;  %3806 = vmatmul.msk.f32.gmra.mxu2 %vm75_vm1, %v3756_v7  ;;  %3905 = vmatmul.msk.f32.gmra.mxu3 %vm75_vm1, %v3855_v8  ;;  %v3758_v8 = vld [vmem:[%s7357_s0 + $0x480] sm:$0xff] }
 0x169   :  { %v2652_v20 = vadd.f32 %v2651_v17, %v2650_v52  ;;  %v649_v21 = vsel %vm391_vm2, %v573_v15, 0.0  ;;  %v1165_v22 = vadd.f32 %v1164_v18, %v1163_v54 }
 0x16a   :  { %v650_v23 = vadd.f32 %v649_v21, %v648_v55  ;;  %v1317_v24 = vsel %vm391_vm2, %v1241_v19, 0.0  ;;  %v1664_v25 = vpop.f32.mrf.mxu2 }
 0x16b   :  { %v1318_v27 = vadd.f32 %v1317_v24, %v1316_v58  ;;  %v1665_v28 = vadd.f32 %v5077_v26, %v1664_v25  ;;  %v2332_v29 = vpop.f32.mrf.mxu3  ;;  %v331_v30 = vpop.f32.mrf.mxu0 }
 0x16c   :  { %v2333_v32 = vadd.f32 %v5077_v26, %v2332_v29  ;;  %v332_v33 = vadd.f32 %v5077_v26, %v331_v30  ;;  %v999_v2 = vpop.f32.mrf.mxu1 }
 0x16d   :  { %1756 = vst.msk [vmem:[#allocation2 + $0x3f0] sm:$0xff] %vm391_vm2, %v1665_v28  ;;  %v1832_v35 = vsel %vm391_vm2, %v1665_v28, 0.0  ;;  %v1909_v36 = vmul.f32 %v1665_v28, %v1665_v28  ;;  %v1000_v37 = vadd.f32 %v5077_v26, %v999_v2 }
 0x16e   :  { %v1833_v40 = vadd.f32 %v1832_v35, %v1831_v9  ;;  %2424 = vst.msk [vmem:[#allocation2 + $0x578] sm:$0xff] %vm391_vm2, %v2333_v32  ;;  %v2500_v41 = vsel %vm391_vm2, %v2333_v32, 0.0  ;;  %v2577_v42 = vmul.f32 %v2333_v32, %v2333_v32  ;;  %v498_v43 = vsel %vm391_vm2, %v332_v33, 0.0  ;;  %3609 = vmatmul.msk.f32.gmra.mxu0 %vm75_vm1, %v68_v31  ;;  %v3857_v9 = vld [vmem:[%s7357_s0 + $0x608] sm:$0xff]  ;;  %v70_v32 = vld [vmem:[%s7357_s0 + $0x178] sm:$0xff]  ;;  %v3660_v35 = vld [vmem:[%s7357_s0 + $0x300] sm:$0xff] }
 0x16f   :  { %v1985_v44 = vsel %vm391_vm2, %v1909_v36, 0.0  ;;  %v2501_v45 = vadd.f32 %v2500_v41, %v2499_v13  ;;  %421 = vst.msk [vmem:[#allocation2 + $0xe8] sm:$0xff] %vm391_vm2, %v332_v33  ;;  %v499_v46 = vadd.f32 %v498_v43, %v497_v14  ;;  %v574_v47 = vmul.f32 %v332_v33, %v332_v33  ;;  %3708 = vmatmul.msk.f32.gmra.mxu1 %vm75_vm1, %v3658_v34 }
 0x170   :  { %v1986_v48 = vadd.f32 %v1985_v44, %v1984_v16  ;;  %v2653_v49 = vsel %vm391_vm2, %v2577_v42, 0.0  ;;  %1089 = vst.msk [vmem:[#allocation2 + $0x270] sm:$0xff] %vm391_vm2, %v1000_v37  ;;  %v1166_v50 = vsel %vm391_vm2, %v1000_v37, 0.0  ;;  %v1242_v52 = vmul.f32 %v1000_v37, %v1000_v37  ;;  %3807 = vmatmul.msk.f32.gmra.mxu2 %vm75_vm1, %v3757_v38  ;;  %3906 = vmatmul.msk.f32.gmra.mxu3 %vm75_vm1, %v3856_v39  ;;  %v3759_v39 = vld [vmem:[%s7357_s0 + $0x488] sm:$0xff] }
 0x171   :  { %v2654_v53 = vadd.f32 %v2653_v49, %v2652_v20  ;;  %v651_v54 = vsel %vm391_vm2, %v574_v47, 0.0  ;;  %v1167_v55 = vadd.f32 %v1166_v50, %v1165_v22 }
 0x172   :  { %v652_v56 = vadd.f32 %v651_v54, %v650_v23  ;;  %v1319_v57 = vsel %vm391_vm2, %v1242_v52, 0.0  ;;  %v1667_v58 = vpop.f32.mrf.mxu2 }
 0x173   :  { %v1320_v59 = vadd.f32 %v1319_v57, %v1318_v27  ;;  %v1668_v60 = vadd.f32 %v5077_v26, %v1667_v58  ;;  %v2335_v61 = vpop.f32.mrf.mxu3  ;;  %v334_v62 = vpop.f32.mrf.mxu0 }
 0x174   :  { %v2336_v0 = vadd.f32 %v5077_v26, %v2335_v61  ;;  %v335_v1 = vadd.f32 %v5077_v26, %v334_v62  ;;  %v1002_v3 = vpop.f32.mrf.mxu1 }
 0x175   :  { %1757 = vst.msk [vmem:[#allocation2 + $0x3f8] sm:$0xff] %vm391_vm2, %v1668_v60  ;;  %v1834_v5 = vsel %vm391_vm2, %v1668_v60, 0.0  ;;  %v1910_v6 = vmul.f32 %v1668_v60, %v1668_v60  ;;  %v1003_v7 = vadd.f32 %v5077_v26, %v1002_v3 }
 0x176   :  { %v1835_v10 = vadd.f32 %v1834_v5, %v1833_v40  ;;  %2425 = vst.msk [vmem:[#allocation2 + $0x580] sm:$0xff] %vm391_vm2, %v2336_v0  ;;  %v2502_v11 = vsel %vm391_vm2, %v2336_v0, 0.0  ;;  %v2578_v51 = vmul.f32 %v2336_v0, %v2336_v0  ;;  %v500_v12 = vsel %vm391_vm2, %v335_v1, 0.0  ;;  %3610 = vmatmul.msk.f32.gmra.mxu0 %vm75_vm1, %v69_v63  ;;  %v3858_v40 = vld [vmem:[%s7357_s0 + $0x610] sm:$0xff]  ;;  %v71_v0 = vld [vmem:[%s7357_s0 + $0x180] sm:$0xff]  ;;  %v3661_v5 = vld [vmem:[%s7357_s0 + $0x308] sm:$0xff] }
 0x177   :  { %v1987_v13 = vsel %vm391_vm2, %v1910_v6, 0.0  ;;  %v2503_v14 = vadd.f32 %v2502_v11, %v2501_v45  ;;  %422 = vst.msk [vmem:[#allocation2 + $0xf0] sm:$0xff] %vm391_vm2, %v335_v1  ;;  %v501_v15 = vadd.f32 %v500_v12, %v499_v46  ;;  %v575_v16 = vmul.f32 %v335_v1, %v335_v1  ;;  %3709 = vmatmul.msk.f32.gmra.mxu1 %vm75_vm1, %v3659_v4 }
 0x178   :  { %v1988_v17 = vadd.f32 %v1987_v13, %v1986_v48  ;;  %v2655_v18 = vsel %vm391_vm2, %v2578_v51, 0.0  ;;  %1090 = vst.msk [vmem:[#allocation2 + $0x278] sm:$0xff] %vm391_vm2, %v1003_v7  ;;  %v1168_v19 = vsel %vm391_vm2, %v1003_v7, 0.0  ;;  %v1243_v20 = vmul.f32 %v1003_v7, %v1003_v7  ;;  %3808 = vmatmul.msk.f32.gmra.mxu2 %vm75_vm1, %v3758_v8  ;;  %3907 = vmatmul.msk.f32.gmra.mxu3 %vm75_vm1, %v3857_v9  ;;  %v3760_v9 = vld [vmem:[%s7357_s0 + $0x490] sm:$0xff] }
 0x179   :  { %v2656_v21 = vadd.f32 %v2655_v18, %v2654_v53  ;;  %v653_v22 = vsel %vm391_vm2, %v575_v16, 0.0  ;;  %v1169_v23 = vadd.f32 %v1168_v19, %v1167_v55 }
 0x17a   :  { %v654_v24 = vadd.f32 %v653_v22, %v652_v56  ;;  %v1321_v25 = vsel %vm391_vm2, %v1243_v20, 0.0  ;;  %v1670_v27 = vpop.f32.mrf.mxu2 }
 0x17b   :  { %v1322_v28 = vadd.f32 %v1321_v25, %v1320_v59  ;;  %v1671_v29 = vadd.f32 %v5077_v26, %v1670_v27  ;;  %v2338_v30 = vpop.f32.mrf.mxu3  ;;  %v337_v31 = vpop.f32.mrf.mxu0 }
 0x17c   :  { %v2339_v33 = vadd.f32 %v5077_v26, %v2338_v30  ;;  %v338_v2 = vadd.f32 %v5077_v26, %v337_v31  ;;  %v1005_v34 = vpop.f32.mrf.mxu1 }
 0x17d   :  { %1758 = vst.msk [vmem:[#allocation2 + $0x400] sm:$0xff] %vm391_vm2, %v1671_v29  ;;  %v1836_v36 = vsel %vm391_vm2, %v1671_v29, 0.0  ;;  %v1911_v37 = vmul.f32 %v1671_v29, %v1671_v29  ;;  %v1006_v38 = vadd.f32 %v5077_v26, %v1005_v34 }
 0x17e   :  { %v1837_v41 = vadd.f32 %v1836_v36, %v1835_v10  ;;  %2426 = vst.msk [vmem:[#allocation2 + $0x588] sm:$0xff] %vm391_vm2, %v2339_v33  ;;  %v2504_v42 = vsel %vm391_vm2, %v2339_v33, 0.0  ;;  %v2579_v43 = vmul.f32 %v2339_v33, %v2339_v33  ;;  %v502_v44 = vsel %vm391_vm2, %v338_v2, 0.0  ;;  %3611 = vmatmul.msk.f32.gmra.mxu0 %vm75_vm1, %v70_v32  ;;  %v3859_v10 = vld [vmem:[%s7357_s0 + $0x618] sm:$0xff] }
 0x17f   :  { %v1989_v45 = vsel %vm391_vm2, %v1911_v37, 0.0  ;;  %v2505_v46 = vadd.f32 %v2504_v42, %v2503_v14  ;;  %423 = vst.msk [vmem:[#allocation2 + $0xf8] sm:$0xff] %vm391_vm2, %v338_v2  ;;  %v503_v47 = vadd.f32 %v502_v44, %v501_v15  ;;  %v576_v48 = vmul.f32 %v338_v2, %v338_v2  ;;  %3710 = vmatmul.msk.f32.gmra.mxu1 %vm75_vm1, %v3660_v35 }
 0x180   :  { %v1990_v49 = vadd.f32 %v1989_v45, %v1988_v17  ;;  %v2657_v50 = vsel %vm391_vm2, %v2579_v43, 0.0  ;;  %1091 = vst.msk [vmem:[#allocation2 + $0x280] sm:$0xff] %vm391_vm2, %v1006_v38  ;;  %v1170_v52 = vsel %vm391_vm2, %v1006_v38, 0.0  ;;  %v1244_v53 = vmul.f32 %v1006_v38, %v1006_v38  ;;  %3809 = vmatmul.msk.f32.gmra.mxu2 %vm75_vm1, %v3759_v39  ;;  %3908 = vmatmul.msk.f32.gmra.mxu3 %vm75_vm1, %v3858_v40 }
 0x181   :  { %v2658_v54 = vadd.f32 %v2657_v50, %v2656_v21  ;;  %v655_v55 = vsel %vm391_vm2, %v576_v48, 0.0  ;;  %v1171_v56 = vadd.f32 %v1170_v52, %v1169_v23 }
 0x182   :  { %v656_v57 = vadd.f32 %v655_v55, %v654_v24  ;;  %v1323_v58 = vsel %vm391_vm2, %v1244_v53, 0.0  ;;  %v1673_v59 = vpop.f32.mrf.mxu2 }
 0x183   :  { %v1324_v60 = vadd.f32 %v1323_v58, %v1322_v28  ;;  %v1674_v61 = vadd.f32 %v5077_v26, %v1673_v59  ;;  %v2341_v62 = vpop.f32.mrf.mxu3  ;;  %v340_v63 = vpop.f32.mrf.mxu0 }
 0x184   :  { %v2342_v1 = vadd.f32 %v5077_v26, %v2341_v62  ;;  %v341_v3 = vadd.f32 %v5077_v26, %v340_v63  ;;  %v1008_v4 = vpop.f32.mrf.mxu1 }
 0x185   :  { %1759 = vst.msk [vmem:[#allocation2 + $0x408] sm:$0xff] %vm391_vm2, %v1674_v61  ;;  %v1838_v6 = vsel %vm391_vm2, %v1674_v61, 0.0  ;;  %v1912_v7 = vmul.f32 %v1674_v61, %v1674_v61  ;;  %v1009_v8 = vadd.f32 %v5077_v26, %v1008_v4 }
 0x186   :  { %v1839_v11 = vadd.f32 %v1838_v6, %v1837_v41  ;;  %2427 = vst.msk [vmem:[#allocation2 + $0x590] sm:$0xff] %vm391_vm2, %v2342_v1  ;;  %v2506_v51 = vsel %vm391_vm2, %v2342_v1, 0.0  ;;  %v2580_v12 = vmul.f32 %v2342_v1, %v2342_v1  ;;  %v504_v13 = vsel %vm391_vm2, %v341_v3, 0.0  ;;  %3612 = vmatmul.msk.f32.gmra.mxu0 %vm75_vm1, %v71_v0 }
 0x187   :  { %v1991_v14 = vsel %vm391_vm2, %v1912_v7, 0.0  ;;  %v2507_v15 = vadd.f32 %v2506_v51, %v2505_v46  ;;  %424 = vst.msk [vmem:[#allocation2 + $0x100] sm:$0xff] %vm391_vm2, %v341_v3  ;;  %v505_v16 = vadd.f32 %v504_v13, %v503_v47  ;;  %v577_v17 = vmul.f32 %v341_v3, %v341_v3  ;;  %3711 = vmatmul.msk.f32.gmra.mxu1 %vm75_vm1, %v3661_v5 }
 0x188   :  { %v1992_v18 = vadd.f32 %v1991_v14, %v1990_v49  ;;  %v2659_v19 = vsel %vm391_vm2, %v2580_v12, 0.0  ;;  %1092 = vst.msk [vmem:[#allocation2 + $0x288] sm:$0xff] %vm391_vm2, %v1009_v8  ;;  %v1172_v20 = vsel %vm391_vm2, %v1009_v8, 0.0  ;;  %v1245_v21 = vmul.f32 %v1009_v8, %v1009_v8  ;;  %3810 = vmatmul.msk.f32.gmra.mxu2 %vm75_vm1, %v3760_v9  ;;  %3909 = vmatmul.msk.f32.gmra.mxu3 %vm75_vm1, %v3859_v10 }
 0x189   :  { %v2660_v22 = vadd.f32 %v2659_v19, %v2658_v54  ;;  %v657_v23 = vsel %vm391_vm2, %v577_v17, 0.0  ;;  %v1173_v24 = vadd.f32 %v1172_v20, %v1171_v56 }
 0x18a   :  { %v658_v25 = vadd.f32 %v657_v23, %v656_v57  ;;  %v1325_v27 = vsel %vm391_vm2, %v1245_v21, 0.0  ;;  %v1676_v28 = vpop.f32.mrf.mxu2 }
 0x18b   :  { %v1326_v29 = vadd.f32 %v1325_v27, %v1324_v60  ;;  %v1677_v30 = vadd.f32 %v5077_v26, %v1676_v28  ;;  %v2344_v31 = vpop.f32.mrf.mxu3  ;;  %v343_v32 = vpop.f32.mrf.mxu0 }
 0x18c   :  { %v2345_v33 = vadd.f32 %v5077_v26, %v2344_v31  ;;  %v344_v2 = vadd.f32 %v5077_v26, %v343_v32  ;;  %v1011_v34 = vpop.f32.mrf.mxu1 }
 0x18d   :  { %1760 = vst.msk [vmem:[#allocation2 + $0x410] sm:$0xff] %vm391_vm2, %v1677_v30  ;;  %v1840_v35 = vsel %vm391_vm2, %v1677_v30, 0.0  ;;  %v1913_v36 = vmul.f32 %v1677_v30, %v1677_v30  ;;  %v1012_v37 = vadd.f32 %v5077_v26, %v1011_v34 }
 0x18e   :  { %v1841_v38 = vadd.f32 %v1840_v35, %v1839_v11  ;;  %2428 = vst.msk [vmem:[#allocation2 + $0x598] sm:$0xff] %vm391_vm2, %v2345_v33  ;;  %v2508_v39 = vsel %vm391_vm2, %v2345_v33, 0.0  ;;  %v2581_v40 = vmul.f32 %v2345_v33, %v2345_v33  ;;  %v506_v41 = vsel %vm391_vm2, %v344_v2, 0.0 }
 0x18f   :  { %v1993_v42 = vsel %vm391_vm2, %v1913_v36, 0.0  ;;  %v2509_v43 = vadd.f32 %v2508_v39, %v2507_v15  ;;  %425 = vst.msk [vmem:[#allocation2 + $0x108] sm:$0xff] %vm391_vm2, %v344_v2  ;;  %v507_v44 = vadd.f32 %v506_v41, %v505_v16  ;;  %v578_v45 = vmul.f32 %v344_v2, %v344_v2 }
 0x190   :  { %v1994_v46 = vadd.f32 %v1993_v42, %v1992_v18  ;;  %v2661_v47 = vsel %vm391_vm2, %v2581_v40, 0.0  ;;  %1093 = vst.msk [vmem:[#allocation2 + $0x290] sm:$0xff] %vm391_vm2, %v1012_v37  ;;  %v1174_v48 = vsel %vm391_vm2, %v1012_v37, 0.0  ;;  %v1246_v49 = vmul.f32 %v1012_v37, %v1012_v37 }
 0x191   :  { %v2662_v50 = vadd.f32 %v2661_v47, %v2660_v22  ;;  %v659_v52 = vsel %vm391_vm2, %v578_v45, 0.0  ;;  %v1175_v53 = vadd.f32 %v1174_v48, %v1173_v24 }
 0x192   :  { %v660_v54 = vadd.f32 %v659_v52, %v658_v25  ;;  %v1327_v55 = vsel %vm391_vm2, %v1246_v49, 0.0  ;;  %v1679_v56 = vpop.f32.mrf.mxu2 }
 0x193   :  { %v1328_v57 = vadd.f32 %v1327_v55, %v1326_v29  ;;  %v1680_v58 = vadd.f32 %v5077_v26, %v1679_v56  ;;  %v2347_v59 = vpop.f32.mrf.mxu3  ;;  %v346_v60 = vpop.f32.mrf.mxu0 }
 0x194   :  { %v2348_v61 = vadd.f32 %v5077_v26, %v2347_v59  ;;  %v347_v62 = vadd.f32 %v5077_v26, %v346_v60  ;;  %v1014_v63 = vpop.f32.mrf.mxu1 }
 0x195   :  { %1761 = vst.msk [vmem:[#allocation2 + $0x418] sm:$0xff] %vm391_vm2, %v1680_v58  ;;  %v1842_v0 = vsel %vm391_vm2, %v1680_v58, 0.0  ;;  %v1914_v1 = vmul.f32 %v1680_v58, %v1680_v58  ;;  %v1015_v3 = vadd.f32 %v5077_v26, %v1014_v63 }
 0x196   :  { %v1843_v4 = vadd.f32 %v1842_v0, %v1841_v38  ;;  %2429 = vst.msk [vmem:[#allocation2 + $0x5a0] sm:$0xff] %vm391_vm2, %v2348_v61  ;;  %v2510_v5 = vsel %vm391_vm2, %v2348_v61, 0.0  ;;  %v2582_v6 = vmul.f32 %v2348_v61, %v2348_v61  ;;  %v508_v7 = vsel %vm391_vm2, %v347_v62, 0.0 }
 0x197   :  { %v1995_v8 = vsel %vm391_vm2, %v1914_v1, 0.0  ;;  %v2511_v9 = vadd.f32 %v2510_v5, %v2509_v43  ;;  %426 = vst.msk [vmem:[#allocation2 + $0x110] sm:$0xff] %vm391_vm2, %v347_v62  ;;  %v509_v10 = vadd.f32 %v508_v7, %v507_v44  ;;  %v579_v11 = vmul.f32 %v347_v62, %v347_v62 }
 0x198   :  { %v1996_v51 = vadd.f32 %v1995_v8, %v1994_v46  ;;  %v2663_v12 = vsel %vm391_vm2, %v2582_v6, 0.0  ;;  %1094 = vst.msk [vmem:[#allocation2 + $0x298] sm:$0xff] %vm391_vm2, %v1015_v3  ;;  %v1176_v13 = vsel %vm391_vm2, %v1015_v3, 0.0  ;;  %v1247_v14 = vmul.f32 %v1015_v3, %v1015_v3 }
 0x199   :  { %v2664_v15 = vadd.f32 %v2663_v12, %v2662_v50  ;;  %v661_v16 = vsel %vm391_vm2, %v579_v11, 0.0  ;;  %v1177_v17 = vadd.f32 %v1176_v13, %v1175_v53 }
 0x19a   :  { %v662_v18 = vadd.f32 %v661_v16, %v660_v54  ;;  %v1329_v19 = vsel %vm391_vm2, %v1247_v14, 0.0  ;;  %v1682_v20 = vpop.f32.mrf.mxu2 }
 0x19b   :  { %v1330_v21 = vadd.f32 %v1329_v19, %v1328_v57  ;;  %v1683_v22 = vadd.f32 %v5077_v26, %v1682_v20  ;;  %v2350_v23 = vpop.f32.mrf.mxu3  ;;  %v349_v24 = vpop.f32.mrf.mxu0 }
 0x19c   :  { %v2351_v25 = vadd.f32 %v5077_v26, %v2350_v23  ;;  %v350_v27 = vadd.f32 %v5077_v26, %v349_v24  ;;  %v1017_v28 = vpop.f32.mrf.mxu1 }
 0x19d   :  { %1762 = vst.msk [vmem:[#allocation2 + $0x420] sm:$0xff] %vm391_vm2, %v1683_v22  ;;  %v1844_v29 = vsel %vm391_vm2, %v1683_v22, 0.0  ;;  %v1915_v30 = vmul.f32 %v1683_v22, %v1683_v22  ;;  %v1018_v31 = vadd.f32 %v5077_v26, %v1017_v28 }
 0x19e   :  { %v1845_v32 = vadd.f32 %v1844_v29, %v1843_v4  ;;  %2430 = vst.msk [vmem:[#allocation2 + $0x5a8] sm:$0xff] %vm391_vm2, %v2351_v25  ;;  %v2512_v33 = vsel %vm391_vm2, %v2351_v25, 0.0  ;;  %v2583_v2 = vmul.f32 %v2351_v25, %v2351_v25  ;;  %v510_v34 = vsel %vm391_vm2, %v350_v27, 0.0 }
 0x19f   :  { %v1997_v35 = vsel %vm391_vm2, %v1915_v30, 0.0  ;;  %v2513_v36 = vadd.f32 %v2512_v33, %v2511_v9  ;;  %427 = vst.msk [vmem:[#allocation2 + $0x118] sm:$0xff] %vm391_vm2, %v350_v27  ;;  %v511_v37 = vadd.f32 %v510_v34, %v509_v10  ;;  %v580_v38 = vmul.f32 %v350_v27, %v350_v27 }
 0x1a0   :  { %v1998_v39 = vadd.f32 %v1997_v35, %v1996_v51  ;;  %v2665_v40 = vsel %vm391_vm2, %v2583_v2, 0.0  ;;  %1095 = vst.msk [vmem:[#allocation2 + $0x2a0] sm:$0xff] %vm391_vm2, %v1018_v31  ;;  %v1178_v41 = vsel %vm391_vm2, %v1018_v31, 0.0  ;;  %v1248_v42 = vmul.f32 %v1018_v31, %v1018_v31 }
 0x1a1   :  { %v2666_v43 = vadd.f32 %v2665_v40, %v2664_v15  ;;  %v663_v44 = vsel %vm391_vm2, %v580_v38, 0.0  ;;  %v1179_v45 = vadd.f32 %v1178_v41, %v1177_v17 }
 0x1a2   :  { %v664_v46 = vadd.f32 %v663_v44, %v662_v18  ;;  %v1331_v47 = vsel %vm391_vm2, %v1248_v42, 0.0 }
 0x1a3   :  { %v1332_v48 = vadd.f32 %v1331_v47, %v1330_v21  ;;  %v1685_v49 = vpop.f32.mrf.mxu2  ;;  %v2353_v50 = vpop.f32.mrf.mxu3 }
 0x1a4   :  { %v1686_v52 = vadd.f32 %v5077_v26, %v1685_v49  ;;  %v2354_v53 = vadd.f32 %v5077_v26, %v2353_v50  ;;  %v352_v54 = vpop.f32.mrf.mxu0  ;;  %v1020_v55 = vpop.f32.mrf.mxu1 }
 0x1a5   :  { %v353_v56 = vadd.f32 %v5077_v26, %v352_v54  ;;  %v1021_v57 = vadd.f32 %v5077_v26, %v1020_v55 }
 0x1a6   :  { %1763 = vst.msk [vmem:[#allocation2 + $0x428] sm:$0xff] %vm391_vm2, %v1686_v52  ;;  %v1846_v58 = vsel %vm391_vm2, %v1686_v52, 0.0  ;;  %v1916_v59 = vmul.f32 %v1686_v52, %v1686_v52  ;;  %v2514_v60 = vsel %vm391_vm2, %v2354_v53, 0.0  ;;  %v2584_v61 = vmul.f32 %v2354_v53, %v2354_v53 }
 0x1a7   :  { %v1847_v62 = vadd.f32 %v1846_v58, %v1845_v32  ;;  %2431 = vst.msk [vmem:[#allocation2 + $0x5b0] sm:$0xff] %vm391_vm2, %v2354_v53  ;;  %v2515_v63 = vadd.f32 %v2514_v60, %v2513_v36  ;;  %v512_v0 = vsel %vm391_vm2, %v353_v56, 0.0  ;;  %v581_v1 = vmul.f32 %v353_v56, %v353_v56 }
 0x1a8   :  { %v1999_v3 = vsel %vm391_vm2, %v1916_v59, 0.0  ;;  %v2667_v4 = vsel %vm391_vm2, %v2584_v61, 0.0  ;;  %428 = vst.msk [vmem:[#allocation2 + $0x120] sm:$0xff] %vm391_vm2, %v353_v56  ;;  %v513_v5 = vadd.f32 %v512_v0, %v511_v37  ;;  %v1180_v6 = vsel %vm391_vm2, %v1021_v57, 0.0 }
 0x1a9   :  { %v2000_v7 = vadd.f32 %v1999_v3, %v1998_v39  ;;  %v2668_v8 = vadd.f32 %v2667_v4, %v2666_v43  ;;  %v665_v9 = vsel %vm391_vm2, %v581_v1, 0.0  ;;  %1096 = vst.msk [vmem:[#allocation2 + $0x2a8] sm:$0xff] %vm391_vm2, %v1021_v57  ;;  %v1181_v10 = vadd.f32 %v1180_v6, %v1179_v45 }
 0x1aa   :  { %v666_v11 = vadd.f32 %v665_v9, %v664_v46  ;;  %v1249_v51 = vmul.f32 %v1021_v57, %v1021_v57 }
 0x1ab   :  { %v1688_v12 = vpop.f32.mrf.mxu2  ;;  %v2356_v13 = vpop.f32.mrf.mxu3 }
 0x1ac   :  { %v1333_v14 = vsel %vm391_vm2, %v1249_v51, 0.0  ;;  %v1689_v15 = vadd.f32 %v5077_v26, %v1688_v12  ;;  %v2357_v16 = vadd.f32 %v5077_v26, %v2356_v13  ;;  %v355_v17 = vpop.f32.mrf.mxu0  ;;  %v1023_v18 = vpop.f32.mrf.mxu1 }
 0x1ad   :  { %v1334_v19 = vadd.f32 %v1333_v14, %v1332_v48  ;;  %v356_v20 = vadd.f32 %v5077_v26, %v355_v17  ;;  %v1024_v21 = vadd.f32 %v5077_v26, %v1023_v18 }
 0x1ae   :  { %1764 = vst.msk [vmem:[#allocation2 + $0x430] sm:$0xff] %vm391_vm2, %v1689_v15  ;;  %v1848_v22 = vsel %vm391_vm2, %v1689_v15, 0.0  ;;  %v1917_v23 = vmul.f32 %v1689_v15, %v1689_v15  ;;  %v2516_v24 = vsel %vm391_vm2, %v2357_v16, 0.0  ;;  %v2585_v25 = vmul.f32 %v2357_v16, %v2357_v16 }
 0x1af   :  { %v1849_v27 = vadd.f32 %v1848_v22, %v1847_v62  ;;  %2432 = vst.msk [vmem:[#allocation2 + $0x5b8] sm:$0xff] %vm391_vm2, %v2357_v16  ;;  %v2517_v28 = vadd.f32 %v2516_v24, %v2515_v63  ;;  %v514_v29 = vsel %vm391_vm2, %v356_v20, 0.0  ;;  %v582_v30 = vmul.f32 %v356_v20, %v356_v20 }
 0x1b0   :  { %v2001_v31 = vsel %vm391_vm2, %v1917_v23, 0.0  ;;  %v2669_v32 = vsel %vm391_vm2, %v2585_v25, 0.0  ;;  %429 = vst.msk [vmem:[#allocation2 + $0x128] sm:$0xff] %vm391_vm2, %v356_v20  ;;  %v515_v33 = vadd.f32 %v514_v29, %v513_v5  ;;  %v1182_v2 = vsel %vm391_vm2, %v1024_v21, 0.0 }
 0x1b1   :  { %v2002_v34 = vadd.f32 %v2001_v31, %v2000_v7  ;;  %v2670_v35 = vadd.f32 %v2669_v32, %v2668_v8  ;;  %v667_v36 = vsel %vm391_vm2, %v582_v30, 0.0  ;;  %1097 = vst.msk [vmem:[#allocation2 + $0x2b0] sm:$0xff] %vm391_vm2, %v1024_v21  ;;  %v1183_v37 = vadd.f32 %v1182_v2, %v1181_v10 }
 0x1b2   :  { %v668_v38 = vadd.f32 %v667_v36, %v666_v11  ;;  %v1250_v39 = vmul.f32 %v1024_v21, %v1024_v21 }
 0x1b3   :  { %v1691_v40 = vpop.f32.mrf.mxu2  ;;  %v2359_v41 = vpop.f32.mrf.mxu3 }
 0x1b4   :  { %v1335_v42 = vsel %vm391_vm2, %v1250_v39, 0.0  ;;  %v1692_v43 = vadd.f32 %v5077_v26, %v1691_v40  ;;  %v2360_v44 = vadd.f32 %v5077_v26, %v2359_v41  ;;  %v358_v45 = vpop.f32.mrf.mxu0  ;;  %v1026_v46 = vpop.f32.mrf.mxu1 }
 0x1b5   :  { %v1336_v47 = vadd.f32 %v1335_v42, %v1334_v19  ;;  %v359_v48 = vadd.f32 %v5077_v26, %v358_v45  ;;  %v1027_v49 = vadd.f32 %v5077_v26, %v1026_v46 }
 0x1b6   :  { %1765 = vst.msk [vmem:[#allocation2 + $0x438] sm:$0xff] %vm391_vm2, %v1692_v43  ;;  %v1850_v50 = vsel %vm391_vm2, %v1692_v43, 0.0  ;;  %v1918_v52 = vmul.f32 %v1692_v43, %v1692_v43  ;;  %v2518_v53 = vsel %vm391_vm2, %v2360_v44, 0.0  ;;  %v2586_v54 = vmul.f32 %v2360_v44, %v2360_v44 }
 0x1b7   :  { %v1851_v55 = vadd.f32 %v1850_v50, %v1849_v27  ;;  %2433 = vst.msk [vmem:[#allocation2 + $0x5c0] sm:$0xff] %vm391_vm2, %v2360_v44  ;;  %v2519_v56 = vadd.f32 %v2518_v53, %v2517_v28  ;;  %v516_v57 = vsel %vm391_vm2, %v359_v48, 0.0  ;;  %v583_v58 = vmul.f32 %v359_v48, %v359_v48 }
 0x1b8   :  { %v2003_v59 = vsel %vm391_vm2, %v1918_v52, 0.0  ;;  %v2671_v60 = vsel %vm391_vm2, %v2586_v54, 0.0  ;;  %430 = vst.msk [vmem:[#allocation2 + $0x130] sm:$0xff] %vm391_vm2, %v359_v48  ;;  %v517_v61 = vadd.f32 %v516_v57, %v515_v33  ;;  %v1184_v62 = vsel %vm391_vm2, %v1027_v49, 0.0 }
 0x1b9   :  { %v2004_v63 = vadd.f32 %v2003_v59, %v2002_v34  ;;  %v2672_v0 = vadd.f32 %v2671_v60, %v2670_v35  ;;  %v669_v1 = vsel %vm391_vm2, %v583_v58, 0.0  ;;  %1098 = vst.msk [vmem:[#allocation2 + $0x2b8] sm:$0xff] %vm391_vm2, %v1027_v49  ;;  %v1185_v3 = vadd.f32 %v1184_v62, %v1183_v37 }
 0x1ba   :  { %v670_v4 = vadd.f32 %v669_v1, %v668_v38  ;;  %v1251_v5 = vmul.f32 %v1027_v49, %v1027_v49 }
 0x1bb   :  { %v1694_v6 = vpop.f32.mrf.mxu2  ;;  %v2362_v7 = vpop.f32.mrf.mxu3 }
 0x1bc   :  { %v1337_v8 = vsel %vm391_vm2, %v1251_v5, 0.0  ;;  %v1695_v9 = vadd.f32 %v5077_v26, %v1694_v6  ;;  %v2363_v10 = vadd.f32 %v5077_v26, %v2362_v7  ;;  %v361_v11 = vpop.f32.mrf.mxu0  ;;  %v1029_v51 = vpop.f32.mrf.mxu1 }
 0x1bd   :  { %v1338_v12 = vadd.f32 %v1337_v8, %v1336_v47  ;;  %v362_v13 = vadd.f32 %v5077_v26, %v361_v11  ;;  %v1030_v14 = vadd.f32 %v5077_v26, %v1029_v51 }
 0x1be   :  { %1766 = vst.msk [vmem:[#allocation2 + $0x440] sm:$0xff] %vm391_vm2, %v1695_v9  ;;  %v1852_v15 = vsel %vm391_vm2, %v1695_v9, 0.0  ;;  %v1919_v16 = vmul.f32 %v1695_v9, %v1695_v9  ;;  %v2520_v17 = vsel %vm391_vm2, %v2363_v10, 0.0  ;;  %v2587_v18 = vmul.f32 %v2363_v10, %v2363_v10 }
 0x1bf   :  { %v1853_v19 = vadd.f32 %v1852_v15, %v1851_v55  ;;  %2434 = vst.msk [vmem:[#allocation2 + $0x5c8] sm:$0xff] %vm391_vm2, %v2363_v10  ;;  %v2521_v20 = vadd.f32 %v2520_v17, %v2519_v56  ;;  %v518_v21 = vsel %vm391_vm2, %v362_v13, 0.0  ;;  %v584_v22 = vmul.f32 %v362_v13, %v362_v13 }
 0x1c0   :  { %v2005_v23 = vsel %vm391_vm2, %v1919_v16, 0.0  ;;  %v2673_v24 = vsel %vm391_vm2, %v2587_v18, 0.0  ;;  %431 = vst.msk [vmem:[#allocation2 + $0x138] sm:$0xff] %vm391_vm2, %v362_v13  ;;  %v519_v25 = vadd.f32 %v518_v21, %v517_v61  ;;  %v1186_v27 = vsel %vm391_vm2, %v1030_v14, 0.0 }
 0x1c1   :  { %v2006_v28 = vadd.f32 %v2005_v23, %v2004_v63  ;;  %v2674_v29 = vadd.f32 %v2673_v24, %v2672_v0  ;;  %v671_v30 = vsel %vm391_vm2, %v584_v22, 0.0  ;;  %1099 = vst.msk [vmem:[#allocation2 + $0x2c0] sm:$0xff] %vm391_vm2, %v1030_v14  ;;  %v1187_v31 = vadd.f32 %v1186_v27, %v1185_v3 }
 0x1c2   :  { %v672_v32 = vadd.f32 %v671_v30, %v670_v4  ;;  %v1252_v33 = vmul.f32 %v1030_v14, %v1030_v14 }
 0x1c3   :  { %v1697_v2 = vpop.f32.mrf.mxu2  ;;  %v2365_v34 = vpop.f32.mrf.mxu3 }
 0x1c4   :  { %v1339_v35 = vsel %vm391_vm2, %v1252_v33, 0.0  ;;  %v1698_v36 = vadd.f32 %v5077_v26, %v1697_v2  ;;  %v2366_v37 = vadd.f32 %v5077_v26, %v2365_v34  ;;  %v364_v38 = vpop.f32.mrf.mxu0  ;;  %v1032_v39 = vpop.f32.mrf.mxu1 }
 0x1c5   :  { %v1340_v40 = vadd.f32 %v1339_v35, %v1338_v12  ;;  %v365_v41 = vadd.f32 %v5077_v26, %v364_v38  ;;  %v1033_v42 = vadd.f32 %v5077_v26, %v1032_v39 }
 0x1c6   :  { %1767 = vst.msk [vmem:[#allocation2 + $0x448] sm:$0xff] %vm391_vm2, %v1698_v36  ;;  %v1854_v43 = vsel %vm391_vm2, %v1698_v36, 0.0  ;;  %v1920_v44 = vmul.f32 %v1698_v36, %v1698_v36  ;;  %v2522_v45 = vsel %vm391_vm2, %v2366_v37, 0.0  ;;  %v2588_v46 = vmul.f32 %v2366_v37, %v2366_v37 }
 0x1c7   :  { %v1855_v47 = vadd.f32 %v1854_v43, %v1853_v19  ;;  %2435 = vst.msk [vmem:[#allocation2 + $0x5d0] sm:$0xff] %vm391_vm2, %v2366_v37  ;;  %v2523_v48 = vadd.f32 %v2522_v45, %v2521_v20  ;;  %v520_v49 = vsel %vm391_vm2, %v365_v41, 0.0  ;;  %v585_v50 = vmul.f32 %v365_v41, %v365_v41 }
 0x1c8   :  { %v2007_v52 = vsel %vm391_vm2, %v1920_v44, 0.0  ;;  %v2675_v53 = vsel %vm391_vm2, %v2588_v46, 0.0  ;;  %432 = vst.msk [vmem:[#allocation2 + $0x140] sm:$0xff] %vm391_vm2, %v365_v41  ;;  %v521_v54 = vadd.f32 %v520_v49, %v519_v25  ;;  %v1188_v55 = vsel %vm391_vm2, %v1033_v42, 0.0 }
 0x1c9   :  { %v2008_v56 = vadd.f32 %v2007_v52, %v2006_v28  ;;  %v2676_v57 = vadd.f32 %v2675_v53, %v2674_v29  ;;  %v673_v58 = vsel %vm391_vm2, %v585_v50, 0.0  ;;  %1100 = vst.msk [vmem:[#allocation2 + $0x2c8] sm:$0xff] %vm391_vm2, %v1033_v42  ;;  %v1189_v59 = vadd.f32 %v1188_v55, %v1187_v31  ;;  %v5418_v29 = vld [vmem:[%s7358_s2] ss:$0 sm:$0xff] }
 0x1ca   :  { %v674_v60 = vadd.f32 %v673_v58, %v672_v32  ;;  %v1253_v61 = vmul.f32 %v1033_v42, %v1033_v42 }
 0x1cb   :  { %v1700_v62 = vpop.f32.mrf.mxu2  ;;  %v2368_v63 = vpop.f32.mrf.mxu3 }
 0x1cc   :  { %v1341_v0 = vsel %vm391_vm2, %v1253_v61, 0.0  ;;  %v1701_v1 = vadd.f32 %v5077_v26, %v1700_v62  ;;  %v2369_v3 = vadd.f32 %v5077_v26, %v2368_v63  ;;  %v367_v4 = vpop.f32.mrf.mxu0  ;;  %v1035_v5 = vpop.f32.mrf.mxu1 }
 0x1cd   :  { %v1342_v6 = vadd.f32 %v1341_v0, %v1340_v40  ;;  %v368_v7 = vadd.f32 %v5077_v26, %v367_v4  ;;  %v1036_v8 = vadd.f32 %v5077_v26, %v1035_v5 }
 0x1ce   :  { %1768 = vst.msk [vmem:[#allocation2 + $0x450] sm:$0xff] %vm391_vm2, %v1701_v1  ;;  %v1856_v9 = vsel %vm391_vm2, %v1701_v1, 0.0  ;;  %v1921_v10 = vmul.f32 %v1701_v1, %v1701_v1  ;;  %v2524_v11 = vsel %vm391_vm2, %v2369_v3, 0.0  ;;  %v2589_v51 = vmul.f32 %v2369_v3, %v2369_v3 }
 0x1cf   :  { %v1857_v12 = vadd.f32 %v1856_v9, %v1855_v47  ;;  %2436 = vst.msk [vmem:[#allocation2 + $0x5d8] sm:$0xff] %vm391_vm2, %v2369_v3  ;;  %v2525_v13 = vadd.f32 %v2524_v11, %v2523_v48  ;;  %v522_v14 = vsel %vm391_vm2, %v368_v7, 0.0  ;;  %v586_v15 = vmul.f32 %v368_v7, %v368_v7 }
 0x1d0   :  { %v2009_v16 = vsel %vm391_vm2, %v1921_v10, 0.0  ;;  %v2677_v17 = vsel %vm391_vm2, %v2589_v51, 0.0  ;;  %433 = vst.msk [vmem:[#allocation2 + $0x148] sm:$0xff] %vm391_vm2, %v368_v7  ;;  %v523_v26 = vadd.f32 %v522_v14, %v521_v54  ;;  %v1190_v18 = vsel %vm391_vm2, %v1036_v8, 0.0 }
 0x1d1   :  { %v2010_v19 = vadd.f32 %v2009_v16, %v2008_v56  ;;  %v2678_v20 = vadd.f32 %v2677_v17, %v2676_v57  ;;  %v675_v21 = vsel %vm391_vm2, %v586_v15, 0.0  ;;  %1101 = vst.msk [vmem:[#allocation2 + $0x2d0] sm:$0xff] %vm391_vm2, %v1036_v8  ;;  %v1191_v22 = vadd.f32 %v1190_v18, %v1189_v59 }
 0x1d2   :  { %v676_v23 = vadd.f32 %v675_v21, %v674_v60  ;;  %v1254_v24 = vmul.f32 %v1036_v8, %v1036_v8 }
 0x1d3   :  { %v1703_v25 = vpop.f32.mrf.mxu2  ;;  %v2371_v27 = vpop.f32.mrf.mxu3 }
 0x1d4   :  { %v1343_v28 = vsel %vm391_vm2, %v1254_v24, 0.0  ;;  %v1704_v30 = vadd.f32 %v5418_v29, %v1703_v25  ;;  %v2372_v31 = vadd.f32 %v5418_v29, %v2371_v27  ;;  %v370_v32 = vpop.f32.mrf.mxu0  ;;  %v1038_v33 = vpop.f32.mrf.mxu1 }
 0x1d5   :  { %v1344_v2 = vadd.f32 %v1343_v28, %v1342_v6  ;;  %v371_v34 = vadd.f32 %v5418_v29, %v370_v32  ;;  %v1039_v35 = vadd.f32 %v5418_v29, %v1038_v33 }
 0x1d6   :  { %1769 = vst.msk [vmem:[#allocation2 + $0x458] sm:$0xff] %vm391_vm2, %v1704_v30  ;;  %v1858_v36 = vsel %vm391_vm2, %v1704_v30, 0.0  ;;  %v1922_v37 = vmul.f32 %v1704_v30, %v1704_v30  ;;  %v2526_v38 = vsel %vm391_vm2, %v2372_v31, 0.0  ;;  %v2590_v39 = vmul.f32 %v2372_v31, %v2372_v31 }
 0x1d7   :  { %v1859_v40 = vadd.f32 %v1858_v36, %v1857_v12  ;;  %2437 = vst.msk [vmem:[#allocation2 + $0x5e0] sm:$0xff] %vm391_vm2, %v2372_v31  ;;  %v2527_v41 = vadd.f32 %v2526_v38, %v2525_v13  ;;  %v524_v42 = vsel %vm391_vm2, %v371_v34, 0.0  ;;  %v587_v43 = vmul.f32 %v371_v34, %v371_v34 }
 0x1d8   :  { %v2011_v44 = vsel %vm391_vm2, %v1922_v37, 0.0  ;;  %v2679_v45 = vsel %vm391_vm2, %v2590_v39, 0.0  ;;  %434 = vst.msk [vmem:[#allocation2 + $0x150] sm:$0xff] %vm391_vm2, %v371_v34  ;;  %v525_v46 = vadd.f32 %v524_v42, %v523_v26  ;;  %v1192_v47 = vsel %vm391_vm2, %v1039_v35, 0.0 }
 0x1d9   :  { %v2012_v48 = vadd.f32 %v2011_v44, %v2010_v19  ;;  %v2680_v49 = vadd.f32 %v2679_v45, %v2678_v20  ;;  %v677_v50 = vsel %vm391_vm2, %v587_v43, 0.0  ;;  %1102 = vst.msk [vmem:[#allocation2 + $0x2d8] sm:$0xff] %vm391_vm2, %v1039_v35  ;;  %v1193_v52 = vadd.f32 %v1192_v47, %v1191_v22 }
 0x1da   :  { %v678_v53 = vadd.f32 %v677_v50, %v676_v23  ;;  %v1255_v54 = vmul.f32 %v1039_v35, %v1039_v35 }
 0x1db   :  { %v1706_v55 = vpop.f32.mrf.mxu2  ;;  %v2374_v56 = vpop.f32.mrf.mxu3 }
 0x1dc   :  { %v1345_v57 = vsel %vm391_vm2, %v1255_v54, 0.0  ;;  %v1707_v58 = vadd.f32 %v5418_v29, %v1706_v55  ;;  %v2375_v59 = vadd.f32 %v5418_v29, %v2374_v56  ;;  %v373_v60 = vpop.f32.mrf.mxu0  ;;  %v1041_v61 = vpop.f32.mrf.mxu1 }
 0x1dd   :  { %v1346_v62 = vadd.f32 %v1345_v57, %v1344_v2  ;;  %v374_v63 = vadd.f32 %v5418_v29, %v373_v60  ;;  %v1042_v0 = vadd.f32 %v5418_v29, %v1041_v61 }
 0x1de   :  { %1770 = vst.msk [vmem:[#allocation2 + $0x460] sm:$0xff] %vm391_vm2, %v1707_v58  ;;  %v1860_v1 = vsel %vm391_vm2, %v1707_v58, 0.0  ;;  %v1923_v3 = vmul.f32 %v1707_v58, %v1707_v58  ;;  %v2528_v4 = vsel %vm391_vm2, %v2375_v59, 0.0  ;;  %v2591_v5 = vmul.f32 %v2375_v59, %v2375_v59 }
 0x1df   :  { %v1861_v6 = vadd.f32 %v1860_v1, %v1859_v40  ;;  %2438 = vst.msk [vmem:[#allocation2 + $0x5e8] sm:$0xff] %vm391_vm2, %v2375_v59  ;;  %v2529_v7 = vadd.f32 %v2528_v4, %v2527_v41  ;;  %v526_v8 = vsel %vm391_vm2, %v374_v63, 0.0  ;;  %v588_v9 = vmul.f32 %v374_v63, %v374_v63 }
 0x1e0   :  { %v2013_v10 = vsel %vm391_vm2, %v1923_v3, 0.0  ;;  %v2681_v11 = vsel %vm391_vm2, %v2591_v5, 0.0  ;;  %435 = vst.msk [vmem:[#allocation2 + $0x158] sm:$0xff] %vm391_vm2, %v374_v63  ;;  %v527_v51 = vadd.f32 %v526_v8, %v525_v46  ;;  %v1194_v12 = vsel %vm391_vm2, %v1042_v0, 0.0 }
 0x1e1   :  { %v2014_v13 = vadd.f32 %v2013_v10, %v2012_v48  ;;  %v2682_v14 = vadd.f32 %v2681_v11, %v2680_v49  ;;  %v679_v15 = vsel %vm391_vm2, %v588_v9, 0.0  ;;  %1103 = vst.msk [vmem:[#allocation2 + $0x2e0] sm:$0xff] %vm391_vm2, %v1042_v0  ;;  %v1195_v16 = vadd.f32 %v1194_v12, %v1193_v52 }
 0x1e2   :  { %v680_v17 = vadd.f32 %v679_v15, %v678_v53  ;;  %v1256_v26 = vmul.f32 %v1042_v0, %v1042_v0 }
 0x1e3   :  { %v1709_v18 = vpop.f32.mrf.mxu2  ;;  %v2377_v19 = vpop.f32.mrf.mxu3 }
 0x1e4   :  { %v1347_v20 = vsel %vm391_vm2, %v1256_v26, 0.0  ;;  %v1710_v21 = vadd.f32 %v5418_v29, %v1709_v18  ;;  %v2378_v22 = vadd.f32 %v5418_v29, %v2377_v19  ;;  %v376_v23 = vpop.f32.mrf.mxu0  ;;  %v1044_v24 = vpop.f32.mrf.mxu1 }
 0x1e5   :  { %v1348_v25 = vadd.f32 %v1347_v20, %v1346_v62  ;;  %v377_v27 = vadd.f32 %v5418_v29, %v376_v23  ;;  %v1045_v28 = vadd.f32 %v5418_v29, %v1044_v24 }
 0x1e6   :  { %1771 = vst.msk [vmem:[#allocation2 + $0x468] sm:$0xff] %vm391_vm2, %v1710_v21  ;;  %v1862_v30 = vsel %vm391_vm2, %v1710_v21, 0.0  ;;  %v1924_v31 = vmul.f32 %v1710_v21, %v1710_v21  ;;  %v2530_v32 = vsel %vm391_vm2, %v2378_v22, 0.0  ;;  %v2592_v33 = vmul.f32 %v2378_v22, %v2378_v22 }
 0x1e7   :  { %v1863_v2 = vadd.f32 %v1862_v30, %v1861_v6  ;;  %2439 = vst.msk [vmem:[#allocation2 + $0x5f0] sm:$0xff] %vm391_vm2, %v2378_v22  ;;  %v2531_v34 = vadd.f32 %v2530_v32, %v2529_v7  ;;  %v528_v35 = vsel %vm391_vm2, %v377_v27, 0.0  ;;  %v589_v36 = vmul.f32 %v377_v27, %v377_v27 }
 0x1e8   :  { %v2015_v37 = vsel %vm391_vm2, %v1924_v31, 0.0  ;;  %v2683_v38 = vsel %vm391_vm2, %v2592_v33, 0.0  ;;  %436 = vst.msk [vmem:[#allocation2 + $0x160] sm:$0xff] %vm391_vm2, %v377_v27  ;;  %v529_v39 = vadd.f32 %v528_v35, %v527_v51  ;;  %v1196_v40 = vsel %vm391_vm2, %v1045_v28, 0.0 }
 0x1e9   :  { %v2016_v41 = vadd.f32 %v2015_v37, %v2014_v13  ;;  %v2684_v42 = vadd.f32 %v2683_v38, %v2682_v14  ;;  %v681_v43 = vsel %vm391_vm2, %v589_v36, 0.0  ;;  %1104 = vst.msk [vmem:[#allocation2 + $0x2e8] sm:$0xff] %vm391_vm2, %v1045_v28  ;;  %v1197_v44 = vadd.f32 %v1196_v40, %v1195_v16 }
 0x1ea   :  { %v682_v45 = vadd.f32 %v681_v43, %v680_v17  ;;  %v1257_v46 = vmul.f32 %v1045_v28, %v1045_v28 }
 0x1eb   :  { %v1712_v47 = vpop.f32.mrf.mxu2  ;;  %v2380_v48 = vpop.f32.mrf.mxu3 }
 0x1ec   :  { %v1349_v49 = vsel %vm391_vm2, %v1257_v46, 0.0  ;;  %v1713_v50 = vadd.f32 %v5418_v29, %v1712_v47  ;;  %v2381_v52 = vadd.f32 %v5418_v29, %v2380_v48  ;;  %v379_v53 = vpop.f32.mrf.mxu0  ;;  %v1047_v54 = vpop.f32.mrf.mxu1 }
 0x1ed   :  { %v1350_v55 = vadd.f32 %v1349_v49, %v1348_v25  ;;  %v380_v56 = vadd.f32 %v5418_v29, %v379_v53  ;;  %v1048_v57 = vadd.f32 %v5418_v29, %v1047_v54 }
 0x1ee   :  { %1772 = vst.msk [vmem:[#allocation2 + $0x470] sm:$0xff] %vm391_vm2, %v1713_v50  ;;  %v1864_v58 = vsel %vm391_vm2, %v1713_v50, 0.0  ;;  %v1925_v59 = vmul.f32 %v1713_v50, %v1713_v50  ;;  %v2532_v60 = vsel %vm391_vm2, %v2381_v52, 0.0  ;;  %v2593_v61 = vmul.f32 %v2381_v52, %v2381_v52 }
 0x1ef   :  { %v1865_v62 = vadd.f32 %v1864_v58, %v1863_v2  ;;  %2440 = vst.msk [vmem:[#allocation2 + $0x5f8] sm:$0xff] %vm391_vm2, %v2381_v52  ;;  %v2533_v63 = vadd.f32 %v2532_v60, %v2531_v34  ;;  %v530_v0 = vsel %vm391_vm2, %v380_v56, 0.0  ;;  %v590_v1 = vmul.f32 %v380_v56, %v380_v56 }
 0x1f0   :  { %v2017_v3 = vsel %vm391_vm2, %v1925_v59, 0.0  ;;  %v2685_v4 = vsel %vm391_vm2, %v2593_v61, 0.0  ;;  %437 = vst.msk [vmem:[#allocation2 + $0x168] sm:$0xff] %vm391_vm2, %v380_v56  ;;  %v531_v5 = vadd.f32 %v530_v0, %v529_v39  ;;  %v1198_v6 = vsel %vm391_vm2, %v1048_v57, 0.0 }
 0x1f1   :  { %v2018_v7 = vadd.f32 %v2017_v3, %v2016_v41  ;;  %v2686_v8 = vadd.f32 %v2685_v4, %v2684_v42  ;;  %v683_v9 = vsel %vm391_vm2, %v590_v1, 0.0  ;;  %1105 = vst.msk [vmem:[#allocation2 + $0x2f0] sm:$0xff] %vm391_vm2, %v1048_v57  ;;  %v1199_v10 = vadd.f32 %v1198_v6, %v1197_v44 }
 0x1f2   :  { %v684_v11 = vadd.f32 %v683_v9, %v682_v45  ;;  %v1258_v51 = vmul.f32 %v1048_v57, %v1048_v57 }
 0x1f3   :  { %v1715_v12 = vpop.f32.mrf.mxu2  ;;  %v2383_v13 = vpop.f32.mrf.mxu3 }
 0x1f4   :  { %v1351_v14 = vsel %vm391_vm2, %v1258_v51, 0.0  ;;  %v1716_v15 = vadd.f32 %v5418_v29, %v1715_v12  ;;  %v2384_v16 = vadd.f32 %v5418_v29, %v2383_v13  ;;  %v382_v17 = vpop.f32.mrf.mxu0  ;;  %v1050_v26 = vpop.f32.mrf.mxu1 }
 0x1f5   :  { %v1352_v18 = vadd.f32 %v1351_v14, %v1350_v55  ;;  %v383_v19 = vadd.f32 %v5418_v29, %v382_v17  ;;  %v1051_v20 = vadd.f32 %v5418_v29, %v1050_v26 }
 0x1f6   :  { %1773 = vst.msk [vmem:[#allocation2 + $0x478] sm:$0xff] %vm391_vm2, %v1716_v15  ;;  %v1866_v21 = vsel %vm391_vm2, %v1716_v15, 0.0  ;;  %v1926_v22 = vmul.f32 %v1716_v15, %v1716_v15  ;;  %v2534_v23 = vsel %vm391_vm2, %v2384_v16, 0.0  ;;  %v2594_v24 = vmul.f32 %v2384_v16, %v2384_v16 }
 0x1f7   :  { %v1867_v25 = vadd.f32 %v1866_v21, %v1865_v62  ;;  %2441 = vst.msk [vmem:[#allocation2 + $0x600] sm:$0xff] %vm391_vm2, %v2384_v16  ;;  %v2535_v27 = vadd.f32 %v2534_v23, %v2533_v63  ;;  %v532_v28 = vsel %vm391_vm2, %v383_v19, 0.0  ;;  %v591_v30 = vmul.f32 %v383_v19, %v383_v19 }
 0x1f8   :  { %v2019_v31 = vsel %vm391_vm2, %v1926_v22, 0.0  ;;  %v2687_v32 = vsel %vm391_vm2, %v2594_v24, 0.0  ;;  %438 = vst.msk [vmem:[#allocation2 + $0x170] sm:$0xff] %vm391_vm2, %v383_v19  ;;  %v533_v33 = vadd.f32 %v532_v28, %v531_v5  ;;  %v1200_v2 = vsel %vm391_vm2, %v1051_v20, 0.0 }
 0x1f9   :  { %v2020_v34 = vadd.f32 %v2019_v31, %v2018_v7  ;;  %v2688_v35 = vadd.f32 %v2687_v32, %v2686_v8  ;;  %v685_v36 = vsel %vm391_vm2, %v591_v30, 0.0  ;;  %1106 = vst.msk [vmem:[#allocation2 + $0x2f8] sm:$0xff] %vm391_vm2, %v1051_v20  ;;  %v1201_v37 = vadd.f32 %v1200_v2, %v1199_v10 }
 0x1fa   :  { %v686_v38 = vadd.f32 %v685_v36, %v684_v11  ;;  %v1259_v39 = vmul.f32 %v1051_v20, %v1051_v20 }
 0x1fb   :  { %v1718_v40 = vpop.f32.mrf.mxu2  ;;  %v2386_v41 = vpop.f32.mrf.mxu3 }
 0x1fc   :  { %v1353_v42 = vsel %vm391_vm2, %v1259_v39, 0.0  ;;  %v1719_v43 = vadd.f32 %v5418_v29, %v1718_v40  ;;  %v2387_v44 = vadd.f32 %v5418_v29, %v2386_v41  ;;  %v385_v45 = vpop.f32.mrf.mxu0  ;;  %v1053_v46 = vpop.f32.mrf.mxu1 }
 0x1fd   :  { %v1354_v47 = vadd.f32 %v1353_v42, %v1352_v18  ;;  %v386_v48 = vadd.f32 %v5418_v29, %v385_v45  ;;  %v1054_v49 = vadd.f32 %v5418_v29, %v1053_v46 }
 0x1fe   :  { %1774 = vst.msk [vmem:[#allocation2 + $0x480] sm:$0xff] %vm391_vm2, %v1719_v43  ;;  %v1868_v50 = vsel %vm391_vm2, %v1719_v43, 0.0  ;;  %v1927_v52 = vmul.f32 %v1719_v43, %v1719_v43  ;;  %v2536_v53 = vsel %vm391_vm2, %v2387_v44, 0.0  ;;  %v2595_v54 = vmul.f32 %v2387_v44, %v2387_v44 }
 0x1ff   :  { %v1869_v55 = vadd.f32 %v1868_v50, %v1867_v25  ;;  %2442 = vst.msk [vmem:[#allocation2 + $0x608] sm:$0xff] %vm391_vm2, %v2387_v44  ;;  %v2537_v56 = vadd.f32 %v2536_v53, %v2535_v27  ;;  %v534_v57 = vsel %vm391_vm2, %v386_v48, 0.0  ;;  %v592_v58 = vmul.f32 %v386_v48, %v386_v48 }
 0x200   :  { %v2021_v59 = vsel %vm391_vm2, %v1927_v52, 0.0  ;;  %v2689_v60 = vsel %vm391_vm2, %v2595_v54, 0.0  ;;  %439 = vst.msk [vmem:[#allocation2 + $0x178] sm:$0xff] %vm391_vm2, %v386_v48  ;;  %v535_v61 = vadd.f32 %v534_v57, %v533_v33  ;;  %v1202_v62 = vsel %vm391_vm2, %v1054_v49, 0.0 }
 0x201   :  { %v2022_v63 = vadd.f32 %v2021_v59, %v2020_v34  ;;  %v2690_v0 = vadd.f32 %v2689_v60, %v2688_v35  ;;  %v687_v1 = vsel %vm391_vm2, %v592_v58, 0.0  ;;  %1107 = vst.msk [vmem:[#allocation2 + $0x300] sm:$0xff] %vm391_vm2, %v1054_v49  ;;  %v1203_v3 = vadd.f32 %v1202_v62, %v1201_v37 }
 0x202   :  { %v688_v4 = vadd.f32 %v687_v1, %v686_v38  ;;  %v1260_v5 = vmul.f32 %v1054_v49, %v1054_v49 }
 0x203   :  { %v1721_v6 = vpop.f32.mrf.mxu2  ;;  %v2389_v7 = vpop.f32.mrf.mxu3 }
 0x204   :  { %v1355_v8 = vsel %vm391_vm2, %v1260_v5, 0.0  ;;  %v1722_v9 = vadd.f32 %v5418_v29, %v1721_v6  ;;  %v2390_v10 = vadd.f32 %v5418_v29, %v2389_v7  ;;  %v388_v11 = vpop.f32.mrf.mxu0  ;;  %v1056_v51 = vpop.f32.mrf.mxu1 }
 0x205   :  { %v1356_v12 = vadd.f32 %v1355_v8, %v1354_v47  ;;  %v389_v13 = vadd.f32 %v5418_v29, %v388_v11  ;;  %v1057_v14 = vadd.f32 %v5418_v29, %v1056_v51 }
 0x206   :  { %1775 = vst.msk [vmem:[#allocation2 + $0x488] sm:$0xff] %vm391_vm2, %v1722_v9  ;;  %v1870_v15 = vsel %vm391_vm2, %v1722_v9, 0.0  ;;  %v1928_v16 = vmul.f32 %v1722_v9, %v1722_v9  ;;  %v2538_v17 = vsel %vm391_vm2, %v2390_v10, 0.0  ;;  %v2596_v26 = vmul.f32 %v2390_v10, %v2390_v10 }
 0x207   :  { %v1871_v18 = vadd.f32 %v1870_v15, %v1869_v55  ;;  %2443 = vst.msk [vmem:[#allocation2 + $0x610] sm:$0xff] %vm391_vm2, %v2390_v10  ;;  %v2539_v19 = vadd.f32 %v2538_v17, %v2537_v56  ;;  %v536_v20 = vsel %vm391_vm2, %v389_v13, 0.0  ;;  %v593_v21 = vmul.f32 %v389_v13, %v389_v13 }
 0x208   :  { %v2023_v22 = vsel %vm391_vm2, %v1928_v16, 0.0  ;;  %v2691_v23 = vsel %vm391_vm2, %v2596_v26, 0.0  ;;  %440 = vst.msk [vmem:[#allocation2 + $0x180] sm:$0xff] %vm391_vm2, %v389_v13  ;;  %v537_v24 = vadd.f32 %v536_v20, %v535_v61  ;;  %v1204_v25 = vsel %vm391_vm2, %v1057_v14, 0.0 }
 0x209   :  { %v2024_v27 = vadd.f32 %v2023_v22, %v2022_v63  ;;  %v2692_v28 = vadd.f32 %v2691_v23, %v2690_v0  ;;  %v689_v30 = vsel %vm391_vm2, %v593_v21, 0.0  ;;  %1108 = vst.msk [vmem:[#allocation2 + $0x308] sm:$0xff] %vm391_vm2, %v1057_v14  ;;  %v1205_v31 = vadd.f32 %v1204_v25, %v1203_v3 }
 0x20a   :  { %v538_v32 = vrot.slane %v537_v24, 4  ;;  %v690_v33 = vadd.f32 %v689_v30, %v688_v4  ;;  %v1261_v2 = vmul.f32 %v1057_v14, %v1057_v14 }
 0x20b   :  { %v1206_v34 = vrot.slane %v1205_v31, 4  ;;  %v1724_v35 = vpop.f32.mrf.mxu2  ;;  %v2392_v36 = vpop.f32.mrf.mxu3 }
 0x20c   :  { %v539_v37 = vadd.f32 %v538_v32, %v537_v24  ;;  %v691_v38 = vrot.slane %v690_v33, 4  ;;  %v1357_v39 = vsel %vm391_vm2, %v1261_v2, 0.0  ;;  %v1725_v40 = vadd.f32 %v5418_v29, %v1724_v35 }
 0x20d   :  { %v1207_v41 = vadd.f32 %v1206_v34, %v1205_v31  ;;  %v1358_v42 = vadd.f32 %v1357_v39, %v1356_v12  ;;  %v2393_v43 = vadd.f32 %v5418_v29, %v2392_v36 }
 0x20e   :  { %v540_v44 = vrot.slane %v539_v37, 2  ;;  %v692_v45 = vadd.f32 %v691_v38, %v690_v33  ;;  %1776 = vst.msk [vmem:[#allocation2 + $0x490] sm:$0xff] %vm391_vm2, %v1725_v40  ;;  %v1872_v46 = vsel %vm391_vm2, %v1725_v40, 0.0  ;;  %v1929_v47 = vmul.f32 %v1725_v40, %v1725_v40 }
 0x20f   :  { %v1208_v48 = vrot.slane %v1207_v41, 2  ;;  %v1359_v49 = vrot.slane %v1358_v42, 4  ;;  %v1873_v50 = vadd.f32 %v1872_v46, %v1871_v18  ;;  %2444 = vst.msk [vmem:[#allocation2 + $0x618] sm:$0xff] %vm391_vm2, %v2393_v43  ;;  %v2540_v52 = vsel %vm391_vm2, %v2393_v43, 0.0 }
 0x210   :  { %v541_v53 = vadd.f32 %v540_v44, %v539_v37  ;;  %v693_v54 = vrot.slane %v692_v45, 2  ;;  %v2025_v55 = vsel %vm391_vm2, %v1929_v47, 0.0  ;;  %v2541_v56 = vadd.f32 %v2540_v52, %v2539_v19 }
 0x211   :  { %v1209_v29 = vadd.f32 %v1208_v48, %v1207_v41  ;;  %v1360_v57 = vadd.f32 %v1359_v49, %v1358_v42  ;;  %v1874_v58 = vrot.slane %v1873_v50, 4  ;;  %v2026_v59 = vadd.f32 %v2025_v55, %v2024_v27  ;;  %v2723_v55 = vld [vmem:[#allocation2 + $0x8] sm:$0xff] }
 0x212   :  { %v542_v60 = vrot.slane %v541_v53, 1  ;;  %v694_v61 = vadd.f32 %v693_v54, %v692_v45  ;;  %v2542_v62 = vrot.slane %v2541_v56, 4  ;;  %v2597_v63 = vmul.f32 %v2393_v43, %v2393_v43  ;;  %v2722_v54 = vld [vmem:[#allocation2] sm:$0xff] }
 0x213   :  { %v1210_v0 = vrot.slane %v1209_v29, 1  ;;  %v1361_v1 = vrot.slane %v1360_v57, 2  ;;  %v1875_v3 = vadd.f32 %v1874_v58, %v1873_v50  ;;  %v2027_v4 = vrot.slane %v2026_v59, 4  ;;  %v2717_v50 = vld [vmem:[%s7359_s3] sm:$0x1] }
 0x214   :  { %v543_v5 = vadd.f32 %v542_v60, %v541_v53  ;;  %v695_v6 = vrot.slane %v694_v61, 1  ;;  %v2543_v7 = vadd.f32 %v2542_v62, %v2541_v56  ;;  %v2693_v8 = vsel %vm391_vm2, %v2597_v63, 0.0  ;;  %v2724_v56 = vld [vmem:[#allocation2 + $0x10] sm:$0xff]  ;;  %v2726_v58 = vld [vmem:[#allocation2 + $0x20] sm:$0xff]  ;;  %v2729_v63 = vld [vmem:[#allocation2 + $0x38] sm:$0xff] }
 0x215   :  { %v1211_v9 = vadd.f32 %v1210_v0, %v1209_v29  ;;  %v1362_v10 = vadd.f32 %v1361_v1, %v1360_v57  ;;  %v1876_v11 = vrot.slane %v1875_v3, 2  ;;  %v2028_v51 = vadd.f32 %v2027_v4, %v2026_v59  ;;  %v5546_v29 = vld [vmem:[%s7360_s4] sm:$0x1]  ;;  %v2725_v57 = vld [vmem:[#allocation2 + $0x18] sm:$0xff]  ;;  %v2727_v59 = vld [vmem:[#allocation2 + $0x28] sm:$0xff] }
 0x216   :  { %v696_v12 = vadd.f32 %v695_v6, %v694_v61  ;;  %v2544_v13 = vrot.slane %v2543_v7, 2  ;;  %v2694_v14 = vadd.f32 %v2693_v8, %v2692_v28  ;;  %v2728_v60 = vld [vmem:[#allocation2 + $0x30] sm:$0xff]  ;;  %v2730_v0 = vld [vmem:[#allocation2 + $0x40] sm:$0xff]  ;;  %v2731_v1 = vld [vmem:[#allocation2 + $0x48] sm:$0xff] }
 0x217   :  { %v1212_v15 = vadd.f32 %v1211_v9, %v543_v5  ;;  %v1363_v16 = vrot.slane %v1362_v10, 1  ;;  %v1877_v17 = vadd.f32 %v1876_v11, %v1875_v3  ;;  %v2029_v26 = vrot.slane %v2028_v51, 2  ;;  %v2732_v3 = vld [vmem:[#allocation2 + $0x50] sm:$0xff]  ;;  %v2733_v4 = vld [vmem:[#allocation2 + $0x58] sm:$0xff]  ;;  %v2734_v5 = vld [vmem:[#allocation2 + $0x60] sm:$0xff] }
 0x218   :  { %v2545_v18 = vadd.f32 %v2544_v13, %v2543_v7  ;;  %v2695_v19 = vrot.slane %v2694_v14, 4  ;;  %v2735_v6 = vld [vmem:[#allocation2 + $0x68] sm:$0xff]  ;;  %v2736_v7 = vld [vmem:[#allocation2 + $0x70] sm:$0xff] }
 0x219   :  { %v1364_v20 = vadd.f32 %v1363_v16, %v1362_v10  ;;  %v1878_v21 = vrot.slane %v1877_v17, 1  ;;  %v2030_v22 = vadd.f32 %v2029_v26, %v2028_v51  ;;  %v2737_v51 = vld [vmem:[#allocation2 + $0x78] sm:$0xff]  ;;  %v2739_v13 = vld [vmem:[#allocation2 + $0x88] sm:$0xff] }
 0x21a   :  { %v2546_v23 = vrot.slane %v2545_v18, 1  ;;  %v2696_v24 = vadd.f32 %v2695_v19, %v2694_v14  ;;  %v2740_v14 = vld [vmem:[#allocation2 + $0x90] sm:$0xff]  ;;  %v2742_v19 = vld [vmem:[#allocation2 + $0xa0] sm:$0xff] }
 0x21b   :  { %v1365_v25 = vadd.f32 %v1364_v20, %v696_v12  ;;  %v1879_v27 = vadd.f32 %v1878_v21, %v1877_v17  ;;  %v2031_v30 = vrot.slane %v2030_v22, 1  ;;  %v2738_v12 = vld [vmem:[#allocation2 + $0x80] sm:$0xff]  ;;  %v2743_v20 = vld [vmem:[#allocation2 + $0xa8] sm:$0xff]  ;;  %v2744_v21 = vld [vmem:[#allocation2 + $0xb0] sm:$0xff] }
 0x21c   :  { %v2697_v31 = vrot.slane %v2696_v24, 2  ;;  %v2547_v2 = vadd.f32 %v2546_v23, %v2545_v18  ;;  %v2741_v18 = vld [vmem:[#allocation2 + $0x98] sm:$0xff] }
 0x21d   :  { %v1880_v32 = vadd.f32 %v1879_v27, %v1212_v15  ;;  %v2032_v33 = vadd.f32 %v2031_v30, %v2030_v22  ;;  %v2745_v27 = vld [vmem:[#allocation2 + $0xb8] sm:$0xff]  ;;  %v2746_v30 = vld [vmem:[#allocation2 + $0xc0] sm:$0xff] }
 0x21e   :  { %v2698_v34 = vadd.f32 %v2697_v31, %v2696_v24  ;;  %v2747_v31 = vld [vmem:[#allocation2 + $0xc8] sm:$0xff] }
 0x21f   :  { %v2033_v28 = vadd.f32 %v2032_v33, %v1365_v25  ;;  %v2548_v35 = vadd.f32 %v2547_v2, %v1880_v32 }
 0x220   :  { %v2699_v36 = vrot.slane %v2698_v34, 1 }
 0x221   :  { %v2702_v37 = vmul.f32 0.0006377551, %v2548_v35  ;;  %v2749_v35 = vld [vmem:[#allocation2 + $0xd8] sm:$0xff] }
 0x222   :  { %v2700_v38 = vadd.f32 %v2699_v36, %v2698_v34  ;;  %v2750_v36 = vld [vmem:[#allocation2 + $0xe0] sm:$0xff] }
 0x223   :  { %v2704_v40 = vmul.f32 %v2702_v37, %v2702_v37 }
 0x224   :  { %v2701_v39 = vadd.f32 %v2700_v38, %v2033_v28  ;;  %v2748_v28 = vld [vmem:[#allocation2 + $0xd0] sm:$0xff] }
 0x226   :  { %v2703_v41 = vmul.f32 0.0006377551, %v2701_v39 }
 0x228   :  { %v2705_v42 = vsub.f32 %v2703_v41, %v2704_v40  ;;  %v2751_v41 = vld [vmem:[#allocation2 + $0xe8] sm:$0xff] }
 0x22a   :  { %v2706_v43 = vadd.f32 1e-05, %v2705_v42  ;;  %v2752_v42 = vld [vmem:[#allocation2 + $0xf0] sm:$0xff] }
 0x22c   :  { %3911 = vrsqrt.f32 %v2706_v43  ;;  %vm2713_vm4 = vweird.f32 %v2706_v43 }
 0x232   :  { %v3912_v44 = vpop.eup %3911 }
 0x233   :  { %v2708_v45 = vmul.f32 %v3912_v44, %v2706_v43  ;;  %vm2714_vm3 = vweird.f32 %v3912_v44  ;;  %v2753_v43 = vld [vmem:[#allocation2 + $0xf8] sm:$0xff] }
 0x234   :  { %vm2715_vm5 = vmor %vm2713_vm4, %vm2714_vm3 }
 0x235   :  { %v2709_v46 = vmul.f32 %v3912_v44, %v2708_v45 }
 0x237   :  { %v2710_v47 = vmul.f32 0.5, %v2709_v46 }
 0x239   :  { %v2711_v48 = vsub.f32 1.5, %v2710_v47 }
 0x23b   :  { %v2712_v49 = vmul.f32 %v3912_v44, %v2711_v48  ;;  %v2754_v48 = vld [vmem:[#allocation2 + $0x100] sm:$0xff] }
 0x23d   :  { %v2716_v52 = vsel %vm2715_vm5, %v3912_v44, %v2712_v49  ;;  %v2755_v49 = vld [vmem:[#allocation2 + $0x108] sm:$0xff] }
 0x23e   :  { %v2718_v53 = vmul.f32 %v2717_v50, %v2716_v52  ;;  %v2756_v50 = vld [vmem:[#allocation2 + $0x110] sm:$0xff] }
 0x240   :  { %v5548_v61 = vmul.f32 %v2718_v53, %v2702_v37  ;;  %v5550_v62 = vperm.slane %v2718_v53, 0 }
 0x242   :  { %7519 = vst [vmem:[#allocation3_spill] sm:$0xff] %v5550_v62  ;;  %v2721_v8 = vsub.f32 %v5546_v29, %v5548_v61  ;;  %v5555_v9 = vmul.f32 %v5550_v62, %v2722_v54  ;;  %v5558_v10 = vmul.f32 %v5550_v62, %v2723_v55  ;;  %v5561_v11 = vmul.f32 %v5550_v62, %v2724_v56  ;;  %v2757_v56 = vld [vmem:[#allocation2 + $0x118] sm:$0xff] }
 0x243   :  { %v5564_v15 = vmul.f32 %v5550_v62, %v2725_v57  ;;  %v5567_v16 = vmul.f32 %v5550_v62, %v2726_v58  ;;  %v5570_v17 = vmul.f32 %v5550_v62, %v2727_v59  ;;  %v5573_v26 = vmul.f32 %v5550_v62, %v2728_v60  ;;  %v2758_v57 = vld [vmem:[#allocation2 + $0x120] sm:$0xff]  ;;  %v2759_v58 = vld [vmem:[#allocation2 + $0x128] sm:$0xff] }
 0x244   :  { %v5576_v22 = vmul.f32 %v5550_v62, %v2729_v63  ;;  %v5579_v23 = vmul.f32 %v5550_v62, %v2730_v0  ;;  %v5582_v24 = vmul.f32 %v5550_v62, %v2731_v1  ;;  %v5585_v25 = vmul.f32 %v5550_v62, %v2732_v3  ;;  %v2760_v1 = vld [vmem:[#allocation2 + $0x130] sm:$0xff]  ;;  %v2761_v3 = vld [vmem:[#allocation2 + $0x138] sm:$0xff] }
 0x245   :  { %v5588_v32 = vmul.f32 %v5550_v62, %v2733_v4  ;;  %v5591_v33 = vmul.f32 %v5550_v62, %v2734_v5  ;;  %v5594_v2 = vmul.f32 %v5550_v62, %v2735_v6  ;;  %v5597_v34 = vmul.f32 %v5550_v62, %v2736_v7  ;;  %v2762_v4 = vld [vmem:[#allocation2 + $0x140] sm:$0xff] }
 0x246   :  { %v5600_v37 = vmul.f32 %v5550_v62, %v2737_v51  ;;  %v5603_v38 = vmul.f32 %v5550_v62, %v2738_v12  ;;  %v5606_v39 = vmul.f32 %v5550_v62, %v2739_v13  ;;  %v5609_v40 = vmul.f32 %v5550_v62, %v2740_v14  ;;  %v2873_v12 = vld [vmem:[#allocation2 + $0x188] sm:$0xff]  ;;  %v2764_v14 = vld [vmem:[#allocation2 + $0x150] sm:$0xff] }
 0x247   :  { %v5612_v44 = vmul.f32 %v5550_v62, %v2741_v18  ;;  %v5615_v45 = vmul.f32 %v5550_v62, %v2742_v19  ;;  %v5618_v46 = vmul.f32 %v5550_v62, %v2743_v20  ;;  %v5621_v47 = vmul.f32 %v5550_v62, %v2744_v21  ;;  %v2763_v13 = vld [vmem:[#allocation2 + $0x148] sm:$0xff]  ;;  %v2765_v18 = vld [vmem:[#allocation2 + $0x158] sm:$0xff] }
 0x248   :  { %v5624_v52 = vmul.f32 %v5550_v62, %v2745_v27  ;;  %v5627_v53 = vmul.f32 %v5550_v62, %v2746_v30  ;;  %v5630_v54 = vmul.f32 %v5550_v62, %v2747_v31  ;;  %v5633_v55 = vmul.f32 %v5550_v62, %v2748_v28  ;;  %v2766_v30 = vld [vmem:[#allocation2 + $0x160] sm:$0xff]  ;;  %v2767_v31 = vld [vmem:[#allocation2 + $0x168] sm:$0xff]  ;;  %v2768_v28 = vld [vmem:[#allocation2 + $0x170] sm:$0xff] }
 0x249   :  { %v5636_v59 = vmul.f32 %v5550_v62, %v2749_v35  ;;  %v5639_v60 = vmul.f32 %v5550_v62, %v2750_v36  ;;  %v5642_v63 = vmul.f32 %v5550_v62, %v2751_v41  ;;  %v5645_v0 = vmul.f32 %v5550_v62, %v2752_v42 }
 0x24a   :  { %v5648_v5 = vmul.f32 %v5550_v62, %v2753_v43  ;;  %v5651_v6 = vmul.f32 %v5550_v62, %v2754_v48  ;;  %v5654_v7 = vmul.f32 %v5550_v62, %v2755_v49  ;;  %v5657_v51 = vmul.f32 %v5550_v62, %v2756_v50  ;;  %v2874_v43 = vld [vmem:[#allocation2 + $0x190] sm:$0xff]  ;;  %v2769_v48 = vld [vmem:[#allocation2 + $0x178] sm:$0xff]  ;;  %v2770_v49 = vld [vmem:[#allocation2 + $0x180] sm:$0xff] }
 0x24b   :  { %v5660_v19 = vmul.f32 %v5550_v62, %v2757_v56  ;;  %v5663_v20 = vmul.f32 %v5550_v62, %v2758_v57  ;;  %v5666_v21 = vmul.f32 %v5550_v62, %v2759_v58  ;;  %v5669_v27 = vmul.f32 %v5550_v62, %v2760_v1  ;;  %v2875_v1 = vld [vmem:[#allocation2 + $0x198] sm:$0xff] }
 0x24c   :  { %v5672_v35 = vmul.f32 %v5550_v62, %v2761_v3  ;;  %v5675_v36 = vmul.f32 %v5550_v62, %v2762_v4  ;;  %v5678_v41 = vmul.f32 %v5550_v62, %v2763_v13  ;;  %v5681_v42 = vmul.f32 %v5550_v62, %v2764_v14  ;;  %v2876_v3 = vld [vmem:[#allocation2 + $0x1a0] sm:$0xff]  ;;  %v2877_v4 = vld [vmem:[#allocation2 + $0x1a8] sm:$0xff] }
 0x24d   :  { %v5684_v50 = vmul.f32 %v5550_v62, %v2765_v18  ;;  %v5687_v56 = vmul.f32 %v5550_v62, %v2766_v30  ;;  %v5690_v57 = vmul.f32 %v5550_v62, %v2767_v31  ;;  %v5693_v58 = vmul.f32 %v5550_v62, %v2768_v28 }
 0x24e   :  { %v5696_v13 = vmul.f32 %v5550_v62, %v2769_v48  ;;  %v5699_v14 = vmul.f32 %v5550_v62, %v2770_v49  ;;  %v5704_v18 = vperm.slane %v2721_v8, 0  ;;  %v5707_v30 = vmul.f32 %v2873_v12, %v5550_v62 }
 0x24f   :  { %v5710_v31 = vmul.f32 %v2874_v43, %v5550_v62  ;;  %v5713_v28 = vmul.f32 %v2875_v1, %v5550_v62  ;;  %v5716_v48 = vmul.f32 %v2876_v3, %v5550_v62  ;;  %v5719_v49 = vmul.f32 %v2877_v4, %v5550_v62  ;;  %v2878_v1 = vld [vmem:[#allocation2 + $0x1b0] sm:$0xff]  ;;  %v2879_v3 = vld [vmem:[#allocation2 + $0x1b8] sm:$0xff] }
 0x250   :  { %7520 = vst [vmem:[#allocation4_spill] sm:$0xff] %v5704_v18  ;;  %v5723_v29 = vadd.f32 %v5704_v18, %v5555_v9  ;;  %v5727_v61 = vadd.f32 %v5704_v18, %v5558_v10  ;;  %v5731_v8 = vadd.f32 %v5704_v18, %v5561_v11  ;;  %v5735_v12 = vadd.f32 %v5704_v18, %v5564_v15 }
 0x251   :  { %v5739_v43 = vadd.f32 %v5704_v18, %v5567_v16  ;;  %v5743_v9 = vadd.f32 %v5704_v18, %v5570_v17  ;;  %v5747_v10 = vadd.f32 %v5704_v18, %v5573_v26  ;;  %v5751_v11 = vadd.f32 %v5704_v18, %v5576_v22 }
 0x252   :  { %7521 = vst [vmem:[#allocation5_spill] sm:$0xff] %v5735_v12  ;;  %v5755_v15 = vadd.f32 %v5704_v18, %v5579_v23  ;;  %v5759_v16 = vadd.f32 %v5704_v18, %v5582_v24  ;;  %v5763_v17 = vadd.f32 %v5704_v18, %v5585_v25  ;;  %v5767_v26 = vadd.f32 %v5704_v18, %v5588_v32 }
 0x253   :  { %7522 = vst [vmem:[#allocation6_spill] sm:$0xff] %v5739_v43  ;;  %v5771_v22 = vadd.f32 %v5704_v18, %v5591_v33  ;;  %v5775_v23 = vadd.f32 %v5704_v18, %v5594_v2  ;;  %v5779_v24 = vadd.f32 %v5704_v18, %v5597_v34  ;;  %v5783_v25 = vadd.f32 %v5704_v18, %v5600_v37 }
 0x254   :  { %7523 = vst [vmem:[#allocation7_spill] sm:$0xff] %v5743_v9  ;;  %v5787_v32 = vadd.f32 %v5704_v18, %v5603_v38  ;;  %v5791_v33 = vadd.f32 %v5704_v18, %v5606_v39  ;;  %v5795_v2 = vadd.f32 %v5704_v18, %v5609_v40  ;;  %v5799_v34 = vadd.f32 %v5704_v18, %v5612_v44  ;;  %v2921_v9 = vld [vmem:[#allocation2 + $0x308] sm:$0xff] }
 0x255   :  { %7524 = vst [vmem:[#allocation8_spill] sm:$0xff] %v5747_v10  ;;  %v5803_v37 = vadd.f32 %v5704_v18, %v5615_v45  ;;  %v5807_v38 = vadd.f32 %v5704_v18, %v5618_v46  ;;  %v5811_v39 = vadd.f32 %v5704_v18, %v5621_v47  ;;  %v5815_v40 = vadd.f32 %v5704_v18, %v5624_v52 }
 0x256   :  { %7525 = vst [vmem:[#allocation9_spill] sm:$0xff] %v5751_v11  ;;  %v5819_v44 = vadd.f32 %v5704_v18, %v5627_v53  ;;  %v5823_v45 = vadd.f32 %v5704_v18, %v5630_v54  ;;  %v5827_v46 = vadd.f32 %v5704_v18, %v5633_v55  ;;  %v5831_v47 = vadd.f32 %v5704_v18, %v5636_v59  ;;  %v2919_v11 = vld [vmem:[#allocation2 + $0x2f8] sm:$0xff] }
 0x257   :  { %7526 = vst [vmem:[#allocation10_spill] sm:$0xff] %v5755_v15  ;;  %v5835_v52 = vadd.f32 %v5704_v18, %v5639_v60  ;;  %v5839_v53 = vadd.f32 %v5704_v18, %v5642_v63  ;;  %v5843_v54 = vadd.f32 %v5704_v18, %v5645_v0  ;;  %v5847_v55 = vadd.f32 %v5704_v18, %v5648_v5  ;;  %v2880_v5 = vld [vmem:[#allocation2 + $0x1c0] sm:$0xff]  ;;  %v2918_v15 = vld [vmem:[#allocation2 + $0x2f0] sm:$0xff] }
 0x258   :  { %7527 = vst [vmem:[#allocation11_spill] sm:$0xff] %v5759_v16  ;;  %v5851_v59 = vadd.f32 %v5704_v18, %v5651_v6  ;;  %v5855_v60 = vadd.f32 %v5704_v18, %v5654_v7  ;;  %v5859_v63 = vadd.f32 %v5704_v18, %v5657_v51  ;;  %v5863_v0 = vadd.f32 %v5704_v18, %v5660_v19  ;;  %v2881_v19 = vld [vmem:[#allocation2 + $0x1c8] sm:$0xff] }
 0x259   :  { %7528 = vst [vmem:[#allocation12_spill] sm:$0xff] %v5763_v17  ;;  %v5867_v4 = vadd.f32 %v5704_v18, %v5663_v20  ;;  %v5871_v6 = vadd.f32 %v5704_v18, %v5666_v21  ;;  %v5875_v7 = vadd.f32 %v5704_v18, %v5669_v27  ;;  %v5879_v51 = vadd.f32 %v5704_v18, %v5672_v35  ;;  %v2916_v17 = vld [vmem:[#allocation2 + $0x2e0] sm:$0xff] }
 0x25a   :  { %7529 = vst [vmem:[#allocation13_spill] sm:$0xff] %v5767_v26  ;;  %v5883_v20 = vadd.f32 %v5704_v18, %v5675_v36  ;;  %v5887_v21 = vadd.f32 %v5704_v18, %v5678_v41  ;;  %v5891_v27 = vadd.f32 %v5704_v18, %v5681_v42  ;;  %v5895_v35 = vadd.f32 %v5704_v18, %v5684_v50  ;;  %v2915_v26 = vld [vmem:[#allocation2 + $0x2d8] sm:$0xff] }
 0x25b   :  { %7530 = vst [vmem:[#allocation14_spill] sm:$0xff] %v5771_v22  ;;  %v5899_v36 = vadd.f32 %v5704_v18, %v5687_v56  ;;  %v5903_v41 = vadd.f32 %v5704_v18, %v5690_v57  ;;  %v5907_v42 = vadd.f32 %v5704_v18, %v5693_v58  ;;  %v5911_v50 = vadd.f32 %v5704_v18, %v5696_v13  ;;  %v2894_v13 = vld [vmem:[#allocation2 + $0x230] sm:$0xff] }
 0x25c   :  { %7531 = vst [vmem:[#allocation15_spill] sm:$0xff] %v5775_v23  ;;  %v5915_v56 = vadd.f32 %v5704_v18, %v5699_v14  ;;  %v5921_v57 = vmul.f32 %v2879_v3, %v5550_v62  ;;  %v5924_v58 = vmul.f32 %v2880_v5, %v5550_v62  ;;  %v2897_v3 = vld [vmem:[#allocation2 + $0x248] sm:$0xff]  ;;  %v2899_v5 = vld [vmem:[#allocation2 + $0x258] sm:$0xff]  ;;  %v2965_v10 = vmul.f32 %v2916_v17, %v5550_v62 }
 0x25d   :  { %7532 = vst [vmem:[#allocation16_spill] sm:$0xff] %v5779_v24  ;;  %v2912_v24 = vld [vmem:[#allocation2 + $0x2c0] sm:$0xff]  ;;  %v2913_v23 = vld [vmem:[#allocation2 + $0x2c8] sm:$0xff]  ;;  %v2970_v43 = vmul.f32 %v2921_v9, %v5550_v62  ;;  %v6009_v17 = vadd.f32 %v5713_v28, %v5704_v18 }
 0x25e   :  { %7533 = vst [vmem:[#allocation17_spill] sm:$0xff] %v5783_v25  ;;  %v2961_v16 = vmul.f32 %v2912_v24, %v5550_v62  ;;  %v6029_v28 = vadd.f32 %v5924_v58, %v5704_v18 }
 0x25f   :  { %7534 = vst [vmem:[#allocation18_spill] sm:$0xff] %v5787_v32 }
 0x260   :  { %7535 = vst [vmem:[#allocation19_spill] sm:$0xff] %v5791_v33  ;;  %v2911_v33 = vld [vmem:[#allocation2 + $0x2b8] sm:$0xff] }
 0x261   :  { %7536 = vst [vmem:[#allocation20_spill] sm:$0xff] %v5795_v2  ;;  %v2909_v2 = vld [vmem:[#allocation2 + $0x2a8] sm:$0xff] }
 0x262   :  { %7537 = vst [vmem:[#allocation21_spill] sm:$0xff] %v5799_v34  ;;  %v2948_v34 = vmul.f32 %v2899_v5, %v5550_v62 }
 0x263   :  { %7538 = vst [vmem:[#allocation22_spill] sm:$0xff] %v5803_v37 }
 0x264   :  { %7539 = vst [vmem:[#allocation23_spill] sm:$0xff] %v5807_v38  ;;  %v2908_v38 = vld [vmem:[#allocation2 + $0x2a0] sm:$0xff] }
 0x265   :  { %7540 = vst [vmem:[#allocation24_spill] sm:$0xff] %v5811_v39  ;;  %v2907_v39 = vld [vmem:[#allocation2 + $0x298] sm:$0xff]  ;;  %v2957_v22 = vmul.f32 %v2908_v38, %v5550_v62  ;;  %v2964_v38 = vmul.f32 %v2915_v26, %v5550_v62  ;;  %v6005_v26 = vadd.f32 %v5710_v31, %v5704_v18  ;;  %v6025_v31 = vadd.f32 %v5921_v57, %v5704_v18 }
 0x266   :  { %7541 = vst [vmem:[#allocation25_spill] sm:$0xff] %v5815_v40  ;;  %v5966_v40 = vmul.f32 %v2894_v13, %v5550_v62  ;;  %v2910_v13 = vld [vmem:[#allocation2 + $0x2b0] sm:$0xff] }
 0x267   :  { %7542 = vst [vmem:[#allocation26_spill] sm:$0xff] %v5819_v44  ;;  %v2905_v44 = vld [vmem:[#allocation2 + $0x288] sm:$0xff] }
 0x268   :  { %7543 = vst [vmem:[#allocation27_spill] sm:$0xff] %v5823_v45  ;;  %v2904_v45 = vld [vmem:[#allocation2 + $0x280] sm:$0xff] }
 0x269   :  { %7544 = vst [vmem:[#allocation28_spill] sm:$0xff] %v5827_v46  ;;  %v2953_v25 = vmul.f32 %v2904_v45, %v5550_v62  ;;  %v2960_v45 = vmul.f32 %v2911_v33, %v5550_v62  ;;  %v2968_v33 = vmul.f32 %v2919_v11, %v5550_v62  ;;  %v6017_v11 = vadd.f32 %v5719_v49, %v5704_v18 }
 0x26a   :  { %7545 = vst [vmem:[#allocation29_spill] sm:$0xff] %v5831_v47  ;;  %v2902_v47 = vld [vmem:[#allocation2 + $0x270] sm:$0xff] }
 0x26b   :  { %7546 = vst [vmem:[#allocation30_spill] sm:$0xff] %v5835_v52  ;;  %v2901_v52 = vld [vmem:[#allocation2 + $0x268] sm:$0xff]  ;;  %v2951_v32 = vmul.f32 %v2902_v47, %v5550_v62  ;;  %v2958_v47 = vmul.f32 %v2909_v2, %v5550_v62 }
 0x26c   :  { %7547 = vst [vmem:[#allocation31_spill] sm:$0xff] %v5839_v53 }
 0x26d   :  { %7548 = vst [vmem:[#allocation32_spill] sm:$0xff] %v5843_v54 }
 0x26e   :  { %7549 = vst [vmem:[#allocation33_spill] sm:$0xff] %v5847_v55 }
 0x26f   :  { %7550 = vst [vmem:[#allocation34_spill] sm:$0xff] %v5851_v59  ;;  %v5927_v59 = vmul.f32 %v2881_v19, %v5550_v62 }
 0x270   :  { %7551 = vst [vmem:[#allocation35_spill] sm:$0xff] %v5855_v60  ;;  %v2884_v60 = vld [vmem:[#allocation2 + $0x1e0] sm:$0xff] }
 0x271   :  { %7552 = vst [vmem:[#allocation36_spill] sm:$0xff] %v5859_v63  ;;  %v2883_v63 = vld [vmem:[#allocation2 + $0x1d8] sm:$0xff] }
 0x272   :  { %7553 = vst [vmem:[#allocation37_spill] sm:$0xff] %v5863_v0  ;;  %v2882_v0 = vld [vmem:[#allocation2 + $0x1d0] sm:$0xff]  ;;  %v5933_v14 = vmul.f32 %v2883_v63, %v5550_v62  ;;  %v2900_v63 = vld [vmem:[#allocation2 + $0x260] sm:$0xff] }
 0x273   :  { %7554 = vst [vmem:[#allocation38_spill] sm:$0xff] %v5867_v4  ;;  %v2888_v4 = vld [vmem:[#allocation2 + $0x200] sm:$0xff]  ;;  %v5930_v55 = vmul.f32 %v2882_v0, %v5550_v62 }
 0x274   :  { %7555 = vst [vmem:[#allocation39_spill] sm:$0xff] %v5871_v6  ;;  %v2887_v6 = vld [vmem:[#allocation2 + $0x1f8] sm:$0xff]  ;;  %v5948_v0 = vmul.f32 %v2888_v4, %v5550_v62  ;;  %v6041_v9 = vadd.f32 %v5933_v14, %v5704_v18 }
 0x275   :  { %7556 = vst [vmem:[#allocation40_spill] sm:$0xff] %v5875_v7  ;;  %v2886_v7 = vld [vmem:[#allocation2 + $0x1f0] sm:$0xff]  ;;  %v5945_v19 = vmul.f32 %v2887_v6, %v5550_v62  ;;  %v2903_v6 = vld [vmem:[#allocation2 + $0x278] sm:$0xff]  ;;  %v6037_v49 = vadd.f32 %v5930_v55, %v5704_v18 }
 0x276   :  { %7557 = vst [vmem:[#allocation41_spill] sm:$0xff] %v5879_v51  ;;  %v2885_v51 = vld [vmem:[#allocation2 + $0x1e8] sm:$0xff]  ;;  %v5942_v53 = vmul.f32 %v2886_v7, %v5550_v62  ;;  %v6061_v58 = vadd.f32 %v5948_v0, %v5704_v18  ;;  %v6085_v0 = vadd.f32 %v5966_v40, %v5704_v18 }
 0x277   :  { %7558 = vst [vmem:[#allocation42_spill] sm:$0xff] %v5883_v20  ;;  %v2892_v20 = vld [vmem:[#allocation2 + $0x220] sm:$0xff]  ;;  %v5939_v54 = vmul.f32 %v2885_v51, %v5550_v62  ;;  %v6057_v55 = vadd.f32 %v5945_v19, %v5704_v18 }
 0x278   :  { %7559 = vst [vmem:[#allocation43_spill] sm:$0xff] %v5887_v21  ;;  %v2891_v21 = vld [vmem:[#allocation2 + $0x218] sm:$0xff]  ;;  %v5960_v7 = vmul.f32 %v2892_v20, %v5550_v62  ;;  %v2946_v20 = vmul.f32 %v2897_v3, %v5550_v62  ;;  %v2914_v3 = vld [vmem:[#allocation2 + $0x2d0] sm:$0xff] }
 0x279   :  { %7560 = vst [vmem:[#allocation44_spill] sm:$0xff] %v5891_v27  ;;  %v2890_v27 = vld [vmem:[#allocation2 + $0x210] sm:$0xff]  ;;  %v5957_v51 = vmul.f32 %v2891_v21, %v5550_v62  ;;  %v6049_v57 = vadd.f32 %v5939_v54, %v5704_v18 }
 0x27a   :  { %7561 = vst [vmem:[#allocation45_spill] sm:$0xff] %v5895_v35  ;;  %v2889_v35 = vld [vmem:[#allocation2 + $0x208] sm:$0xff]  ;;  %v5954_v46 = vmul.f32 %v2890_v27, %v5550_v62  ;;  %v2906_v21 = vld [vmem:[#allocation2 + $0x290] sm:$0xff] }
 0x27b   :  { %7562 = vst [vmem:[#allocation46_spill] sm:$0xff] %v5899_v36  ;;  %v5918_v36 = vmul.f32 %v2878_v1, %v5550_v62  ;;  %v5936_v1 = vmul.f32 %v2884_v60, %v5550_v62  ;;  %v5951_v60 = vmul.f32 %v2889_v35, %v5550_v62  ;;  %v2955_v5 = vmul.f32 %v2906_v21, %v5550_v62 }
 0x27c   :  { %7563 = vst [vmem:[#allocation47_spill] sm:$0xff] %v5903_v41  ;;  %v2896_v41 = vld [vmem:[#allocation2 + $0x240] sm:$0xff]  ;;  %v2962_v21 = vmul.f32 %v2913_v23, %v5550_v62  ;;  %v6001_v23 = vadd.f32 %v5707_v30, %v5704_v18  ;;  %v6069_v54 = vadd.f32 %v5954_v46, %v5704_v18 }
 0x27d   :  { %7564 = vst [vmem:[#allocation48_spill] sm:$0xff] %v5907_v42  ;;  %v2893_v42 = vld [vmem:[#allocation2 + $0x228] sm:$0xff]  ;;  %v5972_v27 = vmul.f32 %v2896_v41, %v5550_v62  ;;  %v2952_v41 = vmul.f32 %v2903_v6, %v5550_v62  ;;  %v2959_v6 = vmul.f32 %v2910_v13, %v5550_v62  ;;  %v2967_v13 = vmul.f32 %v2918_v15, %v5550_v62 }
 0x27e   :  { %7565 = vst [vmem:[#allocation49_spill] sm:$0xff] %v5911_v50  ;;  %v2895_v50 = vld [vmem:[#allocation2 + $0x238] sm:$0xff]  ;;  %v5963_v4 = vmul.f32 %v2893_v42, %v5550_v62  ;;  %v2949_v42 = vmul.f32 %v2900_v63, %v5550_v62  ;;  %v2956_v63 = vmul.f32 %v2907_v39, %v5550_v62  ;;  %v2963_v39 = vmul.f32 %v2914_v3, %v5550_v62 }
 0x27f   :  { %7566 = vst [vmem:[#allocation50_spill] sm:$0xff] %v5915_v56  ;;  %v2898_v56 = vld [vmem:[#allocation2 + $0x250] sm:$0xff]  ;;  %v5969_v35 = vmul.f32 %v2895_v50, %v5550_v62  ;;  %v2950_v50 = vmul.f32 %v2901_v52, %v5550_v62  ;;  %v2917_v52 = vld [vmem:[#allocation2 + $0x2e8] sm:$0xff]  ;;  %v6013_v15 = vadd.f32 %v5716_v48, %v5704_v18  ;;  %v6021_v30 = vadd.f32 %v5918_v36, %v5704_v18 }
 0x280   :  { %v2947_v37 = vmul.f32 %v2898_v56, %v5550_v62  ;;  %v2954_v56 = vmul.f32 %v2905_v44, %v5550_v62  ;;  %v2920_v44 = vld [vmem:[#allocation2 + $0x300] sm:$0xff]  ;;  %v2966_v2 = vmul.f32 %v2917_v52, %v5550_v62  ;;  %7567 = vst [vmem:[#allocation51_spill] sm:$0xff] %v6001_v23  ;;  %v6033_v48 = vadd.f32 %v5927_v59, %v5704_v18  ;;  %v3109_v23 = vld [vmem:[#allocation2 + $0x450] sm:$0xff] }
 0x281   :  { %v2969_v24 = vmul.f32 %v2920_v44, %v5550_v62  ;;  %7568 = vst [vmem:[#allocation52_spill] sm:$0xff] %v6005_v26  ;;  %v6045_v36 = vadd.f32 %v5936_v1, %v5704_v18  ;;  %v6053_v59 = vadd.f32 %v5942_v53, %v5704_v18  ;;  %v6065_v14 = vadd.f32 %v5951_v60, %v5704_v18 }
 0x282   :  { %7569 = vst [vmem:[#allocation53_spill] sm:$0xff] %v6009_v17  ;;  %v6073_v53 = vadd.f32 %v5957_v51, %v5704_v18  ;;  %v6077_v1 = vadd.f32 %v5960_v7, %v5704_v18  ;;  %v6081_v19 = vadd.f32 %v5963_v4, %v5704_v18  ;;  %v6089_v46 = vadd.f32 %v5969_v35, %v5704_v18 }
 0x283   :  { %7570 = vst [vmem:[#allocation54_spill] sm:$0xff] %v6013_v15  ;;  %v6093_v60 = vadd.f32 %v5972_v27, %v5704_v18  ;;  %v6096_v51 = vadd.f32 %v2946_v20, %v5704_v18  ;;  %v6099_v7 = vadd.f32 %v2947_v37, %v5704_v18  ;;  %v6102_v4 = vadd.f32 %v2948_v34, %v5704_v18  ;;  %v3108_v15 = vld [vmem:[#allocation2 + $0x448] sm:$0xff] }
 0x284   :  { %7571 = vst [vmem:[#allocation55_spill] sm:$0xff] %v6017_v11  ;;  %v6105_v40 = vadd.f32 %v2949_v42, %v5704_v18  ;;  %v6108_v3 = vadd.f32 %v2950_v50, %v5704_v18  ;;  %v6111_v35 = vadd.f32 %v2951_v32, %v5704_v18  ;;  %v6114_v27 = vadd.f32 %v2952_v41, %v5704_v18  ;;  %v3106_v11 = vld [vmem:[#allocation2 + $0x438] sm:$0xff] }
 0x285   :  { %7572 = vst [vmem:[#allocation56_spill] sm:$0xff] %v6021_v30  ;;  %v6117_v20 = vadd.f32 %v2953_v25, %v5704_v18  ;;  %v6120_v37 = vadd.f32 %v2954_v56, %v5704_v18  ;;  %v6123_v34 = vadd.f32 %v2955_v5, %v5704_v18  ;;  %v6126_v42 = vadd.f32 %v2956_v63, %v5704_v18 }
 0x286   :  { %7573 = vst [vmem:[#allocation57_spill] sm:$0xff] %v6025_v31  ;;  %v6129_v50 = vadd.f32 %v2957_v22, %v5704_v18  ;;  %v6132_v32 = vadd.f32 %v2958_v47, %v5704_v18  ;;  %v6135_v41 = vadd.f32 %v2959_v6, %v5704_v18  ;;  %v6138_v25 = vadd.f32 %v2960_v45, %v5704_v18 }
 0x287   :  { %7574 = vst [vmem:[#allocation58_spill] sm:$0xff] %v6029_v28  ;;  %v6141_v56 = vadd.f32 %v2961_v16, %v5704_v18  ;;  %v6144_v5 = vadd.f32 %v2962_v21, %v5704_v18  ;;  %v6147_v63 = vadd.f32 %v2963_v39, %v5704_v18  ;;  %v6150_v22 = vadd.f32 %v2964_v38, %v5704_v18  ;;  %v3105_v28 = vld [vmem:[#allocation2 + $0x430] sm:$0xff]  ;;  %v3116_v21 = vld [vmem:[#allocation2 + $0x488] sm:$0xff] }
 0x288   :  { %7575 = vst [vmem:[#allocation59_spill] sm:$0xff] %v6033_v48  ;;  %v6153_v52 = vadd.f32 %v2965_v10, %v5704_v18  ;;  %v6156_v47 = vadd.f32 %v2966_v2, %v5704_v18  ;;  %v6159_v6 = vadd.f32 %v2967_v13, %v5704_v18  ;;  %v6162_v16 = vadd.f32 %v2968_v33, %v5704_v18  ;;  %v3104_v48 = vld [vmem:[#allocation2 + $0x428] sm:$0xff]  ;;  %v3113_v38 = vld [vmem:[#allocation2 + $0x470] sm:$0xff]  ;;  %v3115_v10 = vld [vmem:[#allocation2 + $0x480] sm:$0xff] }
 0x289   :  { %7576 = vst [vmem:[#allocation60_spill] sm:$0xff] %v6037_v49  ;;  %v6165_v45 = vadd.f32 %v2969_v24, %v5704_v18  ;;  %v6168_v44 = vadd.f32 %v2970_v43, %v5704_v18  ;;  %v3110_v18 = vld [vmem:[#allocation2 + $0x458] sm:$0xff]  ;;  %v3154_v24 = vmul.f32 %v3105_v28, %v5550_v62  ;;  %v3112_v13 = vld [vmem:[#allocation2 + $0x468] sm:$0xff]  ;;  %v3158_v39 = vmul.f32 %v3109_v23, %v5550_v62 }
 0x28a   :  { %7577 = vst [vmem:[#allocation61_spill] sm:$0xff] %v6041_v9  ;;  %v3102_v9 = vld [vmem:[#allocation2 + $0x418] sm:$0xff]  ;;  %v3161_v28 = vmul.f32 %v3112_v13, %v5550_v62  ;;  %v3162_v43 = vmul.f32 %v3113_v38, %v5550_v62  ;;  %v7661_v23 = vld [vmem:[#allocation4_spill] sm:$0xff] }
 0x28b   :  { %7578 = vst [vmem:[#allocation62_spill] sm:$0xff] %v6045_v36  ;;  %v3101_v36 = vld [vmem:[#allocation2 + $0x410] sm:$0xff] }
 0x28c   :  { %7579 = vst [vmem:[#allocation63_spill] sm:$0xff] %v6049_v57  ;;  %v3069_v57 = vld [vmem:[#allocation2 + $0x310] sm:$0xff]  ;;  %v3150_v26 = vmul.f32 %v3101_v36, %v5550_v62  ;;  %v3157_v36 = vmul.f32 %v3108_v15, %v5550_v62 }
 0x28d   :  { %7580 = vst [vmem:[#allocation64_spill] sm:$0xff] %v6053_v59 }
 0x28e   :  { %7581 = vst [vmem:[#allocation65_spill] sm:$0xff] %v6057_v55  ;;  %v3099_v55 = vld [vmem:[#allocation2 + $0x400] sm:$0xff] }
 0x28f   :  { %7582 = vst [vmem:[#allocation66_spill] sm:$0xff] %v6061_v58  ;;  %v3098_v58 = vld [vmem:[#allocation2 + $0x3f8] sm:$0xff]  ;;  %v3148_v17 = vmul.f32 %v3099_v55, %v5550_v62  ;;  %v3155_v55 = vmul.f32 %v3106_v11, %v5550_v62  ;;  %v3164_v11 = vmul.f32 %v3115_v10, %v5550_v62 }
 0x290   :  { %7583 = vst [vmem:[#allocation67_spill] sm:$0xff] %v6065_v14 }
 0x291   :  { %7584 = vst [vmem:[#allocation68_spill] sm:$0xff] %v6069_v54  ;;  %v3072_v54 = vld [vmem:[#allocation2 + $0x328] sm:$0xff] }
 0x292   :  { %7585 = vst [vmem:[#allocation69_spill] sm:$0xff] %v6073_v53 }
 0x293   :  { %7586 = vst [vmem:[#allocation70_spill] sm:$0xff] %v6077_v1 }
 0x294   :  { %7587 = vst [vmem:[#allocation71_spill] sm:$0xff] %v6081_v19  ;;  %v6269_v19 = vmul.f32 %v3069_v57, %v5550_v62  ;;  %v3088_v57 = vld [vmem:[#allocation2 + $0x3a8] sm:$0xff] }
 0x295   :  { %7588 = vst [vmem:[#allocation72_spill] sm:$0xff] %v6085_v0 }
 0x296   :  { %7589 = vst [vmem:[#allocation73_spill] sm:$0xff] %v6089_v46  ;;  %v3076_v46 = vld [vmem:[#allocation2 + $0x348] sm:$0xff]  ;;  %v3167_v2 = vadd.f32 %v6269_v19, %v7661_v23 }
 0x297   :  { %7590 = vst [vmem:[#allocation74_spill] sm:$0xff] %v6093_v60  ;;  %v3089_v60 = vld [vmem:[#allocation2 + $0x3b0] sm:$0xff] }
 0x298   :  { %7591 = vst [vmem:[#allocation75_spill] sm:$0xff] %v6096_v51  ;;  %v3070_v51 = vld [vmem:[#allocation2 + $0x318] sm:$0xff] }
 0x299   :  { %7592 = vst [vmem:[#allocation76_spill] sm:$0xff] %v6099_v7  ;;  %v3073_v7 = vld [vmem:[#allocation2 + $0x330] sm:$0xff] }
 0x29a   :  { %7593 = vst [vmem:[#allocation77_spill] sm:$0xff] %v6102_v4  ;;  %v3084_v4 = vld [vmem:[#allocation2 + $0x388] sm:$0xff] }
 0x29b   :  { %7594 = vst [vmem:[#allocation78_spill] sm:$0xff] %v6105_v40  ;;  %v3080_v40 = vld [vmem:[#allocation2 + $0x368] sm:$0xff] }
 0x29c   :  { %7595 = vst [vmem:[#allocation79_spill] sm:$0xff] %v6108_v3  ;;  %v6278_v3 = vmul.f32 %v3072_v54, %v5550_v62  ;;  %v3090_v54 = vld [vmem:[#allocation2 + $0x3b8] sm:$0xff] }
 0x29d   :  { %7596 = vst [vmem:[#allocation80_spill] sm:$0xff] %v6111_v35  ;;  %v3074_v35 = vld [vmem:[#allocation2 + $0x338] sm:$0xff] }
 0x29e   :  { %7597 = vst [vmem:[#allocation81_spill] sm:$0xff] %v6114_v27  ;;  %v3077_v27 = vld [vmem:[#allocation2 + $0x350] sm:$0xff]  ;;  %v3170_v38 = vadd.f32 %v6278_v3, %v7661_v23 }
 0x29f   :  { %7598 = vst [vmem:[#allocation82_spill] sm:$0xff] %v6117_v20  ;;  %v3071_v20 = vld [vmem:[#allocation2 + $0x320] sm:$0xff] }
 0x2a0   :  { %7599 = vst [vmem:[#allocation83_spill] sm:$0xff] %v6120_v37  ;;  %v6275_v1 = vmul.f32 %v3071_v20, %v5550_v62  ;;  %v6281_v37 = vmul.f32 %v3073_v7, %v5550_v62  ;;  %v6293_v20 = vmul.f32 %v3077_v27, %v5550_v62  ;;  %v3092_v7 = vld [vmem:[#allocation2 + $0x3c8] sm:$0xff] }
 0x2a1   :  { %7600 = vst [vmem:[#allocation84_spill] sm:$0xff] %v6123_v34  ;;  %v3096_v27 = vld [vmem:[#allocation2 + $0x3e8] sm:$0xff] }
 0x2a2   :  { %7601 = vst [vmem:[#allocation85_spill] sm:$0xff] %v6126_v42  ;;  %v3078_v42 = vld [vmem:[#allocation2 + $0x358] sm:$0xff]  ;;  %v3145_v30 = vmul.f32 %v3096_v27, %v5550_v62  ;;  %v3171_v13 = vadd.f32 %v6281_v37, %v7661_v23 }
 0x2a3   :  { %7602 = vst [vmem:[#allocation86_spill] sm:$0xff] %v6129_v50  ;;  %v3081_v50 = vld [vmem:[#allocation2 + $0x370] sm:$0xff] }
 0x2a4   :  { %7603 = vst [vmem:[#allocation87_spill] sm:$0xff] %v6132_v32  ;;  %v3075_v32 = vld [vmem:[#allocation2 + $0x340] sm:$0xff] }
 0x2a5   :  { %7604 = vst [vmem:[#allocation88_spill] sm:$0xff] %v6135_v41  ;;  %v6287_v34 = vmul.f32 %v3075_v32, %v5550_v62  ;;  %v6305_v32 = vmul.f32 %v3081_v50, %v5550_v62  ;;  %v3095_v41 = vld [vmem:[#allocation2 + $0x3e0] sm:$0xff] }
 0x2a6   :  { %7605 = vst [vmem:[#allocation89_spill] sm:$0xff] %v6138_v25  ;;  %v3082_v25 = vld [vmem:[#allocation2 + $0x378] sm:$0xff]  ;;  %v3144_v31 = vmul.f32 %v3095_v41, %v5550_v62  ;;  %v3151_v41 = vmul.f32 %v3102_v9, %v5550_v62  ;;  %v3117_v9 = vld [vmem:[#allocation2 + $0x490] sm:$0xff] }
 0x2a7   :  { %7606 = vst [vmem:[#allocation90_spill] sm:$0xff] %v6141_v56  ;;  %v3085_v56 = vld [vmem:[#allocation2 + $0x390] sm:$0xff]  ;;  %v6308_v53 = vmul.f32 %v3082_v25, %v5550_v62  ;;  %v6326_v25 = vmul.f32 %v3088_v57, %v5550_v62  ;;  %v3103_v57 = vld [vmem:[#allocation2 + $0x420] sm:$0xff]  ;;  %v3166_v15 = vmul.f32 %v3117_v9, %v5550_v62  ;;  %v3173_v10 = vadd.f32 %v6287_v34, %v7661_v23 }
 0x2a8   :  { %7607 = vst [vmem:[#allocation91_spill] sm:$0xff] %v6144_v5  ;;  %v3079_v5 = vld [vmem:[#allocation2 + $0x360] sm:$0xff]  ;;  %v3152_v27 = vmul.f32 %v3103_v57, %v5550_v62  ;;  %v3159_v57 = vmul.f32 %v3110_v18, %v5550_v62 }
 0x2a9   :  { %7608 = vst [vmem:[#allocation92_spill] sm:$0xff] %v6147_v63  ;;  %v3093_v63 = vld [vmem:[#allocation2 + $0x3d0] sm:$0xff]  ;;  %v6299_v0 = vmul.f32 %v3079_v5, %v5550_v62  ;;  %v6317_v5 = vmul.f32 %v3085_v56, %v5550_v62  ;;  %v6332_v56 = vmul.f32 %v3090_v54, %v5550_v62  ;;  %v3180_v34 = vadd.f32 %v6308_v53, %v7661_v23 }
 0x2aa   :  { %7609 = vst [vmem:[#allocation93_spill] sm:$0xff] %v6150_v22  ;;  %v3086_v22 = vld [vmem:[#allocation2 + $0x398] sm:$0xff] }
 0x2ab   :  { %7610 = vst [vmem:[#allocation94_spill] sm:$0xff] %v6153_v52  ;;  %v6296_v52 = vmul.f32 %v3078_v42, %v5550_v62  ;;  %v6314_v42 = vmul.f32 %v3084_v4, %v5550_v62  ;;  %v6320_v50 = vmul.f32 %v3086_v22, %v5550_v62  ;;  %v3100_v4 = vld [vmem:[#allocation2 + $0x408] sm:$0xff]  ;;  %v6338_v22 = vmul.f32 %v3092_v7, %v5550_v62 }
 0x2ac   :  { %7611 = vst [vmem:[#allocation95_spill] sm:$0xff] %v6156_v47  ;;  %v3083_v47 = vld [vmem:[#allocation2 + $0x380] sm:$0xff]  ;;  %v3147_v7 = vmul.f32 %v3098_v58, %v5550_v62  ;;  %v3114_v58 = vld [vmem:[#allocation2 + $0x478] sm:$0xff]  ;;  %v3177_v3 = vadd.f32 %v6299_v0, %v7661_v23 }
 0x2ad   :  { %7612 = vst [vmem:[#allocation96_spill] sm:$0xff] %v6159_v6  ;;  %v6272_v6 = vmul.f32 %v3070_v51, %v5550_v62  ;;  %v6290_v51 = vmul.f32 %v3076_v46, %v5550_v62  ;;  %v3094_v46 = vld [vmem:[#allocation2 + $0x3d8] sm:$0xff]  ;;  %v6311_v14 = vmul.f32 %v3083_v47, %v5550_v62  ;;  %v6329_v47 = vmul.f32 %v3089_v60, %v5550_v62 }
 0x2ae   :  { %7613 = vst [vmem:[#allocation97_spill] sm:$0xff] %v6162_v16  ;;  %v3091_v16 = vld [vmem:[#allocation2 + $0x3c0] sm:$0xff]  ;;  %v3143_v60 = vmul.f32 %v3094_v46, %v5550_v62  ;;  %v3163_v33 = vmul.f32 %v3114_v58, %v5550_v62  ;;  %v3184_v0 = vadd.f32 %v6320_v50, %v7661_v23  ;;  %v3193_v58 = vadd.f32 %v3144_v31, %v7661_v23 }
 0x2af   :  { %7614 = vst [vmem:[#allocation98_spill] sm:$0xff] %v6165_v45  ;;  %v6284_v45 = vmul.f32 %v3074_v35, %v5550_v62  ;;  %v6302_v35 = vmul.f32 %v3080_v40, %v5550_v62  ;;  %v3097_v40 = vld [vmem:[#allocation2 + $0x3f0] sm:$0xff]  ;;  %v6335_v49 = vmul.f32 %v3091_v16, %v5550_v62  ;;  %v3107_v16 = vld [vmem:[#allocation2 + $0x440] sm:$0xff]  ;;  %v3168_v18 = vadd.f32 %v6272_v6, %v7661_v23 }
 0x2b0   :  { %7615 = vst [vmem:[#allocation99_spill] sm:$0xff] %v6168_v44  ;;  %v3087_v44 = vld [vmem:[#allocation2 + $0x3a0] sm:$0xff]  ;;  %v3146_v54 = vmul.f32 %v3097_v40, %v5550_v62  ;;  %v3153_v40 = vmul.f32 %v3104_v48, %v5550_v62  ;;  %v3174_v19 = vadd.f32 %v6290_v51, %v7661_v23  ;;  %v3175_v6 = vadd.f32 %v6293_v20, %v7661_v23 }
 0x2b1   :  { %v6323_v59 = vmul.f32 %v3087_v44, %v5550_v62  ;;  %v6341_v44 = vmul.f32 %v3093_v63, %v5550_v62  ;;  %v3149_v63 = vmul.f32 %v3100_v4, %v5550_v62  ;;  %v3111_v46 = vld [vmem:[#allocation2 + $0x460] sm:$0xff]  ;;  %v3156_v4 = vmul.f32 %v3107_v16, %v5550_v62 }
 0x2b2   :  { %v3160_v48 = vmul.f32 %v3111_v46, %v5550_v62  ;;  %v3165_v16 = vmul.f32 %v3116_v21, %v5550_v62  ;;  %v3169_v46 = vadd.f32 %v6275_v1, %v7661_v23  ;;  %v3172_v21 = vadd.f32 %v6284_v45, %v7661_v23 }
 0x2b3   :  { %v3176_v1 = vadd.f32 %v6296_v52, %v7661_v23  ;;  %v3178_v37 = vadd.f32 %v6302_v35, %v7661_v23  ;;  %v3179_v45 = vadd.f32 %v6305_v32, %v7661_v23  ;;  %v3181_v51 = vadd.f32 %v6311_v14, %v7661_v23 }
 0x2b4   :  { %v3182_v20 = vadd.f32 %v6314_v42, %v7661_v23  ;;  %v3183_v52 = vadd.f32 %v6317_v5, %v7661_v23  ;;  %v3185_v35 = vadd.f32 %v6323_v59, %v7661_v23  ;;  %v3186_v32 = vadd.f32 %v6326_v25, %v7661_v23 }
 0x2b5   :  { %v3187_v53 = vadd.f32 %v6329_v47, %v7661_v23  ;;  %v3188_v14 = vadd.f32 %v6332_v56, %v7661_v23  ;;  %v3189_v42 = vadd.f32 %v6335_v49, %v7661_v23  ;;  %v3190_v5 = vadd.f32 %v6338_v22, %v7661_v23 }
 0x2b6   :  { %v3191_v50 = vadd.f32 %v6341_v44, %v7661_v23  ;;  %v3192_v59 = vadd.f32 %v3143_v60, %v7661_v23  ;;  %v3194_v25 = vadd.f32 %v3145_v30, %v7661_v23  ;;  %v3195_v47 = vadd.f32 %v3146_v54, %v7661_v23 }
 0x2b7   :  { %v3196_v9 = vadd.f32 %v3147_v7, %v7661_v23  ;;  %v3197_v56 = vadd.f32 %v3148_v17, %v7661_v23  ;;  %v3198_v49 = vadd.f32 %v3149_v63, %v7661_v23  ;;  %v3199_v62 = vadd.f32 %v3150_v26, %v7661_v23 }
 0x2b8   :  { %v3200_v22 = vadd.f32 %v3151_v41, %v7661_v23  ;;  %v3201_v44 = vadd.f32 %v3152_v27, %v7661_v23  ;;  %v3202_v60 = vadd.f32 %v3153_v40, %v7661_v23  ;;  %v3203_v31 = vadd.f32 %v3154_v24, %v7661_v23 }
 0x2b9   :  { %v3204_v30 = vadd.f32 %v3155_v55, %v7661_v23  ;;  %v3205_v54 = vadd.f32 %v3156_v4, %v7661_v23  ;;  %v3206_v7 = vadd.f32 %v3157_v36, %v7661_v23  ;;  %v3207_v17 = vadd.f32 %v3158_v39, %v7661_v23  ;;  %v7664_v39 = vld [vmem:[#allocation51_spill] sm:$0xff] }
 0x2ba   :  { %v3208_v63 = vadd.f32 %v3159_v57, %v7661_v23  ;;  %v3209_v26 = vadd.f32 %v3160_v48, %v7661_v23  ;;  %v3210_v41 = vadd.f32 %v3161_v28, %v7661_v23  ;;  %v3211_v27 = vadd.f32 %v3162_v43, %v7661_v23  ;;  %v7667_v48 = vld [vmem:[#allocation52_spill] sm:$0xff] }
 0x2bb   :  { %v3212_v40 = vadd.f32 %v3163_v33, %v7661_v23  ;;  %v3213_v24 = vadd.f32 %v3164_v11, %v7661_v23  ;;  %v6440_v55 = vadd.f32 %v3165_v16, %v7661_v23  ;;  %v6443_v4 = vadd.f32 %v3166_v15, %v7661_v23  ;;  %v7669_v33 = vld [vmem:[#allocation53_spill] sm:$0xff] }
 0x2bc   :  { %v7665_v36 = vmax.f32 %v5723_v29, %v7664_v39  ;;  %v7668_v28 = vmax.f32 %v5727_v61, %v7667_v48  ;;  %v7670_v43 = vmax.f32 %v5731_v8, %v7669_v33  ;;  %v7671_v16 = vld [vmem:[#allocation5_spill] sm:$0xff]  ;;  %v7675_v29 = vld [vmem:[#allocation55_spill] sm:$0xff]  ;;  %v7681_v48 = vld [vmem:[#allocation8_spill] sm:$0xff] }
 0x2bd   :  { %7662 = vst [vmem:[#allocation100_spill] sm:$0xff] %v6440_v55  ;;  %v7672_v55 = vld [vmem:[#allocation54_spill] sm:$0xff]  ;;  %v7685_v33 = vld [vmem:[#allocation9_spill] sm:$0xff] }
 0x2be   :  { %7663 = vst [vmem:[#allocation101_spill] sm:$0xff] %v6443_v4  ;;  %v6448_v57 = vmax.f32 %v7665_v36, %v3167_v2  ;;  %v6453_v12 = vmax.f32 %v7668_v28, %v3168_v18  ;;  %v6458_v11 = vmax.f32 %v7670_v43, %v3169_v46  ;;  %v7673_v15 = vmax.f32 %v7671_v16, %v7672_v55  ;;  %v7674_v4 = vld [vmem:[#allocation6_spill] sm:$0xff]  ;;  %v7677_v36 = vld [vmem:[#allocation7_spill] sm:$0xff]  ;;  %v7682_v28 = vld [vmem:[#allocation57_spill] sm:$0xff] }
 0x2bf   :  { %v7676_v39 = vmax.f32 %v7674_v4, %v7675_v29  ;;  %v7683_v8 = vmax.f32 %v7681_v48, %v7682_v28  ;;  %v7686_v43 = vld [vmem:[#allocation58_spill] sm:$0xff]  ;;  %v7693_v29 = vld [vmem:[#allocation11_spill] sm:$0xff]  ;;  %v7701_v28 = vld [vmem:[#allocation13_spill] sm:$0xff] }
 0x2c0   :  { %7666 = vst [vmem:[#allocation51_spill] sm:$0xff] %v6448_v57  ;;  %v6463_v23 = vmax.f32 %v7673_v15, %v3170_v38  ;;  %v7678_v57 = vld [vmem:[#allocation56_spill] sm:$0xff]  ;;  %v7687_v55 = vmax.f32 %v7685_v33, %v7686_v43  ;;  %v7689_v16 = vld [vmem:[#allocation10_spill] sm:$0xff]  ;;  %v7690_v15 = vld [vmem:[#allocation59_spill] sm:$0xff] }
 0x2c1   :  { %v6468_v2 = vmax.f32 %v7676_v39, %v3171_v13  ;;  %v7679_v61 = vmax.f32 %v7677_v36, %v7678_v57  ;;  %v6478_v46 = vmax.f32 %v7683_v8, %v3173_v10  ;;  %v7691_v4 = vmax.f32 %v7689_v16, %v7690_v15  ;;  %v7694_v39 = vld [vmem:[#allocation60_spill] sm:$0xff]  ;;  %v7702_v8 = vld [vmem:[#allocation62_spill] sm:$0xff]  ;;  %v7709_v15 = vld [vmem:[#allocation15_spill] sm:$0xff] }
 0x2c2   :  { %v6483_v38 = vmax.f32 %v7687_v55, %v3174_v19  ;;  %v7695_v57 = vmax.f32 %v7693_v29, %v7694_v39  ;;  %v7697_v36 = vld [vmem:[#allocation12_spill] sm:$0xff]  ;;  %v7703_v33 = vmax.f32 %v7701_v28, %v7702_v8  ;;  %v7705_v43 = vld [vmem:[#allocation14_spill] sm:$0xff]  ;;  %v7706_v55 = vld [vmem:[#allocation63_spill] sm:$0xff] }
 0x2c3   :  { %v6473_v18 = vmax.f32 %v7679_v61, %v3172_v21  ;;  %7684 = vst [vmem:[#allocation53_spill] sm:$0xff] %v6478_v46  ;;  %v6488_v13 = vmax.f32 %v7691_v4, %v3175_v6  ;;  %v7698_v61 = vld [vmem:[#allocation61_spill] sm:$0xff]  ;;  %v7707_v16 = vmax.f32 %v7705_v43, %v7706_v55  ;;  %v7710_v4 = vld [vmem:[#allocation64_spill] sm:$0xff]  ;;  %v7721_v8 = vld [vmem:[#allocation18_spill] sm:$0xff] }
 0x2c4   :  { %7688 = vst [vmem:[#allocation5_spill] sm:$0xff] %v6483_v38  ;;  %v6493_v21 = vmax.f32 %v7695_v57, %v3176_v1  ;;  %v7699_v48 = vmax.f32 %v7697_v36, %v7698_v61  ;;  %v6503_v19 = vmax.f32 %v7703_v33, %v3178_v37  ;;  %v7711_v29 = vmax.f32 %v7709_v15, %v7710_v4  ;;  %v7713_v39 = vld [vmem:[#allocation16_spill] sm:$0xff]  ;;  %v7714_v57 = vld [vmem:[#allocation65_spill] sm:$0xff]  ;;  %v7722_v33 = vld [vmem:[#allocation67_spill] sm:$0xff] }
 0x2c5   :  { %7680 = vst [vmem:[#allocation52_spill] sm:$0xff] %v6473_v18  ;;  %v6508_v6 = vmax.f32 %v7707_v16, %v3179_v45  ;;  %v7715_v36 = vmax.f32 %v7713_v39, %v7714_v57  ;;  %v7717_v61 = vld [vmem:[#allocation17_spill] sm:$0xff]  ;;  %v7723_v43 = vmax.f32 %v7721_v8, %v7722_v33  ;;  %v7725_v55 = vld [vmem:[#allocation19_spill] sm:$0xff]  ;;  %v7726_v16 = vld [vmem:[#allocation68_spill] sm:$0xff] }
 0x2c6   :  { %7692 = vst [vmem:[#allocation54_spill] sm:$0xff] %v6488_v13  ;;  %v6498_v10 = vmax.f32 %v7699_v48, %v3177_v3  ;;  %v6513_v1 = vmax.f32 %v7711_v29, %v3180_v34  ;;  %v7718_v48 = vld [vmem:[#allocation66_spill] sm:$0xff]  ;;  %v7727_v15 = vmax.f32 %v7725_v55, %v7726_v16  ;;  %v7729_v4 = vld [vmem:[#allocation20_spill] sm:$0xff]  ;;  %v7730_v29 = vld [vmem:[#allocation69_spill] sm:$0xff] }
 0x2c7   :  { %7696 = vst [vmem:[#allocation6_spill] sm:$0xff] %v6493_v21  ;;  %v6518_v3 = vmax.f32 %v7715_v36, %v3181_v51  ;;  %v7719_v28 = vmax.f32 %v7717_v61, %v7718_v48  ;;  %v6528_v45 = vmax.f32 %v7723_v43, %v3183_v52  ;;  %v7731_v39 = vmax.f32 %v7729_v4, %v7730_v29  ;;  %v7733_v57 = vld [vmem:[#allocation21_spill] sm:$0xff]  ;;  %v7734_v36 = vld [vmem:[#allocation70_spill] sm:$0xff]  ;;  %v7741_v33 = vld [vmem:[#allocation23_spill] sm:$0xff] }
 0x2c8   :  { %7700 = vst [vmem:[#allocation55_spill] sm:$0xff] %v6498_v10  ;;  %v6533_v34 = vmax.f32 %v7727_v15, %v3184_v0  ;;  %v7735_v61 = vmax.f32 %v7733_v57, %v7734_v36  ;;  %v7737_v48 = vld [vmem:[#allocation22_spill] sm:$0xff]  ;;  %v7742_v43 = vld [vmem:[#allocation72_spill] sm:$0xff]  ;;  %v7746_v15 = vld [vmem:[#allocation73_spill] sm:$0xff] }
 0x2c9   :  { %7704 = vst [vmem:[#allocation7_spill] sm:$0xff] %v6503_v19  ;;  %v6523_v37 = vmax.f32 %v7719_v28, %v3182_v20  ;;  %v6538_v51 = vmax.f32 %v7731_v39, %v3185_v35  ;;  %v7738_v28 = vld [vmem:[#allocation71_spill] sm:$0xff]  ;;  %v7743_v55 = vmax.f32 %v7741_v33, %v7742_v43  ;;  %v7745_v16 = vld [vmem:[#allocation24_spill] sm:$0xff]  ;;  %v7749_v29 = vld [vmem:[#allocation25_spill] sm:$0xff] }
 0x2ca   :  { %7708 = vst [vmem:[#allocation56_spill] sm:$0xff] %v6508_v6  ;;  %v6543_v20 = vmax.f32 %v7735_v61, %v3186_v32  ;;  %v7739_v8 = vmax.f32 %v7737_v48, %v7738_v28  ;;  %v7747_v4 = vmax.f32 %v7745_v16, %v7746_v15  ;;  %v7750_v39 = vld [vmem:[#allocation74_spill] sm:$0xff]  ;;  %v7754_v61 = vld [vmem:[#allocation75_spill] sm:$0xff]  ;;  %v7761_v43 = vld [vmem:[#allocation28_spill] sm:$0xff] }
 0x2cb   :  { %7712 = vst [vmem:[#allocation8_spill] sm:$0xff] %v6513_v1  ;;  %v6553_v0 = vmax.f32 %v7743_v55, %v3188_v14  ;;  %v7751_v57 = vmax.f32 %v7749_v29, %v7750_v39  ;;  %v7753_v36 = vld [vmem:[#allocation26_spill] sm:$0xff]  ;;  %v7757_v28 = vld [vmem:[#allocation27_spill] sm:$0xff]  ;;  %v7762_v55 = vld [vmem:[#allocation77_spill] sm:$0xff] }
 0x2cc   :  { %7716 = vst [vmem:[#allocation57_spill] sm:$0xff] %v6518_v3  ;;  %v6548_v52 = vmax.f32 %v7739_v8, %v3187_v53  ;;  %v6558_v35 = vmax.f32 %v7747_v4, %v3189_v42  ;;  %v7755_v48 = vmax.f32 %v7753_v36, %v7754_v61  ;;  %v7758_v8 = vld [vmem:[#allocation76_spill] sm:$0xff]  ;;  %v7763_v16 = vmax.f32 %v7761_v43, %v7762_v55  ;;  %v7765_v15 = vld [vmem:[#allocation29_spill] sm:$0xff]  ;;  %v7766_v4 = vld [vmem:[#allocation78_spill] sm:$0xff] }
 0x2cd   :  { %7720 = vst [vmem:[#allocation9_spill] sm:$0xff] %v6523_v37  ;;  %v6563_v32 = vmax.f32 %v7751_v57, %v3190_v5  ;;  %v7759_v33 = vmax.f32 %v7757_v28, %v7758_v8  ;;  %v7767_v29 = vmax.f32 %v7765_v15, %v7766_v4  ;;  %v7769_v39 = vld [vmem:[#allocation30_spill] sm:$0xff]  ;;  %v7770_v57 = vld [vmem:[#allocation79_spill] sm:$0xff]  ;;  %v7777_v8 = vld [vmem:[#allocation32_spill] sm:$0xff] }
 0x2ce   :  { %7724 = vst [vmem:[#allocation58_spill] sm:$0xff] %v6528_v45  ;;  %v6568_v53 = vmax.f32 %v7755_v48, %v3191_v50  ;;  %v6578_v42 = vmax.f32 %v7763_v16, %v3193_v58  ;;  %v7771_v36 = vmax.f32 %v7769_v39, %v7770_v57  ;;  %v7773_v61 = vld [vmem:[#allocation31_spill] sm:$0xff]  ;;  %v7774_v48 = vld [vmem:[#allocation80_spill] sm:$0xff]  ;;  %v7781_v55 = vld [vmem:[#allocation33_spill] sm:$0xff] }
 0x2cf   :  { %7728 = vst [vmem:[#allocation10_spill] sm:$0xff] %v6533_v34  ;;  %v6573_v14 = vmax.f32 %v7759_v33, %v3192_v59  ;;  %v6583_v5 = vmax.f32 %v7767_v29, %v3194_v25  ;;  %v7775_v28 = vmax.f32 %v7773_v61, %v7774_v48  ;;  %v7778_v33 = vld [vmem:[#allocation81_spill] sm:$0xff]  ;;  %v7782_v16 = vld [vmem:[#allocation82_spill] sm:$0xff]  ;;  %v7786_v29 = vld [vmem:[#allocation83_spill] sm:$0xff] }
 0x2d0   :  { %7732 = vst [vmem:[#allocation59_spill] sm:$0xff] %v6538_v51  ;;  %v6588_v50 = vmax.f32 %v7771_v36, %v3195_v47  ;;  %v7779_v43 = vmax.f32 %v7777_v8, %v7778_v33  ;;  %v7783_v15 = vmax.f32 %v7781_v55, %v7782_v16  ;;  %v7785_v4 = vld [vmem:[#allocation34_spill] sm:$0xff]  ;;  %v7789_v57 = vld [vmem:[#allocation35_spill] sm:$0xff]  ;;  %v7790_v36 = vld [vmem:[#allocation84_spill] sm:$0xff] }
 0x2d1   :  { %7736 = vst [vmem:[#allocation11_spill] sm:$0xff] %v6543_v20  ;;  %v6593_v59 = vmax.f32 %v7775_v28, %v3196_v9  ;;  %v7787_v39 = vmax.f32 %v7785_v4, %v7786_v29  ;;  %v7791_v61 = vmax.f32 %v7789_v57, %v7790_v36  ;;  %v7793_v48 = vld [vmem:[#allocation36_spill] sm:$0xff]  ;;  %v7794_v28 = vld [vmem:[#allocation85_spill] sm:$0xff]  ;;  %v3265_v33 = vld [vmem:[#allocation2 + $0x498] sm:$0xff] }
 0x2d2   :  { %7740 = vst [vmem:[#allocation60_spill] sm:$0xff] %v6548_v52  ;;  %v6598_v58 = vmax.f32 %v7779_v43, %v3197_v56  ;;  %v6603_v25 = vmax.f32 %v7783_v15, %v3198_v49  ;;  %v7795_v8 = vmax.f32 %v7793_v48, %v7794_v28  ;;  %v3266_v43 = vld [vmem:[#allocation2 + $0x4a0] sm:$0xff]  ;;  %v7797_v55 = vld [vmem:[#allocation37_spill] sm:$0xff]  ;;  %v7798_v49 = vld [vmem:[#allocation86_spill] sm:$0xff] }
 0x2d3   :  { %7744 = vst [vmem:[#allocation12_spill] sm:$0xff] %v6553_v0  ;;  %v6608_v47 = vmax.f32 %v7787_v39, %v3199_v62  ;;  %v6613_v9 = vmax.f32 %v7791_v61, %v3200_v22  ;;  %v7799_v16 = vmax.f32 %v7797_v55, %v7798_v49  ;;  %v7801_v4 = vld [vmem:[#allocation38_spill] sm:$0xff]  ;;  %v7802_v62 = vld [vmem:[#allocation87_spill] sm:$0xff]  ;;  %v7806_v22 = vld [vmem:[#allocation88_spill] sm:$0xff] }
 0x2d4   :  { %7748 = vst [vmem:[#allocation61_spill] sm:$0xff] %v6558_v35  ;;  %v6618_v56 = vmax.f32 %v7795_v8, %v3201_v44  ;;  %v7803_v29 = vmax.f32 %v7801_v4, %v7802_v62  ;;  %v7805_v57 = vld [vmem:[#allocation39_spill] sm:$0xff]  ;;  %v7809_v48 = vld [vmem:[#allocation40_spill] sm:$0xff]  ;;  %v7810_v44 = vld [vmem:[#allocation89_spill] sm:$0xff] }
 0x2d5   :  { %7752 = vst [vmem:[#allocation13_spill] sm:$0xff] %v6563_v32  ;;  %v6623_v15 = vmax.f32 %v7799_v16, %v3202_v60  ;;  %v7807_v36 = vmax.f32 %v7805_v57, %v7806_v22  ;;  %v7811_v28 = vmax.f32 %v7809_v48, %v7810_v44  ;;  %v3269_v55 = vld [vmem:[#allocation2 + $0x4b8] sm:$0xff]  ;;  %v3270_v60 = vld [vmem:[#allocation2 + $0x4c0] sm:$0xff]  ;;  %v7813_v49 = vld [vmem:[#allocation41_spill] sm:$0xff] }
 0x2d6   :  { %7756 = vst [vmem:[#allocation62_spill] sm:$0xff] %v6568_v53  ;;  %v6628_v39 = vmax.f32 %v7803_v29, %v3203_v31  ;;  %v7814_v16 = vld [vmem:[#allocation90_spill] sm:$0xff]  ;;  %v7818_v62 = vld [vmem:[#allocation91_spill] sm:$0xff]  ;;  %v7822_v22 = vld [vmem:[#allocation92_spill] sm:$0xff] }
 0x2d7   :  { %7760 = vst [vmem:[#allocation14_spill] sm:$0xff] %v6573_v14  ;;  %v6633_v61 = vmax.f32 %v7807_v36, %v3204_v30  ;;  %v6638_v8 = vmax.f32 %v7811_v28, %v3205_v54  ;;  %v7817_v31 = vld [vmem:[#allocation42_spill] sm:$0xff]  ;;  %v7821_v30 = vld [vmem:[#allocation43_spill] sm:$0xff]  ;;  %v7825_v54 = vld [vmem:[#allocation44_spill] sm:$0xff] }
 0x2d8   :  { %7764 = vst [vmem:[#allocation63_spill] sm:$0xff] %v6578_v42  ;;  %v7819_v29 = vmax.f32 %v7817_v31, %v7818_v62  ;;  %v7823_v36 = vmax.f32 %v7821_v30, %v7822_v22  ;;  %v7826_v44 = vld [vmem:[#allocation93_spill] sm:$0xff]  ;;  %v7834_v62 = vld [vmem:[#allocation95_spill] sm:$0xff]  ;;  %v7838_v22 = vld [vmem:[#allocation96_spill] sm:$0xff] }
 0x2d9   :  { %7768 = vst [vmem:[#allocation15_spill] sm:$0xff] %v6583_v5  ;;  %v7827_v28 = vmax.f32 %v7825_v54, %v7826_v44  ;;  %v7842_v44 = vld [vmem:[#allocation97_spill] sm:$0xff]  ;;  %v3297_v42 = vld [vmem:[#allocation2 + $0x598] sm:$0xff]  ;;  %v3298_v14 = vld [vmem:[#allocation2 + $0x5a0] sm:$0xff] }
 0x2da   :  { %7772 = vst [vmem:[#allocation64_spill] sm:$0xff] %v6588_v50  ;;  %v6648_v57 = vmax.f32 %v7819_v29, %v3207_v17  ;;  %v6653_v48 = vmax.f32 %v7823_v36, %v3208_v63  ;;  %v7833_v17 = vld [vmem:[#allocation46_spill] sm:$0xff]  ;;  %v7837_v63 = vld [vmem:[#allocation47_spill] sm:$0xff]  ;;  %v3295_v50 = vld [vmem:[#allocation2 + $0x588] sm:$0xff] }
 0x2db   :  { %7776 = vst [vmem:[#allocation16_spill] sm:$0xff] %v6593_v59  ;;  %v7835_v29 = vmax.f32 %v7833_v17, %v7834_v62  ;;  %v7839_v36 = vmax.f32 %v7837_v63, %v7838_v22  ;;  %v7850_v62 = vld [vmem:[#allocation101_spill] sm:$0xff]  ;;  %v7852_v63 = vld [vmem:[#allocation99_spill] sm:$0xff]  ;;  %v3301_v35 = vld [vmem:[#allocation2 + $0x5b8] sm:$0xff] }
 0x2dc   :  { %7780 = vst [vmem:[#allocation65_spill] sm:$0xff] %v6598_v58  ;;  %v3294_v59 = vld [vmem:[#allocation2 + $0x580] sm:$0xff]  ;;  %v3300_v32 = vld [vmem:[#allocation2 + $0x5b0] sm:$0xff]  ;;  %v3305_v37 = vld [vmem:[#allocation2 + $0x5d8] sm:$0xff] }
 0x2dd   :  { %7784 = vst [vmem:[#allocation17_spill] sm:$0xff] %v6603_v25  ;;  %v6668_v30 = vmax.f32 %v7835_v29, %v3211_v27  ;;  %v6673_v54 = vmax.f32 %v7839_v36, %v3212_v40  ;;  %v7851_v29 = vld [vmem:[#allocation50_spill] sm:$0xff]  ;;  %v7855_v36 = vld [vmem:[#allocation3_spill] sm:$0xff]  ;;  %v3292_v25 = vld [vmem:[#allocation2 + $0x570] sm:$0xff] }
 0x2de   :  { %7788 = vst [vmem:[#allocation66_spill] sm:$0xff] %v6608_v47  ;;  %v7853_v40 = vmax.f32 %v7851_v29, %v7852_v63  ;;  %v3286_v29 = vld [vmem:[#allocation2 + $0x540] sm:$0xff]  ;;  %v3291_v47 = vld [vmem:[#allocation2 + $0x568] sm:$0xff]  ;;  %v3341_v0 = vmul.f32 %v3292_v25, %v7855_v36  ;;  %v3304_v51 = vld [vmem:[#allocation2 + $0x5d0] sm:$0xff]  ;;  %v3347_v45 = vmul.f32 %v3298_v14, %v7855_v36  ;;  %v3354_v14 = vmul.f32 %v3305_v37, %v7855_v36 }
 0x2df   :  { %7792 = vst [vmem:[#allocation18_spill] sm:$0xff] %v6613_v9  ;;  %v3268_v9 = vld [vmem:[#allocation2 + $0x4b0] sm:$0xff]  ;;  %v3302_v20 = vld [vmem:[#allocation2 + $0x5c0] sm:$0xff]  ;;  %v3309_v19 = vld [vmem:[#allocation2 + $0x5f8] sm:$0xff] }
 0x2e0   :  { %7796 = vst [vmem:[#allocation67_spill] sm:$0xff] %v6618_v56  ;;  %v3267_v56 = vld [vmem:[#allocation2 + $0x4a8] sm:$0xff]  ;;  %v6690_v22 = vmax.f32 %v7853_v40, %v7850_v62  ;;  %v3284_v62 = vld [vmem:[#allocation2 + $0x530] sm:$0xff]  ;;  %v3306_v3 = vld [vmem:[#allocation2 + $0x5e0] sm:$0xff]  ;;  %v3351_v1 = vmul.f32 %v3302_v20, %v7855_v36  ;;  %v3358_v20 = vmul.f32 %v3309_v19, %v7855_v36 }
 0x2e1   :  { %7800 = vst [vmem:[#allocation19_spill] sm:$0xff] %v6623_v15  ;;  %v7815_v15 = vmax.f32 %v7813_v49, %v7814_v16  ;;  %v3273_v49 = vld [vmem:[#allocation2 + $0x4d8] sm:$0xff]  ;;  %v6750_v5 = vmul.f32 %v3284_v62, %v7855_v36  ;;  %v3308_v6 = vld [vmem:[#allocation2 + $0x5f0] sm:$0xff]  ;;  %v3355_v10 = vmul.f32 %v3306_v3, %v7855_v36  ;;  %v3311_v21 = vld [vmem:[#allocation2 + $0x608] sm:$0xff] }
 0x2e2   :  { %7804 = vst [vmem:[#allocation68_spill] sm:$0xff] %v6628_v39  ;;  %v3272_v39 = vld [vmem:[#allocation2 + $0x4d0] sm:$0xff]  ;;  %v7830_v16 = vld [vmem:[#allocation94_spill] sm:$0xff]  ;;  %v3360_v46 = vmul.f32 %v3311_v21, %v7855_v36  ;;  %v7856_v37 = vld [vmem:[#allocation4_spill] sm:$0xff] }
 0x2e3   :  { %7808 = vst [vmem:[#allocation20_spill] sm:$0xff] %v6633_v61  ;;  %v6643_v4 = vmax.f32 %v7815_v15, %v3206_v7  ;;  %v3271_v61 = vld [vmem:[#allocation2 + $0x4c8] sm:$0xff]  ;;  %v3274_v7 = vld [vmem:[#allocation2 + $0x4e0] sm:$0xff]  ;;  %v7829_v15 = vld [vmem:[#allocation45_spill] sm:$0xff]  ;;  %v6714_v40 = vmul.f32 %v3272_v39, %v7855_v36 }
 0x2e4   :  { %7812 = vst [vmem:[#allocation69_spill] sm:$0xff] %v6638_v8  ;;  %v6658_v8 = vmax.f32 %v7827_v28, %v3209_v26  ;;  %v7841_v26 = vld [vmem:[#allocation48_spill] sm:$0xff]  ;;  %v6711_v63 = vmul.f32 %v3271_v61, %v7855_v36  ;;  %v3312_v13 = vld [vmem:[#allocation2 + $0x610] sm:$0xff] }
 0x2e5   :  { %7816 = vst [vmem:[#allocation21_spill] sm:$0xff] %v6643_v4  ;;  %v7831_v4 = vmax.f32 %v7829_v15, %v7830_v16  ;;  %v7843_v28 = vmax.f32 %v7841_v26, %v7842_v44  ;;  %v3277_v15 = vld [vmem:[#allocation2 + $0x4f8] sm:$0xff]  ;;  %v7846_v16 = vld [vmem:[#allocation49_spill] sm:$0xff]  ;;  %v6693_v26 = vmul.f32 %v3265_v33, %v7855_v36  ;;  %v3279_v44 = vld [vmem:[#allocation2 + $0x508] sm:$0xff] }
 0x2e6   :  { %7820 = vst [vmem:[#allocation70_spill] sm:$0xff] %v6648_v57  ;;  %v3276_v57 = vld [vmem:[#allocation2 + $0x4f0] sm:$0xff]  ;;  %v3283_v33 = vld [vmem:[#allocation2 + $0x528] sm:$0xff]  ;;  %v6729_v61 = vmul.f32 %v3277_v15, %v7855_v36  ;;  %v3293_v15 = vld [vmem:[#allocation2 + $0x578] sm:$0xff] }
 0x2e7   :  { %7824 = vst [vmem:[#allocation22_spill] sm:$0xff] %v6653_v48  ;;  %v6663_v31 = vmax.f32 %v7831_v4, %v3210_v41  ;;  %v3275_v48 = vld [vmem:[#allocation2 + $0x4e8] sm:$0xff]  ;;  %v3278_v41 = vld [vmem:[#allocation2 + $0x500] sm:$0xff]  ;;  %v3342_v52 = vmul.f32 %v3293_v15, %v7855_v36  ;;  %v3349_v15 = vmul.f32 %v3300_v32, %v7855_v36  ;;  %v6795_v3 = vadd.f32 %v6693_v26, %v7856_v37 }
 0x2e8   :  { %7828 = vst [vmem:[#allocation71_spill] sm:$0xff] %v6658_v8  ;;  %v6678_v8 = vmax.f32 %v7843_v28, %v3213_v24  ;;  %v7845_v4 = vld [vmem:[#allocation100_spill] sm:$0xff]  ;;  %v6696_v24 = vmul.f32 %v3266_v43, %v7855_v36  ;;  %v3280_v28 = vld [vmem:[#allocation2 + $0x510] sm:$0xff]  ;;  %v3285_v43 = vld [vmem:[#allocation2 + $0x538] sm:$0xff]  ;;  %v6732_v39 = vmul.f32 %v3278_v41, %v7855_v36  ;;  %v6747_v41 = vmul.f32 %v3283_v33, %v7855_v36 }
 0x2e9   :  { %7832 = vst [vmem:[#allocation23_spill] sm:$0xff] %v6663_v31  ;;  %v7847_v31 = vld [vmem:[#allocation98_spill] sm:$0xff]  ;;  %v6738_v58 = vmul.f32 %v3280_v28, %v7855_v36  ;;  %v6756_v28 = vmul.f32 %v3286_v29, %v7855_v36  ;;  %v3340_v29 = vmul.f32 %v3291_v47, %v7855_v36  ;;  %v3307_v47 = vld [vmem:[#allocation2 + $0x5e8] sm:$0xff]  ;;  %v6823_v26 = vadd.f32 %v6714_v40, %v7856_v37 }
 0x2ea   :  { %7836 = vst [vmem:[#allocation72_spill] sm:$0xff] %v6668_v30  ;;  %v7848_v17 = vmax.f32 %v7846_v16, %v7847_v31  ;;  %v6699_v31 = vmul.f32 %v3267_v56, %v7855_v36  ;;  %v6705_v16 = vmul.f32 %v3269_v55, %v7855_v36  ;;  %v6717_v56 = vmul.f32 %v3273_v49, %v7855_v36  ;;  %v3287_v55 = vld [vmem:[#allocation2 + $0x548] sm:$0xff]  ;;  %v3290_v49 = vld [vmem:[#allocation2 + $0x560] sm:$0xff] }
 0x2eb   :  { %7840 = vst [vmem:[#allocation24_spill] sm:$0xff] %v6673_v54  ;;  %v3282_v54 = vld [vmem:[#allocation2 + $0x520] sm:$0xff]  ;;  %v6726_v30 = vmul.f32 %v3276_v57, %v7855_v36  ;;  %v6768_v62 = vmul.f32 %v3290_v49, %v7855_v36  ;;  %v3346_v49 = vmul.f32 %v3297_v42, %v7855_v36  ;;  %v3353_v42 = vmul.f32 %v3304_v51, %v7855_v36 }
 0x2ec   :  { %7844 = vst [vmem:[#allocation73_spill] sm:$0xff] %v6678_v8  ;;  %v6684_v27 = vmax.f32 %v7848_v17, %v7845_v4  ;;  %v3281_v8 = vld [vmem:[#allocation2 + $0x518] sm:$0xff]  ;;  %v6702_v4 = vmul.f32 %v3268_v9, %v7855_v36  ;;  %v6708_v17 = vmul.f32 %v3270_v60, %v7855_v36  ;;  %v6720_v9 = vmul.f32 %v3274_v7, %v7855_v36 }
 0x2ed   :  { %7854 = vst [vmem:[#allocation74_spill] sm:$0xff] %v6690_v22  ;;  %v3288_v22 = vld [vmem:[#allocation2 + $0x550] sm:$0xff]  ;;  %v3289_v60 = vld [vmem:[#allocation2 + $0x558] sm:$0xff]  ;;  %v6735_v7 = vmul.f32 %v3279_v44, %v7855_v36  ;;  %v6744_v57 = vmul.f32 %v3282_v54, %v7855_v36  ;;  %v6753_v44 = vmul.f32 %v3285_v43, %v7855_v36  ;;  %v6759_v54 = vmul.f32 %v3287_v55, %v7855_v36  ;;  %v3299_v43 = vld [vmem:[#allocation2 + $0x5a8] sm:$0xff] }
 0x2ee   :  { %7849 = vst [vmem:[#allocation25_spill] sm:$0xff] %v6684_v27  ;;  %v6723_v27 = vmul.f32 %v3275_v48, %v7855_v36  ;;  %v6741_v48 = vmul.f32 %v3281_v8, %v7855_v36  ;;  %v3296_v8 = vld [vmem:[#allocation2 + $0x590] sm:$0xff]  ;;  %v6762_v53 = vmul.f32 %v3288_v22, %v7855_v36  ;;  %v6765_v33 = vmul.f32 %v3289_v60, %v7855_v36  ;;  %v3303_v22 = vld [vmem:[#allocation2 + $0x5c8] sm:$0xff] }
 0x2ef   :  { %v3343_v55 = vmul.f32 %v3294_v59, %v7855_v36  ;;  %v3344_v60 = vmul.f32 %v3295_v50, %v7855_v36  ;;  %v3345_v34 = vmul.f32 %v3296_v8, %v7855_v36  ;;  %v3348_v25 = vmul.f32 %v3299_v43, %v7855_v36  ;;  %v3310_v50 = vld [vmem:[#allocation2 + $0x600] sm:$0xff]  ;;  %v3313_v43 = vld [vmem:[#allocation2 + $0x618] sm:$0xff] }
 0x2f0   :  { %v3350_v59 = vmul.f32 %v3301_v35, %v7855_v36  ;;  %v3352_v8 = vmul.f32 %v3303_v22, %v7855_v36  ;;  %v3356_v32 = vmul.f32 %v3307_v47, %v7855_v36  ;;  %v3357_v35 = vmul.f32 %v3308_v6, %v7855_v36 }
 0x2f1   :  { %v3359_v38 = vmul.f32 %v3310_v50, %v7855_v36  ;;  %v3361_v22 = vmul.f32 %v3312_v13, %v7855_v36  ;;  %v3362_v51 = vmul.f32 %v3313_v43, %v7855_v36  ;;  %v6799_v18 = vadd.f32 %v6696_v24, %v7856_v37 }
 0x2f2   :  { %v6803_v6 = vadd.f32 %v6699_v31, %v7856_v37  ;;  %v6807_v19 = vadd.f32 %v6702_v4, %v7856_v37  ;;  %v6811_v13 = vadd.f32 %v6705_v16, %v7856_v37  ;;  %v6815_v21 = vadd.f32 %v6708_v17, %v7856_v37 }
 0x2f3   :  { %v6819_v36 = vadd.f32 %v6711_v63, %v7856_v37  ;;  %v6827_v24 = vadd.f32 %v6717_v56, %v7856_v37  ;;  %v6831_v31 = vadd.f32 %v6720_v9, %v7856_v37  ;;  %v6835_v4 = vadd.f32 %v6723_v27, %v7856_v37 }
 0x2f4   :  { %v6839_v16 = vadd.f32 %v6726_v30, %v7856_v37  ;;  %v6843_v17 = vadd.f32 %v6729_v61, %v7856_v37  ;;  %v6847_v63 = vadd.f32 %v6732_v39, %v7856_v37  ;;  %v6851_v40 = vadd.f32 %v6735_v7, %v7856_v37 }
 0x2f5   :  { %v6855_v27 = vadd.f32 %v6738_v58, %v7856_v37  ;;  %v6859_v30 = vadd.f32 %v6741_v48, %v7856_v37  ;;  %v6863_v56 = vadd.f32 %v6744_v57, %v7856_v37  ;;  %v6867_v9 = vadd.f32 %v6747_v41, %v7856_v37 }
 0x2f6   :  { %v6871_v61 = vadd.f32 %v6750_v5, %v7856_v37  ;;  %v6875_v58 = vadd.f32 %v6753_v44, %v7856_v37  ;;  %v6879_v39 = vadd.f32 %v6756_v28, %v7856_v37  ;;  %v6883_v7 = vadd.f32 %v6759_v54, %v7856_v37 }
 0x2f7   :  { %7857 = vst [vmem:[#allocation26_spill] sm:$0xff] %v6867_v9  ;;  %v6887_v48 = vadd.f32 %v6762_v53, %v7856_v37  ;;  %v6891_v5 = vadd.f32 %v6765_v33, %v7856_v37  ;;  %v6895_v57 = vadd.f32 %v6768_v62, %v7856_v37  ;;  %v6898_v41 = vadd.f32 %v3340_v29, %v7856_v37  ;;  %v7910_v9 = vld [vmem:[#allocation66_spill] sm:$0xff] }
 0x2f8   :  { %7858 = vst [vmem:[#allocation75_spill] sm:$0xff] %v6871_v61  ;;  %v6901_v44 = vadd.f32 %v3341_v0, %v7856_v37  ;;  %v6904_v28 = vadd.f32 %v3342_v52, %v7856_v37  ;;  %v6907_v53 = vadd.f32 %v3343_v55, %v7856_v37  ;;  %v6910_v54 = vadd.f32 %v3344_v60, %v7856_v37  ;;  %v7911_v61 = vld [vmem:[#allocation18_spill] sm:$0xff] }
 0x2f9   :  { %7859 = vst [vmem:[#allocation27_spill] sm:$0xff] %v6875_v58  ;;  %v6913_v33 = vadd.f32 %v3345_v34, %v7856_v37  ;;  %v6916_v62 = vadd.f32 %v3346_v49, %v7856_v37  ;;  %v6919_v29 = vadd.f32 %v3347_v45, %v7856_v37  ;;  %v6922_v0 = vadd.f32 %v3348_v25, %v7856_v37  ;;  %v7912_v58 = vld [vmem:[#allocation67_spill] sm:$0xff] }
 0x2fa   :  { %7860 = vst [vmem:[#allocation76_spill] sm:$0xff] %v6879_v39  ;;  %v6925_v52 = vadd.f32 %v3349_v15, %v7856_v37  ;;  %v6928_v55 = vadd.f32 %v3350_v59, %v7856_v37  ;;  %v6931_v60 = vadd.f32 %v3351_v1, %v7856_v37  ;;  %v6934_v34 = vadd.f32 %v3352_v8, %v7856_v37  ;;  %v7913_v39 = vld [vmem:[#allocation19_spill] sm:$0xff] }
 0x2fb   :  { %7861 = vst [vmem:[#allocation28_spill] sm:$0xff] %v6883_v7  ;;  %v6937_v49 = vadd.f32 %v3353_v42, %v7856_v37  ;;  %v6940_v45 = vadd.f32 %v3354_v14, %v7856_v37  ;;  %v6943_v47 = vadd.f32 %v3355_v10, %v7856_v37  ;;  %v6946_v25 = vadd.f32 %v3356_v32, %v7856_v37  ;;  %v7882_v42 = vld [vmem:[#allocation51_spill] sm:$0xff]  ;;  %v7914_v7 = vld [vmem:[#allocation68_spill] sm:$0xff] }
 0x2fc   :  { %7862 = vst [vmem:[#allocation77_spill] sm:$0xff] %v6887_v48  ;;  %v6949_v15 = vadd.f32 %v3357_v35, %v7856_v37  ;;  %v6952_v1 = vadd.f32 %v3358_v20, %v7856_v37  ;;  %v6955_v59 = vadd.f32 %v3359_v38, %v7856_v37  ;;  %v6958_v50 = vadd.f32 %v3360_v46, %v7856_v37  ;;  %v7883_v35 = vld [vmem:[#allocation52_spill] sm:$0xff] }
 0x2fd   :  { %7863 = vst [vmem:[#allocation29_spill] sm:$0xff] %v6891_v5  ;;  %v6961_v8 = vadd.f32 %v3361_v22, %v7856_v37  ;;  %v6964_v10 = vadd.f32 %v3362_v51, %v7856_v37  ;;  %v3412_v14 = vmax.f32 %v7882_v42, %v6795_v3  ;;  %v3413_v43 = vmax.f32 %v6453_v12, %v6799_v18  ;;  %v7884_v22 = vld [vmem:[#allocation53_spill] sm:$0xff]  ;;  %v7886_v12 = vld [vmem:[#allocation54_spill] sm:$0xff]  ;;  %v7915_v48 = vld [vmem:[#allocation20_spill] sm:$0xff] }
 0x2fe   :  { %7864 = vst [vmem:[#allocation78_spill] sm:$0xff] %v6895_v57  ;;  %v3414_v32 = vmax.f32 %v6458_v11, %v6803_v6  ;;  %v3415_v38 = vmax.f32 %v6463_v23, %v6807_v19  ;;  %v3416_v46 = vmax.f32 %v6468_v2, %v6811_v13  ;;  %v3417_v20 = vmax.f32 %v7883_v35, %v6815_v21  ;;  %v7885_v37 = vld [vmem:[#allocation5_spill] sm:$0xff]  ;;  %v7887_v11 = vld [vmem:[#allocation6_spill] sm:$0xff]  ;;  %v7888_v23 = vld [vmem:[#allocation55_spill] sm:$0xff] }
 0x2ff   :  { %7865 = vst [vmem:[#allocation30_spill] sm:$0xff] %v6898_v41  ;;  %v3418_v51 = vmax.f32 %v7884_v22, %v6819_v36  ;;  %v3419_v3 = vmax.f32 %v7885_v37, %v6823_v26  ;;  %v3420_v18 = vmax.f32 %v7886_v12, %v6827_v24  ;;  %v3421_v6 = vmax.f32 %v7887_v11, %v6831_v31  ;;  %v7889_v2 = vld [vmem:[#allocation7_spill] sm:$0xff]  ;;  %v7890_v21 = vld [vmem:[#allocation56_spill] sm:$0xff]  ;;  %v7892_v26 = vld [vmem:[#allocation57_spill] sm:$0xff] }
 0x300   :  { %7866 = vst [vmem:[#allocation79_spill] sm:$0xff] %v6901_v44  ;;  %v3422_v19 = vmax.f32 %v7888_v23, %v6835_v4  ;;  %v3423_v13 = vmax.f32 %v7889_v2, %v6839_v16  ;;  %v3424_v42 = vmax.f32 %v7890_v21, %v6843_v17  ;;  %v7891_v36 = vld [vmem:[#allocation8_spill] sm:$0xff]  ;;  %v3426_v22 = vmax.f32 %v7892_v26, %v6851_v40  ;;  %v7893_v24 = vld [vmem:[#allocation9_spill] sm:$0xff]  ;;  %v7894_v31 = vld [vmem:[#allocation58_spill] sm:$0xff] }
 0x301   :  { %7867 = vst [vmem:[#allocation31_spill] sm:$0xff] %v6904_v28  ;;  %v3425_v35 = vmax.f32 %v7891_v36, %v6847_v63  ;;  %v3427_v37 = vmax.f32 %v7893_v24, %v6855_v27  ;;  %v3428_v12 = vmax.f32 %v7894_v31, %v6859_v30  ;;  %v7895_v4 = vld [vmem:[#allocation10_spill] sm:$0xff]  ;;  %v7896_v16 = vld [vmem:[#allocation59_spill] sm:$0xff]  ;;  %v7898_v63 = vld [vmem:[#allocation60_spill] sm:$0xff]  ;;  %v3461_v44 = vmax.f32 %v3412_v14, 0.0 }
 0x302   :  { %7868 = vst [vmem:[#allocation80_spill] sm:$0xff] %v6907_v53  ;;  %v7897_v17 = vld [vmem:[#allocation11_spill] sm:$0xff]  ;;  %v7899_v40 = vld [vmem:[#allocation12_spill] sm:$0xff]  ;;  %v7900_v27 = vld [vmem:[#allocation61_spill] sm:$0xff]  ;;  %v3464_v28 = vmax.f32 %v3415_v38, 0.0  ;;  %v3468_v14 = vmax.f32 %v3419_v3, 0.0  ;;  %v7927_v38 = vmax.f32 %v7895_v4, %v6863_v56 }
 0x303   :  { %7869 = vst [vmem:[#allocation32_spill] sm:$0xff] %v6910_v54  ;;  %v7901_v30 = vld [vmem:[#allocation13_spill] sm:$0xff]  ;;  %v7902_v31 = vld [vmem:[#allocation62_spill] sm:$0xff]  ;;  %v7904_v2 = vld [vmem:[#allocation63_spill] sm:$0xff] }
 0x304   :  { %7870 = vst [vmem:[#allocation81_spill] sm:$0xff] %v6913_v33  ;;  %v7903_v23 = vld [vmem:[#allocation14_spill] sm:$0xff]  ;;  %v7905_v21 = vld [vmem:[#allocation15_spill] sm:$0xff]  ;;  %v7906_v36 = vld [vmem:[#allocation64_spill] sm:$0xff] }
 0x305   :  { %7871 = vst [vmem:[#allocation33_spill] sm:$0xff] %v6916_v62  ;;  %v7907_v26 = vld [vmem:[#allocation16_spill] sm:$0xff]  ;;  %v7908_v24 = vld [vmem:[#allocation65_spill] sm:$0xff]  ;;  %v7918_v41 = vld [vmem:[#allocation70_spill] sm:$0xff] }
 0x306   :  { %7872 = vst [vmem:[#allocation82_spill] sm:$0xff] %v6919_v29  ;;  %v7909_v11 = vld [vmem:[#allocation17_spill] sm:$0xff]  ;;  %v7921_v53 = vld [vmem:[#allocation23_spill] sm:$0xff]  ;;  %v7922_v54 = vld [vmem:[#allocation72_spill] sm:$0xff] }
 0x307   :  { %7873 = vst [vmem:[#allocation34_spill] sm:$0xff] %v6922_v0  ;;  %v7916_v5 = vld [vmem:[#allocation69_spill] sm:$0xff]  ;;  %v7923_v33 = vld [vmem:[#allocation24_spill] sm:$0xff]  ;;  %v7926_v0 = vld [vmem:[#allocation74_spill] sm:$0xff] }
 0x308   :  { %7874 = vst [vmem:[#allocation83_spill] sm:$0xff] %v6925_v52  ;;  %v7917_v57 = vld [vmem:[#allocation21_spill] sm:$0xff]  ;;  %v3462_v52 = vmax.f32 %v3413_v43, 0.0  ;;  %v3469_v43 = vmax.f32 %v3420_v18, 0.0  ;;  %v7930_v18 = vld [vmem:[#allocation75_spill] sm:$0xff] }
 0x309   :  { %7875 = vst [vmem:[#allocation35_spill] sm:$0xff] %v6928_v55  ;;  %v7924_v62 = vld [vmem:[#allocation73_spill] sm:$0xff]  ;;  %v3465_v55 = vmax.f32 %v3416_v46, 0.0  ;;  %v3478_v46 = vmax.f32 %v7927_v38, 0.0  ;;  %v7932_v56 = vld [vmem:[#allocation27_spill] sm:$0xff] }
 0x30a   :  { %7876 = vst [vmem:[#allocation84_spill] sm:$0xff] %v6931_v60  ;;  %v3456_v60 = vmax.f32 %v7922_v54, %v6952_v1  ;;  %v7925_v29 = vld [vmem:[#allocation25_spill] sm:$0xff] }
 0x30b   :  { %7877 = vst [vmem:[#allocation36_spill] sm:$0xff] %v6934_v34  ;;  %v3466_v34 = vmax.f32 %v3417_v20, 0.0  ;;  %v7928_v20 = vld [vmem:[#allocation26_spill] sm:$0xff]  ;;  %v7982_v54 = vmax.f32 %v7925_v29, %v6961_v8 }
 0x30c   :  { %7878 = vst [vmem:[#allocation85_spill] sm:$0xff] %v6937_v49  ;;  %v3458_v49 = vmax.f32 %v7924_v62, %v6958_v50 }
 0x30d   :  { %7879 = vst [vmem:[#allocation37_spill] sm:$0xff] %v6940_v45  ;;  %v3467_v45 = vmax.f32 %v3418_v51, 0.0  ;;  %v7929_v51 = vmax.f32 %v7896_v16, %v7928_v20 }
 0x30e   :  { %7880 = vst [vmem:[#allocation86_spill] sm:$0xff] %v6943_v47  ;;  %v3460_v47 = vmax.f32 %v7926_v0, %v6964_v10 }
 0x30f   :  { %7881 = vst [vmem:[#allocation38_spill] sm:$0xff] %v6946_v25  ;;  %v3463_v25 = vmax.f32 %v3414_v32, 0.0  ;;  %v3477_v32 = vmax.f32 %v3428_v12, 0.0  ;;  %v3479_v3 = vmax.f32 %v7929_v51, 0.0  ;;  %v7936_v12 = vld [vmem:[#allocation28_spill] sm:$0xff] }
 0x310   :  { %3510 = vst.msk [vmem:[%s7361_s5] sm:$0xff] %vm391_vm2, %v3461_v44  ;;  %v3470_v44 = vmax.f32 %v3421_v6, 0.0  ;;  %v7931_v6 = vmax.f32 %v7897_v17, %v7930_v18  ;;  %v7937_v4 = vmax.f32 %v7900_v27, %v7936_v12  ;;  %v7938_v17 = vld [vmem:[#allocation77_spill] sm:$0xff]  ;;  %v7942_v27 = vld [vmem:[#allocation78_spill] sm:$0xff] }
 0x311   :  { %3511 = vst.msk [vmem:[%s7361_s5 + $0x8] sm:$0xff] %vm391_vm2, %v3462_v52  ;;  %v3471_v52 = vmax.f32 %v3422_v19, 0.0 }
 0x312   :  { %3512 = vst.msk [vmem:[%s7361_s5 + $0x10] sm:$0xff] %vm391_vm2, %v3463_v25  ;;  %v3472_v25 = vmax.f32 %v3423_v13, 0.0  ;;  %v3480_v19 = vmax.f32 %v7931_v6, 0.0  ;;  %v7933_v13 = vmax.f32 %v7898_v63, %v7932_v56  ;;  %v3483_v16 = vmax.f32 %v7937_v4, 0.0 }
 0x313   :  { %3513 = vst.msk [vmem:[%s7361_s5 + $0x18] sm:$0xff] %vm391_vm2, %v3464_v28  ;;  %v3473_v28 = vmax.f32 %v3424_v42, 0.0  ;;  %v7939_v63 = vmax.f32 %v7901_v30, %v7938_v17  ;;  %v7944_v30 = vld [vmem:[#allocation30_spill] sm:$0xff] }
 0x314   :  { %3514 = vst.msk [vmem:[%s7361_s5 + $0x20] sm:$0xff] %vm391_vm2, %v3465_v55  ;;  %v3474_v55 = vmax.f32 %v3425_v35, 0.0  ;;  %v3481_v42 = vmax.f32 %v7933_v13, 0.0  ;;  %v7934_v35 = vld [vmem:[#allocation76_spill] sm:$0xff] }
 0x315   :  { %3515 = vst.msk [vmem:[%s7361_s5 + $0x28] sm:$0xff] %vm391_vm2, %v3466_v34  ;;  %v3475_v34 = vmax.f32 %v3426_v22, 0.0  ;;  %v7935_v22 = vmax.f32 %v7899_v40, %v7934_v35  ;;  %v7940_v40 = vld [vmem:[#allocation29_spill] sm:$0xff] }
 0x316   :  { %3516 = vst.msk [vmem:[%s7361_s5 + $0x30] sm:$0xff] %vm391_vm2, %v3467_v45  ;;  %v3476_v45 = vmax.f32 %v3427_v37, 0.0 }
 0x317   :  { %3517 = vst.msk [vmem:[%s7361_s5 + $0x38] sm:$0xff] %vm391_vm2, %v3468_v14  ;;  %v3482_v37 = vmax.f32 %v7935_v22, 0.0  ;;  %v3484_v14 = vmax.f32 %v7939_v63, 0.0 }
 0x318   :  { %3518 = vst.msk [vmem:[%s7361_s5 + $0x40] sm:$0xff] %vm391_vm2, %v3469_v43  ;;  %v7941_v43 = vmax.f32 %v7902_v31, %v7940_v40  ;;  %v7946_v31 = vld [vmem:[#allocation79_spill] sm:$0xff] }
 0x319   :  { %3519 = vst.msk [vmem:[%s7361_s5 + $0x48] sm:$0xff] %vm391_vm2, %v3470_v44 }
 0x31a   :  { %3520 = vst.msk [vmem:[%s7361_s5 + $0x50] sm:$0xff] %vm391_vm2, %v3471_v52  ;;  %v3485_v44 = vmax.f32 %v7941_v43, 0.0  ;;  %v7943_v52 = vmax.f32 %v7903_v23, %v7942_v27  ;;  %v7948_v23 = vld [vmem:[#allocation31_spill] sm:$0xff] }
 0x31b   :  { %3521 = vst.msk [vmem:[%s7361_s5 + $0x58] sm:$0xff] %vm391_vm2, %v3472_v25 }
 0x31c   :  { %3522 = vst.msk [vmem:[%s7361_s5 + $0x60] sm:$0xff] %vm391_vm2, %v3473_v28  ;;  %v3486_v25 = vmax.f32 %v7943_v52, 0.0  ;;  %v7945_v28 = vmax.f32 %v7904_v2, %v7944_v30  ;;  %v7950_v2 = vld [vmem:[#allocation80_spill] sm:$0xff] }
 0x31d   :  { %3523 = vst.msk [vmem:[%s7361_s5 + $0x68] sm:$0xff] %vm391_vm2, %v3474_v55 }
 0x31e   :  { %3524 = vst.msk [vmem:[%s7361_s5 + $0x70] sm:$0xff] %vm391_vm2, %v3475_v34  ;;  %v3487_v55 = vmax.f32 %v7945_v28, 0.0  ;;  %v7947_v34 = vmax.f32 %v7905_v21, %v7946_v31  ;;  %v7952_v21 = vld [vmem:[#allocation32_spill] sm:$0xff] }
 0x31f   :  { %3525 = vst.msk [vmem:[%s7361_s5 + $0x78] sm:$0xff] %vm391_vm2, %v3476_v45  ;;  %v7953_v51 = vmax.f32 %v7908_v24, %v7952_v21  ;;  %v7958_v24 = vld [vmem:[#allocation82_spill] sm:$0xff] }
 0x320   :  { %3526 = vst.msk [vmem:[%s7361_s5 + $0x80] sm:$0xff] %vm391_vm2, %v3477_v32  ;;  %v3488_v45 = vmax.f32 %v7947_v34, 0.0  ;;  %v7949_v32 = vmax.f32 %v7906_v36, %v7948_v23  ;;  %v7954_v36 = vld [vmem:[#allocation81_spill] sm:$0xff]  ;;  %v7959_v13 = vmax.f32 %v7911_v61, %v7958_v24  ;;  %v7964_v61 = vld [vmem:[#allocation35_spill] sm:$0xff]  ;;  %v3505_v23 = vmax.f32 %v3456_v60, 0.0 }
 0x321   :  { %3527 = vst.msk [vmem:[%s7361_s5 + $0x88] sm:$0xff] %vm391_vm2, %v3478_v46  ;;  %v7951_v46 = vmax.f32 %v7907_v26, %v7950_v2  ;;  %v7955_v18 = vmax.f32 %v7909_v11, %v7954_v36  ;;  %v7956_v26 = vld [vmem:[#allocation33_spill] sm:$0xff]  ;;  %v7960_v11 = vld [vmem:[#allocation34_spill] sm:$0xff]  ;;  %v7965_v4 = vmax.f32 %v7914_v7, %v7964_v61  ;;  %v3508_v60 = vmax.f32 %v7982_v54, 0.0 }
 0x322   :  { %3528 = vst.msk [vmem:[%s7361_s5 + $0x90] sm:$0xff] %vm391_vm2, %v3479_v3  ;;  %v3489_v38 = vmax.f32 %v7949_v32, 0.0  ;;  %v3491_v3 = vmax.f32 %v7953_v51, 0.0  ;;  %v7961_v35 = vmax.f32 %v7912_v58, %v7960_v11  ;;  %v7966_v58 = vld [vmem:[#allocation84_spill] sm:$0xff]  ;;  %v7970_v7 = vld [vmem:[#allocation85_spill] sm:$0xff]  ;;  %v7981_v32 = vmax.f32 %v7923_v33, %v6955_v59 }
 0x323   :  { %3529 = vst.msk [vmem:[%s7361_s5 + $0x98] sm:$0xff] %vm391_vm2, %v3480_v19  ;;  %v3490_v20 = vmax.f32 %v7951_v46, 0.0  ;;  %v3492_v6 = vmax.f32 %v7955_v18, 0.0  ;;  %v7957_v19 = vmax.f32 %v7910_v9, %v7956_v26  ;;  %v7962_v9 = vld [vmem:[#allocation83_spill] sm:$0xff]  ;;  %v7967_v17 = vmax.f32 %v7915_v48, %v7966_v58  ;;  %v7972_v48 = vld [vmem:[#allocation37_spill] sm:$0xff] }
 0x324   :  { %3530 = vst.msk [vmem:[%s7361_s5 + $0xa0] sm:$0xff] %vm391_vm2, %v3481_v42  ;;  %v3494_v42 = vmax.f32 %v7959_v13, 0.0  ;;  %v3495_v22 = vmax.f32 %v7961_v35, 0.0  ;;  %v7971_v43 = vmax.f32 %v7917_v57, %v7970_v7  ;;  %v7973_v27 = vmax.f32 %v7918_v41, %v7972_v48  ;;  %v7977_v57 = vld [vmem:[#allocation71_spill] sm:$0xff] }
 0x325   :  { %3531 = vst.msk [vmem:[%s7361_s5 + $0xa8] sm:$0xff] %vm391_vm2, %v3482_v37  ;;  %v3493_v56 = vmax.f32 %v7957_v19, 0.0  ;;  %v7963_v37 = vmax.f32 %v7913_v39, %v7962_v9  ;;  %v3498_v63 = vmax.f32 %v7967_v17, 0.0  ;;  %v7968_v39 = vld [vmem:[#allocation36_spill] sm:$0xff]  ;;  %v7980_v41 = vmax.f32 %v7921_v53, %v6949_v15 }
 0x326   :  { %3532 = vst.msk [vmem:[%s7361_s5 + $0xb0] sm:$0xff] %vm391_vm2, %v3483_v16  ;;  %v3497_v16 = vmax.f32 %v7965_v4, 0.0  ;;  %v3501_v52 = vmax.f32 %v7973_v27, 0.0  ;;  %v3507_v53 = vmax.f32 %v3458_v49, 0.0  ;;  %v3509_v33 = vmax.f32 %v3460_v47, 0.0 }
 0x327   :  { %3533 = vst.msk [vmem:[%s7361_s5 + $0xb8] sm:$0xff] %vm391_vm2, %v3484_v14  ;;  %v3496_v12 = vmax.f32 %v7963_v37, 0.0  ;;  %v7969_v14 = vmax.f32 %v7916_v5, %v7968_v39  ;;  %v7974_v5 = vld [vmem:[#allocation22_spill] sm:$0xff] }
 0x328   :  { %3534 = vst.msk [vmem:[%s7361_s5 + $0xc0] sm:$0xff] %vm391_vm2, %v3485_v44  ;;  %v3500_v44 = vmax.f32 %v7971_v43, 0.0 }
 0x329   :  { %3535 = vst.msk [vmem:[%s7361_s5 + $0xc8] sm:$0xff] %vm391_vm2, %v3486_v25  ;;  %v3499_v40 = vmax.f32 %v7969_v14, 0.0  ;;  %v7975_v25 = vld [vmem:[#allocation86_spill] sm:$0xff] }
 0x32a   :  { %3536 = vst.msk [vmem:[%s7361_s5 + $0xd0] sm:$0xff] %vm391_vm2, %v3487_v55  ;;  %v7976_v30 = vmax.f32 %v7974_v5, %v7975_v25  ;;  %v7978_v55 = vld [vmem:[#allocation38_spill] sm:$0xff] }
 0x32b   :  { %3537 = vst.msk [vmem:[%s7361_s5 + $0xd8] sm:$0xff] %vm391_vm2, %v3488_v45  ;;  %v7979_v31 = vmax.f32 %v7977_v57, %v7978_v55  ;;  %v3504_v45 = vmax.f32 %v7980_v41, 0.0 }
 0x32c   :  { %3538 = vst.msk [vmem:[%s7361_s5 + $0xe0] sm:$0xff] %vm391_vm2, %v3489_v38  ;;  %v3502_v28 = vmax.f32 %v7976_v30, 0.0  ;;  %v3506_v38 = vmax.f32 %v7981_v32, 0.0 }
 0x32d   :  { %3539 = vst.msk [vmem:[%s7361_s5 + $0xe8] sm:$0xff] %vm391_vm2, %v3490_v20  ;;  %v3503_v34 = vmax.f32 %v7979_v31, 0.0 }
 0x32e   :  { %3540 = vst.msk [vmem:[%s7361_s5 + $0xf0] sm:$0xff] %vm391_vm2, %v3491_v3 }
 0x32f   :  { %3541 = vst.msk [vmem:[%s7361_s5 + $0xf8] sm:$0xff] %vm391_vm2, %v3492_v6 }
 0x330   :  { %3542 = vst.msk [vmem:[%s7361_s5 + $0x100] sm:$0xff] %vm391_vm2, %v3493_v56 }
 0x331   :  { %3543 = vst.msk [vmem:[%s7361_s5 + $0x108] sm:$0xff] %vm391_vm2, %v3494_v42 }
 0x332   :  { %3544 = vst.msk [vmem:[%s7361_s5 + $0x110] sm:$0xff] %vm391_vm2, %v3495_v22 }
 0x333   :  { %3545 = vst.msk [vmem:[%s7361_s5 + $0x118] sm:$0xff] %vm391_vm2, %v3496_v12 }
 0x334   :  { %3546 = vst.msk [vmem:[%s7361_s5 + $0x120] sm:$0xff] %vm391_vm2, %v3497_v16 }
 0x335   :  { %3547 = vst.msk [vmem:[%s7361_s5 + $0x128] sm:$0xff] %vm391_vm2, %v3498_v63 }
 0x336   :  { %3548 = vst.msk [vmem:[%s7361_s5 + $0x130] sm:$0xff] %vm391_vm2, %v3499_v40 }
 0x337   :  { %3549 = vst.msk [vmem:[%s7361_s5 + $0x138] sm:$0xff] %vm391_vm2, %v3500_v44 }
 0x338   :  { %3550 = vst.msk [vmem:[%s7361_s5 + $0x140] sm:$0xff] %vm391_vm2, %v3501_v52 }
 0x339   :  { %3551 = vst.msk [vmem:[%s7361_s5 + $0x148] sm:$0xff] %vm391_vm2, %v3502_v28 }
 0x33a   :  { %3552 = vst.msk [vmem:[%s7361_s5 + $0x150] sm:$0xff] %vm391_vm2, %v3503_v34 }
 0x33b   :  { %3553 = vst.msk [vmem:[%s7361_s5 + $0x158] sm:$0xff] %vm391_vm2, %v3504_v45 }
 0x33c   :  { %3554 = vst.msk [vmem:[%s7361_s5 + $0x160] sm:$0xff] %vm391_vm2, %v3505_v23 }
 0x33d   :  { %3555 = vst.msk [vmem:[%s7361_s5 + $0x168] sm:$0xff] %vm391_vm2, %v3506_v38 }
 0x33e   :  { %3556 = vst.msk [vmem:[%s7361_s5 + $0x170] sm:$0xff] %vm391_vm2, %v3507_v53 }
 0x33f   :  { %3557 = vst.msk [vmem:[%s7361_s5 + $0x178] sm:$0xff] %vm391_vm2, %v3508_v60 }
 0x340   :  { %3558 = vst.msk [vmem:[%s7361_s5 + $0x180] sm:$0xff] %vm391_vm2, %v3509_v33 }

// kernel: handwritten_forward.4
= control target key start
LH: loop header
LB: loop body
LE: loop exit
PB: predicated region body
PF: predicated region fallthrough
CT: control target
= control target key end

     0   :  { %vm68_vm0 = vcmask 130048   ;;  %vm220_vm1 = vcmask 523264   ;;  %vm233_vm2 = vcmask 517120   ;;  %s2694_s1 = inlined_call_operand.vmem [shape: f32[144,64], index: 1, kind: input, shape index: {}]   ;;  %s2695_s0 = inlined_call_operand.vmem [shape: f32[4,98,144], index: 0, kind: input, shape index: {}]   ;;  %s2696_s2 = inlined_call_operand.vmem [shape: f32[1,64], index: 2, kind: input, shape index: {}]   ;;  %s2697_s3 = inlined_call_operand.vmem [shape: f32[1,64], index: 3, kind: input, shape index: {}]   ;;  %s2698_s4 = inlined_call_operand.vmem [shape: f32[1,64], index: 4, kind: input, shape index: {}]   ;;  %s2699_s5 = inlined_call_operand.vmem [shape: f32[98,64], index: 5, kind: output, shape index: {}]  }
   0x1   :  { %v1553_v0 = vld [vmem:[%s2694_s1 + $0x78] sm:$0xff]  ;;  %v1558_v1 = vld [vmem:[%s2694_s1 + $0x88] sm:$0xff]  ;;  %v1563_v2 = vld [vmem:[%s2694_s1 + $0x70] sm:$0xff] }
   0x2   :  { %108 = vmatpush.msra.mxu0 %v1553_v0  ;;  %378 = vmatpush.msra.mxu2 %v1553_v0  ;;  %v1570_v3 = vld [vmem:[%s2694_s1 + $0x80] sm:$0xff]  ;;  %v1382_v4 = vld [vmem:[%s2695_s0 + $0xd8] sm:$0xff]  ;;  %v1579_v5 = vld [vmem:[%s2694_s1 + $0x68] sm:$0xff] }
   0x3   :  { %448 = vmatpush.msra.mxu3 %v1558_v1  ;;  %178 = vmatpush.msra.mxu1 %v1558_v1  ;;  %v40_v6 = vld [vmem:[%s2695_s0 + $0x8] sm:$0xff]  ;;  %v1591_v7 = vld [vmem:[%s2694_s1 + $0x60] sm:$0xff]  ;;  %v1601_v8 = vld [vmem:[%s2694_s1 + $0x58] sm:$0xff] }
   0x4   :  { %109 = vmatpush.msra.mxu0 %v1563_v2  ;;  %379 = vmatpush.msra.mxu2 %v1563_v2  ;;  %v1609_v9 = vld [vmem:[%s2694_s1 + $0x50] sm:$0xff]  ;;  %v1384_v10 = vld [vmem:[%s2695_s0 + $0xe8] sm:$0xff]  ;;  %v42_v12 = vld [vmem:[%s2695_s0 + $0x18] sm:$0xff] }
   0x5   :  { %449 = vmatpush.msra.mxu3 %v1570_v3  ;;  %179 = vmatpush.msra.mxu1 %v1570_v3  ;;  %v1621_v11 = vld [vmem:[%s2694_s1 + $0x48] sm:$0xff]  ;;  %v1633_v13 = vld [vmem:[%s2694_s1 + $0x40] sm:$0xff]  ;;  %v1643_v14 = vld [vmem:[%s2694_s1 + $0x38] sm:$0xff] }
   0x6   :  { %1407 = vmatmul.msk.f32.vlgmr.msra.gmra.mxu3 %vm68_vm0, %v1382_v4  ;;  %110 = vmatpush.msra.mxu0 %v1579_v5  ;;  %v1651_v15 = vld [vmem:[%s2694_s1 + $0x30] sm:$0xff]  ;;  %v1386_v16 = vld [vmem:[%s2695_s0 + $0xf8] sm:$0xff]  ;;  %v1663_v17 = vld [vmem:[%s2694_s1 + $0x28] sm:$0xff] }
   0x7   :  { %380 = vmatpush.msra.mxu2 %v1579_v5  ;;  %1368 = vmatmul.msk.f32.vlgmr.msra.gmra.mxu1 %vm68_vm0, %v40_v6  ;;  %v44_v18 = vld [vmem:[%s2695_s0 + $0x28] sm:$0xff]  ;;  %v1674_v19 = vld [vmem:[%s2694_s1 + $0x20] sm:$0xff]  ;;  %v1683_v20 = vld [vmem:[%s2694_s1 + $0x18] sm:$0xff] }
   0x8   :  { %111 = vmatpush.msra.mxu0 %v1591_v7  ;;  %717 = vmatpush.msrb.mxu3 %v1558_v1  ;;  %v1691_v21 = vld [vmem:[%s2694_s1 + $0x10] sm:$0xff]  ;;  %v1388_v22 = vld [vmem:[%s2695_s0 + $0x108] sm:$0xff]  ;;  %v46_v24 = vld [vmem:[%s2695_s0 + $0x38] sm:$0xff] }
   0x9   :  { %381 = vmatpush.msra.mxu2 %v1591_v7  ;;  %647 = vmatpush.msrb.mxu1 %v1553_v0  ;;  %v1702_v23 = vld [vmem:[%s2694_s1 + $0x8] sm:$0xff]  ;;  %v1713_v25 = vld [vmem:[%s2694_s1] sm:$0xff]  ;;  %v1381_v27 = vld [vmem:[%s2695_s0 + $0xd0] sm:$0xff] }
   0xa   :  { %112 = vmatpush.msra.mxu0 %v1601_v8  ;;  %718 = vmatpush.msrb.mxu3 %v1570_v3  ;;  %v39_v26 = vld [vmem:[%s2695_s0] sm:$0xff]  ;;  %v1390_v28 = vld [vmem:[%s2695_s0 + $0x118] sm:$0xff]  ;;  %v48_v29 = vld [vmem:[%s2695_s0 + $0x48] sm:$0xff] }
   0xb   :  { %382 = vmatpush.msra.mxu2 %v1601_v8  ;;  %648 = vmatpush.msrb.mxu1 %v1563_v2  ;;  %v41_v30 = vld [vmem:[%s2695_s0 + $0x10] sm:$0xff]  ;;  %v1383_v31 = vld [vmem:[%s2695_s0 + $0xe0] sm:$0xff]  ;;  %v1392_v32 = vld [vmem:[%s2695_s0 + $0x128] sm:$0xff] }
   0xc   :  { %113 = vmatpush.msra.mxu0 %v1609_v9  ;;  %1514 = vmatpush.msra.mxu3 %v1558_v1  ;;  %v50_v33 = vld [vmem:[%s2695_s0 + $0x58] sm:$0xff]  ;;  %v43_v34 = vld [vmem:[%s2695_s0 + $0x20] sm:$0xff]  ;;  %v1385_v35 = vld [vmem:[%s2695_s0 + $0xf0] sm:$0xff] }
   0xd   :  { %383 = vmatpush.msra.mxu2 %v1609_v9  ;;  %649 = vmatpush.msrb.mxu1 %v1579_v5  ;;  %v1394_v36 = vld [vmem:[%s2695_s0 + $0x138] sm:$0xff]  ;;  %v52_v37 = vld [vmem:[%s2695_s0 + $0x68] sm:$0xff]  ;;  %v45_v38 = vld [vmem:[%s2695_s0 + $0x30] sm:$0xff] }
   0xe   :  { %1408 = vmatmul.msk.f32.gmra.mxu3 %vm68_vm0, %v1384_v10  ;;  %114 = vmatpush.msra.mxu0 %v1621_v11  ;;  %v1387_v39 = vld [vmem:[%s2695_s0 + $0x100] sm:$0xff]  ;;  %v1396_v40 = vld [vmem:[%s2695_s0 + $0x148] sm:$0xff]  ;;  %v54_v41 = vld [vmem:[%s2695_s0 + $0x78] sm:$0xff] }
   0xf   :  { %384 = vmatpush.msra.mxu2 %v1621_v11  ;;  %1369 = vmatmul.msk.f32.gmra.mxu1 %vm68_vm0, %v42_v12  ;;  %v47_v42 = vld [vmem:[%s2695_s0 + $0x40] sm:$0xff]  ;;  %v1389_v43 = vld [vmem:[%s2695_s0 + $0x110] sm:$0xff]  ;;  %v1398_v44 = vld [vmem:[%s2695_s0 + $0x158] sm:$0xff] }
  0x10   :  { %115 = vmatpush.msra.mxu0 %v1633_v13  ;;  %650 = vmatpush.msrb.mxu1 %v1591_v7  ;;  %v56_v45 = vld [vmem:[%s2695_s0 + $0x88] sm:$0xff]  ;;  %v49_v46 = vld [vmem:[%s2695_s0 + $0x50] sm:$0xff]  ;;  %v1391_v47 = vld [vmem:[%s2695_s0 + $0x120] sm:$0xff] }
  0x11   :  { %385 = vmatpush.msra.mxu2 %v1633_v13  ;;  %1515 = vmatpush.msra.mxu3 %v1570_v3  ;;  %v1400_v48 = vld [vmem:[%s2695_s0 + $0x168] sm:$0xff]  ;;  %v58_v49 = vld [vmem:[%s2695_s0 + $0x98] sm:$0xff]  ;;  %v51_v50 = vld [vmem:[%s2695_s0 + $0x60] sm:$0xff] }
  0x12   :  { %116 = vmatpush.msra.mxu0 %v1643_v14  ;;  %651 = vmatpush.msrb.mxu1 %v1601_v8  ;;  %v1393_v51 = vld [vmem:[%s2695_s0 + $0x130] sm:$0xff]  ;;  %v1402_v52 = vld [vmem:[%s2695_s0 + $0x178] sm:$0xff]  ;;  %v60_v53 = vld [vmem:[%s2695_s0 + $0xa8] sm:$0xff] }
  0x13   :  { %386 = vmatpush.msra.mxu2 %v1643_v14  ;;  %v53_v54 = vld [vmem:[%s2695_s0 + $0x70] sm:$0xff]  ;;  %v1395_v55 = vld [vmem:[%s2695_s0 + $0x140] sm:$0xff]  ;;  %v1404_v56 = vld [vmem:[%s2695_s0 + $0x188] sm:$0xff] }
  0x14   :  { %117 = vmatpush.msra.mxu0 %v1651_v15  ;;  %652 = vmatpush.msrb.mxu1 %v1609_v9  ;;  %v62_v57 = vld [vmem:[%s2695_s0 + $0xb8] sm:$0xff]  ;;  %v55_v58 = vld [vmem:[%s2695_s0 + $0x80] sm:$0xff]  ;;  %v1397_v59 = vld [vmem:[%s2695_s0 + $0x150] sm:$0xff] }
  0x15   :  { %387 = vmatpush.msra.mxu2 %v1651_v15  ;;  %v1406_v60 = vld [vmem:[%s2695_s0 + $0x198] sm:$0x3]  ;;  %v64_v61 = vld [vmem:[%s2695_s0 + $0xc8] sm:$0x3]  ;;  %v57_v62 = vld [vmem:[%s2695_s0 + $0x90] sm:$0xff] }
  0x16   :  { %1409 = vmatmul.msk.f32.gmra.mxu3 %vm68_vm0, %v1386_v16  ;;  %118 = vmatpush.msra.mxu0 %v1663_v17  ;;  %v1399_v63 = vld [vmem:[%s2695_s0 + $0x160] sm:$0xff]  ;;  %v1423_v4 = vld [vmem:[%s2695_s0 + $0x1b8] sm:$0xff]  ;;  %v61_v6 = vld [vmem:[%s2695_s0 + $0xb0] sm:$0xff] }
  0x17   :  { %388 = vmatpush.msra.mxu2 %v1663_v17  ;;  %1370 = vmatmul.msk.f32.gmra.mxu1 %vm68_vm0, %v44_v18  ;;  %v63_v10 = vld [vmem:[%s2695_s0 + $0xc0] sm:$0x3]  ;;  %v1427_v12 = vld [vmem:[%s2695_s0 + $0x1d8] sm:$0xff]  ;;  %v1429_v18 = vld [vmem:[%s2695_s0 + $0x1e8] sm:$0xff] }
  0x18   :  { %119 = vmatpush.msra.mxu0 %v1674_v19  ;;  %653 = vmatpush.msrb.mxu1 %v1621_v11  ;;  %v1460_v16 = vld [vmem:[%s2695_s0 + $0x278] sm:$0xff] }
  0x19   :  { %389 = vmatpush.msra.mxu2 %v1674_v19 }
  0x1a   :  { %120 = vmatpush.msra.mxu0 %v1683_v20  ;;  %654 = vmatpush.msrb.mxu1 %v1633_v13 }
  0x1b   :  { %390 = vmatpush.msra.mxu2 %v1683_v20 }
  0x1c   :  { %121 = vmatpush.msra.mxu0 %v1691_v21  ;;  %655 = vmatpush.msrb.mxu1 %v1643_v14 }
  0x1d   :  { %391 = vmatpush.msra.mxu2 %v1691_v21 }
  0x1e   :  { %1410 = vmatmul.msk.f32.gmra.mxu3 %vm68_vm0, %v1388_v22  ;;  %122 = vmatpush.msra.mxu0 %v1702_v23  ;;  %v1462_v22 = vld [vmem:[%s2695_s0 + $0x288] sm:$0xff] }
  0x1f   :  { %392 = vmatpush.msra.mxu2 %v1702_v23  ;;  %1371 = vmatmul.msk.f32.gmra.mxu1 %vm68_vm0, %v46_v24  ;;  %v1431_v24 = vld [vmem:[%s2695_s0 + $0x1f8] sm:$0xff] }
  0x20   :  { %123 = vmatpush.msra.mxu0 %v1713_v25  ;;  %656 = vmatpush.msrb.mxu1 %v1651_v15 }
  0x21   :  { %393 = vmatpush.msra.mxu2 %v1713_v25  ;;  %124 = vmatmul.f32.vlgmr.msra.gmra.mxu0 %v39_v26  ;;  %v1430_v26 = vld [vmem:[%s2695_s0 + $0x1f0] sm:$0xff] }
  0x22   :  { %394 = vmatmul.f32.vlgmr.msra.gmra.mxu2 %v1381_v27  ;;  %916 = vmatpush.msrb.mxu0 %v1553_v0  ;;  %v1463_v27 = vld [vmem:[%s2695_s0 + $0x290] sm:$0xff] }
  0x23   :  { %986 = vmatpush.msrb.mxu2 %v1558_v1  ;;  %657 = vmatpush.msrb.mxu1 %v1663_v17  ;;  %v1420_v1 = vld [vmem:[%s2695_s0 + $0x1a0] sm:$0xff] }
  0x24   :  { %917 = vmatpush.msrb.mxu0 %v1563_v2 }
  0x25   :  { %987 = vmatpush.msrb.mxu2 %v1570_v3  ;;  %658 = vmatpush.msrb.mxu1 %v1674_v19  ;;  %v1401_v3 = vld [vmem:[%s2695_s0 + $0x170] sm:$0xff] }
  0x26   :  { %1411 = vmatmul.msk.f32.gmra.mxu3 %vm68_vm0, %v1390_v28  ;;  %918 = vmatpush.msrb.mxu0 %v1579_v5  ;;  %v1464_v28 = vld [vmem:[%s2695_s0 + $0x298] sm:$0xff] }
  0x27   :  { %1372 = vmatmul.msk.f32.gmra.mxu1 %vm68_vm0, %v48_v29 }
  0x28   :  { %919 = vmatpush.msrb.mxu0 %v1591_v7  ;;  %659 = vmatpush.msrb.mxu1 %v1683_v20 }
  0x29   :  { %127 = vmatmul.f32.gmra.mxu0 %v41_v30  ;;  %v1433_v30 = vld [vmem:[%s2695_s0 + $0x208] sm:$0xff] }
  0x2a   :  { %397 = vmatmul.f32.gmra.mxu2 %v1383_v31  ;;  %920 = vmatpush.msrb.mxu0 %v1601_v8  ;;  %v1987_v31 = vld [vmem:[%s2696_s2] ss:$0 sm:$0xff] }
  0x2b   :  { %660 = vmatpush.msrb.mxu1 %v1691_v21 }
  0x2c   :  { %921 = vmatpush.msrb.mxu0 %v1609_v9 }
  0x2d   :  { %661 = vmatpush.msrb.mxu1 %v1702_v23 }
  0x2e   :  { %1412 = vmatmul.msk.f32.gmra.mxu3 %vm68_vm0, %v1392_v32  ;;  %922 = vmatpush.msrb.mxu0 %v1621_v11 }
  0x2f   :  { %1373 = vmatmul.msk.f32.gmra.mxu1 %vm68_vm0, %v50_v33  ;;  %v1432_v33 = vld [vmem:[%s2695_s0 + $0x200] sm:$0xff] }
  0x30   :  { %923 = vmatpush.msrb.mxu0 %v1633_v13  ;;  %662 = vmatpush.msrb.mxu1 %v1713_v25 }
  0x31   :  { %130 = vmatmul.f32.gmra.mxu0 %v43_v34 }
  0x32   :  { %1498 = vmatpush.msra.mxu1 %v1553_v0  ;;  %400 = vmatmul.f32.gmra.mxu2 %v1385_v35  ;;  %v1421_v0 = vld [vmem:[%s2695_s0 + $0x1a8] sm:$0xff]  ;;  %v1465_v35 = vld [vmem:[%s2695_s0 + $0x2a0] sm:$0xff] }
  0x33   :  { %924 = vmatpush.msrb.mxu0 %v1643_v14 }
  0x34   :  { %1499 = vmatpush.msra.mxu1 %v1563_v2  ;;  %v59_v2 = vld [vmem:[%s2695_s0 + $0xa0] sm:$0xff] }
  0x35   :  { %925 = vmatpush.msrb.mxu0 %v1651_v15 }
  0x36   :  { %1500 = vmatpush.msra.mxu1 %v1579_v5  ;;  %1413 = vmatmul.msk.f32.gmra.mxu3 %vm68_vm0, %v1394_v36  ;;  %v1422_v5 = vld [vmem:[%s2695_s0 + $0x1b0] sm:$0xff] }
  0x37   :  { %926 = vmatpush.msrb.mxu0 %v1663_v17  ;;  %1374 = vmatmul.msk.f32.gmra.mxu1 %vm68_vm0, %v52_v37  ;;  %v1466_v37 = vld [vmem:[%s2695_s0 + $0x2a8] sm:$0xff] }
  0x38   :  { %1501 = vmatpush.msra.mxu1 %v1591_v7  ;;  %v1403_v7 = vld [vmem:[%s2695_s0 + $0x180] sm:$0xff] }
  0x39   :  { %927 = vmatpush.msrb.mxu0 %v1674_v19 }
  0x3a   :  { %133 = vmatmul.f32.gmra.mxu0 %v45_v38  ;;  %403 = vmatmul.f32.gmra.mxu2 %v1387_v39 }
  0x3b   :  { %928 = vmatpush.msrb.mxu0 %v1683_v20  ;;  %1502 = vmatpush.msra.mxu1 %v1601_v8  ;;  %v1425_v8 = vld [vmem:[%s2695_s0 + $0x1c8] sm:$0xff] }
  0x3d   :  { %929 = vmatpush.msrb.mxu0 %v1691_v21  ;;  %1503 = vmatpush.msra.mxu1 %v1609_v9  ;;  %v1424_v9 = vld [vmem:[%s2695_s0 + $0x1c0] sm:$0xff] }
  0x3e   :  { %1414 = vmatmul.msk.f32.gmra.mxu3 %vm68_vm0, %v1396_v40  ;;  %v1435_v40 = vld [vmem:[%s2695_s0 + $0x218] sm:$0xff] }
  0x3f   :  { %930 = vmatpush.msrb.mxu0 %v1702_v23  ;;  %1375 = vmatmul.msk.f32.gmra.mxu1 %vm68_vm0, %v54_v41 }
  0x40   :  { %1504 = vmatpush.msra.mxu1 %v1621_v11  ;;  %v1405_v11 = vld [vmem:[%s2695_s0 + $0x190] sm:$0x3] }
  0x41   :  { %931 = vmatpush.msrb.mxu0 %v1713_v25 }
  0x42   :  { %136 = vmatmul.f32.gmra.mxu0 %v47_v42  ;;  %406 = vmatmul.f32.gmra.mxu2 %v1389_v43  ;;  %v1434_v42 = vld [vmem:[%s2695_s0 + $0x210] sm:$0xff] }
  0x43   :  { %1505 = vmatpush.msra.mxu1 %v1633_v13 }
  0x45   :  { %1506 = vmatpush.msra.mxu1 %v1643_v14  ;;  %v1426_v14 = vld [vmem:[%s2695_s0 + $0x1d0] sm:$0xff] }
  0x46   :  { %1415 = vmatmul.msk.f32.gmra.mxu3 %vm68_vm0, %v1398_v44 }
  0x47   :  { %1507 = vmatpush.msra.mxu1 %v1651_v15  ;;  %v1459_v15 = vld [vmem:[%s2695_s0 + $0x270] sm:$0xff] }
  0x48   :  { %1376 = vmatmul.msk.f32.gmra.mxu1 %vm68_vm0, %v56_v45 }
  0x49   :  { %1508 = vmatpush.msra.mxu1 %v1663_v17 }
  0x4a   :  { %139 = vmatmul.f32.gmra.mxu0 %v49_v46  ;;  %409 = vmatmul.f32.gmra.mxu2 %v1391_v47  ;;  %v1467_v46 = vld [vmem:[%s2695_s0 + $0x2b0] sm:$0xff] }
  0x4b   :  { %1509 = vmatpush.msra.mxu1 %v1674_v19 }
  0x4d   :  { %1510 = vmatpush.msra.mxu1 %v1683_v20  ;;  %v1428_v20 = vld [vmem:[%s2695_s0 + $0x1e0] sm:$0xff] }
  0x4e   :  { %1416 = vmatmul.msk.f32.gmra.mxu3 %vm68_vm0, %v1400_v48  ;;  %v1468_v48 = vld [vmem:[%s2695_s0 + $0x2b8] sm:$0xff] }
  0x4f   :  { %1511 = vmatpush.msra.mxu1 %v1691_v21  ;;  %v1461_v21 = vld [vmem:[%s2695_s0 + $0x280] sm:$0xff] }
  0x50   :  { %1377 = vmatmul.msk.f32.gmra.mxu1 %vm68_vm0, %v58_v49 }
  0x51   :  { %1512 = vmatpush.msra.mxu1 %v1702_v23 }
  0x52   :  { %142 = vmatmul.f32.gmra.mxu0 %v51_v50  ;;  %412 = vmatmul.f32.gmra.mxu2 %v1393_v51 }
  0x53   :  { %1513 = vmatpush.msra.mxu1 %v1713_v25 }
  0x56   :  { %1417 = vmatmul.msk.f32.gmra.mxu3 %vm68_vm0, %v1402_v52 }
  0x58   :  { %1378 = vmatmul.msk.f32.gmra.mxu1 %vm68_vm0, %v60_v53 }
  0x5a   :  { %145 = vmatmul.f32.gmra.mxu0 %v53_v54  ;;  %415 = vmatmul.f32.gmra.mxu2 %v1395_v55 }
  0x5e   :  { %1418 = vmatmul.msk.f32.gmra.mxu3 %vm68_vm0, %v1404_v56  ;;  %v1437_v56 = vld [vmem:[%s2695_s0 + $0x228] sm:$0xff] }
  0x60   :  { %1379 = vmatmul.msk.f32.gmra.mxu1 %vm68_vm0, %v62_v57 }
  0x62   :  { %148 = vmatmul.f32.gmra.mxu0 %v55_v58  ;;  %418 = vmatmul.f32.gmra.mxu2 %v1397_v59  ;;  %v1436_v59 = vld [vmem:[%s2695_s0 + $0x220] sm:$0xff] }
  0x66   :  { %1419 = vmatmul.msk.f32.gmra.mxu3 %vm68_vm0, %v1406_v60 }
  0x68   :  { %1380 = vmatmul.msk.f32.gmra.mxu1 %vm68_vm0, %v64_v61 }
  0x6a   :  { %151 = vmatmul.f32.gmra.mxu0 %v57_v62  ;;  %421 = vmatmul.f32.gmra.mxu2 %v1399_v63 }
  0x6e   :  { %1446 = vmatmul.msk.f32.vlgmr.msrb.gmra.mxu3 %vm68_vm0, %v1421_v0 }
  0x70   :  { %663 = vmatmul.f32.vlgmr.msrb.gmra.mxu1 %v1420_v1 }
  0x72   :  { %154 = vmatmul.f32.gmra.mxu0 %v59_v2  ;;  %424 = vmatmul.f32.gmra.mxu2 %v1401_v3  ;;  %v1469_v2 = vld [vmem:[%s2695_s0 + $0x2c0] sm:$0xff] }
  0x76   :  { %1447 = vmatmul.msk.f32.gmra.mxu3 %vm68_vm0, %v1423_v4  ;;  %v1470_v4 = vld [vmem:[%s2695_s0 + $0x2c8] sm:$0xff] }
  0x78   :  { %666 = vmatmul.f32.gmra.mxu1 %v1422_v5 }
  0x7a   :  { %157 = vmatmul.f32.gmra.mxu0 %v61_v6  ;;  %427 = vmatmul.f32.gmra.mxu2 %v1403_v7 }
  0x7e   :  { %1448 = vmatmul.msk.f32.gmra.mxu3 %vm68_vm0, %v1425_v8 }
  0x80   :  { %669 = vmatmul.f32.gmra.mxu1 %v1424_v9 }
  0x82   :  { %160 = vmatmul.f32.gmra.mxu0 %v63_v10  ;;  %430 = vmatmul.f32.gmra.mxu2 %v1405_v11 }
  0x84   :  { %v181_v13 = vpop.f32.mrf.mxu1 }
  0x86   :  { %1449 = vmatmul.msk.f32.gmra.mxu3 %vm68_vm0, %v1427_v12 }
  0x88   :  { %672 = vmatmul.f32.gmra.mxu1 %v1426_v14 }
  0x89   :  { %v451_v17 = vpop.f32.mrf.mxu3 }
  0x8a   :  { %932 = vmatmul.f32.vlgmr.msrb.gmra.mxu0 %v1459_v15  ;;  %1485 = vmatmul.msk.f32.vlgmr.msrb.gmra.mxu2 %vm68_vm0, %v1460_v16  ;;  %v1439_v15 = vld [vmem:[%s2695_s0 + $0x238] sm:$0xff] }
  0x8c   :  { %v184_v19 = vpop.f32.mrf.mxu1 }
  0x8e   :  { %1450 = vmatmul.msk.f32.gmra.mxu3 %vm68_vm0, %v1429_v18 }
  0x90   :  { %675 = vmatmul.f32.gmra.mxu1 %v1428_v20  ;;  %v1438_v20 = vld [vmem:[%s2695_s0 + $0x230] sm:$0xff] }
  0x91   :  { %v1960_v23 = vpop.f32.mrf.mxu3 }
  0x92   :  { %935 = vmatmul.f32.gmra.mxu0 %v1461_v21  ;;  %1486 = vmatmul.msk.f32.gmra.mxu2 %vm68_vm0, %v1462_v22 }
  0x94   :  { %v1966_v25 = vpop.f32.mrf.mxu1 }
  0x96   :  { %1451 = vmatmul.msk.f32.gmra.mxu3 %vm68_vm0, %v1431_v24 }
  0x98   :  { %678 = vmatmul.f32.gmra.mxu1 %v1430_v26 }
  0x99   :  { %v1978_v29 = vpop.f32.mrf.mxu3 }
  0x9a   :  { %938 = vmatmul.f32.gmra.mxu0 %v1463_v27  ;;  %1487 = vmatmul.msk.f32.gmra.mxu2 %vm68_vm0, %v1464_v28  ;;  %v1471_v27 = vld [vmem:[%s2695_s0 + $0x2d0] sm:$0xff] }
  0x9c   :  { %v1989_v32 = vpop.f32.mrf.mxu1 }
  0x9e   :  { %1452 = vmatmul.msk.f32.gmra.mxu3 %vm68_vm0, %v1433_v30  ;;  %v125_v34 = vpop.f32.mrf.mxu0  ;;  %v1472_v30 = vld [vmem:[%s2695_s0 + $0x2d8] sm:$0xff] }
  0x9f   :  { %v126_v36 = vadd.f32 %v1987_v31, %v125_v34 }
  0xa0   :  { %681 = vmatmul.f32.gmra.mxu1 %v1432_v33 }
  0xa1   :  { %v182_v38 = vadd.f32 %v181_v13, %v126_v36  ;;  %v2002_v39 = vpop.f32.mrf.mxu3 }
  0xa2   :  { %941 = vmatmul.f32.gmra.mxu0 %v1465_v35  ;;  %1488 = vmatmul.msk.f32.gmra.mxu2 %vm68_vm0, %v1466_v37 }
  0xa3   :  { %221 = vst.msk [vmem:[#allocation2] sm:$0xff] %vm220_vm1, %v182_v38  ;;  %v267_v50 = vmul.f32 %v182_v38, %v182_v38  ;;  %v235_v53 = vsel %vm220_vm1, %v182_v38, 0.0 }
  0xa4   :  { %v2009_v41 = vpop.f32.mrf.mxu1 }
  0xa5   :  { %v395_v43 = vpop.f32.mrf.mxu2  ;;  %v280_v60 = vsel %vm220_vm1, %v267_v50, 0.0 }
  0xa6   :  { %v396_v44 = vadd.f32 %v1987_v31, %v395_v43  ;;  %1453 = vmatmul.msk.f32.gmra.mxu3 %vm68_vm0, %v1435_v40  ;;  %v128_v45 = vpop.f32.mrf.mxu0 }
  0xa7   :  { %v129_v47 = vadd.f32 %v1987_v31, %v128_v45  ;;  %v1440_v45 = vld [vmem:[%s2695_s0 + $0x240] sm:$0xff] }
  0xa8   :  { %684 = vmatmul.f32.gmra.mxu1 %v1434_v42  ;;  %v452_v49 = vadd.f32 %v451_v17, %v396_v44 }
  0xa9   :  { %v185_v51 = vadd.f32 %v184_v19, %v129_v47  ;;  %v2023_v52 = vpop.f32.mrf.mxu3 }
  0xaa   :  { %944 = vmatmul.f32.gmra.mxu0 %v1467_v46  ;;  %491 = vst.msk [vmem:[#allocation2 + $0x68] sm:$0xff] %vm220_vm1, %v452_v49  ;;  %1489 = vmatmul.msk.f32.gmra.mxu2 %vm68_vm0, %v1468_v48  ;;  %v536_v5 = vmul.f32 %v452_v49, %v452_v49  ;;  %v504_v9 = vsel %vm220_vm1, %v452_v49, 0.0 }
  0xab   :  { %222 = vst.msk [vmem:[#allocation2 + $0x8] sm:$0xff] %vm220_vm1, %v185_v51  ;;  %v236_v54 = vsel %vm220_vm1, %v185_v51, 0.0  ;;  %v268_v55 = vmul.f32 %v185_v51, %v185_v51 }
  0xac   :  { %v237_v57 = vadd.f32 %v236_v54, %v235_v53  ;;  %v2033_v58 = vpop.f32.mrf.mxu1  ;;  %v549_v16 = vsel %vm220_vm1, %v536_v5, 0.0  ;;  %v1473_v53 = vld [vmem:[%s2695_s0 + $0x2e0] sm:$0xff] }
  0xad   :  { %v281_v61 = vsel %vm220_vm1, %v268_v55, 0.0  ;;  %v398_v62 = vpop.f32.mrf.mxu2  ;;  %v1474_v55 = vld [vmem:[%s2695_s0 + $0x2e8] sm:$0xff] }
  0xae   :  { %v282_v63 = vadd.f32 %v281_v61, %v280_v60  ;;  %v399_v0 = vadd.f32 %v1987_v31, %v398_v62  ;;  %1454 = vmatmul.msk.f32.gmra.mxu3 %vm68_vm0, %v1437_v56  ;;  %v131_v1 = vpop.f32.mrf.mxu0 }
  0xaf   :  { %v132_v3 = vadd.f32 %v1987_v31, %v131_v1 }
  0xb0   :  { %687 = vmatmul.f32.gmra.mxu1 %v1436_v59  ;;  %v455_v6 = vadd.f32 %v1960_v23, %v399_v0 }
  0xb1   :  { %v188_v7 = vadd.f32 %v1966_v25, %v132_v3  ;;  %v2051_v8 = vpop.f32.mrf.mxu3  ;;  %v1442_v3 = vld [vmem:[%s2695_s0 + $0x250] sm:$0xff] }
  0xb2   :  { %947 = vmatmul.f32.gmra.mxu0 %v1469_v2  ;;  %492 = vst.msk [vmem:[#allocation2 + $0x70] sm:$0xff] %vm220_vm1, %v455_v6  ;;  %v505_v10 = vsel %vm220_vm1, %v455_v6, 0.0  ;;  %v537_v11 = vmul.f32 %v455_v6, %v455_v6  ;;  %1490 = vmatmul.msk.f32.gmra.mxu2 %vm68_vm0, %v1470_v4 }
  0xb3   :  { %v506_v12 = vadd.f32 %v505_v10, %v504_v9  ;;  %223 = vst.msk [vmem:[#allocation2 + $0x10] sm:$0xff] %vm220_vm1, %v188_v7  ;;  %v238_v13 = vsel %vm220_vm1, %v188_v7, 0.0  ;;  %v269_v14 = vmul.f32 %v188_v7, %v188_v7 }
  0xb4   :  { %v550_v17 = vsel %vm220_vm1, %v537_v11, 0.0  ;;  %v239_v18 = vadd.f32 %v238_v13, %v237_v57  ;;  %v2064_v19 = vpop.f32.mrf.mxu1  ;;  %v1475_v11 = vld [vmem:[%s2695_s0 + $0x2f0] sm:$0xff]  ;;  %v1476_v13 = vld [vmem:[%s2695_s0 + $0x2f8] sm:$0xff] }
  0xb5   :  { %v551_v21 = vadd.f32 %v550_v17, %v549_v16  ;;  %v283_v22 = vsel %vm220_vm1, %v269_v14, 0.0  ;;  %v401_v23 = vpop.f32.mrf.mxu2 }
  0xb6   :  { %v284_v24 = vadd.f32 %v283_v22, %v282_v63  ;;  %v402_v25 = vadd.f32 %v1987_v31, %v401_v23  ;;  %1455 = vmatmul.msk.f32.gmra.mxu3 %vm68_vm0, %v1439_v15 }
  0xb7   :  { %v134_v26 = vpop.f32.mrf.mxu0 }
  0xb8   :  { %v135_v28 = vadd.f32 %v1987_v31, %v134_v26  ;;  %690 = vmatmul.f32.gmra.mxu1 %v1438_v20  ;;  %v458_v33 = vadd.f32 %v1978_v29, %v402_v25  ;;  %v1441_v29 = vld [vmem:[%s2695_s0 + $0x248] sm:$0xff]  ;;  %v1444_v25 = vld [vmem:[%s2695_s0 + $0x260] sm:$0x3] }
  0xb9   :  { %v2081_v35 = vpop.f32.mrf.mxu3 }
  0xba   :  { %v191_v34 = vadd.f32 %v1989_v32, %v135_v28  ;;  %950 = vmatmul.f32.gmra.mxu0 %v1471_v27  ;;  %493 = vst.msk [vmem:[#allocation2 + $0x78] sm:$0xff] %vm220_vm1, %v458_v33  ;;  %v507_v36 = vsel %vm220_vm1, %v458_v33, 0.0  ;;  %v538_v37 = vmul.f32 %v458_v33, %v458_v33  ;;  %1491 = vmatmul.msk.f32.gmra.mxu2 %vm68_vm0, %v1472_v30 }
  0xbb   :  { %v508_v38 = vadd.f32 %v507_v36, %v506_v12  ;;  %v1477_v36 = vld [vmem:[%s2695_s0 + $0x300] sm:$0xff] }
  0xbc   :  { %224 = vst.msk [vmem:[#allocation2 + $0x18] sm:$0xff] %vm220_vm1, %v191_v34  ;;  %v240_v40 = vsel %vm220_vm1, %v191_v34, 0.0  ;;  %v270_v42 = vmul.f32 %v191_v34, %v191_v34  ;;  %v552_v32 = vsel %vm220_vm1, %v538_v37, 0.0  ;;  %v2092_v44 = vpop.f32.mrf.mxu1 }
  0xbd   :  { %v241_v43 = vadd.f32 %v240_v40, %v239_v18  ;;  %v553_v46 = vadd.f32 %v552_v32, %v551_v21  ;;  %v404_v48 = vpop.f32.mrf.mxu2 }
  0xbe   :  { %v285_v47 = vsel %vm220_vm1, %v270_v42, 0.0  ;;  %v405_v50 = vadd.f32 %v1987_v31, %v404_v48  ;;  %1456 = vmatmul.msk.f32.gmra.mxu3 %vm68_vm0, %v1441_v29 }
  0xbf   :  { %v286_v49 = vadd.f32 %v285_v47, %v284_v24  ;;  %v137_v51 = vpop.f32.mrf.mxu0 }
  0xc0   :  { %v138_v54 = vadd.f32 %v1987_v31, %v137_v51  ;;  %693 = vmatmul.f32.gmra.mxu1 %v1440_v45  ;;  %v461_v56 = vadd.f32 %v2002_v39, %v405_v50  ;;  %v1443_v39 = vld [vmem:[%s2695_s0 + $0x258] sm:$0xff]  ;;  %v1483_v50 = vld [vmem:[%s2695_s0 + $0x330] sm:$0x3] }
  0xc1   :  { %v2109_v59 = vpop.f32.mrf.mxu3 }
  0xc2   :  { %v194_v57 = vadd.f32 %v2009_v41, %v138_v54  ;;  %953 = vmatmul.f32.gmra.mxu0 %v1473_v53  ;;  %494 = vst.msk [vmem:[#allocation2 + $0x80] sm:$0xff] %vm220_vm1, %v461_v56  ;;  %v509_v60 = vsel %vm220_vm1, %v461_v56, 0.0  ;;  %v539_v61 = vmul.f32 %v461_v56, %v461_v56  ;;  %1492 = vmatmul.msk.f32.gmra.mxu2 %vm68_vm0, %v1474_v55 }
  0xc3   :  { %v510_v62 = vadd.f32 %v509_v60, %v508_v38  ;;  %v1478_v38 = vld [vmem:[%s2695_s0 + $0x308] sm:$0xff]  ;;  %v1479_v60 = vld [vmem:[%s2695_s0 + $0x310] sm:$0xff] }
  0xc4   :  { %225 = vst.msk [vmem:[#allocation2 + $0x20] sm:$0xff] %vm220_vm1, %v194_v57  ;;  %v242_v63 = vsel %vm220_vm1, %v194_v57, 0.0  ;;  %v271_v0 = vmul.f32 %v194_v57, %v194_v57  ;;  %v554_v41 = vsel %vm220_vm1, %v539_v61, 0.0 }
  0xc5   :  { %v243_v1 = vadd.f32 %v242_v63, %v241_v43  ;;  %v2120_v2 = vpop.f32.mrf.mxu1  ;;  %v555_v4 = vadd.f32 %v554_v41, %v553_v46  ;;  %v407_v6 = vpop.f32.mrf.mxu2 }
  0xc6   :  { %v287_v5 = vsel %vm220_vm1, %v271_v0, 0.0  ;;  %v408_v9 = vadd.f32 %v1987_v31, %v407_v6  ;;  %1457 = vmatmul.msk.f32.gmra.mxu3 %vm68_vm0, %v1443_v39 }
  0xc7   :  { %v288_v7 = vadd.f32 %v287_v5, %v286_v49  ;;  %v140_v10 = vpop.f32.mrf.mxu0 }
  0xc8   :  { %v141_v12 = vadd.f32 %v1987_v31, %v140_v10  ;;  %696 = vmatmul.f32.gmra.mxu1 %v1442_v3  ;;  %v464_v14 = vadd.f32 %v2023_v52, %v408_v9  ;;  %v1445_v52 = vld [vmem:[%s2695_s0 + $0x268] sm:$0x3] }
  0xc9   :  { %v2137_v16 = vpop.f32.mrf.mxu3 }
  0xca   :  { %v197_v15 = vadd.f32 %v2033_v58, %v141_v12  ;;  %956 = vmatmul.f32.gmra.mxu0 %v1475_v11  ;;  %495 = vst.msk [vmem:[#allocation2 + $0x88] sm:$0xff] %vm220_vm1, %v464_v14  ;;  %v511_v17 = vsel %vm220_vm1, %v464_v14, 0.0  ;;  %v540_v18 = vmul.f32 %v464_v14, %v464_v14  ;;  %1493 = vmatmul.msk.f32.gmra.mxu2 %vm68_vm0, %v1476_v13  ;;  %v1481_v14 = vld [vmem:[%s2695_s0 + $0x320] sm:$0xff] }
  0xcb   :  { %v512_v20 = vadd.f32 %v511_v17, %v510_v62  ;;  %v1480_v62 = vld [vmem:[%s2695_s0 + $0x318] sm:$0xff]  ;;  %v1482_v17 = vld [vmem:[%s2695_s0 + $0x328] sm:$0xff] }
  0xcc   :  { %226 = vst.msk [vmem:[#allocation2 + $0x28] sm:$0xff] %vm220_vm1, %v197_v15  ;;  %v244_v21 = vsel %vm220_vm1, %v197_v15, 0.0  ;;  %v272_v22 = vmul.f32 %v197_v15, %v197_v15  ;;  %v556_v58 = vsel %vm220_vm1, %v540_v18, 0.0 }
  0xcd   :  { %v245_v23 = vadd.f32 %v244_v21, %v243_v1  ;;  %v2148_v24 = vpop.f32.mrf.mxu1  ;;  %v557_v26 = vadd.f32 %v556_v58, %v555_v4  ;;  %v410_v28 = vpop.f32.mrf.mxu2 }
  0xce   :  { %v289_v27 = vsel %vm220_vm1, %v272_v22, 0.0  ;;  %v411_v33 = vadd.f32 %v1987_v31, %v410_v28  ;;  %1458 = vmatmul.msk.f32.gmra.mxu3 %vm68_vm0, %v1445_v52 }
  0xcf   :  { %v290_v30 = vadd.f32 %v289_v27, %v288_v7  ;;  %v143_v34 = vpop.f32.mrf.mxu0 }
  0xd0   :  { %v144_v37 = vadd.f32 %v1987_v31, %v143_v34  ;;  %699 = vmatmul.f32.gmra.mxu1 %v1444_v25  ;;  %v467_v40 = vadd.f32 %v2051_v8, %v411_v33  ;;  %v1484_v8 = vld [vmem:[%s2695_s0 + $0x338] sm:$0x3] }
  0xd1   :  { %v2165_v29 = vpop.f32.mrf.mxu3 }
  0xd2   :  { %v200_v42 = vadd.f32 %v2064_v19, %v144_v37  ;;  %959 = vmatmul.f32.gmra.mxu0 %v1477_v36  ;;  %496 = vst.msk [vmem:[#allocation2 + $0x90] sm:$0xff] %vm220_vm1, %v467_v40  ;;  %v513_v32 = vsel %vm220_vm1, %v467_v40, 0.0  ;;  %v541_v43 = vmul.f32 %v467_v40, %v467_v40  ;;  %1494 = vmatmul.msk.f32.gmra.mxu2 %vm68_vm0, %v1478_v38 }
  0xd3   :  { %v514_v45 = vadd.f32 %v513_v32, %v512_v20 }
  0xd4   :  { %227 = vst.msk [vmem:[#allocation2 + $0x30] sm:$0xff] %vm220_vm1, %v200_v42  ;;  %v246_v46 = vsel %vm220_vm1, %v200_v42, 0.0  ;;  %v273_v47 = vmul.f32 %v200_v42, %v200_v42  ;;  %v558_v19 = vsel %vm220_vm1, %v541_v43, 0.0 }
  0xd5   :  { %v247_v48 = vadd.f32 %v246_v46, %v245_v23  ;;  %v2176_v49 = vpop.f32.mrf.mxu1  ;;  %v559_v51 = vadd.f32 %v558_v19, %v557_v26  ;;  %v413_v54 = vpop.f32.mrf.mxu2 }
  0xd6   :  { %v291_v53 = vsel %vm220_vm1, %v273_v47, 0.0  ;;  %v414_v56 = vadd.f32 %v1987_v31, %v413_v54  ;;  %1497 = vmatmul.msk.f32.vlgmr.msra.gmra.mxu3 %vm68_vm0, %v1484_v8 }
  0xd7   :  { %v292_v55 = vadd.f32 %v291_v53, %v290_v30  ;;  %v146_v57 = vpop.f32.mrf.mxu0 }
  0xd8   :  { %v147_v61 = vadd.f32 %v1987_v31, %v146_v57  ;;  %968 = vmatmul.f32.vlgmr.msra.gmra.mxu1 %v1483_v50  ;;  %v470_v63 = vadd.f32 %v2081_v35, %v414_v56 }
  0xd9   :  { %v2193_v39 = vpop.f32.mrf.mxu3 }
  0xda   :  { %v203_v0 = vadd.f32 %v2092_v44, %v147_v61  ;;  %962 = vmatmul.f32.gmra.mxu0 %v1479_v60  ;;  %497 = vst.msk [vmem:[#allocation2 + $0x98] sm:$0xff] %vm220_vm1, %v470_v63  ;;  %v515_v41 = vsel %vm220_vm1, %v470_v63, 0.0  ;;  %v542_v1 = vmul.f32 %v470_v63, %v470_v63  ;;  %1495 = vmatmul.msk.f32.gmra.mxu2 %vm68_vm0, %v1480_v62 }
  0xdb   :  { %v516_v3 = vadd.f32 %v515_v41, %v514_v45 }
  0xdc   :  { %228 = vst.msk [vmem:[#allocation2 + $0x38] sm:$0xff] %vm220_vm1, %v203_v0  ;;  %v248_v4 = vsel %vm220_vm1, %v203_v0, 0.0  ;;  %v274_v5 = vmul.f32 %v203_v0, %v203_v0  ;;  %v560_v35 = vsel %vm220_vm1, %v542_v1, 0.0 }
  0xdd   :  { %v249_v6 = vadd.f32 %v248_v4, %v247_v48  ;;  %v2201_v44 = vpop.f32.mrf.mxu1  ;;  %v561_v7 = vadd.f32 %v560_v35, %v559_v51  ;;  %v416_v10 = vpop.f32.mrf.mxu2 }
  0xde   :  { %v293_v9 = vsel %vm220_vm1, %v274_v5, 0.0  ;;  %v417_v12 = vadd.f32 %v1987_v31, %v416_v10 }
  0xdf   :  { %v294_v11 = vadd.f32 %v293_v9, %v292_v55  ;;  %v149_v13 = vpop.f32.mrf.mxu0 }
  0xe0   :  { %v150_v15 = vadd.f32 %v1987_v31, %v149_v13  ;;  %v473_v18 = vadd.f32 %v2109_v59, %v417_v12 }
  0xe1   :  { %v2214_v21 = vpop.f32.mrf.mxu3 }
  0xe2   :  { %v206_v20 = vadd.f32 %v2120_v2, %v150_v15  ;;  %965 = vmatmul.f32.gmra.mxu0 %v1481_v14  ;;  %498 = vst.msk [vmem:[#allocation2 + $0xa0] sm:$0xff] %vm220_vm1, %v473_v18  ;;  %v517_v22 = vsel %vm220_vm1, %v473_v18, 0.0  ;;  %v543_v52 = vmul.f32 %v473_v18, %v473_v18  ;;  %1496 = vmatmul.msk.f32.gmra.mxu2 %vm68_vm0, %v1482_v17 }
  0xe3   :  { %v518_v58 = vadd.f32 %v517_v22, %v516_v3 }
  0xe4   :  { %229 = vst.msk [vmem:[#allocation2 + $0x40] sm:$0xff] %vm220_vm1, %v206_v20  ;;  %v250_v23 = vsel %vm220_vm1, %v206_v20, 0.0  ;;  %v275_v25 = vmul.f32 %v206_v20, %v206_v20  ;;  %v562_v59 = vsel %vm220_vm1, %v543_v52, 0.0 }
  0xe5   :  { %v251_v26 = vadd.f32 %v250_v23, %v249_v6  ;;  %v2222_v2 = vpop.f32.mrf.mxu1  ;;  %v563_v27 = vadd.f32 %v562_v59, %v561_v7  ;;  %v419_v30 = vpop.f32.mrf.mxu2 }
  0xe6   :  { %v295_v28 = vsel %vm220_vm1, %v275_v25, 0.0  ;;  %v420_v34 = vadd.f32 %v1987_v31, %v419_v30 }
  0xe7   :  { %v296_v33 = vadd.f32 %v295_v28, %v294_v11  ;;  %v152_v36 = vpop.f32.mrf.mxu0 }
  0xe8   :  { %v153_v37 = vadd.f32 %v1987_v31, %v152_v36  ;;  %v476_v38 = vadd.f32 %v2137_v16, %v420_v34 }
  0xe9   :  { %v2229_v42 = vpop.f32.mrf.mxu3 }
  0xea   :  { %v209_v40 = vadd.f32 %v2148_v24, %v153_v37  ;;  %499 = vst.msk [vmem:[#allocation2 + $0xa8] sm:$0xff] %vm220_vm1, %v476_v38  ;;  %v519_v32 = vsel %vm220_vm1, %v476_v38, 0.0  ;;  %v544_v43 = vmul.f32 %v476_v38, %v476_v38 }
  0xeb   :  { %v520_v45 = vadd.f32 %v519_v32, %v518_v58 }
  0xec   :  { %230 = vst.msk [vmem:[#allocation2 + $0x48] sm:$0xff] %vm220_vm1, %v209_v40  ;;  %v252_v46 = vsel %vm220_vm1, %v209_v40, 0.0  ;;  %v276_v47 = vmul.f32 %v209_v40, %v209_v40  ;;  %v564_v8 = vsel %vm220_vm1, %v544_v43, 0.0 }
  0xed   :  { %v253_v19 = vadd.f32 %v252_v46, %v251_v26  ;;  %v664_v48 = vpop.f32.mrf.mxu1  ;;  %v565_v16 = vadd.f32 %v564_v8, %v563_v27  ;;  %v422_v50 = vpop.f32.mrf.mxu2 }
  0xee   :  { %v297_v24 = vsel %vm220_vm1, %v276_v47, 0.0  ;;  %v423_v53 = vadd.f32 %v1987_v31, %v422_v50  ;;  %v665_v55 = vadd.f32 %v1987_v31, %v664_v48 }
  0xef   :  { %v298_v51 = vadd.f32 %v297_v24, %v296_v33  ;;  %v155_v54 = vpop.f32.mrf.mxu0 }
  0xf0   :  { %v156_v56 = vadd.f32 %v1987_v31, %v155_v54  ;;  %v479_v57 = vadd.f32 %v2165_v29, %v423_v53 }
  0xf1   :  { %v720_v61 = vpop.f32.mrf.mxu3 }
  0xf2   :  { %v212_v60 = vadd.f32 %v2176_v49, %v156_v56  ;;  %500 = vst.msk [vmem:[#allocation2 + $0xb0] sm:$0xff] %vm220_vm1, %v479_v57  ;;  %v521_v62 = vsel %vm220_vm1, %v479_v57, 0.0  ;;  %v545_v63 = vmul.f32 %v479_v57, %v479_v57  ;;  %v721_v0 = vadd.f32 %v720_v61, %v665_v55 }
  0xf3   :  { %v522_v41 = vadd.f32 %v521_v62, %v520_v45 }
  0xf4   :  { %231 = vst.msk [vmem:[#allocation2 + $0x50] sm:$0xff] %vm220_vm1, %v212_v60  ;;  %v254_v1 = vsel %vm220_vm1, %v212_v60, 0.0  ;;  %v277_v3 = vmul.f32 %v212_v60, %v212_v60  ;;  %v566_v4 = vsel %vm220_vm1, %v545_v63, 0.0  ;;  %v805_v12 = vmul.f32 %v721_v0, %v721_v0 }
  0xf5   :  { %v255_v5 = vadd.f32 %v254_v1, %v253_v19  ;;  %760 = vst.msk [vmem:[#allocation2 + $0xd0] sm:$0xff] %vm220_vm1, %v721_v0  ;;  %v667_v29 = vpop.f32.mrf.mxu1  ;;  %v567_v49 = vadd.f32 %v566_v4, %v565_v16  ;;  %v425_v6 = vpop.f32.mrf.mxu2  ;;  %v773_v18 = vsel %vm220_vm1, %v721_v0, 0.0 }
  0xf6   :  { %v299_v35 = vsel %vm220_vm1, %v277_v3, 0.0  ;;  %v426_v9 = vadd.f32 %v1987_v31, %v425_v6  ;;  %v668_v11 = vadd.f32 %v1987_v31, %v667_v29  ;;  %v818_v58 = vsel %vm220_vm1, %v805_v12, 0.0 }
  0xf7   :  { %v300_v7 = vadd.f32 %v299_v35, %v298_v51  ;;  %v158_v10 = vpop.f32.mrf.mxu0 }
  0xf8   :  { %v159_v13 = vadd.f32 %v1987_v31, %v158_v10  ;;  %v482_v14 = vadd.f32 %v2193_v39, %v426_v9 }
  0xf9   :  { %v723_v17 = vpop.f32.mrf.mxu3 }
  0xfa   :  { %v215_v15 = vadd.f32 %v2201_v44, %v159_v13  ;;  %501 = vst.msk [vmem:[#allocation2 + $0xb8] sm:$0xff] %vm220_vm1, %v482_v14  ;;  %v523_v20 = vsel %vm220_vm1, %v482_v14, 0.0  ;;  %v546_v22 = vmul.f32 %v482_v14, %v482_v14  ;;  %v724_v52 = vadd.f32 %v723_v17, %v668_v11 }
  0xfb   :  { %v524_v23 = vadd.f32 %v523_v20, %v522_v41 }
  0xfc   :  { %232 = vst.msk [vmem:[#allocation2 + $0x58] sm:$0xff] %vm220_vm1, %v215_v15  ;;  %v256_v25 = vsel %vm220_vm1, %v215_v15, 0.0  ;;  %v278_v59 = vmul.f32 %v215_v15, %v215_v15  ;;  %v568_v39 = vsel %vm220_vm1, %v546_v22, 0.0  ;;  %v774_v26 = vsel %vm220_vm1, %v724_v52, 0.0 }
  0xfd   :  { %v257_v44 = vadd.f32 %v256_v25, %v255_v5  ;;  %761 = vst.msk [vmem:[#allocation2 + $0xd8] sm:$0xff] %vm220_vm1, %v724_v52  ;;  %v806_v27 = vmul.f32 %v724_v52, %v724_v52  ;;  %v670_v28 = vpop.f32.mrf.mxu1  ;;  %v569_v30 = vadd.f32 %v568_v39, %v567_v49  ;;  %v775_v34 = vadd.f32 %v774_v26, %v773_v18  ;;  %v428_v36 = vpop.f32.mrf.mxu2 }
  0xfe   :  { %v301_v33 = vsel %vm220_vm1, %v278_v59, 0.0  ;;  %v429_v40 = vadd.f32 %v1987_v31, %v428_v36  ;;  %v671_v43 = vadd.f32 %v1987_v31, %v670_v28 }
  0xff   :  { %v302_v37 = vadd.f32 %v301_v33, %v300_v7  ;;  %v819_v38 = vsel %vm220_vm1, %v806_v27, 0.0  ;;  %v161_v32 = vpop.f32.mrf.mxu0 }
 0x100   :  { %v820_v45 = vadd.f32 %v819_v38, %v818_v58  ;;  %v162_v46 = vadd.f32 %v1987_v31, %v161_v32  ;;  %v485_v47 = vadd.f32 %v2214_v21, %v429_v40 }
 0x101   :  { %v726_v19 = vpop.f32.mrf.mxu3 }
 0x102   :  { %v218_v8 = vadd.f32 %v2222_v2, %v162_v46  ;;  %502 = vst.msk [vmem:[#allocation2 + $0xc0] sm:$0xff] %vm220_vm1, %v485_v47  ;;  %v525_v48 = vsel %vm220_vm1, %v485_v47, 0.0  ;;  %v547_v16 = vmul.f32 %v485_v47, %v485_v47  ;;  %v727_v24 = vadd.f32 %v726_v19, %v671_v43 }
 0x103   :  { %v526_v50 = vadd.f32 %v525_v48, %v524_v23 }
 0x104   :  { %234 = vst.msk [vmem:[#allocation2 + $0x60] sm:$0x3] %vm233_vm2, %v218_v8  ;;  %v258_v51 = vsel %vm233_vm2, %v218_v8, 0.0  ;;  %v279_v53 = vmul.f32 %v218_v8, %v218_v8  ;;  %v570_v54 = vsel %vm220_vm1, %v547_v16, 0.0  ;;  %v776_v21 = vsel %vm220_vm1, %v727_v24, 0.0 }
 0x105   :  { %v259_v55 = vadd.f32 %v258_v51, %v257_v44  ;;  %762 = vst.msk [vmem:[#allocation2 + $0xe0] sm:$0xff] %vm220_vm1, %v727_v24  ;;  %v807_v2 = vmul.f32 %v727_v24, %v727_v24  ;;  %v673_v56 = vpop.f32.mrf.mxu1  ;;  %v571_v57 = vadd.f32 %v570_v54, %v569_v30  ;;  %v777_v61 = vadd.f32 %v776_v21, %v775_v34  ;;  %v431_v62 = vpop.f32.mrf.mxu2 }
 0x106   :  { %v303_v60 = vsel %vm233_vm2, %v279_v53, 0.0  ;;  %v432_v1 = vadd.f32 %v1987_v31, %v431_v62  ;;  %v674_v5 = vadd.f32 %v1987_v31, %v673_v56 }
 0x107   :  { %v260_v63 = vrot.slane %v259_v55, 4  ;;  %v304_v0 = vadd.f32 %v303_v60, %v302_v37  ;;  %v821_v41 = vsel %vm220_vm1, %v807_v2, 0.0  ;;  %v933_v3 = vpop.f32.mrf.mxu0 }
 0x108   :  { %v822_v4 = vadd.f32 %v821_v41, %v820_v45  ;;  %v488_v35 = vadd.f32 %v2229_v42, %v432_v1  ;;  %v934_v7 = vadd.f32 %v1987_v31, %v933_v3 }
 0x109   :  { %v261_v29 = vadd.f32 %v260_v63, %v259_v55  ;;  %v305_v49 = vrot.slane %v304_v0, 4  ;;  %v729_v6 = vpop.f32.mrf.mxu3 }
 0x10a   :  { %503 = vst.msk [vmem:[#allocation2 + $0xc8] sm:$0x3] %vm233_vm2, %v488_v35  ;;  %v527_v11 = vsel %vm233_vm2, %v488_v35, 0.0  ;;  %v548_v12 = vmul.f32 %v488_v35, %v488_v35  ;;  %v730_v14 = vadd.f32 %v729_v6, %v674_v5 }
 0x10b   :  { %v262_v9 = vrot.slane %v261_v29, 2  ;;  %v306_v10 = vadd.f32 %v305_v49, %v304_v0  ;;  %v528_v13 = vadd.f32 %v527_v11, %v526_v50 }
 0x10c   :  { %v572_v17 = vsel %vm233_vm2, %v548_v12, 0.0  ;;  %763 = vst.msk [vmem:[#allocation2 + $0xe8] sm:$0xff] %vm220_vm1, %v730_v14  ;;  %v778_v42 = vsel %vm220_vm1, %v730_v14, 0.0  ;;  %v808_v52 = vmul.f32 %v730_v14, %v730_v14 }
 0x10d   :  { %v307_v15 = vrot.slane %v306_v10, 2  ;;  %v676_v18 = vpop.f32.mrf.mxu1  ;;  %v529_v20 = vrot.slane %v528_v13, 4  ;;  %v573_v22 = vadd.f32 %v572_v17, %v571_v57  ;;  %v989_v58 = vpop.f32.mrf.mxu2  ;;  %v263_v23 = vadd.f32 %v262_v9, %v261_v29 }
 0x10e   :  { %v779_v25 = vadd.f32 %v778_v42, %v777_v61  ;;  %v990_v59 = vadd.f32 %v989_v58, %v934_v7  ;;  %v823_v27 = vsel %vm220_vm1, %v808_v52, 0.0  ;;  %v677_v28 = vadd.f32 %v1987_v31, %v676_v18 }
 0x10f   :  { %v936_v39 = vpop.f32.mrf.mxu0  ;;  %v530_v44 = vadd.f32 %v529_v20, %v528_v13  ;;  %v574_v26 = vrot.slane %v573_v22, 4  ;;  %v824_v30 = vadd.f32 %v823_v27, %v822_v4  ;;  %v308_v33 = vadd.f32 %v307_v15, %v306_v10 }
 0x110   :  { %1029 = vst.msk [vmem:[#allocation2 + $0x138] sm:$0xff] %vm220_vm1, %v990_v59  ;;  %v937_v40 = vadd.f32 %v1987_v31, %v936_v39  ;;  %v264_v32 = vrot.slane %v263_v23, 1  ;;  %v1074_v51 = vmul.f32 %v990_v59, %v990_v59  ;;  %v1042_v61 = vsel %vm220_vm1, %v990_v59, 0.0 }
 0x111   :  { %v531_v34 = vrot.slane %v530_v44, 2  ;;  %v575_v36 = vadd.f32 %v574_v26, %v573_v22  ;;  %v732_v37 = vpop.f32.mrf.mxu3  ;;  %v309_v19 = vrot.slane %v308_v33, 1 }
 0x112   :  { %v733_v38 = vadd.f32 %v732_v37, %v677_v28  ;;  %v265_v2 = vadd.f32 %v264_v32, %v263_v23  ;;  %v1087_v5 = vsel %vm220_vm1, %v1074_v51, 0.0 }
 0x113   :  { %v532_v43 = vadd.f32 %v531_v34, %v530_v44  ;;  %v576_v45 = vrot.slane %v575_v36, 2  ;;  %v310_v0 = vadd.f32 %v309_v19, %v308_v33 }
 0x114   :  { %764 = vst.msk [vmem:[#allocation2 + $0xf0] sm:$0xff] %vm220_vm1, %v733_v38  ;;  %v780_v46 = vsel %vm220_vm1, %v733_v38, 0.0  ;;  %v809_v47 = vmul.f32 %v733_v38, %v733_v38 }
 0x115   :  { %v679_v8 = vpop.f32.mrf.mxu1  ;;  %v533_v48 = vrot.slane %v532_v43, 1  ;;  %v577_v16 = vadd.f32 %v576_v45, %v575_v36  ;;  %v781_v24 = vadd.f32 %v780_v46, %v779_v25  ;;  %v992_v50 = vpop.f32.mrf.mxu2 }
 0x116   :  { %v825_v53 = vsel %vm220_vm1, %v809_v47, 0.0  ;;  %v993_v54 = vadd.f32 %v992_v50, %v937_v40  ;;  %v680_v55 = vadd.f32 %v1987_v31, %v679_v8 }
 0x117   :  { %v939_v21 = vpop.f32.mrf.mxu0  ;;  %v534_v56 = vadd.f32 %v533_v48, %v532_v43  ;;  %v578_v57 = vrot.slane %v577_v16, 1  ;;  %v826_v60 = vadd.f32 %v825_v53, %v824_v30 }
 0x118   :  { %1030 = vst.msk [vmem:[#allocation2 + $0x140] sm:$0xff] %vm220_vm1, %v993_v54  ;;  %v1043_v62 = vsel %vm220_vm1, %v993_v54, 0.0  ;;  %v1075_v63 = vmul.f32 %v993_v54, %v993_v54  ;;  %v940_v35 = vadd.f32 %v1987_v31, %v939_v21 }
 0x119   :  { %v579_v41 = vadd.f32 %v578_v57, %v577_v16  ;;  %v1044_v1 = vadd.f32 %v1043_v62, %v1042_v61  ;;  %v735_v3 = vpop.f32.mrf.mxu3  ;;  %v2299_v4 = vadd.f32 %v534_v56, %v265_v2 }
 0x11a   :  { %v1088_v29 = vsel %vm220_vm1, %v1075_v63, 0.0  ;;  %v736_v49 = vadd.f32 %v735_v3, %v680_v55 }
 0x11b   :  { %v1089_v6 = vadd.f32 %v1088_v29, %v1087_v5  ;;  %v2304_v7 = vadd.f32 %v579_v41, %v310_v0 }
 0x11c   :  { %765 = vst.msk [vmem:[#allocation2 + $0xf8] sm:$0xff] %vm220_vm1, %v736_v49  ;;  %v782_v9 = vsel %vm220_vm1, %v736_v49, 0.0  ;;  %v810_v10 = vmul.f32 %v736_v49, %v736_v49 }
 0x11d   :  { %v682_v11 = vpop.f32.mrf.mxu1  ;;  %v783_v12 = vadd.f32 %v782_v9, %v781_v24  ;;  %v995_v13 = vpop.f32.mrf.mxu2 }
 0x11e   :  { %v827_v14 = vsel %vm220_vm1, %v810_v10, 0.0  ;;  %v996_v15 = vadd.f32 %v995_v13, %v940_v35  ;;  %v683_v17 = vadd.f32 %v1987_v31, %v682_v11 }
 0x11f   :  { %v942_v18 = vpop.f32.mrf.mxu0  ;;  %v828_v20 = vadd.f32 %v827_v14, %v826_v60 }
 0x120   :  { %1031 = vst.msk [vmem:[#allocation2 + $0x148] sm:$0xff] %vm220_vm1, %v996_v15  ;;  %v1045_v22 = vsel %vm220_vm1, %v996_v15, 0.0  ;;  %v1076_v42 = vmul.f32 %v996_v15, %v996_v15  ;;  %v943_v59 = vadd.f32 %v1987_v31, %v942_v18 }
 0x121   :  { %v1046_v52 = vadd.f32 %v1045_v22, %v1044_v1  ;;  %v738_v58 = vpop.f32.mrf.mxu3 }
 0x122   :  { %v1090_v23 = vsel %vm220_vm1, %v1076_v42, 0.0  ;;  %v739_v25 = vadd.f32 %v738_v58, %v683_v17 }
 0x123   :  { %v1091_v39 = vadd.f32 %v1090_v23, %v1089_v6 }
 0x124   :  { %766 = vst.msk [vmem:[#allocation2 + $0x100] sm:$0xff] %vm220_vm1, %v739_v25  ;;  %v784_v44 = vsel %vm220_vm1, %v739_v25, 0.0  ;;  %v811_v26 = vmul.f32 %v739_v25, %v739_v25 }
 0x125   :  { %v685_v27 = vpop.f32.mrf.mxu1  ;;  %v785_v28 = vadd.f32 %v784_v44, %v783_v12  ;;  %v998_v30 = vpop.f32.mrf.mxu2 }
 0x126   :  { %v829_v33 = vsel %vm220_vm1, %v811_v26, 0.0  ;;  %v999_v34 = vadd.f32 %v998_v30, %v943_v59  ;;  %v686_v36 = vadd.f32 %v1987_v31, %v685_v27  ;;  %v2359_v30 = vld [vmem:[%s2696_s2] ss:$0 sm:$0xff] }
 0x127   :  { %v945_v37 = vpop.f32.mrf.mxu0  ;;  %v830_v38 = vadd.f32 %v829_v33, %v828_v20 }
 0x128   :  { %1032 = vst.msk [vmem:[#allocation2 + $0x150] sm:$0xff] %vm220_vm1, %v999_v34  ;;  %v1047_v40 = vsel %vm220_vm1, %v999_v34, 0.0  ;;  %v1077_v32 = vmul.f32 %v999_v34, %v999_v34  ;;  %v946_v8 = vadd.f32 %v1987_v31, %v945_v37 }
 0x129   :  { %v1048_v43 = vadd.f32 %v1047_v40, %v1046_v52  ;;  %v741_v45 = vpop.f32.mrf.mxu3 }
 0x12a   :  { %v1092_v46 = vsel %vm220_vm1, %v1077_v32, 0.0  ;;  %v742_v47 = vadd.f32 %v741_v45, %v686_v36 }
 0x12b   :  { %v1093_v19 = vadd.f32 %v1092_v46, %v1091_v39 }
 0x12c   :  { %767 = vst.msk [vmem:[#allocation2 + $0x108] sm:$0xff] %vm220_vm1, %v742_v47  ;;  %v786_v48 = vsel %vm220_vm1, %v742_v47, 0.0  ;;  %v812_v16 = vmul.f32 %v742_v47, %v742_v47 }
 0x12d   :  { %v688_v24 = vpop.f32.mrf.mxu1  ;;  %v787_v50 = vadd.f32 %v786_v48, %v785_v28  ;;  %v1001_v51 = vpop.f32.mrf.mxu2 }
 0x12e   :  { %v831_v53 = vsel %vm220_vm1, %v812_v16, 0.0  ;;  %v1002_v54 = vadd.f32 %v1001_v51, %v946_v8  ;;  %v689_v55 = vadd.f32 %v1987_v31, %v688_v24 }
 0x12f   :  { %v948_v21 = vpop.f32.mrf.mxu0  ;;  %v832_v2 = vadd.f32 %v831_v53, %v830_v38 }
 0x130   :  { %1033 = vst.msk [vmem:[#allocation2 + $0x158] sm:$0xff] %vm220_vm1, %v1002_v54  ;;  %v1049_v56 = vsel %vm220_vm1, %v1002_v54, 0.0  ;;  %v1078_v57 = vmul.f32 %v1002_v54, %v1002_v54  ;;  %v949_v0 = vadd.f32 %v1987_v31, %v948_v21 }
 0x131   :  { %v2328_v60 = vadd.f32 %v1049_v56, %v1048_v43  ;;  %v744_v61 = vpop.f32.mrf.mxu3 }
 0x132   :  { %v1094_v62 = vsel %vm220_vm1, %v1078_v57, 0.0  ;;  %v745_v63 = vadd.f32 %v744_v61, %v689_v55 }
 0x133   :  { %v2332_v41 = vadd.f32 %v1094_v62, %v1093_v19 }
 0x134   :  { %768 = vst.msk [vmem:[#allocation2 + $0x110] sm:$0xff] %vm220_vm1, %v745_v63  ;;  %v788_v1 = vsel %vm220_vm1, %v745_v63, 0.0  ;;  %v813_v3 = vmul.f32 %v745_v63, %v745_v63 }
 0x135   :  { %v691_v5 = vpop.f32.mrf.mxu1  ;;  %v789_v29 = vadd.f32 %v788_v1, %v787_v50  ;;  %v1004_v49 = vpop.f32.mrf.mxu2 }
 0x136   :  { %v833_v35 = vsel %vm220_vm1, %v813_v3, 0.0  ;;  %v2337_v6 = vadd.f32 %v1004_v49, %v949_v0  ;;  %v692_v9 = vadd.f32 %v1987_v31, %v691_v5 }
 0x137   :  { %v951_v10 = vpop.f32.mrf.mxu0  ;;  %v834_v11 = vadd.f32 %v833_v35, %v832_v2 }
 0x138   :  { %1034 = vst.msk [vmem:[#allocation2 + $0x160] sm:$0xff] %vm220_vm1, %v2337_v6  ;;  %v952_v14 = vadd.f32 %v1987_v31, %v951_v10  ;;  %v1079_v49 = vmul.f32 %v2337_v6, %v2337_v6 }
 0x139   :  { %v747_v12 = vpop.f32.mrf.mxu3 }
 0x13a   :  { %v748_v13 = vadd.f32 %v747_v12, %v692_v9 }
 0x13c   :  { %769 = vst.msk [vmem:[#allocation2 + $0x118] sm:$0xff] %vm220_vm1, %v748_v13  ;;  %v814_v26 = vmul.f32 %v748_v13, %v748_v13  ;;  %v790_v34 = vsel %vm220_vm1, %v748_v13, 0.0 }
 0x13d   :  { %v694_v15 = vpop.f32.mrf.mxu1  ;;  %v1007_v17 = vpop.f32.mrf.mxu2  ;;  %v791_v47 = vadd.f32 %v790_v34, %v789_v29 }
 0x13e   :  { %v2344_v18 = vadd.f32 %v1007_v17, %v952_v14  ;;  %v695_v20 = vadd.f32 %v1987_v31, %v694_v15  ;;  %v835_v37 = vsel %vm220_vm1, %v814_v26, 0.0 }
 0x13f   :  { %v954_v22 = vpop.f32.mrf.mxu0  ;;  %v836_v48 = vadd.f32 %v835_v37, %v834_v11  ;;  %v1051_v11 = vsel %vm220_vm1, %v2337_v6, 0.0 }
 0x140   :  { %1035 = vst.msk [vmem:[#allocation2 + $0x168] sm:$0xff] %vm220_vm1, %v2344_v18  ;;  %v955_v58 = vadd.f32 %v1987_v31, %v954_v22  ;;  %v1080_v12 = vmul.f32 %v2344_v18, %v2344_v18  ;;  %v1053_v22 = vsel %vm220_vm1, %v2344_v18, 0.0  ;;  %v1052_v6 = vadd.f32 %v1051_v11, %v2328_v60 }
 0x141   :  { %v750_v42 = vpop.f32.mrf.mxu3 }
 0x142   :  { %v751_v52 = vadd.f32 %v750_v42, %v695_v20  ;;  %v1096_v20 = vsel %vm220_vm1, %v1079_v49, 0.0  ;;  %v1054_v18 = vadd.f32 %v1053_v22, %v1052_v6 }
 0x144   :  { %770 = vst.msk [vmem:[#allocation2 + $0x120] sm:$0xff] %vm220_vm1, %v751_v52  ;;  %v815_v36 = vmul.f32 %v751_v52, %v751_v52  ;;  %v792_v40 = vsel %vm220_vm1, %v751_v52, 0.0 }
 0x145   :  { %v697_v23 = vpop.f32.mrf.mxu1  ;;  %v1010_v25 = vpop.f32.mrf.mxu2  ;;  %v793_v16 = vadd.f32 %v792_v40, %v791_v47 }
 0x146   :  { %v2351_v59 = vadd.f32 %v1010_v25, %v955_v58  ;;  %v698_v39 = vadd.f32 %v1987_v31, %v697_v23  ;;  %v837_v8 = vsel %vm220_vm1, %v815_v36, 0.0  ;;  %v1098_v25 = vsel %vm220_vm1, %v1080_v12, 0.0 }
 0x147   :  { %v957_v44 = vpop.f32.mrf.mxu0  ;;  %v838_v54 = vadd.f32 %v837_v8, %v836_v48 }
 0x148   :  { %1036 = vst.msk [vmem:[#allocation2 + $0x170] sm:$0xff] %vm220_vm1, %v2351_v59  ;;  %v958_v33 = vadd.f32 %v2359_v30, %v957_v44  ;;  %v1081_v42 = vmul.f32 %v2351_v59, %v2351_v59 }
 0x149   :  { %v753_v27 = vpop.f32.mrf.mxu3 }
 0x14a   :  { %v754_v28 = vadd.f32 %v753_v27, %v698_v39  ;;  %v1055_v39 = vsel %vm220_vm1, %v2351_v59, 0.0  ;;  %v1097_v27 = vadd.f32 %v1096_v20, %v2332_v41  ;;  %v1100_v36 = vsel %vm220_vm1, %v1081_v42, 0.0 }
 0x14c   :  { %771 = vst.msk [vmem:[#allocation2 + $0x128] sm:$0xff] %vm220_vm1, %v754_v28  ;;  %v816_v32 = vmul.f32 %v754_v28, %v754_v28  ;;  %v794_v19 = vsel %vm220_vm1, %v754_v28, 0.0  ;;  %v1099_v37 = vadd.f32 %v1098_v25, %v1097_v27 }
 0x14d   :  { %v700_v31 = vpop.f32.mrf.mxu1  ;;  %v1013_v38 = vpop.f32.mrf.mxu2  ;;  %v795_v55 = vadd.f32 %v794_v19, %v793_v16 }
 0x14e   :  { %v1014_v43 = vadd.f32 %v1013_v38, %v958_v33  ;;  %v701_v45 = vadd.f32 %v2359_v30, %v700_v31  ;;  %v839_v50 = vsel %vm220_vm1, %v816_v32, 0.0  ;;  %v1056_v38 = vadd.f32 %v1055_v39, %v1054_v18 }
 0x14f   :  { %v960_v46 = vpop.f32.mrf.mxu0  ;;  %v840_v57 = vadd.f32 %v839_v50, %v838_v54  ;;  %v1101_v47 = vadd.f32 %v1100_v36, %v1099_v37  ;;  %v1136_v36 = vld [vmem:[%s2698_s4] sm:$0x1] }
 0x150   :  { %1037 = vst.msk [vmem:[#allocation2 + $0x178] sm:$0xff] %vm220_vm1, %v1014_v43  ;;  %v961_v53 = vadd.f32 %v2359_v30, %v960_v46  ;;  %v1082_v44 = vmul.f32 %v1014_v43, %v1014_v43  ;;  %v1057_v60 = vsel %vm220_vm1, %v1014_v43, 0.0 }
 0x151   :  { %v756_v24 = vpop.f32.mrf.mxu3  ;;  %v1058_v8 = vadd.f32 %v1057_v60, %v1056_v38  ;;  %v1139_v60 = vld [vmem:[#allocation2] sm:$0xff] }
 0x152   :  { %v757_v51 = vadd.f32 %v756_v24, %v701_v45  ;;  %v1102_v59 = vsel %vm220_vm1, %v1082_v44, 0.0 }
 0x153   :  { %v1103_v24 = vadd.f32 %v1102_v59, %v1101_v47  ;;  %v1143_v59 = vld [vmem:[#allocation2 + $0x20] sm:$0xff]  ;;  %v1146_v47 = vld [vmem:[#allocation2 + $0x38] sm:$0xff] }
 0x154   :  { %772 = vst.msk [vmem:[#allocation2 + $0x130] sm:$0x3] %vm233_vm2, %v757_v51  ;;  %v796_v21 = vsel %vm233_vm2, %v757_v51, 0.0  ;;  %v817_v2 = vmul.f32 %v757_v51, %v757_v51 }
 0x155   :  { %v969_v56 = vpop.f32.mrf.mxu1  ;;  %v797_v61 = vadd.f32 %v796_v21, %v795_v55  ;;  %v1016_v62 = vpop.f32.mrf.mxu2 }
 0x156   :  { %v841_v63 = vsel %vm233_vm2, %v817_v2, 0.0  ;;  %v1017_v0 = vadd.f32 %v1016_v62, %v961_v53  ;;  %v970_v3 = vadd.f32 %v2359_v30, %v969_v56 }
 0x157   :  { %v963_v1 = vpop.f32.mrf.mxu0  ;;  %v798_v5 = vrot.slane %v797_v61, 4  ;;  %v842_v29 = vadd.f32 %v841_v63, %v840_v57 }
 0x158   :  { %1038 = vst.msk [vmem:[#allocation2 + $0x180] sm:$0xff] %vm220_vm1, %v1017_v0  ;;  %v964_v13 = vadd.f32 %v2359_v30, %v963_v1  ;;  %v1083_v31 = vmul.f32 %v1017_v0, %v1017_v0  ;;  %v1059_v45 = vsel %vm220_vm1, %v1017_v0, 0.0 }
 0x159   :  { %v799_v35 = vadd.f32 %v798_v5, %v797_v61  ;;  %v843_v9 = vrot.slane %v842_v29, 4  ;;  %v1025_v10 = vpop.f32.mrf.mxu3  ;;  %v1060_v51 = vadd.f32 %v1059_v45, %v1058_v8  ;;  %v1182_v45 = vld [vmem:[#allocation2 + $0x68] sm:$0xff] }
 0x15a   :  { %v1026_v14 = vadd.f32 %v1025_v10, %v970_v3  ;;  %v1104_v43 = vsel %vm220_vm1, %v1083_v31, 0.0  ;;  %v1140_v31 = vld [vmem:[#allocation2 + $0x8] sm:$0xff] }
 0x15b   :  { %v800_v15 = vrot.slane %v799_v35, 2  ;;  %v844_v17 = vadd.f32 %v843_v9, %v842_v29  ;;  %v1105_v2 = vadd.f32 %v1104_v43, %v1103_v24  ;;  %v1148_v24 = vld [vmem:[#allocation2 + $0x48] sm:$0xff] }
 0x15c   :  { %1041 = vst.msk [vmem:[#allocation2 + $0x198] sm:$0x3] %vm233_vm2, %v1026_v14  ;;  %v1086_v21 = vmul.f32 %v1026_v14, %v1026_v14  ;;  %v1065_v57 = vsel %vm233_vm2, %v1026_v14, 0.0 }
 0x15d   :  { %v801_v52 = vadd.f32 %v800_v15, %v799_v35  ;;  %v845_v58 = vrot.slane %v844_v17, 2  ;;  %v1019_v23 = vpop.f32.mrf.mxu2 }
 0x15e   :  { %v1020_v26 = vadd.f32 %v1019_v23, %v964_v13 }
 0x15f   :  { %v802_v28 = vrot.slane %v801_v52, 1  ;;  %v846_v33 = vadd.f32 %v845_v58, %v844_v17  ;;  %v966_v34 = vpop.f32.mrf.mxu0 }
 0x160   :  { %1039 = vst.msk [vmem:[#allocation2 + $0x188] sm:$0xff] %vm220_vm1, %v1020_v26  ;;  %v1084_v41 = vmul.f32 %v1020_v26, %v1020_v26  ;;  %v967_v46 = vadd.f32 %v2359_v30, %v966_v34  ;;  %v1061_v16 = vsel %vm220_vm1, %v1020_v26, 0.0 }
 0x161   :  { %v803_v40 = vadd.f32 %v802_v28, %v801_v52  ;;  %v847_v32 = vrot.slane %v846_v33, 1  ;;  %v1062_v30 = vadd.f32 %v1061_v16, %v1060_v51  ;;  %v1134_v28 = vld [vmem:[%s2697_s3] sm:$0x1] }
 0x162   :  { %v1106_v54 = vsel %vm220_vm1, %v1084_v41, 0.0  ;;  %v1144_v41 = vld [vmem:[#allocation2 + $0x28] sm:$0xff]  ;;  %v1147_v16 = vld [vmem:[#allocation2 + $0x40] sm:$0xff] }
 0x163   :  { %v804_v19 = vadd.f32 %v803_v40, %v2299_v4  ;;  %v848_v48 = vadd.f32 %v847_v32, %v846_v33  ;;  %v1107_v61 = vadd.f32 %v1106_v54, %v1105_v2  ;;  %v1141_v40 = vld [vmem:[#allocation2 + $0x10] sm:$0xff]  ;;  %v1142_v32 = vld [vmem:[#allocation2 + $0x18] sm:$0xff] }
 0x164   :  { %v1150_v2 = vld [vmem:[#allocation2 + $0x58] sm:$0xff] }
 0x165   :  { %v849_v50 = vadd.f32 %v848_v48, %v2304_v7  ;;  %v1022_v53 = vpop.f32.mrf.mxu2  ;;  %v1110_v7 = vsel %vm233_vm2, %v1086_v21, 0.0  ;;  %v1183_v21 = vld [vmem:[#allocation2 + $0x70] sm:$0xff] }
 0x166   :  { %v1023_v55 = vadd.f32 %v1022_v53, %v967_v46  ;;  %v1145_v46 = vld [vmem:[#allocation2 + $0x30] sm:$0xff] }
 0x168   :  { %1040 = vst.msk [vmem:[#allocation2 + $0x190] sm:$0xff] %vm220_vm1, %v1023_v55  ;;  %v1063_v4 = vsel %vm220_vm1, %v1023_v55, 0.0  ;;  %v1085_v56 = vmul.f32 %v1023_v55, %v1023_v55 }
 0x169   :  { %v1064_v62 = vadd.f32 %v1063_v4, %v1062_v30  ;;  %v1151_v30 = vld [vmem:[#allocation2 + $0x60] sm:$0x3] }
 0x16a   :  { %v1108_v63 = vsel %vm220_vm1, %v1085_v56, 0.0 }
 0x16b   :  { %v1109_v0 = vadd.f32 %v1108_v63, %v1107_v61  ;;  %v1066_v1 = vadd.f32 %v1065_v57, %v1064_v62  ;;  %v1184_v62 = vld [vmem:[#allocation2 + $0x78] sm:$0xff]  ;;  %v1185_v63 = vld [vmem:[#allocation2 + $0x80] sm:$0xff] }
 0x16d   :  { %v1067_v3 = vrot.slane %v1066_v1, 4  ;;  %v1111_v5 = vadd.f32 %v1110_v7, %v1109_v0  ;;  %v1186_v7 = vld [vmem:[#allocation2 + $0x88] sm:$0xff] }
 0x16f   :  { %v1068_v29 = vadd.f32 %v1067_v3, %v1066_v1  ;;  %v1112_v49 = vrot.slane %v1111_v5, 4 }
 0x171   :  { %v1069_v35 = vrot.slane %v1068_v29, 2  ;;  %v1113_v9 = vadd.f32 %v1112_v49, %v1111_v5 }
 0x173   :  { %v1070_v10 = vadd.f32 %v1069_v35, %v1068_v29  ;;  %v1114_v11 = vrot.slane %v1113_v9, 2 }
 0x175   :  { %v1071_v12 = vrot.slane %v1070_v10, 1  ;;  %v1115_v13 = vadd.f32 %v1114_v11, %v1113_v9 }
 0x177   :  { %v1072_v15 = vadd.f32 %v1071_v12, %v1070_v10  ;;  %v1116_v14 = vrot.slane %v1115_v13, 1 }
 0x179   :  { %v1073_v17 = vadd.f32 %v1072_v15, %v804_v19  ;;  %v1117_v20 = vadd.f32 %v1116_v14, %v1115_v13  ;;  %v1187_v15 = vld [vmem:[#allocation2 + $0x90] sm:$0xff] }
 0x17b   :  { %v1118_v22 = vadd.f32 %v1117_v20, %v849_v50  ;;  %v1119_v42 = vmul.f32 0.0025510204, %v1073_v17  ;;  %v1149_v50 = vld [vmem:[#allocation2 + $0x50] sm:$0xff] }
 0x17d   :  { %v1120_v6 = vmul.f32 0.0025510204, %v1118_v22  ;;  %v1121_v52 = vmul.f32 %v1119_v42, %v1119_v42 }
 0x17f   :  { %v1122_v58 = vsub.f32 %v1120_v6, %v1121_v52  ;;  %v1189_v6 = vld [vmem:[#allocation2 + $0xa0] sm:$0xff]  ;;  %v1190_v52 = vld [vmem:[#allocation2 + $0xa8] sm:$0xff] }
 0x181   :  { %v1123_v23 = vadd.f32 1e-05, %v1122_v58 }
 0x183   :  { %1517 = vrsqrt.f32 %v1123_v23  ;;  %vm1130_vm4 = vweird.f32 %v1123_v23 }
 0x189   :  { %v1518_v25 = vpop.eup %1517 }
 0x18a   :  { %v1125_v39 = vmul.f32 %v1518_v25, %v1123_v23  ;;  %vm1131_vm3 = vweird.f32 %v1518_v25 }
 0x18b   :  { %vm1132_vm5 = vmor %vm1130_vm4, %vm1131_vm3 }
 0x18c   :  { %v1126_v44 = vmul.f32 %v1518_v25, %v1125_v39 }
 0x18e   :  { %v1127_v26 = vmul.f32 0.5, %v1126_v44  ;;  %v1191_v44 = vld [vmem:[#allocation2 + $0xb0] sm:$0xff] }
 0x190   :  { %v1128_v27 = vsub.f32 1.5, %v1127_v26  ;;  %v1192_v26 = vld [vmem:[#allocation2 + $0xb8] sm:$0xff] }
 0x192   :  { %v1129_v18 = vmul.f32 %v1518_v25, %v1128_v27  ;;  %v1193_v27 = vld [vmem:[#allocation2 + $0xc0] sm:$0xff] }
 0x194   :  { %v1133_v33 = vsel %vm1132_vm5, %v1518_v25, %v1129_v18 }
 0x195   :  { %v1135_v34 = vmul.f32 %v1134_v28, %v1133_v33 }
 0x197   :  { %v1137_v37 = vmul.f32 %v1135_v34, %v1119_v42  ;;  %v2417_v38 = vperm.slane %v1135_v34, 0  ;;  %v1188_v42 = vld [vmem:[#allocation2 + $0x98] sm:$0xff] }
 0x199   :  { %v1138_v8 = vsub.f32 %v1136_v36, %v1137_v37  ;;  %v1153_v19 = vmul.f32 %v2417_v38, %v1139_v60  ;;  %v1154_v48 = vmul.f32 %v2417_v38, %v1140_v31  ;;  %v1155_v43 = vmul.f32 %v2417_v38, %v1141_v40  ;;  %v1194_v36 = vld [vmem:[#allocation2 + $0xc8] sm:$0x3] }
 0x19a   :  { %v1156_v51 = vmul.f32 %v2417_v38, %v1142_v32  ;;  %v1157_v53 = vmul.f32 %v2417_v38, %v1143_v59  ;;  %v1158_v54 = vmul.f32 %v2417_v38, %v1144_v41  ;;  %v1159_v55 = vmul.f32 %v2417_v38, %v1145_v46 }
 0x19b   :  { %v1160_v4 = vmul.f32 %v2417_v38, %v1146_v47  ;;  %v1161_v56 = vmul.f32 %v2417_v38, %v1147_v16  ;;  %v1162_v57 = vmul.f32 %v2417_v38, %v1148_v24  ;;  %v1163_v61 = vmul.f32 %v2417_v38, %v1149_v50 }
 0x19c   :  { %v1164_v0 = vmul.f32 %v2417_v38, %v1150_v2  ;;  %v1165_v1 = vmul.f32 %v2417_v38, %v1151_v30  ;;  %v2432_v3 = vperm.slane %v1138_v8, 0  ;;  %v1195_v5 = vmul.f32 %v1182_v45, %v2417_v38 }
 0x19d   :  { %v1196_v29 = vmul.f32 %v1183_v21, %v2417_v38  ;;  %v1197_v49 = vmul.f32 %v1184_v62, %v2417_v38  ;;  %v1198_v35 = vmul.f32 %v1185_v63, %v2417_v38  ;;  %v1199_v9 = vmul.f32 %v1186_v7, %v2417_v38 }
 0x19e   :  { %v2440_v10 = vadd.f32 %v2432_v3, %v1153_v19  ;;  %v2443_v11 = vadd.f32 %v2432_v3, %v1154_v48  ;;  %v2446_v12 = vadd.f32 %v2432_v3, %v1155_v43  ;;  %v2449_v13 = vadd.f32 %v2432_v3, %v1156_v51 }
 0x19f   :  { %v2452_v14 = vadd.f32 %v2432_v3, %v1157_v53  ;;  %v2455_v17 = vadd.f32 %v2432_v3, %v1158_v54  ;;  %v2458_v20 = vadd.f32 %v2432_v3, %v1159_v55  ;;  %v2461_v22 = vadd.f32 %v2432_v3, %v1160_v4  ;;  %v1234_v55 = vld [vmem:[#allocation2 + $0xd0] sm:$0xff] }
 0x1a0   :  { %v2464_v58 = vadd.f32 %v2432_v3, %v1161_v56  ;;  %v2467_v23 = vadd.f32 %v2432_v3, %v1162_v57  ;;  %v2470_v25 = vadd.f32 %v2432_v3, %v1163_v61  ;;  %v2473_v39 = vadd.f32 %v2432_v3, %v1164_v0  ;;  %v1235_v56 = vld [vmem:[#allocation2 + $0xd8] sm:$0xff]  ;;  %v1236_v57 = vld [vmem:[#allocation2 + $0xe0] sm:$0xff]  ;;  %v1237_v61 = vld [vmem:[#allocation2 + $0xe8] sm:$0xff] }
 0x1a1   :  { %v2476_v18 = vadd.f32 %v2432_v3, %v1165_v1  ;;  %v1200_v28 = vmul.f32 %v1187_v15, %v2417_v38  ;;  %v1201_v33 = vmul.f32 %v1188_v42, %v2417_v38  ;;  %v1202_v34 = vmul.f32 %v1189_v6, %v2417_v38  ;;  %v1238_v1 = vld [vmem:[#allocation2 + $0xf0] sm:$0xff]  ;;  %v1245_v42 = vld [vmem:[#allocation2 + $0x128] sm:$0xff] }
 0x1a2   :  { %v1203_v60 = vmul.f32 %v1190_v52, %v2417_v38  ;;  %v1204_v31 = vmul.f32 %v1191_v44, %v2417_v38  ;;  %v1205_v37 = vmul.f32 %v1192_v26, %v2417_v38  ;;  %v1206_v40 = vmul.f32 %v1193_v27, %v2417_v38  ;;  %v1246_v6 = vld [vmem:[#allocation2 + $0x130] sm:$0x3] }
 0x1a3   :  { %v1207_v32 = vmul.f32 %v1194_v36, %v2417_v38  ;;  %v2487_v59 = vadd.f32 %v1195_v5, %v2432_v3  ;;  %v2490_v45 = vadd.f32 %v1196_v29, %v2432_v3  ;;  %v2493_v41 = vadd.f32 %v1197_v49, %v2432_v3  ;;  %v1239_v5 = vld [vmem:[#allocation2 + $0xf8] sm:$0xff]  ;;  %v1240_v29 = vld [vmem:[#allocation2 + $0x100] sm:$0xff] }
 0x1a4   :  { %v2496_v46 = vadd.f32 %v1198_v35, %v2432_v3  ;;  %v2499_v47 = vadd.f32 %v1199_v9, %v2432_v3  ;;  %v2502_v8 = vadd.f32 %v1200_v28, %v2432_v3  ;;  %v2505_v19 = vadd.f32 %v1201_v33, %v2432_v3 }
 0x1a5   :  { %v2508_v48 = vadd.f32 %v1202_v34, %v2432_v3  ;;  %v2511_v43 = vadd.f32 %v1203_v60, %v2432_v3  ;;  %v2514_v16 = vadd.f32 %v1204_v31, %v2432_v3  ;;  %v2517_v24 = vadd.f32 %v1205_v37, %v2432_v3 }
 0x1a6   :  { %v2520_v50 = vadd.f32 %v1206_v40, %v2432_v3  ;;  %v2523_v51 = vadd.f32 %v1207_v32, %v2432_v3  ;;  %v1221_v53 = vmax.f32 %v2440_v10, %v2487_v59  ;;  %v1222_v54 = vmax.f32 %v2443_v11, %v2490_v45  ;;  %v1241_v11 = vld [vmem:[#allocation2 + $0x108] sm:$0xff] }
 0x1a7   :  { %v1223_v21 = vmax.f32 %v2446_v12, %v2493_v41  ;;  %v1224_v2 = vmax.f32 %v2449_v13, %v2496_v46  ;;  %v1225_v30 = vmax.f32 %v2452_v14, %v2499_v47  ;;  %v1226_v4 = vmax.f32 %v2455_v17, %v2502_v8  ;;  %v1242_v12 = vld [vmem:[#allocation2 + $0x110] sm:$0xff]  ;;  %v1243_v13 = vld [vmem:[#allocation2 + $0x118] sm:$0xff] }
 0x1a8   :  { %v1227_v62 = vmax.f32 %v2458_v20, %v2505_v19  ;;  %v1228_v63 = vmax.f32 %v2461_v22, %v2508_v48  ;;  %v1229_v7 = vmax.f32 %v2464_v58, %v2511_v43  ;;  %v1230_v0 = vmax.f32 %v2467_v23, %v2514_v16  ;;  %v1244_v22 = vld [vmem:[#allocation2 + $0x120] sm:$0xff]  ;;  %v1286_v19 = vld [vmem:[#allocation2 + $0x138] sm:$0xff] }
 0x1a9   :  { %v1231_v49 = vmax.f32 %v2470_v25, %v2517_v24  ;;  %v1232_v35 = vmax.f32 %v2473_v39, %v2520_v50  ;;  %v1233_v9 = vmax.f32 %v2476_v18, %v2523_v51  ;;  %v1247_v10 = vmul.f32 %v1234_v55, %v2417_v38  ;;  %v1287_v50 = vld [vmem:[#allocation2 + $0x140] sm:$0xff]  ;;  %v1288_v51 = vld [vmem:[#allocation2 + $0x148] sm:$0xff]  ;;  %v1289_v55 = vld [vmem:[#allocation2 + $0x150] sm:$0xff] }
 0x1aa   :  { %v1248_v15 = vmul.f32 %v1235_v56, %v2417_v38  ;;  %v1249_v14 = vmul.f32 %v1236_v57, %v2417_v38  ;;  %v1250_v17 = vmul.f32 %v1237_v61, %v2417_v38  ;;  %v1251_v20 = vmul.f32 %v1238_v1, %v2417_v38  ;;  %v1290_v57 = vld [vmem:[#allocation2 + $0x158] sm:$0xff]  ;;  %v1292_v61 = vld [vmem:[#allocation2 + $0x168] sm:$0xff] }
 0x1ab   :  { %v1252_v52 = vmul.f32 %v1239_v5, %v2417_v38  ;;  %v1253_v58 = vmul.f32 %v1240_v29, %v2417_v38  ;;  %v1254_v23 = vmul.f32 %v1241_v11, %v2417_v38  ;;  %v1255_v25 = vmul.f32 %v1242_v12, %v2417_v38  ;;  %v1293_v5 = vld [vmem:[#allocation2 + $0x170] sm:$0xff]  ;;  %v1295_v29 = vld [vmem:[#allocation2 + $0x180] sm:$0xff]  ;;  %v1296_v11 = vld [vmem:[#allocation2 + $0x188] sm:$0xff] }
 0x1ac   :  { %v1256_v39 = vmul.f32 %v1243_v13, %v2417_v38  ;;  %v1257_v44 = vmul.f32 %v1244_v22, %v2417_v38  ;;  %v1258_v26 = vmul.f32 %v1245_v42, %v2417_v38  ;;  %v1259_v27 = vmul.f32 %v1246_v6, %v2417_v38  ;;  %v1298_v12 = vld [vmem:[#allocation2 + $0x198] sm:$0x3] }
 0x1ad   :  { %v1260_v18 = vadd.f32 %v1247_v10, %v2432_v3  ;;  %v1261_v28 = vadd.f32 %v1248_v15, %v2432_v3  ;;  %v1262_v33 = vadd.f32 %v1249_v14, %v2432_v3  ;;  %v1263_v34 = vadd.f32 %v1250_v17, %v2432_v3 }
 0x1ae   :  { %v1264_v36 = vadd.f32 %v1251_v20, %v2432_v3  ;;  %v1265_v60 = vadd.f32 %v1252_v52, %v2432_v3  ;;  %v1266_v31 = vadd.f32 %v1253_v58, %v2432_v3  ;;  %v1267_v37 = vadd.f32 %v1254_v23, %v2432_v3 }
 0x1af   :  { %v1268_v40 = vadd.f32 %v1255_v25, %v2432_v3  ;;  %v1269_v32 = vadd.f32 %v1256_v39, %v2432_v3  ;;  %v1270_v59 = vadd.f32 %v1257_v44, %v2432_v3  ;;  %v1271_v45 = vadd.f32 %v1258_v26, %v2432_v3 }
 0x1b0   :  { %v1272_v41 = vadd.f32 %v1259_v27, %v2432_v3  ;;  %v2577_v46 = vmax.f32 %v1221_v53, %v1260_v18  ;;  %v2579_v47 = vmax.f32 %v1222_v54, %v1261_v28  ;;  %v2581_v8 = vmax.f32 %v1223_v21, %v1262_v33 }
 0x1b1   :  { %v2583_v48 = vmax.f32 %v1224_v2, %v1263_v34  ;;  %v2585_v43 = vmax.f32 %v1225_v30, %v1264_v36  ;;  %v2587_v16 = vmax.f32 %v1226_v4, %v1265_v60  ;;  %v2589_v24 = vmax.f32 %v1227_v62, %v1266_v31  ;;  %v1291_v2 = vld [vmem:[#allocation2 + $0x160] sm:$0xff] }
 0x1b2   :  { %v2591_v56 = vmax.f32 %v1228_v63, %v1267_v37  ;;  %v2593_v53 = vmax.f32 %v1229_v7, %v1268_v40  ;;  %v2595_v54 = vmax.f32 %v1230_v0, %v1269_v32  ;;  %v2597_v21 = vmax.f32 %v1231_v49, %v1270_v59  ;;  %v1294_v63 = vld [vmem:[#allocation2 + $0x178] sm:$0xff] }
 0x1b3   :  { %v2599_v30 = vmax.f32 %v1232_v35, %v1271_v45  ;;  %v2601_v4 = vmax.f32 %v1233_v9, %v1272_v41  ;;  %v1299_v62 = vmul.f32 %v1286_v19, %v2417_v38  ;;  %v1300_v1 = vmul.f32 %v1287_v50, %v2417_v38  ;;  %v1297_v35 = vld [vmem:[#allocation2 + $0x190] sm:$0xff] }
 0x1b4   :  { %v1301_v7 = vmul.f32 %v1288_v51, %v2417_v38  ;;  %v1302_v0 = vmul.f32 %v1289_v55, %v2417_v38  ;;  %v1303_v49 = vmul.f32 %v1290_v57, %v2417_v38  ;;  %v1304_v10 = vmul.f32 %v1291_v2, %v2417_v38 }
 0x1b5   :  { %v1305_v9 = vmul.f32 %v1292_v61, %v2417_v38  ;;  %v1306_v13 = vmul.f32 %v1293_v5, %v2417_v38  ;;  %v1307_v15 = vmul.f32 %v1294_v63, %v2417_v38  ;;  %v1308_v14 = vmul.f32 %v1295_v29, %v2417_v38 }
 0x1b6   :  { %v1309_v17 = vmul.f32 %v1296_v11, %v2417_v38  ;;  %v1310_v20 = vmul.f32 %v1297_v35, %v2417_v38  ;;  %v1311_v22 = vmul.f32 %v1298_v12, %v2417_v38  ;;  %v1312_v42 = vadd.f32 %v1299_v62, %v2432_v3 }
 0x1b7   :  { %v1313_v6 = vadd.f32 %v1300_v1, %v2432_v3  ;;  %v1314_v52 = vadd.f32 %v1301_v7, %v2432_v3  ;;  %v1315_v58 = vadd.f32 %v1302_v0, %v2432_v3  ;;  %v1316_v23 = vadd.f32 %v1303_v49, %v2432_v3 }
 0x1b8   :  { %v1317_v25 = vadd.f32 %v1304_v10, %v2432_v3  ;;  %v1318_v39 = vadd.f32 %v1305_v9, %v2432_v3  ;;  %v1319_v44 = vadd.f32 %v1306_v13, %v2432_v3  ;;  %v1320_v26 = vadd.f32 %v1307_v15, %v2432_v3 }
 0x1b9   :  { %v1321_v38 = vadd.f32 %v1308_v14, %v2432_v3  ;;  %v1322_v27 = vadd.f32 %v1309_v17, %v2432_v3  ;;  %v1323_v18 = vadd.f32 %v1310_v20, %v2432_v3  ;;  %v1324_v28 = vadd.f32 %v1311_v22, %v2432_v3 }
 0x1ba   :  { %v1325_v33 = vmax.f32 %v2577_v46, %v1312_v42  ;;  %v1326_v34 = vmax.f32 %v2579_v47, %v1313_v6  ;;  %v1327_v36 = vmax.f32 %v2581_v8, %v1314_v52  ;;  %v1328_v60 = vmax.f32 %v2583_v48, %v1315_v58 }
 0x1bb   :  { %v1329_v31 = vmax.f32 %v2585_v43, %v1316_v23  ;;  %v1330_v37 = vmax.f32 %v2587_v16, %v1317_v25  ;;  %v1331_v40 = vmax.f32 %v2589_v24, %v1318_v39  ;;  %v1332_v32 = vmax.f32 %v2591_v56, %v1319_v44 }
 0x1bc   :  { %v1333_v59 = vmax.f32 %v2593_v53, %v1320_v26  ;;  %v1334_v3 = vmax.f32 %v2595_v54, %v1321_v38  ;;  %v1335_v45 = vmax.f32 %v2597_v21, %v1322_v27  ;;  %v1336_v41 = vmax.f32 %v2599_v30, %v1323_v18 }
 0x1bd   :  { %v1337_v46 = vmax.f32 %v2601_v4, %v1324_v28  ;;  %v1338_v47 = vmax.f32 %v1325_v33, 0.0  ;;  %v1339_v8 = vmax.f32 %v1326_v34, 0.0  ;;  %v1340_v19 = vmax.f32 %v1327_v36, 0.0 }
 0x1be   :  { %v1341_v48 = vmax.f32 %v1328_v60, 0.0  ;;  %v1342_v43 = vmax.f32 %v1329_v31, 0.0  ;;  %v1343_v16 = vmax.f32 %v1330_v37, 0.0  ;;  %v1344_v24 = vmax.f32 %v1331_v40, 0.0 }
 0x1bf   :  { %1351 = vst.msk [vmem:[%s2699_s5] sm:$0xff] %vm220_vm1, %v1338_v47  ;;  %v1345_v50 = vmax.f32 %v1332_v32, 0.0  ;;  %v1346_v51 = vmax.f32 %v1333_v59, 0.0  ;;  %v1347_v55 = vmax.f32 %v1334_v3, 0.0  ;;  %v1348_v56 = vmax.f32 %v1335_v45, 0.0 }
 0x1c0   :  { %1352 = vst.msk [vmem:[%s2699_s5 + $0x8] sm:$0xff] %vm220_vm1, %v1339_v8  ;;  %v1349_v53 = vmax.f32 %v1336_v41, 0.0  ;;  %v1350_v54 = vmax.f32 %v1337_v46, 0.0 }
 0x1c1   :  { %1353 = vst.msk [vmem:[%s2699_s5 + $0x10] sm:$0xff] %vm220_vm1, %v1340_v19 }
 0x1c2   :  { %1354 = vst.msk [vmem:[%s2699_s5 + $0x18] sm:$0xff] %vm220_vm1, %v1341_v48 }
 0x1c3   :  { %1355 = vst.msk [vmem:[%s2699_s5 + $0x20] sm:$0xff] %vm220_vm1, %v1342_v43 }
 0x1c4   :  { %1356 = vst.msk [vmem:[%s2699_s5 + $0x28] sm:$0xff] %vm220_vm1, %v1343_v16 }
 0x1c5   :  { %1357 = vst.msk [vmem:[%s2699_s5 + $0x30] sm:$0xff] %vm220_vm1, %v1344_v24 }
 0x1c6   :  { %1358 = vst.msk [vmem:[%s2699_s5 + $0x38] sm:$0xff] %vm220_vm1, %v1345_v50 }
 0x1c7   :  { %1359 = vst.msk [vmem:[%s2699_s5 + $0x40] sm:$0xff] %vm220_vm1, %v1346_v51 }
 0x1c8   :  { %1360 = vst.msk [vmem:[%s2699_s5 + $0x48] sm:$0xff] %vm220_vm1, %v1347_v55 }
 0x1c9   :  { %1361 = vst.msk [vmem:[%s2699_s5 + $0x50] sm:$0xff] %vm220_vm1, %v1348_v56 }
 0x1ca   :  { %1362 = vst.msk [vmem:[%s2699_s5 + $0x58] sm:$0xff] %vm220_vm1, %v1349_v53 }
 0x1cb   :  { %1363 = vst.msk [vmem:[%s2699_s5 + $0x60] sm:$0x3] %vm233_vm2, %v1350_v54 }

// kernel: handwritten_forward.5
= control target key start
LH: loop header
LB: loop body
LE: loop exit
PB: predicated region body
PF: predicated region fallthrough
CT: control target
= control target key end

     0   :  { %10 = vsyncpa [#allocation4], 0  ;;  %s3785_s18 = smov 0   ;;  %s4419_s0 = inlined_call_operand.vmem [shape: f32[2,3584], index: 0, kind: input, shape index: {}]   ;;  %s4420_s1 = inlined_call_operand.vmem [shape: bf16[3584,512], index: 1, kind: input, shape index: {}]   ;;  %s4421_s2 = inlined_call_operand.vmem [shape: f32[1,512], index: 2, kind: input, shape index: {}]   ;;  %s4422_s3 = inlined_call_operand.vmem [shape: bf16[512,128], index: 3, kind: input, shape index: {}]   ;;  %s4423_s4 = inlined_call_operand.vmem [shape: f32[1,128], index: 4, kind: input, shape index: {}]   ;;  %s4424_s5 = inlined_call_operand.hbm [shape: f32[2,128], index: 5, kind: output, shape index: {}]  }
   0x1 LB: > { %s3791_s19 = sadd.s32 4294967295, %s3751_s18   ;;  %p2405_p0 = scmp.ge.s32.totalorder %s3751_s18, 1  ;;  %s3751_s18 = sphi %s3785_s18, %s16_s18  }
   0x2   : > { %p196_p1 = scmp.lt.s32.totalorder %s3751_s18, 5 }
   0x4   : > { %p197_p2 = pnand %p2405_p0, %p196_p1 }
   0x5   : > { %s225_s20 = smul.u32 (!%p197_p2), 7, %s3791_s19  ;;  %p2409_p5 = scmp.ne.s32.totalorder (!%p197_p2), %s3791_s19, 0 }
   0x6   : > { %200 = sbr.rel (%p197_p2) target bundleno = 573 (0x23d), region = 40 }
   0x7   : > { %s231_s21 = smul.u32 (!%p197_p2), 112, %s3791_s19  ;;  %p226_p3 = scmp.lt.s32.totalorder (!%p197_p2), %s225_s20, 27 }
   0x9   : > { %p232_p4 = scmp.lt.s32.totalorder (!%p197_p2), %s231_s21, 447 }
   0xb   : > { %s4426_s20 = smov (!%p226_p3, %s225_s20), 27  ;;  %s4428_s21 = smov (!%p232_p4, %s231_s21), 447 }
   0xc   : > { %s2406_s22 = sshll.u32 %s4426_s20, 1  ;;  %s3439_s26 = sshll.u32 %s4428_s21, 4 }
   0xd   : > { %s3800_s25 = scalar_lea.vmem %s4419_s0, %s2406_s22  ;;  %s3805_s29 = scalar_lea.vmem %s4420_s1, %s3439_s26 }
   0xe   : > { %241 = sbr.rel (%p2409_p5) target bundleno = 21 (0x15), region = 44 }
  0x13   : > { %v3753_v0 = vmov 0.0  }
  0x14   : > { %242 = vst [vmem:[#allocation2] sm:$0xff] %v3753_v0 }
  0x15 PF: > { %v2524_v1 = vld [vmem:[%s3805_s29 + $0xe0] sm:$0xf]  ;;  %v3470_v2 = vld [vmem:[%s3805_s29 + $0xec] sm:$0xf0]  ;;  %vm1987_vm0 = vcmask 1041408   ;;  %vm1989_vm1 = vcmask 1045508  }
  0x16   : > { %v2652_v3 = vld [vmem:[%s3805_s29 + $0x1e0] sm:$0xf]  ;;  %v2525_v4 = vor.u32 %v3470_v2, %v2524_v1  ;;  %v3502_v5 = vld [vmem:[%s3805_s29 + $0x1ec] sm:$0xf0]  ;;  %vm1991_vm2 = vcmask 1043456   ;;  %p3306_p6 = scmp.ne.s32.totalorder %s3791_s19, 3 }
  0x17   : > { %v2780_v6 = vld [vmem:[%s3805_s29 + $0x2e0] sm:$0xf]  ;;  %v3534_v7 = vld [vmem:[%s3805_s29 + $0x2ec] sm:$0xf0]  ;;  %v2653_v8 = vor.u32 %v3502_v5, %v2652_v3 }
  0x18   : > { %v2781_v9 = vor.u32 %v3534_v7, %v2780_v6  ;;  %v2908_v10 = vld [vmem:[%s3805_s29 + $0x3e0] sm:$0xf]  ;;  %v3566_v11 = vld [vmem:[%s3805_s29 + $0x3ec] sm:$0xf0]  ;;  %1616 = vmatpush.bf16.msra.mxu0 %v2525_v4 }
  0x19   : > { %v2508_v12 = vld [vmem:[%s3805_s29 + $0xc0] sm:$0xf]  ;;  %v2909_v13 = vor.u32 %v3566_v11, %v2908_v10  ;;  %v3466_v14 = vld [vmem:[%s3805_s29 + $0xcc] sm:$0xf0]  ;;  %1629 = vmatpush.bf16.msra.mxu1 %v2653_v8 }
  0x1a   : > { %v2636_v15 = vld [vmem:[%s3805_s29 + $0x1c0] sm:$0xf]  ;;  %v3498_v16 = vld [vmem:[%s3805_s29 + $0x1cc] sm:$0xf0]  ;;  %1642 = vmatpush.bf16.msra.mxu2 %v2781_v9  ;;  %v2509_v17 = vor.u32 %v3466_v14, %v2508_v12 }
  0x1b   : > { %v2637_v18 = vor.u32 %v3498_v16, %v2636_v15  ;;  %v2764_v19 = vld [vmem:[%s3805_s29 + $0x2c0] sm:$0xf]  ;;  %v3530_v20 = vld [vmem:[%s3805_s29 + $0x2cc] sm:$0xf0]  ;;  %1655 = vmatpush.bf16.msra.mxu3 %v2909_v13 }
  0x1c   : > { %v2892_v21 = vld [vmem:[%s3805_s29 + $0x3c0] sm:$0xf]  ;;  %v2765_v22 = vor.u32 %v3530_v20, %v2764_v19  ;;  %v3562_v23 = vld [vmem:[%s3805_s29 + $0x3cc] sm:$0xf0]  ;;  %1617 = vmatpush.bf16.msra.mxu0 %v2509_v17 }
  0x1d   : > { %v2492_v24 = vld [vmem:[%s3805_s29 + $0xa0] sm:$0xf]  ;;  %v3462_v25 = vld [vmem:[%s3805_s29 + $0xac] sm:$0xf0]  ;;  %v2893_v26 = vor.u32 %v3562_v23, %v2892_v21  ;;  %1630 = vmatpush.bf16.msra.mxu1 %v2637_v18 }
  0x1e   : > { %v2620_v27 = vld [vmem:[%s3805_s29 + $0x1a0] sm:$0xf]  ;;  %v3494_v28 = vld [vmem:[%s3805_s29 + $0x1ac] sm:$0xf0]  ;;  %v2493_v30 = vor.u32 %v3462_v25, %v2492_v24  ;;  %1643 = vmatpush.bf16.msra.mxu2 %v2765_v22 }
  0x1f   : > { %v2748_v29 = vld [vmem:[%s3805_s29 + $0x2a0] sm:$0xf]  ;;  %v3526_v31 = vld [vmem:[%s3805_s29 + $0x2ac] sm:$0xf0]  ;;  %v2621_v34 = vor.u32 %v3494_v28, %v2620_v27  ;;  %1656 = vmatpush.bf16.msra.mxu3 %v2893_v26 }
  0x20   : > { %v2876_v32 = vld [vmem:[%s3805_s29 + $0x3a0] sm:$0xf]  ;;  %v3558_v33 = vld [vmem:[%s3805_s29 + $0x3ac] sm:$0xf0]  ;;  %v2749_v35 = vor.u32 %v3526_v31, %v2748_v29  ;;  %1618 = vmatpush.bf16.msra.mxu0 %v2493_v30 }
  0x21   : > { %v2476_v36 = vld [vmem:[%s3805_s29 + $0x80] sm:$0xf]  ;;  %v3458_v37 = vld [vmem:[%s3805_s29 + $0x8c] sm:$0xf0]  ;;  %v2877_v39 = vor.u32 %v3558_v33, %v2876_v32  ;;  %1631 = vmatpush.bf16.msra.mxu1 %v2621_v34 }
  0x22   : > { %v2604_v38 = vld [vmem:[%s3805_s29 + $0x180] sm:$0xf]  ;;  %v3490_v40 = vld [vmem:[%s3805_s29 + $0x18c] sm:$0xf0]  ;;  %v2477_v45 = vor.u32 %v3458_v37, %v2476_v36  ;;  %1644 = vmatpush.bf16.msra.mxu2 %v2749_v35 }
  0x23   : > { %v2732_v41 = vld [vmem:[%s3805_s29 + $0x280] sm:$0xf]  ;;  %v3522_v42 = vld [vmem:[%s3805_s29 + $0x28c] sm:$0xf0]  ;;  %v2605_v46 = vor.u32 %v3490_v40, %v2604_v38  ;;  %1657 = vmatpush.bf16.msra.mxu3 %v2877_v39  ;;  %v3468_v38 = vld [vmem:[%s3805_s29 + $0xe4] sm:$0xf] }
  0x24   : > { %v2860_v43 = vld [vmem:[%s3805_s29 + $0x380] sm:$0xf]  ;;  %v3554_v44 = vld [vmem:[%s3805_s29 + $0x38c] sm:$0xf0]  ;;  %v2733_v47 = vor.u32 %v3522_v42, %v2732_v41  ;;  %1619 = vmatpush.bf16.msra.mxu0 %v2477_v45  ;;  %v2526_v39 = vld [vmem:[%s3805_s29 + $0xf0] sm:$0xf0] }
  0x25   : > { %v2460_v48 = vld [vmem:[%s3805_s29 + $0x60] sm:$0xf]  ;;  %v3454_v49 = vld [vmem:[%s3805_s29 + $0x6c] sm:$0xf0]  ;;  %v2861_v51 = vor.u32 %v3554_v44, %v2860_v43  ;;  %1632 = vmatpush.bf16.msra.mxu1 %v2605_v46 }
  0x26   : > { %v2588_v50 = vld [vmem:[%s3805_s29 + $0x160] sm:$0xf]  ;;  %v3486_v52 = vld [vmem:[%s3805_s29 + $0x16c] sm:$0xf0]  ;;  %v2461_v57 = vor.u32 %v3454_v49, %v2460_v48  ;;  %1645 = vmatpush.bf16.msra.mxu2 %v2733_v47  ;;  %v2529_v47 = vor.u32 %v3468_v38, %v2526_v39 }
  0x27   : > { %v2716_v53 = vld [vmem:[%s3805_s29 + $0x260] sm:$0xf]  ;;  %v3518_v54 = vld [vmem:[%s3805_s29 + $0x26c] sm:$0xf0]  ;;  %v2589_v58 = vor.u32 %v3486_v52, %v2588_v50  ;;  %1658 = vmatpush.bf16.msra.mxu3 %v2861_v51  ;;  %v3464_v51 = vld [vmem:[%s3805_s29 + $0xc4] sm:$0xf] }
  0x28   : > { %v2844_v55 = vld [vmem:[%s3805_s29 + $0x360] sm:$0xf]  ;;  %v3550_v56 = vld [vmem:[%s3805_s29 + $0x36c] sm:$0xf0]  ;;  %v2717_v59 = vor.u32 %v3518_v54, %v2716_v53  ;;  %1620 = vmatpush.bf16.msra.mxu0 %v2461_v57  ;;  %v2510_v52 = vld [vmem:[%s3805_s29 + $0xd0] sm:$0xf0] }
  0x29   : > { %v2444_v60 = vld [vmem:[%s3805_s29 + $0x40] sm:$0xf]  ;;  %v3450_v61 = vld [vmem:[%s3805_s29 + $0x4c] sm:$0xf0]  ;;  %v2845_v63 = vor.u32 %v3550_v56, %v2844_v55  ;;  %1633 = vmatpush.bf16.msra.mxu1 %v2589_v58 }
  0x2a   : > { %v2572_v62 = vld [vmem:[%s3805_s29 + $0x140] sm:$0xf]  ;;  %v3482_v0 = vld [vmem:[%s3805_s29 + $0x14c] sm:$0xf0]  ;;  %v2445_v5 = vor.u32 %v3450_v61, %v2444_v60  ;;  %1646 = vmatpush.bf16.msra.mxu2 %v2717_v59  ;;  %v2513_v61 = vor.u32 %v3464_v51, %v2510_v52 }
  0x2b   : > { %v2700_v1 = vld [vmem:[%s3805_s29 + $0x240] sm:$0xf]  ;;  %v3514_v2 = vld [vmem:[%s3805_s29 + $0x24c] sm:$0xf0]  ;;  %v2573_v6 = vor.u32 %v3482_v0, %v2572_v62  ;;  %1659 = vmatpush.bf16.msra.mxu3 %v2845_v63  ;;  %v3460_v0 = vld [vmem:[%s3805_s29 + $0xa4] sm:$0xf] }
  0x2c   : > { %v2828_v3 = vld [vmem:[%s3805_s29 + $0x340] sm:$0xf]  ;;  %v3546_v4 = vld [vmem:[%s3805_s29 + $0x34c] sm:$0xf0]  ;;  %v2701_v7 = vor.u32 %v3514_v2, %v2700_v1  ;;  %1621 = vmatpush.bf16.msra.mxu0 %v2445_v5  ;;  %v2494_v1 = vld [vmem:[%s3805_s29 + $0xb0] sm:$0xf0] }
  0x2d   : > { %v2428_v8 = vld [vmem:[%s3805_s29 + $0x20] sm:$0xf]  ;;  %v3446_v9 = vld [vmem:[%s3805_s29 + $0x2c] sm:$0xf0]  ;;  %v2829_v11 = vor.u32 %v3546_v4, %v2828_v3  ;;  %1634 = vmatpush.bf16.msra.mxu1 %v2573_v6 }
  0x2e   : > { %v2556_v10 = vld [vmem:[%s3805_s29 + $0x120] sm:$0xf]  ;;  %v3478_v12 = vld [vmem:[%s3805_s29 + $0x12c] sm:$0xf0]  ;;  %v2429_v17 = vor.u32 %v3446_v9, %v2428_v8  ;;  %1647 = vmatpush.bf16.msra.mxu2 %v2701_v7  ;;  %v2497_v9 = vor.u32 %v3460_v0, %v2494_v1 }
  0x2f   : > { %v2684_v13 = vld [vmem:[%s3805_s29 + $0x220] sm:$0xf]  ;;  %v3510_v14 = vld [vmem:[%s3805_s29 + $0x22c] sm:$0xf0]  ;;  %v2557_v20 = vor.u32 %v3478_v12, %v2556_v10  ;;  %1660 = vmatpush.bf16.msra.mxu3 %v2829_v11  ;;  %v3456_v12 = vld [vmem:[%s3805_s29 + $0x84] sm:$0xf] }
  0x30   : > { %v2812_v15 = vld [vmem:[%s3805_s29 + $0x320] sm:$0xf]  ;;  %v3542_v16 = vld [vmem:[%s3805_s29 + $0x32c] sm:$0xf0]  ;;  %v2685_v21 = vor.u32 %v3510_v14, %v2684_v13  ;;  %1622 = vmatpush.bf16.msra.mxu0 %v2429_v17  ;;  %v2478_v13 = vld [vmem:[%s3805_s29 + $0x90] sm:$0xf0] }
  0x31   : > { %v2412_v18 = vld [vmem:[%s3805_s29] sm:$0xf]  ;;  %v3442_v19 = vld [vmem:[%s3805_s29 + $0xc] sm:$0xf0]  ;;  %v2813_v25 = vor.u32 %v3542_v16, %v2812_v15  ;;  %1635 = vmatpush.bf16.msra.mxu1 %v2557_v20 }
  0x32   : > { %v2540_v22 = vld [vmem:[%s3805_s29 + $0x100] sm:$0xf]  ;;  %v3474_v23 = vld [vmem:[%s3805_s29 + $0x10c] sm:$0xf0]  ;;  %v2413_v32 = vor.u32 %v3442_v19, %v2412_v18  ;;  %1648 = vmatpush.bf16.msra.mxu2 %v2685_v21 }
  0x33   : > { %v2668_v24 = vld [vmem:[%s3805_s29 + $0x200] sm:$0xf]  ;;  %v3506_v26 = vld [vmem:[%s3805_s29 + $0x20c] sm:$0xf0]  ;;  %v2541_v36 = vor.u32 %v3474_v23, %v2540_v22  ;;  %1661 = vmatpush.bf16.msra.mxu3 %v2813_v25  ;;  %v2481_v25 = vor.u32 %v3456_v12, %v2478_v13  ;;  %v3564_v12 = vld [vmem:[%s3805_s29 + $0x3e4] sm:$0xf] }
  0x34   : > { %v2796_v27 = vld [vmem:[%s3805_s29 + $0x300] sm:$0xf]  ;;  %v3538_v28 = vld [vmem:[%s3805_s29 + $0x30c] sm:$0xf0]  ;;  %v2669_v37 = vor.u32 %v3506_v26, %v2668_v24  ;;  %1623 = vmatpush.bf16.msra.mxu0 %v2413_v32  ;;  %v2910_v13 = vld [vmem:[%s3805_s29 + $0x3f0] sm:$0xf0] }
  0x35   : > { %v3036_v29 = vld [vmem:[%s3805_s29 + $0x4e0] sm:$0xf]  ;;  %v3598_v30 = vld [vmem:[%s3805_s29 + $0x4ec] sm:$0xf0]  ;;  %v2797_v40 = vor.u32 %v3538_v28, %v2796_v27  ;;  %1636 = vmatpush.bf16.msra.mxu1 %v2541_v36 }
  0x36   : > { %v3164_v31 = vld [vmem:[%s3805_s29 + $0x5e0] sm:$0xf]  ;;  %v3630_v33 = vld [vmem:[%s3805_s29 + $0x5ec] sm:$0xf0]  ;;  %v3037_v41 = vor.u32 %v3598_v30, %v3036_v29  ;;  %1649 = vmatpush.bf16.msra.mxu2 %v2669_v37  ;;  %v3452_v30 = vld [vmem:[%s3805_s29 + $0x64] sm:$0xf] }
  0x37   : > { %v3292_v34 = vld [vmem:[%s3805_s29 + $0x6e0] sm:$0xf]  ;;  %v3662_v35 = vld [vmem:[%s3805_s29 + $0x6ec] sm:$0xf0]  ;;  %v3165_v42 = vor.u32 %v3630_v33, %v3164_v31  ;;  %1662 = vmatpush.bf16.msra.mxu3 %v2797_v40  ;;  %v2462_v31 = vld [vmem:[%s3805_s29 + $0x70] sm:$0xf0] }
  0x38   : > { %v3293_v43 = vor.u32 %v3662_v35, %v3292_v34  ;;  %v3020_v44 = vld [vmem:[%s3805_s29 + $0x4c0] sm:$0xf]  ;;  %v3594_v45 = vld [vmem:[%s3805_s29 + $0x4cc] sm:$0xf0]  ;;  %1668 = vmatpush.bf16.msrb.mxu0 %v3037_v41  ;;  %v2465_v40 = vor.u32 %v3452_v30, %v2462_v31  ;;  %v2766_v31 = vld [vmem:[%s3805_s29 + $0x2d0] sm:$0xf0] }
  0x39   : > { %v3148_v46 = vld [vmem:[%s3805_s29 + $0x5c0] sm:$0xf]  ;;  %v3626_v48 = vld [vmem:[%s3805_s29 + $0x5cc] sm:$0xf0]  ;;  %v3021_v53 = vor.u32 %v3594_v45, %v3020_v44  ;;  %1681 = vmatpush.bf16.msrb.mxu1 %v3165_v42  ;;  %v3448_v44 = vld [vmem:[%s3805_s29 + $0x44] sm:$0xf] }
  0x3a   : > { %v3276_v49 = vld [vmem:[%s3805_s29 + $0x6c0] sm:$0xf]  ;;  %v3658_v50 = vld [vmem:[%s3805_s29 + $0x6cc] sm:$0xf0]  ;;  %1694 = vmatpush.bf16.msrb.mxu2 %v3293_v43  ;;  %v3149_v56 = vor.u32 %v3626_v48, %v3148_v46  ;;  %v2446_v45 = vld [vmem:[%s3805_s29 + $0x50] sm:$0xf0] }
  0x3b   : > { %v3004_v54 = vld [vmem:[%s3805_s29 + $0x4a0] sm:$0xf]  ;;  %v3590_v55 = vld [vmem:[%s3805_s29 + $0x4ac] sm:$0xf0]  ;;  %v3277_v57 = vor.u32 %v3658_v50, %v3276_v49  ;;  %1707 = vmatpush.bf16.msrb.mxu3 %v2529_v47 }
  0x3c   : > { %v3132_v58 = vld [vmem:[%s3805_s29 + $0x5a0] sm:$0xf]  ;;  %v3622_v59 = vld [vmem:[%s3805_s29 + $0x5ac] sm:$0xf0]  ;;  %1669 = vmatpush.bf16.msrb.mxu0 %v3021_v53  ;;  %v3005_v2 = vor.u32 %v3590_v55, %v3004_v54  ;;  %v245_v53 = vld [vmem:[%s3800_s25 + $0x8] sm:$0x3f]  ;;  %v2449_v54 = vor.u32 %v3448_v44, %v2446_v45 }
  0x3d   : > { %v244_v60 = vld [vmem:[%s3800_s25] sm:$0xff]  ;;  %v3654_v63 = vld [vmem:[%s3805_s29 + $0x6ac] sm:$0xf0]  ;;  %1682 = vmatpush.bf16.msrb.mxu1 %v3149_v56  ;;  %v3133_v4 = vor.u32 %v3622_v59, %v3132_v58  ;;  %250 = vst [vmem:[#allocation1 + $0x20] ss:$4 sm:$0xff] %v245_v53 }
  0x3e   : > { %v3260_v62 = vld [vmem:[%s3805_s29 + $0x6a0] sm:$0xf]  ;;  %248 = vst [vmem:[#allocation1] ss:$4 sm:$0xff] %v244_v60  ;;  %1695 = vmatpush.bf16.msrb.mxu2 %v3277_v57  ;;  %v3586_v6 = vld [vmem:[%s3805_s29 + $0x48c] sm:$0xf0] }
  0x3f   : > { %v2988_v3 = vld [vmem:[%s3805_s29 + $0x480] sm:$0xf]  ;;  %v3261_v5 = vor.u32 %v3654_v63, %v3260_v62  ;;  %v3618_v8 = vld [vmem:[%s3805_s29 + $0x58c] sm:$0xf0]  ;;  %1708 = vmatpush.bf16.msrb.mxu3 %v2513_v61  ;;  %v3444_v57 = vld [vmem:[%s3805_s29 + $0x24] sm:$0xf] }
  0x40   : > { %v3116_v7 = vld [vmem:[%s3805_s29 + $0x580] sm:$0xf]  ;;  %v3650_v11 = vld [vmem:[%s3805_s29 + $0x68c] sm:$0xf0]  ;;  %1670 = vmatpush.bf16.msrb.mxu0 %v3005_v2  ;;  %v2989_v16 = vor.u32 %v3586_v6, %v2988_v3  ;;  %v2430_v58 = vld [vmem:[%s3805_s29 + $0x30] sm:$0xf0] }
  0x41   : > { %v3244_v10 = vld [vmem:[%s3805_s29 + $0x680] sm:$0xf]  ;;  %v3582_v15 = vld [vmem:[%s3805_s29 + $0x46c] sm:$0xf0]  ;;  %1683 = vmatpush.bf16.msrb.mxu1 %v3133_v4  ;;  %v3117_v21 = vor.u32 %v3618_v8, %v3116_v7  ;;  %v2433_v4 = vor.u32 %v3444_v57, %v2430_v58  ;;  %v2414_v6 = vld [vmem:[%s3805_s29 + $0x10] sm:$0xf0] }
  0x42   : > { %v2972_v14 = vld [vmem:[%s3805_s29 + $0x460] sm:$0xf]  ;;  %v3614_v18 = vld [vmem:[%s3805_s29 + $0x56c] sm:$0xf0]  ;;  %1696 = vmatpush.bf16.msrb.mxu2 %v3261_v5  ;;  %v3245_v22 = vor.u32 %v3650_v11, %v3244_v10  ;;  %v3440_v5 = vld [vmem:[%s3805_s29 + $0x4] sm:$0xf] }
  0x43   : > { %v3100_v17 = vld [vmem:[%s3805_s29 + $0x560] sm:$0xf]  ;;  %v3646_v20 = vld [vmem:[%s3805_s29 + $0x66c] sm:$0xf0]  ;;  %1709 = vmatpush.bf16.msrb.mxu3 %v2497_v9  ;;  %v2973_v34 = vor.u32 %v3582_v15, %v2972_v14  ;;  %v3500_v7 = vld [vmem:[%s3805_s29 + $0x1e4] sm:$0xf] }
  0x44   : > { %v3228_v19 = vld [vmem:[%s3805_s29 + $0x660] sm:$0xf]  ;;  %1671 = vmatpush.bf16.msrb.mxu0 %v2989_v16  ;;  %v3101_v35 = vor.u32 %v3614_v18, %v3100_v17  ;;  %v3578_v38 = vld [vmem:[%s3805_s29 + $0x44c] sm:$0xf0]  ;;  %v2654_v8 = vld [vmem:[%s3805_s29 + $0x1f0] sm:$0xf0] }
  0x45   : > { %v253_v23 = vld.sshfl [vmem:[#allocation1 + $0x10] sm:$0xff pattern:$0x73625140]  ;;  %v251_v24 = vld.sshfl [vmem:[#allocation1] sm:$0xff pattern:$0x73625140]  ;;  %1684 = vmatpush.bf16.msrb.mxu1 %v3117_v21  ;;  %v3229_v36 = vor.u32 %v3646_v20, %v3228_v19  ;;  %v2417_v19 = vor.u32 %v3440_v5, %v2414_v6  ;;  %v2657_v20 = vor.u32 %v3500_v7, %v2654_v8 }
  0x46   : > { %v3911_v26 = vpack.c.bf16 %v253_v23, %v253_v23  ;;  %v3913_v27 = vpack.c.bf16 %v251_v24, %v251_v24  ;;  %v252_v28 = vld.sshfl [vmem:[#allocation1 + $0x8] sm:$0xff pattern:$0x73625140]  ;;  %v254_v29 = vld.sshfl [vmem:[#allocation1 + $0x18] sm:$0xff pattern:$0x73625140]  ;;  %1697 = vmatpush.bf16.msrb.mxu2 %v3245_v22  ;;  %v2913_v24 = vor.u32 %v3564_v12, %v2910_v13 }
  0x47   : > { %v3917_v32 = vpack.c.bf16 %v252_v28, %v252_v28  ;;  %v3919_v33 = vpack.c.bf16 %v254_v29, %v254_v29  ;;  %v2956_v37 = vld [vmem:[%s3805_s29 + $0x440] sm:$0xf]  ;;  %1710 = vmatpush.bf16.msrb.mxu3 %v2481_v25  ;;  %v3610_v41 = vld [vmem:[%s3805_s29 + $0x54c] sm:$0xf0]  ;;  %v3532_v9 = vld [vmem:[%s3805_s29 + $0x2e4] sm:$0xf] }
  0x48   : > { %1650 = vmatmul.bf16.vlgmr.msra.gmra.mxu2 %v3911_v26  ;;  %v3084_v39 = vld [vmem:[%s3805_s29 + $0x540] sm:$0xf]  ;;  %v3642_v43 = vld [vmem:[%s3805_s29 + $0x64c] sm:$0xf0]  ;;  %1624 = vmatmul.bf16.vlgmr.msra.gmra.mxu0 %v3913_v27  ;;  %v2957_v46 = vor.u32 %v3578_v38, %v2956_v37  ;;  %v2782_v10 = vld [vmem:[%s3805_s29 + $0x2f0] sm:$0xf0] }
  0x49   : > { %v3212_v42 = vld [vmem:[%s3805_s29 + $0x640] sm:$0xf]  ;;  %1637 = vmatmul.bf16.vlgmr.msra.gmra.mxu1 %v3917_v32  ;;  %1663 = vmatmul.bf16.vlgmr.msra.gmra.mxu3 %v3919_v33  ;;  %v3574_v48 = vld [vmem:[%s3805_s29 + $0x42c] sm:$0xf0]  ;;  %v3085_v49 = vor.u32 %v3610_v41, %v3084_v39  ;;  %v3596_v14 = vld [vmem:[%s3805_s29 + $0x4e4] sm:$0xf]  ;;  %v2785_v23 = vor.u32 %v3532_v9, %v2782_v10 }
  0x4a   : > { %1672 = vmatpush.bf16.msrb.mxu0 %v2973_v34  ;;  %v2940_v47 = vld [vmem:[%s3805_s29 + $0x420] sm:$0xf]  ;;  %1685 = vmatpush.bf16.msrb.mxu1 %v3101_v35  ;;  %v3213_v50 = vor.u32 %v3642_v43, %v3212_v42  ;;  %v3606_v52 = vld [vmem:[%s3805_s29 + $0x52c] sm:$0xf0]  ;;  %v3038_v17 = vld [vmem:[%s3805_s29 + $0x4f0] sm:$0xf0] }
  0x4b   : > { %1698 = vmatpush.bf16.msrb.mxu2 %v3229_v36  ;;  %v3068_v51 = vld [vmem:[%s3805_s29 + $0x520] sm:$0xf]  ;;  %1711 = vmatpush.bf16.msrb.mxu3 %v2465_v40  ;;  %v3638_v56 = vld [vmem:[%s3805_s29 + $0x62c] sm:$0xf0]  ;;  %v2941_v59 = vor.u32 %v3574_v48, %v2940_v47  ;;  %v3496_v25 = vld [vmem:[%s3805_s29 + $0x1c4] sm:$0xf]  ;;  %v3041_v30 = vor.u32 %v3596_v14, %v3038_v17 }
  0x4c   : > { %v3196_v55 = vld [vmem:[%s3805_s29 + $0x620] sm:$0xf]  ;;  %v3570_v61 = vld [vmem:[%s3805_s29 + $0x40c] sm:$0xf0]  ;;  %v3069_v63 = vor.u32 %v3606_v52, %v3068_v51  ;;  %v2638_v28 = vld [vmem:[%s3805_s29 + $0x1d0] sm:$0xf0] }
  0x4d   : > { %v2924_v60 = vld [vmem:[%s3805_s29 + $0x400] sm:$0xf]  ;;  %v3197_v0 = vor.u32 %v3638_v56, %v3196_v55  ;;  %v3602_v1 = vld [vmem:[%s3805_s29 + $0x50c] sm:$0xf0]  ;;  %v3528_v29 = vld [vmem:[%s3805_s29 + $0x2c4] sm:$0xf]  ;;  %v2641_v41 = vor.u32 %v3496_v25, %v2638_v28 }
  0x4e   : > { %1673 = vmatpush.bf16.msrb.mxu0 %v2957_v46  ;;  %v3052_v62 = vld [vmem:[%s3805_s29 + $0x500] sm:$0xf]  ;;  %1686 = vmatpush.bf16.msrb.mxu1 %v3085_v49  ;;  %v3634_v3 = vld [vmem:[%s3805_s29 + $0x60c] sm:$0xf0]  ;;  %v2925_v11 = vor.u32 %v3570_v61, %v2924_v60  ;;  %v3560_v34 = vld [vmem:[%s3805_s29 + $0x3c4] sm:$0xf]  ;;  %v2769_v42 = vor.u32 %v3528_v29, %v2766_v31 }
  0x4f   : > { %1699 = vmatpush.bf16.msrb.mxu2 %v3213_v50  ;;  %v3180_v2 = vld [vmem:[%s3805_s29 + $0x600] sm:$0xf]  ;;  %1712 = vmatpush.bf16.msrb.mxu3 %v2449_v54  ;;  %v3053_v15 = vor.u32 %v3602_v1, %v3052_v62  ;;  %v257_v18 = vld.sshfl [vmem:[#allocation1 + $0x30] sm:$0xff pattern:$0x73625140] }
  0x50   : > { %v3181_v16 = vor.u32 %v3634_v3, %v3180_v2  ;;  %v255_v21 = vld.sshfl [vmem:[#allocation1 + $0x20] sm:$0xff pattern:$0x73625140]  ;;  %v256_v22 = vld.sshfl [vmem:[#allocation1 + $0x28] sm:$0xff pattern:$0x73625140]  ;;  %v3964_v36 = vpack.c.bf16 %v257_v18, %v257_v18 }
  0x51   : > { %v2894_v35 = vld [vmem:[%s3805_s29 + $0x3d0] sm:$0xf0]  ;;  %v3592_v37 = vld [vmem:[%s3805_s29 + $0x4c4] sm:$0xf]  ;;  %v3968_v39 = vpack.c.bf16 %v255_v21, %v255_v21  ;;  %v3970_v40 = vpack.c.bf16 %v256_v22, %v256_v22 }
  0x52   : > { %1674 = vmatpush.bf16.msrb.mxu0 %v2941_v59  ;;  %1687 = vmatpush.bf16.msrb.mxu1 %v3069_v63  ;;  %v3022_v38 = vld [vmem:[%s3805_s29 + $0x4d0] sm:$0xf0]  ;;  %v2897_v43 = vor.u32 %v3560_v34, %v2894_v35  ;;  %v3492_v44 = vld [vmem:[%s3805_s29 + $0x1a4] sm:$0xf] }
  0x53   : > { %1700 = vmatpush.bf16.msrb.mxu2 %v3197_v0  ;;  %1713 = vmatpush.bf16.msrb.mxu3 %v2433_v4  ;;  %v2622_v45 = vld [vmem:[%s3805_s29 + $0x1b0] sm:$0xf0]  ;;  %v3524_v46 = vld [vmem:[%s3805_s29 + $0x2a4] sm:$0xf]  ;;  %v3025_v47 = vor.u32 %v3592_v37, %v3022_v38 }
  0x54   : > { %v2750_v48 = vld [vmem:[%s3805_s29 + $0x2b0] sm:$0xf0]  ;;  %v3556_v49 = vld [vmem:[%s3805_s29 + $0x3a4] sm:$0xf]  ;;  %v2625_v53 = vor.u32 %v3492_v44, %v2622_v45 }
  0x55   : > { %v2878_v50 = vld [vmem:[%s3805_s29 + $0x3b0] sm:$0xf0]  ;;  %v3588_v51 = vld [vmem:[%s3805_s29 + $0x4a4] sm:$0xf]  ;;  %v2753_v54 = vor.u32 %v3524_v46, %v2750_v48 }
  0x56   : > { %1675 = vmatpush.bf16.msrb.mxu0 %v2925_v11  ;;  %1688 = vmatpush.bf16.msrb.mxu1 %v3053_v15  ;;  %v3006_v52 = vld [vmem:[%s3805_s29 + $0x4b0] sm:$0xf0]  ;;  %v2881_v55 = vor.u32 %v3556_v49, %v2878_v50  ;;  %v3488_v56 = vld [vmem:[%s3805_s29 + $0x184] sm:$0xf] }
  0x57   : > { %1701 = vmatpush.bf16.msrb.mxu2 %v3181_v16  ;;  %1714 = vmatpush.bf16.msrb.mxu3 %v2417_v19  ;;  %v2606_v57 = vld [vmem:[%s3805_s29 + $0x190] sm:$0xf0]  ;;  %v3520_v58 = vld [vmem:[%s3805_s29 + $0x284] sm:$0xf]  ;;  %v3009_v59 = vor.u32 %v3588_v51, %v3006_v52 }
  0x58   : > { %v2734_v60 = vld [vmem:[%s3805_s29 + $0x290] sm:$0xf0]  ;;  %v3552_v61 = vld [vmem:[%s3805_s29 + $0x384] sm:$0xf]  ;;  %v2609_v1 = vor.u32 %v3488_v56, %v2606_v57 }
  0x59   : > { %1676 = vmatmul.bf16.vlgmr.msrb.gmra.mxu0 %v3968_v39  ;;  %1689 = vmatmul.bf16.vlgmr.msrb.gmra.mxu1 %v3970_v40  ;;  %v2862_v62 = vld [vmem:[%s3805_s29 + $0x390] sm:$0xf0]  ;;  %v3584_v63 = vld [vmem:[%s3805_s29 + $0x484] sm:$0xf]  ;;  %v2737_v2 = vor.u32 %v3520_v58, %v2734_v60 }
  0x5a   : > { %1720 = vmatpush.bf16.msra.mxu0 %v2657_v20  ;;  %1733 = vmatpush.bf16.msra.mxu1 %v2785_v23  ;;  %v2990_v0 = vld [vmem:[%s3805_s29 + $0x490] sm:$0xf0]  ;;  %v2865_v3 = vor.u32 %v3552_v61, %v2862_v62  ;;  %v3484_v4 = vld [vmem:[%s3805_s29 + $0x164] sm:$0xf]  ;;  %v2532_v61 = vld [vmem:[%s3805_s29 + $0xe8] sm:$0xf] }
  0x5b   : > { %1746 = vmatpush.bf16.msra.mxu2 %v2913_v24  ;;  %1759 = vmatpush.bf16.msra.mxu3 %v3041_v30  ;;  %v2590_v5 = vld [vmem:[%s3805_s29 + $0x170] sm:$0xf0]  ;;  %v3516_v6 = vld [vmem:[%s3805_s29 + $0x264] sm:$0xf]  ;;  %v2993_v7 = vor.u32 %v3584_v63, %v2990_v0  ;;  %v3471_v62 = vld [vmem:[%s3805_s29 + $0xf4] sm:$0xf0] }
  0x5c   : > { %1702 = vmatmul.bf16.vlgmr.msrb.gmra.mxu2 %v3964_v36  ;;  %1715 = vmatmul.bf16.vlgmr.msrb.gmra.mxu3 %v3913_v27  ;;  %v2718_v8 = vld [vmem:[%s3805_s29 + $0x270] sm:$0xf0]  ;;  %v3548_v9 = vld [vmem:[%s3805_s29 + $0x364] sm:$0xf]  ;;  %v2593_v13 = vor.u32 %v3484_v4, %v2590_v5 }
  0x5d   : > { %v2846_v10 = vld [vmem:[%s3805_s29 + $0x370] sm:$0xf0]  ;;  %v3580_v11 = vld [vmem:[%s3805_s29 + $0x464] sm:$0xf]  ;;  %v2721_v14 = vor.u32 %v3516_v6, %v2718_v8  ;;  %v2533_v6 = vor.u32 %v3471_v62, %v2532_v61 }
  0x5e   : > { %1721 = vmatpush.bf16.msra.mxu0 %v2641_v41  ;;  %1734 = vmatpush.bf16.msra.mxu1 %v2769_v42  ;;  %v2974_v12 = vld [vmem:[%s3805_s29 + $0x470] sm:$0xf0]  ;;  %v2849_v15 = vor.u32 %v3548_v9, %v2846_v10  ;;  %v3480_v16 = vld [vmem:[%s3805_s29 + $0x144] sm:$0xf] }
  0x5f   : > { %1747 = vmatpush.bf16.msra.mxu2 %v2897_v43  ;;  %1760 = vmatpush.bf16.msra.mxu3 %v3025_v47  ;;  %v2574_v17 = vld [vmem:[%s3805_s29 + $0x150] sm:$0xf0]  ;;  %v3512_v18 = vld [vmem:[%s3805_s29 + $0x244] sm:$0xf]  ;;  %v2977_v19 = vor.u32 %v3580_v11, %v2974_v12  ;;  %v2516_v12 = vld [vmem:[%s3805_s29 + $0xc8] sm:$0xf] }
  0x60   : > { %v2702_v20 = vld [vmem:[%s3805_s29 + $0x250] sm:$0xf0]  ;;  %v3544_v21 = vld [vmem:[%s3805_s29 + $0x344] sm:$0xf]  ;;  %v2577_v25 = vor.u32 %v3480_v16, %v2574_v17 }
  0x61   : > { %v2830_v22 = vld [vmem:[%s3805_s29 + $0x350] sm:$0xf0]  ;;  %v3576_v23 = vld [vmem:[%s3805_s29 + $0x444] sm:$0xf]  ;;  %v2705_v28 = vor.u32 %v3512_v18, %v2702_v20 }
  0x62   : > { %1722 = vmatpush.bf16.msra.mxu0 %v2625_v53  ;;  %1735 = vmatpush.bf16.msra.mxu1 %v2753_v54  ;;  %v2958_v24 = vld [vmem:[%s3805_s29 + $0x450] sm:$0xf0]  ;;  %v2833_v29 = vor.u32 %v3544_v21, %v2830_v22  ;;  %v3476_v30 = vld [vmem:[%s3805_s29 + $0x124] sm:$0xf] }
  0x63   : > { %1748 = vmatpush.bf16.msra.mxu2 %v2881_v55  ;;  %1761 = vmatpush.bf16.msra.mxu3 %v3009_v59  ;;  %v2558_v31 = vld [vmem:[%s3805_s29 + $0x130] sm:$0xf0]  ;;  %v3508_v34 = vld [vmem:[%s3805_s29 + $0x224] sm:$0xf]  ;;  %v2961_v35 = vor.u32 %v3576_v23, %v2958_v24  ;;  %v2500_v24 = vld [vmem:[%s3805_s29 + $0xa8] sm:$0xf] }
  0x64   : > { %v2686_v37 = vld [vmem:[%s3805_s29 + $0x230] sm:$0xf0]  ;;  %v3540_v38 = vld [vmem:[%s3805_s29 + $0x324] sm:$0xf]  ;;  %v2561_v44 = vor.u32 %v3476_v30, %v2558_v31 }
  0x65   : > { %v2814_v41 = vld [vmem:[%s3805_s29 + $0x330] sm:$0xf0]  ;;  %v3572_v42 = vld [vmem:[%s3805_s29 + $0x424] sm:$0xf]  ;;  %v2689_v47 = vor.u32 %v3508_v34, %v2686_v37 }
  0x66   : > { %1723 = vmatpush.bf16.msra.mxu0 %v2609_v1  ;;  %1736 = vmatpush.bf16.msra.mxu1 %v2737_v2  ;;  %v2942_v43 = vld [vmem:[%s3805_s29 + $0x430] sm:$0xf0]  ;;  %v3472_v45 = vld [vmem:[%s3805_s29 + $0x104] sm:$0xf]  ;;  %v2817_v48 = vor.u32 %v3540_v38, %v2814_v41  ;;  %v2660_v1 = vld [vmem:[%s3805_s29 + $0x1e8] sm:$0xf] }
  0x67   : > { %1749 = vmatpush.bf16.msra.mxu2 %v2865_v3  ;;  %1762 = vmatpush.bf16.msra.mxu3 %v2993_v7  ;;  %v2542_v46 = vld [vmem:[%s3805_s29 + $0x110] sm:$0xf0]  ;;  %v3504_v49 = vld [vmem:[%s3805_s29 + $0x204] sm:$0xf]  ;;  %v2945_v52 = vor.u32 %v3572_v42, %v2942_v43  ;;  %v3503_v2 = vld [vmem:[%s3805_s29 + $0x1f4] sm:$0xf0] }
  0x68   : > { %v2670_v50 = vld [vmem:[%s3805_s29 + $0x210] sm:$0xf0]  ;;  %v3536_v51 = vld [vmem:[%s3805_s29 + $0x304] sm:$0xf]  ;;  %v2545_v59 = vor.u32 %v3472_v45, %v2542_v46  ;;  %v2661_v10 = vor.u32 %v3503_v2, %v2660_v1  ;;  %v2484_v43 = vld [vmem:[%s3805_s29 + $0x88] sm:$0xf] }
  0x69   : > { %v2798_v53 = vld [vmem:[%s3805_s29 + $0x310] sm:$0xf0]  ;;  %v3568_v54 = vld [vmem:[%s3805_s29 + $0x404] sm:$0xf]  ;;  %v2673_v63 = vor.u32 %v3504_v49, %v2670_v50  ;;  %v2612_v45 = vld [vmem:[%s3805_s29 + $0x188] sm:$0xf] }
  0x6a   : > { %1724 = vmatpush.bf16.msra.mxu0 %v2593_v13  ;;  %1737 = vmatpush.bf16.msra.mxu1 %v2721_v14  ;;  %v2926_v55 = vld [vmem:[%s3805_s29 + $0x410] sm:$0xf0]  ;;  %v3628_v56 = vld [vmem:[%s3805_s29 + $0x5e4] sm:$0xf]  ;;  %v2801_v0 = vor.u32 %v3536_v51, %v2798_v53  ;;  %v3467_v13 = vld [vmem:[%s3805_s29 + $0xd4] sm:$0xf0] }
  0x6b   : > { %1750 = vmatpush.bf16.msra.mxu2 %v2849_v15  ;;  %1763 = vmatpush.bf16.msra.mxu3 %v2977_v19  ;;  %v3166_v57 = vld [vmem:[%s3805_s29 + $0x5f0] sm:$0xf0]  ;;  %v3660_v58 = vld [vmem:[%s3805_s29 + $0x6e4] sm:$0xf]  ;;  %v2929_v3 = vor.u32 %v3568_v54, %v2926_v55  ;;  %v2644_v14 = vld [vmem:[%s3805_s29 + $0x1c8] sm:$0xf]  ;;  %v2517_v18 = vor.u32 %v3467_v13, %v2516_v12 }
  0x6c   : > { %v3294_v60 = vld [vmem:[%s3805_s29 + $0x6f0] sm:$0xf0]  ;;  %v3169_v4 = vor.u32 %v3628_v56, %v3166_v57  ;;  %v3624_v7 = vld [vmem:[%s3805_s29 + $0x5c4] sm:$0xf]  ;;  %v3499_v15 = vld [vmem:[%s3805_s29 + $0x1d4] sm:$0xf0] }
  0x6d   : > { %v3297_v5 = vor.u32 %v3660_v58, %v3294_v60  ;;  %v3150_v8 = vld [vmem:[%s3805_s29 + $0x5d0] sm:$0xf0]  ;;  %v3656_v9 = vld [vmem:[%s3805_s29 + $0x6c4] sm:$0xf]  ;;  %v2645_v22 = vor.u32 %v3499_v15, %v2644_v14  ;;  %v3491_v46 = vld [vmem:[%s3805_s29 + $0x194] sm:$0xf0] }
  0x6e   : > { %1725 = vmatpush.bf16.msra.mxu0 %v2577_v25  ;;  %1738 = vmatpush.bf16.msra.mxu1 %v2705_v28  ;;  %v3278_v11 = vld [vmem:[%s3805_s29 + $0x6d0] sm:$0xf0]  ;;  %v3153_v16 = vor.u32 %v3624_v7, %v3150_v8  ;;  %v3620_v19 = vld [vmem:[%s3805_s29 + $0x5a4] sm:$0xf]  ;;  %v3463_v25 = vld [vmem:[%s3805_s29 + $0xb4] sm:$0xf0]  ;;  %v2613_v53 = vor.u32 %v3491_v46, %v2612_v45 }
  0x6f   : > { %1751 = vmatpush.bf16.msra.mxu2 %v2833_v29  ;;  %1764 = vmatpush.bf16.msra.mxu3 %v2961_v35  ;;  %v3281_v17 = vor.u32 %v3656_v9, %v3278_v11  ;;  %v3134_v20 = vld [vmem:[%s3805_s29 + $0x5b0] sm:$0xf0]  ;;  %v3652_v21 = vld [vmem:[%s3805_s29 + $0x6a4] sm:$0xf]  ;;  %v2628_v28 = vld [vmem:[%s3805_s29 + $0x1a8] sm:$0xf]  ;;  %v2501_v34 = vor.u32 %v3463_v25, %v2500_v24 }
  0x70   : > { %v3262_v23 = vld [vmem:[%s3805_s29 + $0x6b0] sm:$0xf0]  ;;  %v3495_v29 = vld [vmem:[%s3805_s29 + $0x1b4] sm:$0xf0]  ;;  %v3137_v30 = vor.u32 %v3620_v19, %v3134_v20  ;;  %v3616_v35 = vld [vmem:[%s3805_s29 + $0x584] sm:$0xf] }
  0x71   : > { %v3265_v31 = vor.u32 %v3652_v21, %v3262_v23  ;;  %v3118_v37 = vld [vmem:[%s3805_s29 + $0x590] sm:$0xf0]  ;;  %v3648_v38 = vld [vmem:[%s3805_s29 + $0x684] sm:$0xf]  ;;  %v2629_v41 = vor.u32 %v3495_v29, %v2628_v28  ;;  %v2468_v55 = vld [vmem:[%s3805_s29 + $0x68] sm:$0xf] }
  0x72   : > { %1726 = vmatpush.bf16.msra.mxu0 %v2561_v44  ;;  %1739 = vmatpush.bf16.msra.mxu1 %v2689_v47  ;;  %v3246_v42 = vld [vmem:[%s3805_s29 + $0x690] sm:$0xf0]  ;;  %v3459_v44 = vld [vmem:[%s3805_s29 + $0x94] sm:$0xf0]  ;;  %v3121_v47 = vor.u32 %v3616_v35, %v3118_v37  ;;  %v3612_v50 = vld [vmem:[%s3805_s29 + $0x564] sm:$0xf] }
  0x73   : > { %1752 = vmatpush.bf16.msra.mxu2 %v2817_v48  ;;  %1765 = vmatpush.bf16.msra.mxu3 %v2945_v52  ;;  %v3249_v48 = vor.u32 %v3648_v38, %v3246_v42  ;;  %v2485_v49 = vor.u32 %v3459_v44, %v2484_v43  ;;  %v3102_v51 = vld [vmem:[%s3805_s29 + $0x570] sm:$0xf0]  ;;  %v3644_v52 = vld [vmem:[%s3805_s29 + $0x664] sm:$0xf]  ;;  %v3455_v56 = vld [vmem:[%s3805_s29 + $0x74] sm:$0xf0] }
  0x74   : > { %v3230_v54 = vld [vmem:[%s3805_s29 + $0x670] sm:$0xf0]  ;;  %v2596_v57 = vld [vmem:[%s3805_s29 + $0x168] sm:$0xf]  ;;  %v3487_v58 = vld [vmem:[%s3805_s29 + $0x174] sm:$0xf0]  ;;  %v2469_v61 = vor.u32 %v3455_v56, %v2468_v55 }
  0x75   : > { %v3233_v60 = vor.u32 %v3644_v52, %v3230_v54  ;;  %v3608_v62 = vld [vmem:[%s3805_s29 + $0x544] sm:$0xf]  ;;  %v2597_v1 = vor.u32 %v3487_v58, %v2596_v57  ;;  %v3214_v2 = vld [vmem:[%s3805_s29 + $0x650] sm:$0xf0]  ;;  %v2436_v15 = vld [vmem:[%s3805_s29 + $0x28] sm:$0xf] }
  0x76   : > { %1727 = vmatpush.bf16.msra.mxu0 %v2545_v59  ;;  %1740 = vmatpush.bf16.msra.mxu1 %v2673_v63  ;;  %v3105_v59 = vor.u32 %v3612_v50, %v3102_v51  ;;  %v3086_v63 = vld [vmem:[%s3805_s29 + $0x550] sm:$0xf0]  ;;  %v3636_v12 = vld [vmem:[%s3805_s29 + $0x624] sm:$0xf]  ;;  %v2420_v28 = vld [vmem:[%s3805_s29 + $0x8] sm:$0xf] }
  0x77   : > { %1753 = vmatpush.bf16.msra.mxu2 %v2801_v0  ;;  %1766 = vmatpush.bf16.msra.mxu3 %v2929_v3  ;;  %v3640_v0 = vld [vmem:[%s3805_s29 + $0x644] sm:$0xf]  ;;  %v2452_v3 = vld [vmem:[%s3805_s29 + $0x48] sm:$0xf]  ;;  %v3089_v7 = vor.u32 %v3608_v62, %v3086_v63  ;;  %v3070_v11 = vld [vmem:[%s3805_s29 + $0x530] sm:$0xf0] }
  0x78   : > { %v3217_v8 = vor.u32 %v3640_v0, %v3214_v2  ;;  %v3198_v14 = vld [vmem:[%s3805_s29 + $0x630] sm:$0xf0]  ;;  %v3600_v20 = vld [vmem:[%s3805_s29 + $0x504] sm:$0xf]  ;;  %v2788_v35 = vld [vmem:[%s3805_s29 + $0x2e8] sm:$0xf] }
  0x79   : > { %1728 = vmatmul.bf16.vlgmr.msra.gmra.mxu0 %v3917_v32  ;;  %1741 = vmatmul.bf16.vlgmr.msra.gmra.mxu1 %v3911_v26  ;;  %v3054_v21 = vld [vmem:[%s3805_s29 + $0x510] sm:$0xf0]  ;;  %v3632_v24 = vld [vmem:[%s3805_s29 + $0x604] sm:$0xf]  ;;  %v3535_v37 = vld [vmem:[%s3805_s29 + $0x2f4] sm:$0xf0] }
  0x7a   : > { %1772 = vmatpush.bf16.msrb.mxu0 %v3169_v4  ;;  %1785 = vmatpush.bf16.msrb.mxu1 %v3297_v5  ;;  %v3451_v4 = vld [vmem:[%s3805_s29 + $0x54] sm:$0xf0]  ;;  %v2580_v5 = vld [vmem:[%s3805_s29 + $0x148] sm:$0xf]  ;;  %v3182_v25 = vld [vmem:[%s3805_s29 + $0x610] sm:$0xf0]  ;;  %v2789_v50 = vor.u32 %v3535_v37, %v2788_v35 }
  0x7b   : > { %1798 = vmatpush.bf16.msrb.mxu2 %v2533_v6  ;;  %1811 = vmatpush.bf16.msrb.mxu3 %v2661_v10  ;;  %v3483_v6 = vld [vmem:[%s3805_s29 + $0x154] sm:$0xf0]  ;;  %v2453_v9 = vor.u32 %v3451_v4, %v2452_v3  ;;  %v3604_v10 = vld [vmem:[%s3805_s29 + $0x524] sm:$0xf]  ;;  %v2916_v38 = vld [vmem:[%s3805_s29 + $0x3e8] sm:$0xf]  ;;  %v3185_v45 = vor.u32 %v3632_v24, %v3182_v25 }
  0x7c   : > { %1754 = vmatmul.bf16.vlgmr.msra.gmra.mxu2 %v3919_v33  ;;  %1767 = vmatmul.bf16.vlgmr.msra.gmra.mxu3 %v3968_v39  ;;  %v2581_v13 = vor.u32 %v3483_v6, %v2580_v5  ;;  %v3073_v19 = vor.u32 %v3604_v10, %v3070_v11  ;;  %v3567_v42 = vld [vmem:[%s3805_s29 + $0x3f4] sm:$0xf0]  ;;  %v3044_v43 = vld [vmem:[%s3805_s29 + $0x4e8] sm:$0xf] }
  0x7d   : > { %v3599_v44 = vld [vmem:[%s3805_s29 + $0x4f4] sm:$0xf0]  ;;  %v2917_v51 = vor.u32 %v3567_v42, %v2916_v38  ;;  %v2900_v55 = vld [vmem:[%s3805_s29 + $0x3c8] sm:$0xf] }
  0x7e   : > { %1773 = vmatpush.bf16.msrb.mxu0 %v3153_v16  ;;  %1786 = vmatpush.bf16.msrb.mxu1 %v3281_v17  ;;  %v3447_v16 = vld [vmem:[%s3805_s29 + $0x34] sm:$0xf0]  ;;  %v2564_v17 = vld [vmem:[%s3805_s29 + $0x128] sm:$0xf]  ;;  %v3045_v52 = vor.u32 %v3599_v44, %v3044_v43 }
  0x7f   : > { %1799 = vmatpush.bf16.msrb.mxu2 %v2517_v18  ;;  %1812 = vmatpush.bf16.msrb.mxu3 %v2645_v22  ;;  %v3479_v18 = vld [vmem:[%s3805_s29 + $0x134] sm:$0xf0]  ;;  %v3201_v22 = vor.u32 %v3636_v12, %v3198_v14  ;;  %v2437_v23 = vor.u32 %v3447_v16, %v2436_v15  ;;  %v3028_v58 = vld [vmem:[%s3805_s29 + $0x4c8] sm:$0xf] }
  0x80   : > { %v2565_v29 = vor.u32 %v3479_v18, %v2564_v17  ;;  %v3531_v54 = vld [vmem:[%s3805_s29 + $0x2d4] sm:$0xf0]  ;;  %v2884_v3 = vld [vmem:[%s3805_s29 + $0x3a8] sm:$0xf] }
  0x81   : > { %v3563_v57 = vld [vmem:[%s3805_s29 + $0x3d4] sm:$0xf0]  ;;  %v3012_v6 = vld [vmem:[%s3805_s29 + $0x4a8] sm:$0xf] }
  0x82   : > { %1774 = vmatpush.bf16.msrb.mxu0 %v3137_v30  ;;  %1787 = vmatpush.bf16.msrb.mxu1 %v3265_v31  ;;  %v3443_v30 = vld [vmem:[%s3805_s29 + $0x14] sm:$0xf0]  ;;  %v2548_v31 = vld [vmem:[%s3805_s29 + $0x108] sm:$0xf]  ;;  %v2901_v63 = vor.u32 %v3563_v57, %v2900_v55 }
  0x83   : > { %1800 = vmatpush.bf16.msrb.mxu2 %v2501_v34  ;;  %1813 = vmatpush.bf16.msrb.mxu3 %v2629_v41  ;;  %v3475_v34 = vld [vmem:[%s3805_s29 + $0x114] sm:$0xf0]  ;;  %v3057_v41 = vor.u32 %v3600_v20, %v3054_v21  ;;  %v2421_v46 = vor.u32 %v3443_v30, %v2420_v28  ;;  %v2868_v15 = vld [vmem:[%s3805_s29 + $0x388] sm:$0xf] }
  0x84   : > { %v3527_v2 = vld [vmem:[%s3805_s29 + $0x2b4] sm:$0xf0]  ;;  %v2996_v18 = vld [vmem:[%s3805_s29 + $0x488] sm:$0xf] }
  0x85   : > { %v3559_v5 = vld [vmem:[%s3805_s29 + $0x3b4] sm:$0xf0]  ;;  %v3124_v20 = vld [vmem:[%s3805_s29 + $0x588] sm:$0xf] }
  0x86   : > { %1775 = vmatpush.bf16.msrb.mxu0 %v3121_v47  ;;  %1788 = vmatpush.bf16.msrb.mxu1 %v3249_v48  ;;  %v3172_v47 = vld [vmem:[%s3805_s29 + $0x5e8] sm:$0xf]  ;;  %v3631_v48 = vld [vmem:[%s3805_s29 + $0x5f4] sm:$0xf0]  ;;  %v2885_v11 = vor.u32 %v3559_v5, %v2884_v3 }
  0x87   : > { %1801 = vmatpush.bf16.msrb.mxu2 %v2485_v49  ;;  %1814 = vmatpush.bf16.msrb.mxu3 %v2613_v53  ;;  %v2549_v49 = vor.u32 %v3475_v34, %v2548_v31  ;;  %v2772_v53 = vld [vmem:[%s3805_s29 + $0x2c8] sm:$0xf]  ;;  %v3173_v56 = vor.u32 %v3631_v48, %v3172_v47  ;;  %v3523_v14 = vld [vmem:[%s3805_s29 + $0x294] sm:$0xf0] }
  0x88   : > { %v2773_v62 = vor.u32 %v3531_v54, %v2772_v53  ;;  %v3555_v17 = vld [vmem:[%s3805_s29 + $0x394] sm:$0xf0]  ;;  %v2724_v25 = vld [vmem:[%s3805_s29 + $0x268] sm:$0xf] }
  0x89   : > { %v3619_v21 = vld [vmem:[%s3805_s29 + $0x594] sm:$0xf0]  ;;  %v2980_v34 = vld [vmem:[%s3805_s29 + $0x468] sm:$0xf] }
  0x8a   : > { %1776 = vmatpush.bf16.msrb.mxu0 %v3105_v59  ;;  %1789 = vmatpush.bf16.msrb.mxu1 %v3233_v60  ;;  %v3595_v59 = vld [vmem:[%s3805_s29 + $0x4d4] sm:$0xf0]  ;;  %v3156_v60 = vld [vmem:[%s3805_s29 + $0x5c8] sm:$0xf]  ;;  %v3125_v30 = vor.u32 %v3619_v21, %v3124_v20 }
  0x8b   : > { %1802 = vmatpush.bf16.msrb.mxu2 %v2469_v61  ;;  %1815 = vmatpush.bf16.msrb.mxu3 %v2597_v1  ;;  %v3627_v61 = vld [vmem:[%s3805_s29 + $0x5d4] sm:$0xf0]  ;;  %v3029_v0 = vor.u32 %v3595_v59, %v3028_v58  ;;  %v2756_v1 = vld [vmem:[%s3805_s29 + $0x2a8] sm:$0xf] }
  0x8c   : > { %v3157_v4 = vor.u32 %v3627_v61, %v3156_v60  ;;  %v2757_v10 = vor.u32 %v3527_v2, %v2756_v1  ;;  %v3519_v28 = vld [vmem:[%s3805_s29 + $0x274] sm:$0xf0]  ;;  %v3108_v37 = vld [vmem:[%s3805_s29 + $0x568] sm:$0xf] }
  0x8d   : > { %v3551_v31 = vld [vmem:[%s3805_s29 + $0x374] sm:$0xf0]  ;;  %v2708_v44 = vld [vmem:[%s3805_s29 + $0x248] sm:$0xf] }
  0x8e   : > { %1777 = vmatpush.bf16.msrb.mxu0 %v3089_v7  ;;  %1790 = vmatpush.bf16.msrb.mxu1 %v3217_v8  ;;  %v3591_v7 = vld [vmem:[%s3805_s29 + $0x4b4] sm:$0xf0]  ;;  %v3140_v8 = vld [vmem:[%s3805_s29 + $0x5a8] sm:$0xf] }
  0x8f   : > { %1803 = vmatpush.bf16.msrb.mxu2 %v2453_v9  ;;  %1816 = vmatpush.bf16.msrb.mxu3 %v2581_v13  ;;  %v3623_v9 = vld [vmem:[%s3805_s29 + $0x5b4] sm:$0xf0]  ;;  %v3013_v12 = vor.u32 %v3591_v7, %v3012_v6  ;;  %v2740_v13 = vld [vmem:[%s3805_s29 + $0x288] sm:$0xf] }
  0x90   : > { %v3141_v16 = vor.u32 %v3623_v9, %v3140_v8  ;;  %v3583_v35 = vld [vmem:[%s3805_s29 + $0x474] sm:$0xf0]  ;;  %v2820_v58 = vld [vmem:[%s3805_s29 + $0x328] sm:$0xf] }
  0x91   : > { %v3615_v38 = vld [vmem:[%s3805_s29 + $0x574] sm:$0xf0]  ;;  %v2981_v43 = vor.u32 %v3583_v35, %v2980_v34  ;;  %v2948_v61 = vld [vmem:[%s3805_s29 + $0x428] sm:$0xf]  ;;  %v3465_v34 = vld [vmem:[%s3805_s29 + $0xcc] sm:$0xf] }
  0x92   : > { %1778 = vmatpush.bf16.msrb.mxu0 %v3073_v19  ;;  %1791 = vmatpush.bf16.msrb.mxu1 %v3201_v22  ;;  %v3587_v19 = vld [vmem:[%s3805_s29 + $0x494] sm:$0xf0]  ;;  %v2741_v22 = vor.u32 %v3523_v14, %v2740_v13  ;;  %v3109_v47 = vor.u32 %v3615_v38, %v3108_v37  ;;  %v2676_v2 = vld [vmem:[%s3805_s29 + $0x208] sm:$0xf]  ;;  %v2518_v37 = vld [vmem:[%s3805_s29 + $0xd8] sm:$0xf0] }
  0x93   : > { %1804 = vmatpush.bf16.msrb.mxu2 %v2437_v23  ;;  %1817 = vmatpush.bf16.msrb.mxu3 %v2565_v29  ;;  %v2869_v23 = vor.u32 %v3555_v17, %v2868_v15  ;;  %v2997_v24 = vor.u32 %v3587_v19, %v2996_v18  ;;  %v2852_v29 = vld [vmem:[%s3805_s29 + $0x368] sm:$0xf]  ;;  %v3547_v48 = vld [vmem:[%s3805_s29 + $0x354] sm:$0xf0]  ;;  %v3469_v15 = vld [vmem:[%s3805_s29 + $0xec] sm:$0xf] }
  0x94   : > { %v2853_v42 = vor.u32 %v3551_v31, %v2852_v29  ;;  %v3511_v57 = vld [vmem:[%s3805_s29 + $0x234] sm:$0xf0]  ;;  %v2804_v6 = vld [vmem:[%s3805_s29 + $0x308] sm:$0xf]  ;;  %v2534_v17 = vld [vmem:[%s3805_s29 + $0xf8] sm:$0xf0] }
  0x95   : > { %v3543_v60 = vld [vmem:[%s3805_s29 + $0x334] sm:$0xf0]  ;;  %v2932_v8 = vld [vmem:[%s3805_s29 + $0x408] sm:$0xf]  ;;  %v3501_v18 = vld [vmem:[%s3805_s29 + $0x1ec] sm:$0xf] }
  0x96   : > { %1779 = vmatpush.bf16.msrb.mxu0 %v3057_v41  ;;  %1792 = vmatpush.bf16.msrb.mxu1 %v3185_v45  ;;  %v2725_v41 = vor.u32 %v3519_v28, %v2724_v25  ;;  %v3515_v45 = vld [vmem:[%s3805_s29 + $0x254] sm:$0xf0]  ;;  %v3300_v13 = vld [vmem:[%s3805_s29 + $0x6e8] sm:$0xf]  ;;  %v2662_v19 = vld [vmem:[%s3805_s29 + $0x1f8] sm:$0xf0]  ;;  %v2537_v28 = vor.u32 %v3469_v15, %v2534_v17 }
  0x97   : > { %1805 = vmatpush.bf16.msrb.mxu2 %v2421_v46  ;;  %1818 = vmatpush.bf16.msrb.mxu3 %v2549_v49  ;;  %v2836_v46 = vld [vmem:[%s3805_s29 + $0x348] sm:$0xf]  ;;  %v2709_v53 = vor.u32 %v3515_v45, %v2708_v44  ;;  %v3507_v3 = vld [vmem:[%s3805_s29 + $0x214] sm:$0xf0]  ;;  %v2665_v29 = vor.u32 %v3501_v18, %v2662_v19  ;;  %v3497_v38 = vld [vmem:[%s3805_s29 + $0x1cc] sm:$0xf]  ;;  %v2521_v45 = vor.u32 %v3465_v34, %v2518_v37 }
  0x98   : > { %v2964_v49 = vld [vmem:[%s3805_s29 + $0x448] sm:$0xf]  ;;  %v2837_v54 = vor.u32 %v3547_v48, %v2836_v46  ;;  %v3539_v7 = vld [vmem:[%s3805_s29 + $0x314] sm:$0xf0]  ;;  %v2726_v15 = vld [vmem:[%s3805_s29 + $0x278] sm:$0xf0] }
  0x99   : > { %1780 = vmatmul.bf16.vlgmr.msrb.gmra.mxu0 %v3970_v40  ;;  %1793 = vmatmul.bf16.vlgmr.msrb.gmra.mxu1 %v3964_v36  ;;  %v3663_v14 = vld [vmem:[%s3805_s29 + $0x6f4] sm:$0xf0]  ;;  %v2805_v20 = vor.u32 %v3539_v7, %v2804_v6  ;;  %v3236_v7 = vld [vmem:[%s3805_s29 + $0x668] sm:$0xf] }
  0x9a   : > { %1824 = vmatpush.bf16.msra.mxu0 %v2789_v50  ;;  %1837 = vmatpush.bf16.msra.mxu1 %v2917_v51  ;;  %v3579_v50 = vld [vmem:[%s3805_s29 + $0x454] sm:$0xf0]  ;;  %v3092_v51 = vld [vmem:[%s3805_s29 + $0x548] sm:$0xf]  ;;  %v3301_v25 = vor.u32 %v3663_v14, %v3300_v13  ;;  %v2598_v13 = vld [vmem:[%s3805_s29 + $0x178] sm:$0xf0] }
  0x9b   : > { %1850 = vmatpush.bf16.msra.mxu2 %v3045_v52  ;;  %1863 = vmatpush.bf16.msra.mxu3 %v3173_v56  ;;  %v3611_v52 = vld [vmem:[%s3805_s29 + $0x554] sm:$0xf0]  ;;  %v2965_v55 = vor.u32 %v3579_v50, %v2964_v49  ;;  %v2692_v56 = vld [vmem:[%s3805_s29 + $0x228] sm:$0xf]  ;;  %v3461_v49 = vld [vmem:[%s3805_s29 + $0xac] sm:$0xf] }
  0x9c   : > { %1806 = vmatmul.bf16.vlgmr.msrb.gmra.mxu2 %v3913_v27  ;;  %1819 = vmatmul.bf16.vlgmr.msrb.gmra.mxu3 %v3917_v32  ;;  %v3093_v59 = vor.u32 %v3611_v52, %v3092_v51  ;;  %v2693_v1 = vor.u32 %v3511_v57, %v2692_v56  ;;  %v3659_v31 = vld [vmem:[%s3805_s29 + $0x6d4] sm:$0xf0]  ;;  %v2502_v51 = vld [vmem:[%s3805_s29 + $0xb8] sm:$0xf0]  ;;  %v3493_v52 = vld [vmem:[%s3805_s29 + $0x1ac] sm:$0xf] }
  0x9d   : > { %v3655_v48 = vld [vmem:[%s3805_s29 + $0x6b4] sm:$0xf0]  ;;  %v2505_v57 = vor.u32 %v3461_v49, %v2502_v51  ;;  %v3517_v14 = vld [vmem:[%s3805_s29 + $0x26c] sm:$0xf]  ;;  %v3220_v19 = vld [vmem:[%s3805_s29 + $0x648] sm:$0xf] }
  0x9e   : > { %1825 = vmatpush.bf16.msra.mxu0 %v2773_v62  ;;  %1838 = vmatpush.bf16.msra.mxu1 %v2901_v63  ;;  %v3575_v62 = vld [vmem:[%s3805_s29 + $0x434] sm:$0xf0]  ;;  %v3076_v63 = vld [vmem:[%s3805_s29 + $0x528] sm:$0xf] }
  0x9f   : > { %1851 = vmatpush.bf16.msra.mxu2 %v3029_v0  ;;  %1864 = vmatpush.bf16.msra.mxu3 %v3157_v4  ;;  %v3607_v0 = vld [vmem:[%s3805_s29 + $0x534] sm:$0xf0]  ;;  %v2821_v4 = vor.u32 %v3543_v60, %v2820_v58  ;;  %v2949_v5 = vor.u32 %v3575_v62, %v2948_v61  ;;  %v3457_v61 = vld [vmem:[%s3805_s29 + $0x8c] sm:$0xf]  ;;  %v3188_v49 = vld [vmem:[%s3805_s29 + $0x608] sm:$0xf] }
  0xa0   : > { %v3077_v9 = vor.u32 %v3607_v0, %v3076_v63  ;;  %v3651_v60 = vld [vmem:[%s3805_s29 + $0x694] sm:$0xf0]  ;;  %v2486_v63 = vld [vmem:[%s3805_s29 + $0x98] sm:$0xf0]  ;;  %v3489_v0 = vld [vmem:[%s3805_s29 + $0x18c] sm:$0xf] }
  0xa1   : > { %v3639_v37 = vld [vmem:[%s3805_s29 + $0x634] sm:$0xf0] }
  0xa2   : > { %1826 = vmatpush.bf16.msra.mxu0 %v2757_v10  ;;  %1839 = vmatpush.bf16.msra.mxu1 %v2885_v11  ;;  %v3571_v10 = vld [vmem:[%s3805_s29 + $0x414] sm:$0xf0]  ;;  %v3060_v11 = vld [vmem:[%s3805_s29 + $0x508] sm:$0xf] }
  0xa3   : > { %1852 = vmatpush.bf16.msra.mxu2 %v3013_v12  ;;  %1865 = vmatpush.bf16.msra.mxu3 %v3141_v16  ;;  %v3603_v12 = vld [vmem:[%s3805_s29 + $0x514] sm:$0xf0]  ;;  %v2677_v16 = vor.u32 %v3507_v3, %v2676_v2  ;;  %v2933_v21 = vor.u32 %v3571_v10, %v2932_v8  ;;  %v3521_v2 = vld [vmem:[%s3805_s29 + $0x28c] sm:$0xf]  ;;  %v2742_v3 = vld [vmem:[%s3805_s29 + $0x298] sm:$0xf0] }
  0xa4   : > { %v3647_v8 = vld [vmem:[%s3805_s29 + $0x674] sm:$0xf0]  ;;  %v2745_v10 = vor.u32 %v3521_v2, %v2742_v3  ;;  %v3046_v3 = vld [vmem:[%s3805_s29 + $0x4f8] sm:$0xf0] }
  0xa6   : > { %1827 = vmatpush.bf16.msra.mxu0 %v2741_v22  ;;  %1840 = vmatpush.bf16.msra.mxu1 %v2869_v23  ;;  %v3533_v22 = vld [vmem:[%s3805_s29 + $0x2ec] sm:$0xf]  ;;  %v2790_v23 = vld [vmem:[%s3805_s29 + $0x2f8] sm:$0xf0] }
  0xa7   : > { %1853 = vmatpush.bf16.msra.mxu2 %v2997_v24  ;;  %1866 = vmatpush.bf16.msra.mxu3 %v3125_v30  ;;  %v3061_v24 = vor.u32 %v3603_v12, %v3060_v11  ;;  %v3284_v30 = vld [vmem:[%s3805_s29 + $0x6c8] sm:$0xf]  ;;  %v2793_v35 = vor.u32 %v3533_v22, %v2790_v23  ;;  %v2470_v11 = vld [vmem:[%s3805_s29 + $0x78] sm:$0xf0]  ;;  %v3485_v12 = vld [vmem:[%s3805_s29 + $0x16c] sm:$0xf]  ;;  %v2729_v22 = vor.u32 %v3517_v14, %v2726_v15 }
  0xa8   : > { %v3285_v44 = vor.u32 %v3659_v31, %v3284_v30  ;;  %v2601_v18 = vor.u32 %v3485_v12, %v2598_v13  ;;  %v2454_v23 = vld [vmem:[%s3805_s29 + $0x58] sm:$0xf0] }
  0xaa   : > { %1828 = vmatpush.bf16.msra.mxu0 %v2725_v41  ;;  %1841 = vmatpush.bf16.msra.mxu1 %v2853_v42  ;;  %v2646_v41 = vld [vmem:[%s3805_s29 + $0x1d8] sm:$0xf0]  ;;  %v3529_v42 = vld [vmem:[%s3805_s29 + $0x2cc] sm:$0xf] }
  0xab   : > { %1854 = vmatpush.bf16.msra.mxu2 %v2981_v43  ;;  %1867 = vmatpush.bf16.msra.mxu3 %v3109_v47  ;;  %v2774_v43 = vld [vmem:[%s3805_s29 + $0x2d8] sm:$0xf0]  ;;  %v2649_v46 = vor.u32 %v3497_v38, %v2646_v41  ;;  %v3268_v47 = vld [vmem:[%s3805_s29 + $0x6a8] sm:$0xf]  ;;  %v3445_v38 = vld [vmem:[%s3805_s29 + $0x2c] sm:$0xf] }
  0xac   : > { %v2777_v50 = vor.u32 %v3529_v42, %v2774_v43  ;;  %v3269_v56 = vor.u32 %v3655_v48, %v3268_v47  ;;  %v2438_v42 = vld [vmem:[%s3805_s29 + $0x38] sm:$0xf0]  ;;  %v3477_v43 = vld [vmem:[%s3805_s29 + $0x12c] sm:$0xf] }
  0xae   : > { %1829 = vmatpush.bf16.msra.mxu0 %v2709_v53  ;;  %1842 = vmatpush.bf16.msra.mxu1 %v2837_v54  ;;  %v2630_v53 = vld [vmem:[%s3805_s29 + $0x1b8] sm:$0xf0]  ;;  %v3525_v54 = vld [vmem:[%s3805_s29 + $0x2ac] sm:$0xf] }
  0xaf   : > { %1855 = vmatpush.bf16.msra.mxu2 %v2965_v55  ;;  %1868 = vmatpush.bf16.msra.mxu3 %v3093_v59  ;;  %v2758_v55 = vld [vmem:[%s3805_s29 + $0x2b8] sm:$0xf0]  ;;  %v2633_v58 = vor.u32 %v3493_v52, %v2630_v53  ;;  %v3252_v59 = vld [vmem:[%s3805_s29 + $0x688] sm:$0xf]  ;;  %v2441_v52 = vor.u32 %v3445_v38, %v2438_v42  ;;  %v3589_v38 = vld [vmem:[%s3805_s29 + $0x4ac] sm:$0xf] }
  0xb0   : > { %v2761_v62 = vor.u32 %v3525_v54, %v2758_v55  ;;  %v3441_v54 = vld [vmem:[%s3805_s29 + $0xc] sm:$0xf]  ;;  %v2422_v55 = vld [vmem:[%s3805_s29 + $0x18] sm:$0xf0] }
  0xb2   : > { %1830 = vmatpush.bf16.msra.mxu0 %v2693_v1  ;;  %1843 = vmatpush.bf16.msra.mxu1 %v2821_v4  ;;  %v2614_v1 = vld [vmem:[%s3805_s29 + $0x198] sm:$0xf0]  ;;  %v3253_v4 = vor.u32 %v3651_v60, %v3252_v59  ;;  %v3505_v60 = vld [vmem:[%s3805_s29 + $0x20c] sm:$0xf] }
  0xb3   : > { %1856 = vmatpush.bf16.msra.mxu2 %v2949_v5  ;;  %1869 = vmatpush.bf16.msra.mxu3 %v3077_v9  ;;  %v2489_v5 = vor.u32 %v3457_v61, %v2486_v63  ;;  %v2617_v6 = vor.u32 %v3489_v0, %v2614_v1  ;;  %v3453_v9 = vld [vmem:[%s3805_s29 + $0x6c] sm:$0xf]  ;;  %v2550_v59 = vld [vmem:[%s3805_s29 + $0x118] sm:$0xf0] }
  0xb4   : > { %v2473_v17 = vor.u32 %v3453_v9, %v2470_v11  ;;  %v2678_v61 = vld [vmem:[%s3805_s29 + $0x218] sm:$0xf0]  ;;  %v3597_v0 = vld [vmem:[%s3805_s29 + $0x4ec] sm:$0xf] }
  0xb5   : > { %v2918_v63 = vld [vmem:[%s3805_s29 + $0x3f8] sm:$0xf0]  ;;  %v3661_v9 = vld [vmem:[%s3805_s29 + $0x6ec] sm:$0xf]  ;;  %v2681_v11 = vor.u32 %v3505_v60, %v2678_v61  ;;  %v3049_v14 = vor.u32 %v3597_v0, %v3046_v3 }
  0xb6   : > { %1831 = vmatpush.bf16.msra.mxu0 %v2677_v16  ;;  %1844 = vmatpush.bf16.msra.mxu1 %v2805_v20  ;;  %v3237_v16 = vor.u32 %v3647_v8, %v3236_v7  ;;  %v3643_v20 = vld [vmem:[%s3805_s29 + $0x654] sm:$0xf0]  ;;  %v2425_v7 = vor.u32 %v3441_v54, %v2422_v55  ;;  %v3617_v55 = vld [vmem:[%s3805_s29 + $0x58c] sm:$0xf]  ;;  %v2854_v0 = vld [vmem:[%s3805_s29 + $0x378] sm:$0xf0] }
  0xb7   : > { %1857 = vmatpush.bf16.msra.mxu2 %v2933_v21  ;;  %1870 = vmatpush.bf16.msra.mxu3 %v3061_v24  ;;  %v3449_v21 = vld [vmem:[%s3805_s29 + $0x4c] sm:$0xf]  ;;  %v3221_v30 = vor.u32 %v3643_v20, %v3220_v19 }
  0xb8   : > { %v3481_v24 = vld [vmem:[%s3805_s29 + $0x14c] sm:$0xf]  ;;  %v2457_v31 = vor.u32 %v3449_v21, %v2454_v23 }
  0xb9   : > { %1832 = vmatmul.bf16.vlgmr.msra.gmra.mxu0 %v3911_v26  ;;  %1845 = vmatmul.bf16.vlgmr.msra.gmra.mxu1 %v3919_v33  ;;  %v3625_v23 = vld [vmem:[%s3805_s29 + $0x5cc] sm:$0xf] }
  0xba   : > { %1876 = vmatpush.bf16.msrb.mxu0 %v3301_v25  ;;  %1889 = vmatpush.bf16.msrb.mxu1 %v2537_v28  ;;  %v2582_v25 = vld [vmem:[%s3805_s29 + $0x158] sm:$0xf0]  ;;  %v3513_v28 = vld [vmem:[%s3805_s29 + $0x24c] sm:$0xf] }
  0xbb   : > { %1902 = vmatpush.bf16.msrb.mxu2 %v2665_v29  ;;  %1915 = vmatpush.bf16.msrb.mxu3 %v2793_v35  ;;  %v2710_v29 = vld [vmem:[%s3805_s29 + $0x258] sm:$0xf0]  ;;  %v2585_v34 = vor.u32 %v3481_v24, %v2582_v25  ;;  %v3204_v35 = vld [vmem:[%s3805_s29 + $0x628] sm:$0xf] }
  0xbc   : > { %1858 = vmatmul.bf16.vlgmr.msra.gmra.mxu2 %v3968_v39  ;;  %1871 = vmatmul.bf16.vlgmr.msra.gmra.mxu3 %v3970_v40  ;;  %v2713_v41 = vor.u32 %v3513_v28, %v2710_v29  ;;  %v3205_v48 = vor.u32 %v3639_v37, %v3204_v35  ;;  %v3158_v24 = vld [vmem:[%s3805_s29 + $0x5d8] sm:$0xf0]  ;;  %v3657_v28 = vld [vmem:[%s3805_s29 + $0x6cc] sm:$0xf] }
  0xbd   : > { %v3286_v29 = vld [vmem:[%s3805_s29 + $0x6d8] sm:$0xf0]  ;;  %v3557_v35 = vld [vmem:[%s3805_s29 + $0x3ac] sm:$0xf] }
  0xbe   : > { %1877 = vmatpush.bf16.msrb.mxu0 %v3285_v44  ;;  %1890 = vmatpush.bf16.msrb.mxu1 %v2521_v45  ;;  %v2566_v44 = vld [vmem:[%s3805_s29 + $0x138] sm:$0xf0]  ;;  %v3509_v45 = vld [vmem:[%s3805_s29 + $0x22c] sm:$0xf]  ;;  %v3289_v42 = vor.u32 %v3657_v28, %v3286_v29 }
  0xbf   : > { %1903 = vmatpush.bf16.msrb.mxu2 %v2649_v46  ;;  %1916 = vmatpush.bf16.msrb.mxu3 %v2777_v50  ;;  %v2694_v46 = vld [vmem:[%s3805_s29 + $0x238] sm:$0xf0]  ;;  %v3635_v50 = vld [vmem:[%s3805_s29 + $0x614] sm:$0xf0]  ;;  %v2569_v53 = vor.u32 %v3477_v43, %v2566_v44  ;;  %v3621_v44 = vld [vmem:[%s3805_s29 + $0x5ac] sm:$0xf] }
  0xc0   : > { %v3189_v2 = vor.u32 %v3635_v50, %v3188_v49  ;;  %v2886_v37 = vld [vmem:[%s3805_s29 + $0x3b8] sm:$0xf0] }
  0xc1   : > { %v3014_v43 = vld [vmem:[%s3805_s29 + $0x4b8] sm:$0xf0] }
  0xc2   : > { %1878 = vmatpush.bf16.msrb.mxu0 %v3269_v56  ;;  %1891 = vmatpush.bf16.msrb.mxu1 %v2505_v57  ;;  %v3473_v56 = vld [vmem:[%s3805_s29 + $0x10c] sm:$0xf]  ;;  %v3017_v50 = vor.u32 %v3589_v38, %v3014_v43  ;;  %v3078_v43 = vld [vmem:[%s3805_s29 + $0x538] sm:$0xf0] }
  0xc3   : > { %1904 = vmatpush.bf16.msrb.mxu2 %v2633_v58  ;;  %1917 = vmatpush.bf16.msrb.mxu3 %v2761_v62  ;;  %v2697_v58 = vor.u32 %v3509_v45, %v2694_v46  ;;  %v3565_v62 = vld [vmem:[%s3805_s29 + $0x3ec] sm:$0xf]  ;;  %v2553_v8 = vor.u32 %v3473_v56, %v2550_v59  ;;  %v3142_v45 = vld [vmem:[%s3805_s29 + $0x5b8] sm:$0xf0] }
  0xc4   : > { %v2921_v12 = vor.u32 %v3565_v62, %v2918_v63  ;;  %v3653_v46 = vld [vmem:[%s3805_s29 + $0x6ac] sm:$0xf]  ;;  %v3126_v56 = vld [vmem:[%s3805_s29 + $0x598] sm:$0xf0] }
  0xc5   : > { %v1625_v47 = vpop.f32.mrf.mxu0  ;;  %v3129_v62 = vor.u32 %v3617_v55, %v3126_v56  ;;  %v3549_v63 = vld [vmem:[%s3805_s29 + $0x36c] sm:$0xf]  ;;  %v3190_v56 = vld [vmem:[%s3805_s29 + $0x618] sm:$0xf0] }
  0xc6   : > { %1879 = vmatpush.bf16.msrb.mxu0 %v3253_v4  ;;  %1892 = vmatpush.bf16.msrb.mxu1 %v2489_v5  ;;  %v1638_v51 = vpop.f32.mrf.mxu1  ;;  %v3629_v4 = vld [vmem:[%s3805_s29 + $0x5ec] sm:$0xf]  ;;  %v3174_v5 = vld [vmem:[%s3805_s29 + $0x5f8] sm:$0xf0] }
  0xc7   : > { %1905 = vmatpush.bf16.msrb.mxu2 %v2617_v6  ;;  %1918 = vmatpush.bf16.msrb.mxu3 %v2745_v10  ;;  %v1639_v57 = vadd.f32 %v1638_v51, %v1625_v47  ;;  %v3302_v10 = vld [vmem:[%s3805_s29 + $0x6f8] sm:$0xf0]  ;;  %v3177_v15 = vor.u32 %v3629_v4, %v3174_v5  ;;  %v3145_v51 = vor.u32 %v3621_v44, %v3142_v45  ;;  %v3613_v5 = vld [vmem:[%s3805_s29 + $0x56c] sm:$0xf] }
  0xc8   : > { %v3305_v21 = vor.u32 %v3661_v9, %v3302_v10  ;;  %v3270_v47 = vld [vmem:[%s3805_s29 + $0x6b8] sm:$0xf0]  ;;  %v2857_v10 = vor.u32 %v3549_v63, %v2854_v0  ;;  %v3637_v44 = vld [vmem:[%s3805_s29 + $0x62c] sm:$0xf] }
  0xc9   : > { %v3273_v54 = vor.u32 %v3653_v46, %v3270_v47  ;;  %v2982_v4 = vld [vmem:[%s3805_s29 + $0x478] sm:$0xf0]  ;;  %v3633_v55 = vld [vmem:[%s3805_s29 + $0x60c] sm:$0xf] }
  0xca   : > { %1880 = vmatpush.bf16.msrb.mxu0 %v3237_v16  ;;  %1893 = vmatpush.bf16.msrb.mxu1 %v2473_v17  ;;  %v3561_v16 = vld [vmem:[%s3805_s29 + $0x3cc] sm:$0xf]  ;;  %v2902_v17 = vld [vmem:[%s3805_s29 + $0x3d8] sm:$0xf0] }
  0xcb   : > { %1906 = vmatpush.bf16.msrb.mxu2 %v2601_v18  ;;  %1919 = vmatpush.bf16.msrb.mxu3 %v2729_v22  ;;  %v1651_v1 = vpop.f32.mrf.mxu2  ;;  %v3593_v18 = vld [vmem:[%s3805_s29 + $0x4cc] sm:$0xf]  ;;  %v3030_v22 = vld [vmem:[%s3805_s29 + $0x4d8] sm:$0xf0] }
  0xcc   : > { %v1652_v6 = vadd.f32 %v1651_v1, %v1639_v57  ;;  %v1664_v13 = vpop.f32.mrf.mxu3  ;;  %v3649_v57 = vld [vmem:[%s3805_s29 + $0x68c] sm:$0xf]  ;;  %v3206_v45 = vld [vmem:[%s3805_s29 + $0x638] sm:$0xf0] }
  0xcd   : > { %v1627_v19 = vpop.f32.mrf.mxu0  ;;  %v3581_v1 = vld [vmem:[%s3805_s29 + $0x46c] sm:$0xf] }
  0xce   : > { %1881 = vmatpush.bf16.msrb.mxu0 %v3221_v30  ;;  %1894 = vmatpush.bf16.msrb.mxu1 %v2457_v31  ;;  %v1665_v20 = vadd.f32 %v1664_v13, %v1652_v6  ;;  %v1640_v25 = vpop.f32.mrf.mxu1  ;;  %v2905_v30 = vor.u32 %v3561_v16, %v2902_v17  ;;  %v3033_v31 = vor.u32 %v3593_v18, %v3030_v22  ;;  %v3110_v6 = vld [vmem:[%s3805_s29 + $0x578] sm:$0xf0]  ;;  %v3545_v13 = vld [vmem:[%s3805_s29 + $0x34c] sm:$0xf] }
  0xcf   : > { %1907 = vmatpush.bf16.msrb.mxu2 %v2585_v34  ;;  %1920 = vmatpush.bf16.msrb.mxu3 %v2713_v41  ;;  %v3161_v34 = vor.u32 %v3625_v23, %v3158_v24  ;;  %v2966_v18 = vld [vmem:[%s3805_s29 + $0x458] sm:$0xf0]  ;;  %v3609_v19 = vld [vmem:[%s3805_s29 + $0x54c] sm:$0xf] }
  0xd0   : > { %v3641_v22 = vld [vmem:[%s3805_s29 + $0x64c] sm:$0xf]  ;;  %v3222_v23 = vld [vmem:[%s3805_s29 + $0x658] sm:$0xf0] }
  0xd1   : > { %v3225_v38 = vor.u32 %v3641_v22, %v3222_v23 }
  0xd2   : > { %1882 = vmatpush.bf16.msrb.mxu0 %v3205_v48  ;;  %1895 = vmatpush.bf16.msrb.mxu1 %v2441_v52  ;;  %v2889_v48 = vor.u32 %v3557_v35, %v2886_v37  ;;  %v3553_v52 = vld [vmem:[%s3805_s29 + $0x38c] sm:$0xf]  ;;  %v2822_v35 = vld [vmem:[%s3805_s29 + $0x338] sm:$0xf0] }
  0xd3   : > { %1908 = vmatpush.bf16.msrb.mxu2 %v2569_v53  ;;  %1921 = vmatpush.bf16.msrb.mxu3 %v2697_v58  ;;  %v1653_v41 = vpop.f32.mrf.mxu2  ;;  %v3585_v53 = vld [vmem:[%s3805_s29 + $0x48c] sm:$0xf]  ;;  %v3254_v58 = vld [vmem:[%s3805_s29 + $0x698] sm:$0xf0] }
  0xd4   : > { %v1666_v49 = vpop.f32.mrf.mxu3  ;;  %v3257_v3 = vor.u32 %v3649_v57, %v3254_v58  ;;  %v3573_v37 = vld [vmem:[%s3805_s29 + $0x42c] sm:$0xf]  ;;  %v2950_v41 = vld [vmem:[%s3805_s29 + $0x438] sm:$0xf0] }
  0xd5   : > { %v2953_v47 = vor.u32 %v3573_v37, %v2950_v41  ;;  %v3537_v49 = vld [vmem:[%s3805_s29 + $0x30c] sm:$0xf] }
  0xd6   : > { %1883 = vmatpush.bf16.msrb.mxu0 %v3189_v2  ;;  %1896 = vmatpush.bf16.msrb.mxu1 %v2425_v7  ;;  %v1677_v59 = vpop.f32.mrf.mxu0  ;;  %v1690_v60 = vpop.f32.mrf.mxu1  ;;  %v3645_v7 = vld [vmem:[%s3805_s29 + $0x66c] sm:$0xf] }
  0xd7   : > { %1909 = vmatpush.bf16.msrb.mxu2 %v2553_v8  ;;  %1922 = vmatpush.bf16.msrb.mxu3 %v2681_v11  ;;  %v1678_v2 = vadd.f32 %v1677_v59, %v1665_v20  ;;  %v3238_v8 = vld [vmem:[%s3805_s29 + $0x678] sm:$0xf0]  ;;  %v2985_v11 = vor.u32 %v3581_v1, %v2982_v4 }
  0xd8   : > { %v3241_v17 = vor.u32 %v3645_v7, %v3238_v8  ;;  %v3094_v20 = vld [vmem:[%s3805_s29 + $0x558] sm:$0xf0] }
  0xd9   : > { %1884 = vmatmul.bf16.vlgmr.msrb.gmra.mxu0 %v3964_v36  ;;  %1897 = vmatmul.bf16.vlgmr.msrb.gmra.mxu1 %v3913_v27  ;;  %v1691_v9 = vadd.f32 %v1690_v60, %v1678_v2  ;;  %v3193_v60 = vor.u32 %v3633_v55, %v3190_v56 }
  0xda   : > { %1928 = vmatpush.bf16.msra.mxu0 %v2921_v12  ;;  %1941 = vmatpush.bf16.msra.mxu1 %v3049_v14  ;;  %v3113_v12 = vor.u32 %v3613_v5, %v3110_v6  ;;  %v2838_v14 = vld [vmem:[%s3805_s29 + $0x358] sm:$0xf0] }
  0xdb   : > { %1954 = vmatpush.bf16.msra.mxu2 %v3177_v15  ;;  %1967 = vmatpush.bf16.msra.mxu3 %v3305_v21  ;;  %v3577_v15 = vld [vmem:[%s3805_s29 + $0x44c] sm:$0xf]  ;;  %v2841_v25 = vor.u32 %v3545_v13, %v2838_v14 }
  0xdc   : > { %1910 = vmatmul.bf16.vlgmr.msrb.gmra.mxu2 %v3917_v32  ;;  %1923 = vmatmul.bf16.vlgmr.msrb.gmra.mxu3 %v3911_v26  ;;  %v2870_v32 = vld [vmem:[%s3805_s29 + $0x398] sm:$0xf0] }
  0xdd   : > { %v2998_v26 = vld [vmem:[%s3805_s29 + $0x498] sm:$0xf0]  ;;  %v2873_v27 = vor.u32 %v3553_v52, %v2870_v32  ;;  %v3209_v32 = vor.u32 %v3637_v44, %v3206_v45 }
  0xde   : > { %1929 = vmatpush.bf16.msra.mxu0 %v2905_v30  ;;  %1942 = vmatpush.bf16.msra.mxu1 %v3033_v31  ;;  %v3001_v61 = vor.u32 %v3585_v53, %v2998_v26  ;;  %v1679_v28 = vpop.f32.mrf.mxu0  ;;  %v1692_v29 = vpop.f32.mrf.mxu1  ;;  %v2969_v30 = vor.u32 %v3577_v15, %v2966_v18  ;;  %v3097_v31 = vor.u32 %v3609_v19, %v3094_v20  ;;  %v2934_v53 = vld [vmem:[%s3805_s29 + $0x418] sm:$0xf0] }
  0xdf   : > { %1955 = vmatpush.bf16.msra.mxu2 %v3161_v34  ;;  %1968 = vmatpush.bf16.msra.mxu3 %v3289_v42  ;;  %v1703_v16 = vpop.f32.mrf.mxu2  ;;  %v1716_v24 = vpop.f32.mrf.mxu3  ;;  %v3541_v34 = vld [vmem:[%s3805_s29 + $0x32c] sm:$0xf]  ;;  %v3062_v26 = vld [vmem:[%s3805_s29 + $0x518] sm:$0xf0] }
  0xe0   : > { %v4278_v21 = vadd.f32 %v1703_v16, %v1691_v9  ;;  %v3605_v42 = vld [vmem:[%s3805_s29 + $0x52c] sm:$0xf]  ;;  %v2825_v46 = vor.u32 %v3541_v34, %v2822_v35 }
  0xe2   : > { %1930 = vmatpush.bf16.msra.mxu0 %v2889_v48  ;;  %1943 = vmatpush.bf16.msra.mxu1 %v3017_v50  ;;  %v3081_v48 = vor.u32 %v3605_v42, %v3078_v43  ;;  %v2806_v50 = vld [vmem:[%s3805_s29 + $0x318] sm:$0xf0] }
  0xe3   : > { %1956 = vmatpush.bf16.msra.mxu2 %v3145_v51  ;;  %1969 = vmatpush.bf16.msra.mxu3 %v3273_v54  ;;  %v3569_v51 = vld [vmem:[%s3805_s29 + $0x40c] sm:$0xf]  ;;  %v2809_v58 = vor.u32 %v3537_v49, %v2806_v50 }
  0xe4   : > { %v3601_v54 = vld [vmem:[%s3805_s29 + $0x50c] sm:$0xf] }
  0xe5   : > { %v3065_v59 = vor.u32 %v3601_v54, %v3062_v26 }
  0xe6   : > { %1931 = vmatpush.bf16.msra.mxu0 %v2873_v27  ;;  %1944 = vmatpush.bf16.msra.mxu1 %v3001_v61  ;;  %v2937_v27 = vor.u32 %v3569_v51, %v2934_v53 }
  0xe7   : > { %1957 = vmatpush.bf16.msra.mxu2 %v3129_v62  ;;  %1970 = vmatpush.bf16.msra.mxu3 %v3257_v3  ;;  %v1705_v52 = vpop.f32.mrf.mxu2  ;;  %v1718_v57 = vpop.f32.mrf.mxu3 }
  0xea   : > { %1932 = vmatpush.bf16.msra.mxu0 %v2857_v10  ;;  %1945 = vmatpush.bf16.msra.mxu1 %v2985_v11 }
  0xeb   : > { %1958 = vmatpush.bf16.msra.mxu2 %v3113_v12  ;;  %1971 = vmatpush.bf16.msra.mxu3 %v3241_v17 }
  0xee   : > { %1933 = vmatpush.bf16.msra.mxu0 %v2841_v25  ;;  %1946 = vmatpush.bf16.msra.mxu1 %v2969_v30 }
  0xef   : > { %1959 = vmatpush.bf16.msra.mxu2 %v3097_v31  ;;  %1972 = vmatpush.bf16.msra.mxu3 %v3225_v38 }
  0xf2   : > { %1934 = vmatpush.bf16.msra.mxu0 %v2825_v46  ;;  %1947 = vmatpush.bf16.msra.mxu1 %v2953_v47 }
  0xf3   : > { %1960 = vmatpush.bf16.msra.mxu2 %v3081_v48  ;;  %1973 = vmatpush.bf16.msra.mxu3 %v3209_v32 }
  0xf6   : > { %1935 = vmatpush.bf16.msra.mxu0 %v2809_v58  ;;  %1948 = vmatpush.bf16.msra.mxu1 %v2937_v27  ;;  %v1729_v61 = vpop.f32.mrf.mxu0  ;;  %v1742_v63 = vpop.f32.mrf.mxu1  ;;  %v243_v58 = vld [vmem:[#allocation2] sm:$0xff] }
  0xf7   : > { %1961 = vmatpush.bf16.msra.mxu2 %v3065_v59  ;;  %1974 = vmatpush.bf16.msra.mxu3 %v3193_v60  ;;  %v1730_v62 = vadd.f32 %v1729_v61, %v1716_v24 }
  0xf9   : > { %1936 = vmatmul.bf16.vlgmr.msra.gmra.mxu0 %v3919_v33  ;;  %1949 = vmatmul.bf16.vlgmr.msra.gmra.mxu1 %v3968_v39  ;;  %v1743_v0 = vadd.f32 %v1742_v63, %v1730_v62 }
  0xfa   : > { %1962 = vmatmul.bf16.vlgmr.msra.gmra.mxu2 %v3970_v40  ;;  %1975 = vmatmul.bf16.vlgmr.msra.gmra.mxu3 %v3964_v36 }
  0xfe   : > { %v1731_v5 = vpop.f32.mrf.mxu0  ;;  %v1744_v6 = vpop.f32.mrf.mxu1 }
  0xff   : > { %v1755_v1 = vpop.f32.mrf.mxu2  ;;  %v1768_v3 = vpop.f32.mrf.mxu3 }
 0x100   : > { %v1756_v2 = vadd.f32 %v1755_v1, %v1743_v0 }
 0x102   : > { %v1769_v4 = vadd.f32 %v1768_v3, %v1756_v2 }
 0x107   : > { %v1757_v7 = vpop.f32.mrf.mxu2  ;;  %v1770_v8 = vpop.f32.mrf.mxu3 }
 0x116   : > { %v1781_v9 = vpop.f32.mrf.mxu0  ;;  %v1794_v10 = vpop.f32.mrf.mxu1 }
 0x117   : > { %v1782_v33 = vadd.f32 %v1781_v9, %v1769_v4 }
 0x119   : > { %v1795_v39 = vadd.f32 %v1794_v10, %v1782_v33 }
 0x11b   : > { %v1984_v40 = vrot.slane %v1795_v39, 6 }
 0x11d   : > { %v1988_v36 = vsel %vm1987_vm0, %v4278_v21, %v1984_v40 }
 0x11e   : > { %v1783_v13 = vpop.f32.mrf.mxu0  ;;  %v1796_v15 = vpop.f32.mrf.mxu1 }
 0x11f   : > { %v1807_v11 = vpop.f32.mrf.mxu2  ;;  %v1820_v12 = vpop.f32.mrf.mxu3 }
 0x120   : > { %v1821_v14 = vadd.f32 %v1820_v12, %v1807_v11 }
 0x127   : > { %v1809_v16 = vpop.f32.mrf.mxu2  ;;  %v1822_v17 = vpop.f32.mrf.mxu3 }
 0x136   : > { %v1833_v18 = vpop.f32.mrf.mxu0  ;;  %v1846_v19 = vpop.f32.mrf.mxu1 }
 0x137   : > { %v1834_v41 = vadd.f32 %v1833_v18, %v1821_v14 }
 0x139   : > { %v1847_v43 = vadd.f32 %v1846_v19, %v1834_v41 }
 0x13e   : > { %v1835_v23 = vpop.f32.mrf.mxu0  ;;  %v1848_v24 = vpop.f32.mrf.mxu1 }
 0x13f   : > { %v1859_v20 = vpop.f32.mrf.mxu2  ;;  %v1872_v22 = vpop.f32.mrf.mxu3 }
 0x140   : > { %v1860_v47 = vadd.f32 %v1859_v20, %v1847_v43 }
 0x142   : > { %v1873_v49 = vadd.f32 %v1872_v22, %v1860_v47 }
 0x147   : > { %v1861_v25 = vpop.f32.mrf.mxu2  ;;  %v1874_v28 = vpop.f32.mrf.mxu3 }
 0x156   : > { %v1885_v29 = vpop.f32.mrf.mxu0  ;;  %v1898_v30 = vpop.f32.mrf.mxu1 }
 0x157   : > { %v1886_v52 = vadd.f32 %v1885_v29, %v1873_v49 }
 0x159   : > { %v1985_v56 = vrot.slane %v1886_v52, 4 }
 0x15e   : > { %v1887_v21 = vpop.f32.mrf.mxu0  ;;  %v1900_v35 = vpop.f32.mrf.mxu1 }
 0x15f   : > { %v1911_v31 = vpop.f32.mrf.mxu2  ;;  %v1924_v34 = vpop.f32.mrf.mxu3 }
 0x160   : > { %v1912_v42 = vadd.f32 %v1911_v31, %v1898_v30 }
 0x162   : > { %v1925_v44 = vadd.f32 %v1924_v34, %v1912_v42 }
 0x167   : > { %v1913_v37 = vpop.f32.mrf.mxu2  ;;  %v1926_v38 = vpop.f32.mrf.mxu3 }
 0x176   : > { %v1937_v45 = vpop.f32.mrf.mxu0  ;;  %v1950_v46 = vpop.f32.mrf.mxu1 }
 0x177   : > { %v1938_v48 = vadd.f32 %v1937_v45, %v1925_v44 }
 0x179   : > { %v1951_v50 = vadd.f32 %v1950_v46, %v1938_v48 }
 0x17d   : > { %v1963_v51 = vpop.f32.mrf.mxu2  ;;  %v1976_v53 = vpop.f32.mrf.mxu3 }
 0x17e   : > { %v1964_v32 = vadd.f32 %v1963_v51, %v1951_v50  ;;  %v1939_v54 = vpop.f32.mrf.mxu0  ;;  %v1952_v26 = vpop.f32.mrf.mxu1 }
 0x180   : > { %v1977_v55 = vadd.f32 %v1976_v53, %v1964_v32 }
 0x182   : > { %v1986_v57 = vrot.slane %v1977_v55, 2 }
 0x184   : > { %v1990_v27 = vsel %vm1989_vm1, %v1985_v56, %v1986_v57  ;;  %1999 = sbr.rel (%p3306_p6) target bundleno = 568 (0x238), region = 48 }
 0x185   : > { %v1992_v59 = vsel %vm1991_vm2, %v1988_v36, %v1990_v27  ;;  %v1965_v60 = vpop.f32.mrf.mxu2  ;;  %v1978_v62 = vpop.f32.mrf.mxu3 }
 0x186   : > { %v1994_v61 = vadd.f32 %v1992_v59, %v243_v58 }
 0x188   : > { %1995 = vst [vmem:[#allocation2] sm:$0xff] %v1994_v61 }
 0x189   : > { %v3671_v63 = vld [vmem:[%s4422_s3 + $0x38] sm:$0xff]  ;;  %v3670_v3 = vld [vmem:[%s4422_s3 + $0x30] sm:$0xff]  ;;  %v3669_v7 = vld [vmem:[%s4422_s3 + $0x28] sm:$0xff] }
 0x18a   : > { %v3679_v0 = vld [vmem:[%s4422_s3 + $0x78] sm:$0xff]  ;;  %2289 = vmatpush.bf16.msra.mxu0 %v3671_v63  ;;  %v3678_v4 = vld [vmem:[%s4422_s3 + $0x70] sm:$0xff]  ;;  %v3677_v8 = vld [vmem:[%s4422_s3 + $0x68] sm:$0xff] }
 0x18b   : > { %v3687_v1 = vld [vmem:[%s4422_s3 + $0xb8] sm:$0xff]  ;;  %2302 = vmatpush.bf16.msra.mxu1 %v3679_v0  ;;  %v3686_v5 = vld [vmem:[%s4422_s3 + $0xb0] sm:$0xff]  ;;  %v3685_v9 = vld [vmem:[%s4422_s3 + $0xa8] sm:$0xff] }
 0x18c   : > { %v3695_v2 = vld [vmem:[%s4422_s3 + $0xf8] sm:$0xff]  ;;  %2315 = vmatpush.bf16.msra.mxu2 %v3687_v1  ;;  %v3694_v6 = vld [vmem:[%s4422_s3 + $0xf0] sm:$0xff]  ;;  %v3693_v33 = vld [vmem:[%s4422_s3 + $0xe8] sm:$0xff] }
 0x18d   : > { %2328 = vmatpush.bf16.msra.mxu3 %v3695_v2  ;;  %v3668_v10 = vld [vmem:[%s4422_s3 + $0x20] sm:$0xff]  ;;  %v3667_v16 = vld [vmem:[%s4422_s3 + $0x18] sm:$0xff]  ;;  %v3666_v30 = vld [vmem:[%s4422_s3 + $0x10] sm:$0xff] }
 0x18e   : > { %2290 = vmatpush.bf16.msra.mxu0 %v3670_v3  ;;  %v3676_v39 = vld [vmem:[%s4422_s3 + $0x60] sm:$0xff]  ;;  %v3675_v17 = vld [vmem:[%s4422_s3 + $0x58] sm:$0xff]  ;;  %v3674_v31 = vld [vmem:[%s4422_s3 + $0x50] sm:$0xff] }
 0x18f   : > { %2303 = vmatpush.bf16.msra.mxu1 %v3678_v4  ;;  %v3684_v40 = vld [vmem:[%s4422_s3 + $0xa0] sm:$0xff]  ;;  %v3683_v22 = vld [vmem:[%s4422_s3 + $0x98] sm:$0xff]  ;;  %v2000_v24 = vld [vmem:[#allocation2] sm:$0xff] }
 0x190   : > { %2316 = vmatpush.bf16.msra.mxu2 %v3686_v5  ;;  %v3692_v36 = vld [vmem:[%s4422_s3 + $0xe0] sm:$0xff]  ;;  %v3691_v23 = vld [vmem:[%s4422_s3 + $0xd8] sm:$0xff]  ;;  %v3682_v21 = vld [vmem:[%s4422_s3 + $0x90] sm:$0xff] }
 0x191   : > { %2329 = vmatpush.bf16.msra.mxu3 %v3694_v6  ;;  %v2001_v11 = vld [vmem:[%s4421_s2] sm:$0xf]  ;;  %v3690_v35 = vld [vmem:[%s4422_s3 + $0xd0] sm:$0xff]  ;;  %v3665_v37 = vld [vmem:[%s4422_s3 + $0x8] sm:$0xff] }
 0x192   : > { %2291 = vmatpush.bf16.msra.mxu0 %v3669_v7  ;;  %v2003_v12 = vperm.slane %v2001_v11, 0  ;;  %v2004_v13 = vperm.slane %v2001_v11, 1  ;;  %v2005_v14 = vperm.slane %v2001_v11, 2  ;;  %v2006_v15 = vperm.slane %v2001_v11, 3  ;;  %v3673_v38 = vld [vmem:[%s4422_s3 + $0x48] sm:$0xff]  ;;  %v3664_v43 = vld [vmem:[%s4422_s3] sm:$0xff] }
 0x193   : > { %2304 = vmatpush.bf16.msra.mxu1 %v3677_v8  ;;  %v3681_v41 = vld [vmem:[%s4422_s3 + $0x88] sm:$0xff]  ;;  %v3672_v44 = vld [vmem:[%s4422_s3 + $0x40] sm:$0xff] }
 0x194   : > { %2317 = vmatpush.bf16.msra.mxu2 %v3685_v9  ;;  %v2007_v18 = vrot.slane %v2004_v13, 6  ;;  %v2008_v19 = vrot.slane %v2005_v14, 4  ;;  %v2009_v20 = vrot.slane %v2006_v15, 2  ;;  %v3689_v42 = vld [vmem:[%s4422_s3 + $0xc8] sm:$0xff]  ;;  %v3680_v45 = vld [vmem:[%s4422_s3 + $0x80] sm:$0xff] }
 0x195   : > { %2330 = vmatpush.bf16.msra.mxu3 %v3693_v33  ;;  %v3688_v46 = vld [vmem:[%s4422_s3 + $0xc0] sm:$0xff] }
 0x196   : > { %2292 = vmatpush.bf16.msra.mxu0 %v3668_v10  ;;  %v2010_v25 = vsel %vm1987_vm0, %v2003_v12, %v2007_v18  ;;  %v2011_v28 = vsel %vm1989_vm1, %v2008_v19, %v2009_v20  ;;  %v3712_v54 = vld [vmem:[%s4423_s4] ss:$0 sm:$0xff] }
 0x197   : > { %2305 = vmatpush.bf16.msra.mxu1 %v3676_v39  ;;  %v2012_v29 = vsel %vm1991_vm2, %v2010_v25, %v2011_v28 }
 0x198   : > { %2318 = vmatpush.bf16.msra.mxu2 %v3684_v40  ;;  %v2014_v34 = vadd.f32 %v2012_v29, %v2000_v24 }
 0x199   : > { %2331 = vmatpush.bf16.msra.mxu3 %v3692_v36 }
 0x19a   : > { %2293 = vmatpush.bf16.msra.mxu0 %v3667_v16  ;;  %2016 = vst [vmem:[#allocation1] ss:$4 sm:$0xff] %v2014_v34 }
 0x19b   : > { %2306 = vmatpush.bf16.msra.mxu1 %v3675_v17 }
 0x19c   : > { %2319 = vmatpush.bf16.msra.mxu2 %v3683_v22 }
 0x19d   : > { %2332 = vmatpush.bf16.msra.mxu3 %v3691_v23 }
 0x19e   : > { %2294 = vmatpush.bf16.msra.mxu0 %v3666_v30 }
 0x19f   : > { %2307 = vmatpush.bf16.msra.mxu1 %v3674_v31 }
 0x1a0   : > { %2320 = vmatpush.bf16.msra.mxu2 %v3682_v21 }
 0x1a1   : > { %2333 = vmatpush.bf16.msra.mxu3 %v3690_v35  ;;  %v2017_v47 = vld.sshfl [vmem:[#allocation1] sm:$0xff pattern:$0x73625140]  ;;  %v2018_v48 = vld.sshfl [vmem:[#allocation1 + $0x8] sm:$0xff pattern:$0x73625140] }
 0x1a2   : > { %2295 = vmatpush.bf16.msra.mxu0 %v3665_v37  ;;  %v2019_v49 = vld.sshfl [vmem:[#allocation1 + $0x10] sm:$0xff pattern:$0x73625140]  ;;  %v2020_v50 = vld.sshfl [vmem:[#allocation1 + $0x18] sm:$0xff pattern:$0x73625140]  ;;  %v2025_v51 = vpack.c.bf16 %v2017_v47, %v2017_v47  ;;  %v2026_v52 = vpack.c.bf16 %v2018_v48, %v2018_v48 }
 0x1a3   : > { %2308 = vmatpush.bf16.msra.mxu1 %v3673_v38  ;;  %v2027_v32 = vpack.c.bf16 %v2019_v49, %v2019_v49  ;;  %v2028_v53 = vpack.c.bf16 %v2020_v50, %v2020_v50 }
 0x1a4   : > { %2321 = vmatpush.bf16.msra.mxu2 %v3681_v41 }
 0x1a5   : > { %2334 = vmatpush.bf16.msra.mxu3 %v3689_v42 }
 0x1a6   : > { %2296 = vmatpush.bf16.msra.mxu0 %v3664_v43 }
 0x1a7   : > { %2309 = vmatpush.bf16.msra.mxu1 %v3672_v44 }
 0x1a8   : > { %2322 = vmatpush.bf16.msra.mxu2 %v3680_v45 }
 0x1a9   : > { %2335 = vmatpush.bf16.msra.mxu3 %v3688_v46  ;;  %2297 = vmatmul.bf16.vlgmr.msra.gmra.mxu0 %v2025_v51 }
 0x1aa   : > { %2310 = vmatmul.bf16.vlgmr.msra.gmra.mxu1 %v2026_v52 }
 0x1ab   : > { %2323 = vmatmul.bf16.vlgmr.msra.gmra.mxu2 %v2027_v32 }
 0x1ac   : > { %2336 = vmatmul.bf16.vlgmr.msra.gmra.mxu3 %v2028_v53 }
 0x226   : > { %v2298_v26 = vpop.f32.mrf.mxu0 }
 0x227   : > { %v2311_v55 = vpop.f32.mrf.mxu1  ;;  %v2299_v56 = vadd.f32 %v3712_v54, %v2298_v26 }
 0x229   : > { %v2312_v57 = vadd.f32 %v2311_v55, %v2299_v56 }
 0x22e   : > { %v2324_v58 = vpop.f32.mrf.mxu2  ;;  %v2300_v60 = vpop.f32.mrf.mxu0 }
 0x22f   : > { %v2337_v27 = vpop.f32.mrf.mxu3  ;;  %v2325_v59 = vadd.f32 %v2324_v58, %v2312_v57  ;;  %v2313_v61 = vpop.f32.mrf.mxu1 }
 0x231   : > { %v2338_v62 = vadd.f32 %v2337_v27, %v2325_v59 }
 0x233   : > { %2341 = vst [vmem:[#allocation3] sm:$0x3] %v2338_v62 }
 0x236   : > { %v2326_v63 = vpop.f32.mrf.mxu2 }
 0x237   : > { %v2339_v0 = vpop.f32.mrf.mxu3 }
 0x238 PF: > { %p3700_p7 = scmp.eq.s32.totalorder %s3791_s19, 3  ;;  %s3754_s29 = smov [#allocation3]  }
 0x239   : > { %s2348_s30 = sshll.u32 %s3754_s29, 4  ;;  %s2350_s8 = sshll.u32 %s4424_s5, 4  ;;  %s2349_s30 = int_to_ptr.vmem [resolvable:$true] %s2348_s30  ;;  %s2351_s8 = int_to_ptr.hbm [resolvable:$true] %s2350_s8 }
 0x23a   : > { %3697 = dma.vmem_to_hbm [thread:$0]  (%p3700_p7), %s2349_s30, 32, %s2351_s8, [#allocation4]  }
 0x23b   : > { %3746 = dma.done.wait (%p3700_p7), [#allocation4], 32  }
 0x23c   : > { %3748 = vsyncadd (%p3700_p7), [#allocation4], 4294967264 }
 0x23d PF: > { %s16_s18 = sadd.s32 1, %s3751_s18  }
 0x23e   : > { %p13_p8 = scmp.ge.s32.totalorder %s16_s18, 6  }
 0x240   :  { %15 = sbr.rel (!%p13_p8) target bundleno = 1 (0x1), region = 79 }
 0x245   :  { %2364 = vsyncpa [#allocation4], 1 }
 0x246   :  { %2366 = vsyncpa [#allocation4 + $0x1], 1 }

</bundles_post_ra>
